<compile_context>
chip_gen: v6e
topology: v6e:2x2x1
jax: 0.10.0
libtpu: 0.0.40
codegen_flags: <defaults>
</compile_context>

<pallas_src>
import functools

import jax
import jax.numpy as jnp
from jax import lax
from jax.experimental import pallas as pl
from jax.experimental.pallas import tpu as pltpu

# dtype of the hoisted input-projection matmul operands (f32 accumulation).
PROJ_DTYPE = jnp.bfloat16

_VMEM = pl.BlockSpec(memory_space=pltpu.MemorySpace.VMEM)
_SMEM = pl.BlockSpec(memory_space=pltpu.MemorySpace.SMEM)


# -----------------------------------------------------------------------------
# Fused Pallas kernel: 2x (2-layer BiLSTM + attention) + MLP head
# -----------------------------------------------------------------------------
def _atlstm_kernel(
    xs_ref,       # (Ss*B, E)  sentence embeddings, time-major flat, bf16
    ms_ref,       # (Ss, B)    sentence padding mask (0 = pad)
    xa_ref,       # (Sa*B, E)  aspect embeddings
    ma_ref,       # (Sa, B)    aspect padding mask
    s_wih0_ref, s_b0_ref, s_whh0_ref,   # sentence layer-0: (E,8H) bf16, (1,8H), (2H,8H)
    s_wih1_ref, s_b1_ref, s_whh1_ref,   # sentence layer-1: (2H,8H) bf16, (1,8H), (2H,8H)
    a_wih0_ref, a_b0_ref, a_whh0_ref,   # aspect layer-0
    a_wih1_ref, a_b1_ref, a_whh1_ref,   # aspect layer-1
    attws_ref,    # (1, 2H)    sentence attention weight
    attbs_ref,    # (1, 1)     sentence attention bias (SMEM)
    attwa_ref,    # (1, 2H)
    attba_ref,    # (1, 1)     (SMEM)
    fc1w_ref,     # (4H, H)
    fc1b_ref,     # (1, H)
    fc2w_ref,     # (H, C)
    fc2b_ref,     # (1, C)
    logits_ref,   # out: (B, C)
    wts_s_ref,    # out: (Ss, B) attention weights (time-major)
    wts_a_ref,    # out: (Sa, B)
    xw_s_scr,     # scratch: (Ss*B, 8H) projection, reused by both layers
    out_s_scr,    # scratch: (Ss, B, 2H) hidden states, reused by both layers
    xw_a_scr,     # scratch: (Sa*B, 8H)
    out_a_scr,    # scratch: (Sa, B, 2H)
):
    H = s_whh0_ref.shape[0] // 2
    G = 4 * H                       # gates per direction (i, f, g, o)

    def bilstm_layer(xin, wih_ref, b_ref, whh_ref, xw_scr, out_scr):
        """One bidirectional LSTM layer; fwd+bwd recurrences fused."""
        S, B, _ = out_scr.shape
        # Hoisted input projection for BOTH directions in one MXU matmul
        # (bf16 operands, f32 accumulate); b_ih + b_hh folded in.
        xw_scr[...] = (
            jnp.dot(xin, wih_ref[...], preferred_element_type=jnp.float32)
            + b_ref[...]
        )
        whh = whh_ref[...]          # (2H, 8H) block-diag [whh_f 0; 0 whh_r]

        def step(t, carry):
            h_cat, c_f, c_r = carry                      # (B,2H), (B,H), (B,H)
            tr = S - 1 - t                               # backward-direction time
            # ONE MXU push per step covers both directions' recurrent matmuls.
            g_hh = jnp.dot(h_cat, whh, preferred_element_type=jnp.float32)
            xw_f = xw_scr[pl.ds(t * B, B), :]            # (B, 8H)
            xw_b = xw_scr[pl.ds(tr * B, B), :]
            g_f = xw_f[:, :G] + g_hh[:, :G]              # 128-lane aligned slices
            g_r = xw_b[:, G:] + g_hh[:, G:]
            # Full-vreg transcendentals on the EUP; gate lanes selected after.
            sig_f, tan_f = jax.nn.sigmoid(g_f), jnp.tanh(g_f)
            sig_r, tan_r = jax.nn.sigmoid(g_r), jnp.tanh(g_r)
            c_f = sig_f[:, H:2 * H] * c_f + sig_f[:, :H] * tan_f[:, 2 * H:3 * H]
            c_r = sig_r[:, H:2 * H] * c_r + sig_r[:, :H] * tan_r[:, 2 * H:3 * H]
            h_f = sig_f[:, 3 * H:] * jnp.tanh(c_f)
            h_r = sig_r[:, 3 * H:] * jnp.tanh(c_r)
            # Concat-free layer output: fwd -> cols [:H], bwd -> cols [H:2H],
            # stored time-ordered so the next consumer needs no reversal.
            out_scr[t, :, 0:H] = h_f
            out_scr[tr, :, H:2 * H] = h_r
            return jnp.concatenate([h_f, h_r], axis=1), c_f, c_r

        zh = jnp.zeros((B, 2 * H), jnp.float32)
        zc = jnp.zeros((B, H), jnp.float32)
        # TODO(synk): cap unroll (4-8) for long sequences to avoid vreg spills.
        lax.fori_loop(0, S, step, (zh, zc, zc), unroll=True)

    def stream(x_ref, mask_ref, wih0, b0, whh0, wih1, b1, whh1,
               attw_ref, attb_ref, xw_scr, out_scr, wts_ref):
        S, B, _ = out_scr.shape
        # Layer 0 (embeddings) then layer 1 (layer-0 output).  xw_scr / out_scr
        # are reused across layers: the layer-1 projection reads out_scr before
        # the layer-1 recurrence overwrites it (Pallas ref ops are program-ordered).
        bilstm_layer(x_ref[...], wih0, b0, whh0, xw_scr, out_scr)
        h0 = out_scr[...].reshape(S * B, 2 * H).astype(wih1.dtype)
        bilstm_layer(h0, wih1, b1, whh1, xw_scr, out_scr)

        # Additive attention epilogue: VPU scores + masked softmax over time.
        enc = out_scr[...]                                            # (S, B, 2H)
        scores = jnp.sum(enc * attw_ref[...], axis=-1) + attb_ref[0, 0]   # (S, B)
        scores = jnp.where(mask_ref[...] == 0.0, -1e9, scores)
        scores = scores - jnp.max(scores, axis=0, keepdims=True)
        e = jnp.exp(scores)
        wts = e / jnp.sum(e, axis=0, keepdims=True)                   # (S, B)
        wts_ref[...] = wts
        # TODO(synk): at production S*2H route this weighted sum through the MXU
        #             (einsum 'sb,sbh->bh') and emit wts lane-dense as (B, S).
        return jnp.sum(wts[:, :, None] * enc, axis=0)                 # (B, 2H)

    ctx_s = stream(xs_ref, ms_ref, s_wih0_ref, s_b0_ref, s_whh0_ref,
                   s_wih1_ref, s_b1_ref, s_whh1_ref, attws_ref, attbs_ref,
                   xw_s_scr, out_s_scr, wts_s_ref)
    # TODO(synk): the two streams' recurrences could be interleaved in one
    #             fori_loop for extra ILP; different sequence lengths make the
    #             guards heavy, so they run back-to-back inside the same kernel.
    ctx_a = stream(xa_ref, ma_ref, a_wih0_ref, a_b0_ref, a_whh0_ref,
                   a_wih1_ref, a_b1_ref, a_whh1_ref, attwa_ref, attba_ref,
                   xw_a_scr, out_a_scr, wts_a_ref)

    # MLP head epilogue: concat -> fc1 -> ReLU -> fc2 (dropout = identity, eval).
    feat = jnp.concatenate([ctx_s, ctx_a], axis=1)                    # (B, 4H)
    hid = jnp.maximum(
        jnp.dot(feat, fc1w_ref[...], preferred_element_type=jnp.float32)
        + fc1b_ref[...], 0.0)
    logits_ref[...] = (
        jnp.dot(hid, fc2w_ref[...], preferred_element_type=jnp.float32)
        + fc2b_ref[...])


# -----------------------------------------------------------------------------
# Wrapper (XLA glue: embedding gather, layout plumbing, one pallas_call)
# -----------------------------------------------------------------------------
def aspect_attention_lstm_forward(packed, sentence, aspect, hidden_dim):
    B, Ss = sentence.shape
    _, Sa = aspect.shape
    H = hidden_dim
    emb = packed["embedding"]
    E = emb.shape[1]
    C = packed["fc2_w"].shape[1]

    # Embedding lookup + time-major flattening stay in the wrapper (free glue);
    # the kernel receives (S*B, E) bf16 activations ready for the hoisted matmul.
    xs = jnp.transpose(emb[sentence], (1, 0, 2)).reshape(Ss * B, E).astype(PROJ_DTYPE)
    xa = jnp.transpose(emb[aspect], (1, 0, 2)).reshape(Sa * B, E).astype(PROJ_DTYPE)
    mask_s = (jnp.transpose(sentence) != 0).astype(jnp.float32)       # (Ss, B)
    mask_a = (jnp.transpose(aspect) != 0).astype(jnp.float32)         # (Sa, B)

    ls0, ls1 = packed["sentence_lstm"]
    la0, la1 = packed["aspect_lstm"]

    logits, wts_s_tm, wts_a_tm = pl.pallas_call(
        _atlstm_kernel,
        out_shape=(
            jax.ShapeDtypeStruct((B, C), jnp.float32),
            jax.ShapeDtypeStruct((Ss, B), jnp.float32),
            jax.ShapeDtypeStruct((Sa, B), jnp.float32),
        ),
        in_specs=[_VMEM] * 17 + [_SMEM, _VMEM, _SMEM] + [_VMEM] * 4,
        out_specs=(_VMEM, _VMEM, _VMEM),
        scratch_shapes=[
            pltpu.VMEM((Ss * B, 8 * H), jnp.float32),   # sentence projection (reused)
            pltpu.VMEM((Ss, B, 2 * H), jnp.float32),    # sentence states (reused)
            pltpu.VMEM((Sa * B, 8 * H), jnp.float32),   # aspect projection (reused)
            pltpu.VMEM((Sa, B, 2 * H), jnp.float32),    # aspect states (reused)
        ],
    )(
        xs, mask_s, xa, mask_a,
        ls0["wih"], ls0["b"], ls0["whh"], ls1["wih"], ls1["b"], ls1["whh"],
        la0["wih"], la0["b"], la0["whh"], la1["wih"], la1["b"], la1["whh"],
        packed["sent_attn_w"], packed["sent_attn_b"],
        packed["asp_attn_w"], packed["asp_attn_b"],
        packed["fc1_w"], packed["fc1_b"], packed["fc2_w"], packed["fc2_b"],
    )
    return logits, jnp.transpose(wts_s_tm), jnp.transpose(wts_a_tm)


# -----------------------------------------------------------------------------
# Parameter init (deterministic, PyTorch-shaped) + packing for the kernel
# -----------------------------------------------------------------------------
def init_params(key, vocab_size, embed_dim, hidden_dim, num_classes, num_layers):
    keys = iter(jax.random.split(key, 64))

    def unif(shape, scale):
        return jax.random.uniform(next(keys), shape, jnp.float32, -scale, scale)

    params = {}
    emb = jax.random.normal(next(keys), (vocab_size, embed_dim), jnp.float32)
    params["embedding"] = emb.at[0].set(0.0)  # padding_idx=0

    def lstm_stack():
        layers = []
        k = 1.0 / jnp.sqrt(hidden_dim)
        for layer in range(num_layers):
            din = embed_dim if layer == 0 else 2 * hidden_dim
            layer_p = {}
            for d in ("fwd", "bwd"):
                layer_p[d] = (
                    unif((4 * hidden_dim, din), k),          # W_ih
                    unif((4 * hidden_dim, hidden_dim), k),   # W_hh
                    unif((4 * hidden_dim,), k),              # b_ih
                    unif((4 * hidden_dim,), k),              # b_hh
                )
            layers.append(layer_p)
        return layers

    params["sentence_lstm"] = lstm_stack()
    params["aspect_lstm"] = lstm_stack()

    ka = 1.0 / jnp.sqrt(2.0 * hidden_dim)
    params["sent_attn_w"] = unif((1, 2 * hidden_dim), ka)
    params["sent_attn_b"] = unif((1,), ka)
    params["asp_attn_w"] = unif((1, 2 * hidden_dim), ka)
    params["asp_attn_b"] = unif((1,), ka)

    k1 = 1.0 / jnp.sqrt(4.0 * hidden_dim)
    params["fc1_w"] = unif((hidden_dim, 4 * hidden_dim), k1)
    params["fc1_b"] = unif((hidden_dim,), k1)
    k2 = 1.0 / jnp.sqrt(float(hidden_dim))
    params["fc2_w"] = unif((num_classes, hidden_dim), k2)
    params["fc2_b"] = unif((num_classes,), k2)
    return params


def pack_params(params):
    """Pre-transpose / concatenate weights once (PyTorch gate order i,f,g,o):
       W_ih of both directions concatenated on the gate axis (bf16),
       W_hh packed block-diagonally so the recurrence is one MXU push."""

    def pack_stack(layers):
        out = []
        for p in layers:
            wih_f, whh_f, bih_f, bhh_f = p["fwd"]
            wih_r, whh_r, bih_r, bhh_r = p["bwd"]
            hd = whh_f.shape[1]
            whh_blk = jnp.zeros((2 * hd, 8 * hd), jnp.float32)
            whh_blk = whh_blk.at[:hd, :4 * hd].set(whh_f.T)
            whh_blk = whh_blk.at[hd:, 4 * hd:].set(whh_r.T)
            out.append({
                "wih": jnp.concatenate([wih_f.T, wih_r.T], axis=1).astype(PROJ_DTYPE),
                "b": jnp.concatenate([bih_f + bhh_f, bih_r + bhh_r])[None, :].astype(jnp.float32),
                "whh": whh_blk,                                        # (2H, 8H) f32
            })
        return out

    return {
        "embedding": params["embedding"].astype(jnp.float32),
        "sentence_lstm": pack_stack(params["sentence_lstm"]),
        "aspect_lstm": pack_stack(params["aspect_lstm"]),
        "sent_attn_w": params["sent_attn_w"].astype(jnp.float32),                 # (1, 2H)
        "sent_attn_b": params["sent_attn_b"].reshape(1, 1).astype(jnp.float32),   # (1, 1)
        "asp_attn_w": params["asp_attn_w"].astype(jnp.float32),
        "asp_attn_b": params["asp_attn_b"].reshape(1, 1).astype(jnp.float32),
        "fc1_w": params["fc1_w"].T.astype(jnp.float32),                           # (4H, H)
        "fc1_b": params["fc1_b"][None, :].astype(jnp.float32),                    # (1, H)
        "fc2_w": params["fc2_w"].T.astype(jnp.float32),                           # (H, C)
        "fc2_b": params["fc2_b"][None, :].astype(jnp.float32),                    # (1, C)
    }


# -----------------------------------------------------------------------------
if __name__ == "__main__":
    VOCAB, EMBED, HIDDEN, CLASSES, LAYERS = 40, 32, 32, 3, 2
    B, S_SENT, S_ASP = 2, 8, 4

    key = jax.random.PRNGKey(0)
    pkey, skey, akey = jax.random.split(key, 3)
    params = init_params(pkey, VOCAB, EMBED, HIDDEN, CLASSES, LAYERS)
    packed = pack_params(params)

    sentence = jax.random.randint(skey, (B, S_SENT), 1, VOCAB, dtype=jnp.int32)
    aspect = jax.random.randint(akey, (B, S_ASP), 1, VOCAB, dtype=jnp.int32)
    # introduce padding (token id 0) so the masks are exercised
    sentence = sentence.at[0, -2:].set(0)
    aspect = aspect.at[1, -1:].set(0)

    fwd = jax.jit(
        functools.partial(aspect_attention_lstm_forward, hidden_dim=HIDDEN)
    )
    logits, sent_w, asp_w = fwd(packed, sentence, aspect)
    jax.block_until_ready((logits, sent_w, asp_w))

    assert logits.shape == (B, CLASSES)
    assert sent_w.shape == (B, S_SENT)
    assert asp_w.shape == (B, S_ASP)
    print("KERNEL_OK")
</pallas_src>

<mosaic_0001>
module attributes {stable_mosaic.version = 11 : i64} {
  func.func @_atlstm_kernel(%arg0: memref<16x32xbf16, #tpu.memory_space<vmem>>, %arg1: memref<8x2xf32, #tpu.memory_space<vmem>>, %arg2: memref<8x32xbf16, #tpu.memory_space<vmem>>, %arg3: memref<4x2xf32, #tpu.memory_space<vmem>>, %arg4: memref<32x256xbf16, #tpu.memory_space<vmem>>, %arg5: memref<1x256xf32, #tpu.memory_space<vmem>>, %arg6: memref<64x256xf32, #tpu.memory_space<vmem>>, %arg7: memref<64x256xbf16, #tpu.memory_space<vmem>>, %arg8: memref<1x256xf32, #tpu.memory_space<vmem>>, %arg9: memref<64x256xf32, #tpu.memory_space<vmem>>, %arg10: memref<32x256xbf16, #tpu.memory_space<vmem>>, %arg11: memref<1x256xf32, #tpu.memory_space<vmem>>, %arg12: memref<64x256xf32, #tpu.memory_space<vmem>>, %arg13: memref<64x256xbf16, #tpu.memory_space<vmem>>, %arg14: memref<1x256xf32, #tpu.memory_space<vmem>>, %arg15: memref<64x256xf32, #tpu.memory_space<vmem>>, %arg16: memref<1x64xf32, #tpu.memory_space<vmem>>, %arg17: memref<1x1xf32, #tpu.memory_space<smem>>, %arg18: memref<1x64xf32, #tpu.memory_space<vmem>>, %arg19: memref<1x1xf32, #tpu.memory_space<smem>>, %arg20: memref<128x32xf32, #tpu.memory_space<vmem>>, %arg21: memref<1x32xf32, #tpu.memory_space<vmem>>, %arg22: memref<32x3xf32, #tpu.memory_space<vmem>>, %arg23: memref<1x3xf32, #tpu.memory_space<vmem>>, %arg24: memref<2x3xf32, #tpu.memory_space<vmem>>, %arg25: memref<8x2xf32, #tpu.memory_space<vmem>>, %arg26: memref<4x2xf32, #tpu.memory_space<vmem>>, %arg27: memref<16x256xf32, #tpu.memory_space<vmem>>, %arg28: memref<8x2x64xf32, #tpu.memory_space<vmem>>, %arg29: memref<8x256xf32, #tpu.memory_space<vmem>>, %arg30: memref<4x2x64xf32, #tpu.memory_space<vmem>>) attributes {dimension_semantics = [], scalar_prefetch = 0 : i64, scratch_operands = 4 : i64, tpu.core_type = #tpu.core_type<tc>} {
    %c0 = arith.constant 0 : index
    %c0_0 = arith.constant 0 : index
    %0 = vector.load %arg0[%c0, %c0_0] : memref<16x32xbf16, #tpu.memory_space<vmem>>, vector<16x32xbf16>
    %c0_1 = arith.constant 0 : index
    %c0_2 = arith.constant 0 : index
    %1 = vector.load %arg4[%c0_1, %c0_2] : memref<32x256xbf16, #tpu.memory_space<vmem>>, vector<32x256xbf16>
    %cst = arith.constant dense<0.000000e+00> : vector<16x256xf32>
    %2 = tpu.matmul %0, %1, %cst {dimension_numbers = #tpu.dot_dimension_numbers<[1], [0], [0], [1], [0, 0, 1, 1], [], []>} : vector<16x32xbf16>, vector<32x256xbf16>, vector<16x256xf32> -> vector<16x256xf32>
    %c0_3 = arith.constant 0 : index
    %c0_4 = arith.constant 0 : index
    %3 = vector.load %arg5[%c0_3, %c0_4] : memref<1x256xf32, #tpu.memory_space<vmem>>, vector<1x256xf32>
    %4 = vector.broadcast %3 : vector<1x256xf32> to vector<16x256xf32>
    %5 = arith.addf %2, %4 : vector<16x256xf32>
    %c0_5 = arith.constant 0 : index
    %c0_6 = arith.constant 0 : index
    %6 = vector.load %arg27[%c0_5, %c0_6] : memref<16x256xf32, #tpu.memory_space<vmem>>, vector<16x256xf32>
    tpu.vector_store %arg27[%c0_5, %c0_6], %5 {strides = array<i32>} : memref<16x256xf32, #tpu.memory_space<vmem>>, vector<16x256xf32>,
    %c0_7 = arith.constant 0 : index
    %c0_8 = arith.constant 0 : index
    %7 = vector.load %arg6[%c0_7, %c0_8] : memref<64x256xf32, #tpu.memory_space<vmem>>, vector<64x256xf32>
    %cst_9 = arith.constant 0.000000e+00 : f32
    %8 = vector.broadcast %cst_9 : f32 to vector<2x64xf32>
    %cst_10 = arith.constant 0.000000e+00 : f32
    %9 = vector.broadcast %cst_10 : f32 to vector<2x32xf32>
    %c0_i32 = arith.constant 0 : i32
    %c7_i32 = arith.constant 7 : i32
    %10 = arith.subi %c7_i32, %c0_i32 : i32
    %cst_11 = arith.constant dense<0.000000e+00> : vector<2x256xf32>
    %11 = tpu.matmul %8, %7, %cst_11 {dimension_numbers = #tpu.dot_dimension_numbers<[1], [0], [0], [1], [0, 0, 1, 1], [], []>} : vector<2x64xf32>, vector<64x256xf32>, vector<2x256xf32> -> vector<2x256xf32>
    %c2_i32 = arith.constant 2 : i32
    %12 = arith.muli %c0_i32, %c2_i32 : i32
    %13 = arith.index_cast %12 : i32 to index
    %c0_12 = arith.constant 0 : index
    %14 = vector.load %arg27[%13, %c0_12] : memref<16x256xf32, #tpu.memory_space<vmem>>, vector<2x256xf32>
    %c2_i32_13 = arith.constant 2 : i32
    %15 = arith.muli %10, %c2_i32_13 : i32
    %16 = arith.index_cast %15 : i32 to index
    %c0_14 = arith.constant 0 : index
    %17 = vector.load %arg27[%16, %c0_14] : memref<16x256xf32, #tpu.memory_space<vmem>>, vector<2x256xf32>
    %18 = vector.extract_strided_slice %14 {offsets = [0, 0], sizes = [2, 128], strides = [1, 1]} : vector<2x256xf32> to vector<2x128xf32>
    %19 = vector.extract_strided_slice %11 {offsets = [0, 0], sizes = [2, 128], strides = [1, 1]} : vector<2x256xf32> to vector<2x128xf32>
    %20 = arith.addf %18, %19 : vector<2x128xf32>
    %21 = vector.extract_strided_slice %17 {offsets = [0, 128], sizes = [2, 128], strides = [1, 1]} : vector<2x256xf32> to vector<2x128xf32>
    %22 = vector.extract_strided_slice %11 {offsets = [0, 128], sizes = [2, 128], strides = [1, 1]} : vector<2x256xf32> to vector<2x128xf32>
    %23 = arith.addf %21, %22 : vector<2x128xf32>
    %24 = arith.negf %20 : vector<2x128xf32>
    %25 = math.exp %24 : vector<2x128xf32>
    %cst_15 = arith.constant 1.000000e+00 : f32
    %26 = vector.broadcast %cst_15 : f32 to vector<2x128xf32>
    %27 = arith.addf %26, %25 : vector<2x128xf32>
    %28 = arith.divf %26, %27 : vector<2x128xf32>
    %29 = math.tanh %20 : vector<2x128xf32>
    %30 = arith.negf %23 : vector<2x128xf32>
    %31 = math.exp %30 : vector<2x128xf32>
    %cst_16 = arith.constant 1.000000e+00 : f32
    %32 = vector.broadcast %cst_16 : f32 to vector<2x128xf32>
    %33 = arith.addf %32, %31 : vector<2x128xf32>
    %34 = arith.divf %32, %33 : vector<2x128xf32>
    %35 = math.tanh %23 : vector<2x128xf32>
    %36 = vector.extract_strided_slice %28 {offsets = [0, 32], sizes = [2, 32], strides = [1, 1]} : vector<2x128xf32> to vector<2x32xf32>
    %37 = arith.mulf %36, %9 : vector<2x32xf32>
    %38 = vector.extract_strided_slice %28 {offsets = [0, 0], sizes = [2, 32], strides = [1, 1]} : vector<2x128xf32> to vector<2x32xf32>
    %39 = vector.extract_strided_slice %29 {offsets = [0, 64], sizes = [2, 32], strides = [1, 1]} : vector<2x128xf32> to vector<2x32xf32>
    %40 = arith.mulf %38, %39 : vector<2x32xf32>
    %41 = arith.addf %37, %40 : vector<2x32xf32>
    %42 = vector.extract_strided_slice %34 {offsets = [0, 32], sizes = [2, 32], strides = [1, 1]} : vector<2x128xf32> to vector<2x32xf32>
    %43 = arith.mulf %42, %9 : vector<2x32xf32>
    %44 = vector.extract_strided_slice %34 {offsets = [0, 0], sizes = [2, 32], strides = [1, 1]} : vector<2x128xf32> to vector<2x32xf32>
    %45 = vector.extract_strided_slice %35 {offsets = [0, 64], sizes = [2, 32], strides = [1, 1]} : vector<2x128xf32> to vector<2x32xf32>
    %46 = arith.mulf %44, %45 : vector<2x32xf32>
    %47 = arith.addf %43, %46 : vector<2x32xf32>
    %48 = vector.extract_strided_slice %28 {offsets = [0, 96], sizes = [2, 32], strides = [1, 1]} : vector<2x128xf32> to vector<2x32xf32>
    %49 = math.tanh %41 : vector<2x32xf32>
    %50 = arith.mulf %48, %49 : vector<2x32xf32>
    %51 = vector.extract_strided_slice %34 {offsets = [0, 96], sizes = [2, 32], strides = [1, 1]} : vector<2x128xf32> to vector<2x32xf32>
    %52 = math.tanh %47 : vector<2x32xf32>
    %53 = arith.mulf %51, %52 : vector<2x32xf32>
    %54 = arith.index_cast %c0_i32 : i32 to index
    %c0_17 = arith.constant 0 : index
    %c0_18 = arith.constant 0 : index
    %55 = vector.load %arg28[%54, %c0_17, %c0_18] : memref<8x2x64xf32, #tpu.memory_space<vmem>>, vector<1x2x32xf32>
    %56 = vector.shape_cast %55 : vector<1x2x32xf32> to vector<2x32xf32>
    %57 = vector.shape_cast %50 : vector<2x32xf32> to vector<1x2x32xf32>
    tpu.vector_store %arg28[%54, %c0_17, %c0_18], %57 {strides = array<i32>} : memref<8x2x64xf32, #tpu.memory_space<vmem>>, vector<1x2x32xf32>,
    %58 = arith.index_cast %10 : i32 to index
    %c0_19 = arith.constant 0 : index
    %c32 = arith.constant 32 : index
    %59 = vector.load %arg28[%58, %c0_19, %c32] : memref<8x2x64xf32, #tpu.memory_space<vmem>>, vector<1x2x32xf32>
    %60 = vector.shape_cast %59 : vector<1x2x32xf32> to vector<2x32xf32>
    %61 = vector.shape_cast %53 : vector<2x32xf32> to vector<1x2x32xf32>
    tpu.vector_store %arg28[%58, %c0_19, %c32], %61 {strides = array<i32>} : memref<8x2x64xf32, #tpu.memory_space<vmem>>, vector<1x2x32xf32>,
    %62 = tpu.concatenate %50, %53 in 1 : vector<2x32xf32>, vector<2x32xf32> -> vector<2x64xf32>
    %c1_i32 = arith.constant 1 : i32
    %c7_i32_20 = arith.constant 7 : i32
    %63 = arith.subi %c7_i32_20, %c1_i32 : i32
    %cst_21 = arith.constant dense<0.000000e+00> : vector<2x256xf32>
    %64 = tpu.matmul %62, %7, %cst_21 {dimension_numbers = #tpu.dot_dimension_numbers<[1], [0], [0], [1], [0, 0, 1, 1], [], []>} : vector<2x64xf32>, vector<64x256xf32>, vector<2x256xf32> -> vector<2x256xf32>
    %c2_i32_22 = arith.constant 2 : i32
    %65 = arith.muli %c1_i32, %c2_i32_22 : i32
    %66 = arith.index_cast %65 : i32 to index
    %c0_23 = arith.constant 0 : index
    %67 = vector.load %arg27[%66, %c0_23] : memref<16x256xf32, #tpu.memory_space<vmem>>, vector<2x256xf32>
    %c2_i32_24 = arith.constant 2 : i32
    %68 = arith.muli %63, %c2_i32_24 : i32
    %69 = arith.index_cast %68 : i32 to index
    %c0_25 = arith.constant 0 : index
    %70 = vector.load %arg27[%69, %c0_25] : memref<16x256xf32, #tpu.memory_space<vmem>>, vector<2x256xf32>
    %71 = vector.extract_strided_slice %67 {offsets = [0, 0], sizes = [2, 128], strides = [1, 1]} : vector<2x256xf32> to vector<2x128xf32>
    %72 = vector.extract_strided_slice %64 {offsets = [0, 0], sizes = [2, 128], strides = [1, 1]} : vector<2x256xf32> to vector<2x128xf32>
    %73 = arith.addf %71, %72 : vector<2x128xf32>
    %74 = vector.extract_strided_slice %70 {offsets = [0, 128], sizes = [2, 128], strides = [1, 1]} : vector<2x256xf32> to vector<2x128xf32>
    %75 = vector.extract_strided_slice %64 {offsets = [0, 128], sizes = [2, 128], strides = [1, 1]} : vector<2x256xf32> to vector<2x128xf32>
    %76 = arith.addf %74, %75 : vector<2x128xf32>
    %77 = arith.negf %73 : vector<2x128xf32>
    %78 = math.exp %77 : vector<2x128xf32>
    %cst_26 = arith.constant 1.000000e+00 : f32
    %79 = vector.broadcast %cst_26 : f32 to vector<2x128xf32>
    %80 = arith.addf %79, %78 : vector<2x128xf32>
    %81 = arith.divf %79, %80 : vector<2x128xf32>
    %82 = math.tanh %73 : vector<2x128xf32>
    %83 = arith.negf %76 : vector<2x128xf32>
    %84 = math.exp %83 : vector<2x128xf32>
    %cst_27 = arith.constant 1.000000e+00 : f32
    %85 = vector.broadcast %cst_27 : f32 to vector<2x128xf32>
    %86 = arith.addf %85, %84 : vector<2x128xf32>
    %87 = arith.divf %85, %86 : vector<2x128xf32>
    %88 = math.tanh %76 : vector<2x128xf32>
    %89 = vector.extract_strided_slice %81 {offsets = [0, 32], sizes = [2, 32], strides = [1, 1]} : vector<2x128xf32> to vector<2x32xf32>
    %90 = arith.mulf %89, %41 : vector<2x32xf32>
    %91 = vector.extract_strided_slice %81 {offsets = [0, 0], sizes = [2, 32], strides = [1, 1]} : vector<2x128xf32> to vector<2x32xf32>
    %92 = vector.extract_strided_slice %82 {offsets = [0, 64], sizes = [2, 32], strides = [1, 1]} : vector<2x128xf32> to vector<2x32xf32>
    %93 = arith.mulf %91, %92 : vector<2x32xf32>
    %94 = arith.addf %90, %93 : vector<2x32xf32>
    %95 = vector.extract_strided_slice %87 {offsets = [0, 32], sizes = [2, 32], strides = [1, 1]} : vector<2x128xf32> to vector<2x32xf32>
    %96 = arith.mulf %95, %47 : vector<2x32xf32>
    %97 = vector.extract_strided_slice %87 {offsets = [0, 0], sizes = [2, 32], strides = [1, 1]} : vector<2x128xf32> to vector<2x32xf32>
    %98 = vector.extract_strided_slice %88 {offsets = [0, 64], sizes = [2, 32], strides = [1, 1]} : vector<2x128xf32> to vector<2x32xf32>
    %99 = arith.mulf %97, %98 : vector<2x32xf32>
    %100 = arith.addf %96, %99 : vector<2x32xf32>
    %101 = vector.extract_strided_slice %81 {offsets = [0, 96], sizes = [2, 32], strides = [1, 1]} : vector<2x128xf32> to vector<2x32xf32>
    %102 = math.tanh %94 : vector<2x32xf32>
    %103 = arith.mulf %101, %102 : vector<2x32xf32>
    %104 = vector.extract_strided_slice %87 {offsets = [0, 96], sizes = [2, 32], strides = [1, 1]} : vector<2x128xf32> to vector<2x32xf32>
    %105 = math.tanh %100 : vector<2x32xf32>
    %106 = arith.mulf %104, %105 : vector<2x32xf32>
    %107 = arith.index_cast %c1_i32 : i32 to index
    %c0_28 = arith.constant 0 : index
    %c0_29 = arith.constant 0 : index
    %108 = vector.load %arg28[%107, %c0_28, %c0_29] : memref<8x2x64xf32, #tpu.memory_space<vmem>>, vector<1x2x32xf32>
    %109 = vector.shape_cast %108 : vector<1x2x32xf32> to vector<2x32xf32>
    %110 = vector.shape_cast %103 : vector<2x32xf32> to vector<1x2x32xf32>
    tpu.vector_store %arg28[%107, %c0_28, %c0_29], %110 {strides = array<i32>} : memref<8x2x64xf32, #tpu.memory_space<vmem>>, vector<1x2x32xf32>,
    %111 = arith.index_cast %63 : i32 to index
    %c0_30 = arith.constant 0 : index
    %c32_31 = arith.constant 32 : index
    %112 = vector.load %arg28[%111, %c0_30, %c32_31] : memref<8x2x64xf32, #tpu.memory_space<vmem>>, vector<1x2x32xf32>
    %113 = vector.shape_cast %112 : vector<1x2x32xf32> to vector<2x32xf32>
    %114 = vector.shape_cast %106 : vector<2x32xf32> to vector<1x2x32xf32>
    tpu.vector_store %arg28[%111, %c0_30, %c32_31], %114 {strides = array<i32>} : memref<8x2x64xf32, #tpu.memory_space<vmem>>, vector<1x2x32xf32>,
    %115 = tpu.concatenate %103, %106 in 1 : vector<2x32xf32>, vector<2x32xf32> -> vector<2x64xf32>
    %c2_i32_32 = arith.constant 2 : i32
    %c7_i32_33 = arith.constant 7 : i32
    %116 = arith.subi %c7_i32_33, %c2_i32_32 : i32
    %cst_34 = arith.constant dense<0.000000e+00> : vector<2x256xf32>
    %117 = tpu.matmul %115, %7, %cst_34 {dimension_numbers = #tpu.dot_dimension_numbers<[1], [0], [0], [1], [0, 0, 1, 1], [], []>} : vector<2x64xf32>, vector<64x256xf32>, vector<2x256xf32> -> vector<2x256xf32>
    %c2_i32_35 = arith.constant 2 : i32
    %118 = arith.muli %c2_i32_32, %c2_i32_35 : i32
    %119 = arith.index_cast %118 : i32 to index
    %c0_36 = arith.constant 0 : index
    %120 = vector.load %arg27[%119, %c0_36] : memref<16x256xf32, #tpu.memory_space<vmem>>, vector<2x256xf32>
    %c2_i32_37 = arith.constant 2 : i32
    %121 = arith.muli %116, %c2_i32_37 : i32
    %122 = arith.index_cast %121 : i32 to index
    %c0_38 = arith.constant 0 : index
    %123 = vector.load %arg27[%122, %c0_38] : memref<16x256xf32, #tpu.memory_space<vmem>>, vector<2x256xf32>
    %124 = vector.extract_strided_slice %120 {offsets = [0, 0], sizes = [2, 128], strides = [1, 1]} : vector<2x256xf32> to vector<2x128xf32>
    %125 = vector.extract_strided_slice %117 {offsets = [0, 0], sizes = [2, 128], strides = [1, 1]} : vector<2x256xf32> to vector<2x128xf32>
    %126 = arith.addf %124, %125 : vector<2x128xf32>
    %127 = vector.extract_strided_slice %123 {offsets = [0, 128], sizes = [2, 128], strides = [1, 1]} : vector<2x256xf32> to vector<2x128xf32>
    %128 = vector.extract_strided_slice %117 {offsets = [0, 128], sizes = [2, 128], strides = [1, 1]} : vector<2x256xf32> to vector<2x128xf32>
    %129 = arith.addf %127, %128 : vector<2x128xf32>
    %130 = arith.negf %126 : vector<2x128xf32>
    %131 = math.exp %130 : vector<2x128xf32>
    %cst_39 = arith.constant 1.000000e+00 : f32
    %132 = vector.broadcast %cst_39 : f32 to vector<2x128xf32>
    %133 = arith.addf %132, %131 : vector<2x128xf32>
    %134 = arith.divf %132, %133 : vector<2x128xf32>
    %135 = math.tanh %126 : vector<2x128xf32>
    %136 = arith.negf %129 : vector<2x128xf32>
    %137 = math.exp %136 : vector<2x128xf32>
    %cst_40 = arith.constant 1.000000e+00 : f32
    %138 = vector.broadcast %cst_40 : f32 to vector<2x128xf32>
    %139 = arith.addf %138, %137 : vector<2x128xf32>
    %140 = arith.divf %138, %139 : vector<2x128xf32>
    %141 = math.tanh %129 : vector<2x128xf32>
    %142 = vector.extract_strided_slice %134 {offsets = [0, 32], sizes = [2, 32], strides = [1, 1]} : vector<2x128xf32> to vector<2x32xf32>
    %143 = arith.mulf %142, %94 : vector<2x32xf32>
    %144 = vector.extract_strided_slice %134 {offsets = [0, 0], sizes = [2, 32], strides = [1, 1]} : vector<2x128xf32> to vector<2x32xf32>
    %145 = vector.extract_strided_slice %135 {offsets = [0, 64], sizes = [2, 32], strides = [1, 1]} : vector<2x128xf32> to vector<2x32xf32>
    %146 = arith.mulf %144, %145 : vector<2x32xf32>
    %147 = arith.addf %143, %146 : vector<2x32xf32>
    %148 = vector.extract_strided_slice %140 {offsets = [0, 32], sizes = [2, 32], strides = [1, 1]} : vector<2x128xf32> to vector<2x32xf32>
    %149 = arith.mulf %148, %100 : vector<2x32xf32>
    %150 = vector.extract_strided_slice %140 {offsets = [0, 0], sizes = [2, 32], strides = [1, 1]} : vector<2x128xf32> to vector<2x32xf32>
    %151 = vector.extract_strided_slice %141 {offsets = [0, 64], sizes = [2, 32], strides = [1, 1]} : vector<2x128xf32> to vector<2x32xf32>
    %152 = arith.mulf %150, %151 : vector<2x32xf32>
    %153 = arith.addf %149, %152 : vector<2x32xf32>
    %154 = vector.extract_strided_slice %134 {offsets = [0, 96], sizes = [2, 32], strides = [1, 1]} : vector<2x128xf32> to vector<2x32xf32>
    %155 = math.tanh %147 : vector<2x32xf32>
    %156 = arith.mulf %154, %155 : vector<2x32xf32>
    %157 = vector.extract_strided_slice %140 {offsets = [0, 96], sizes = [2, 32], strides = [1, 1]} : vector<2x128xf32> to vector<2x32xf32>
    %158 = math.tanh %153 : vector<2x32xf32>
    %159 = arith.mulf %157, %158 : vector<2x32xf32>
    %160 = arith.index_cast %c2_i32_32 : i32 to index
    %c0_41 = arith.constant 0 : index
    %c0_42 = arith.constant 0 : index
    %161 = vector.load %arg28[%160, %c0_41, %c0_42] : memref<8x2x64xf32, #tpu.memory_space<vmem>>, vector<1x2x32xf32>
    %162 = vector.shape_cast %161 : vector<1x2x32xf32> to vector<2x32xf32>
    %163 = vector.shape_cast %156 : vector<2x32xf32> to vector<1x2x32xf32>
    tpu.vector_store %arg28[%160, %c0_41, %c0_42], %163 {strides = array<i32>} : memref<8x2x64xf32, #tpu.memory_space<vmem>>, vector<1x2x32xf32>,
    %164 = arith.index_cast %116 : i32 to index
    %c0_43 = arith.constant 0 : index
    %c32_44 = arith.constant 32 : index
    %165 = vector.load %arg28[%164, %c0_43, %c32_44] : memref<8x2x64xf32, #tpu.memory_space<vmem>>, vector<1x2x32xf32>
    %166 = vector.shape_cast %165 : vector<1x2x32xf32> to vector<2x32xf32>
    %167 = vector.shape_cast %159 : vector<2x32xf32> to vector<1x2x32xf32>
    tpu.vector_store %arg28[%164, %c0_43, %c32_44], %167 {strides = array<i32>} : memref<8x2x64xf32, #tpu.memory_space<vmem>>, vector<1x2x32xf32>,
    %168 = tpu.concatenate %156, %159 in 1 : vector<2x32xf32>, vector<2x32xf32> -> vector<2x64xf32>
    %c3_i32 = arith.constant 3 : i32
    %c7_i32_45 = arith.constant 7 : i32
    %169 = arith.subi %c7_i32_45, %c3_i32 : i32
    %cst_46 = arith.constant dense<0.000000e+00> : vector<2x256xf32>
    %170 = tpu.matmul %168, %7, %cst_46 {dimension_numbers = #tpu.dot_dimension_numbers<[1], [0], [0], [1], [0, 0, 1, 1], [], []>} : vector<2x64xf32>, vector<64x256xf32>, vector<2x256xf32> -> vector<2x256xf32>
    %c2_i32_47 = arith.constant 2 : i32
    %171 = arith.muli %c3_i32, %c2_i32_47 : i32
    %172 = arith.index_cast %171 : i32 to index
    %c0_48 = arith.constant 0 : index
    %173 = vector.load %arg27[%172, %c0_48] : memref<16x256xf32, #tpu.memory_space<vmem>>, vector<2x256xf32>
    %c2_i32_49 = arith.constant 2 : i32
    %174 = arith.muli %169, %c2_i32_49 : i32
    %175 = arith.index_cast %174 : i32 to index
    %c0_50 = arith.constant 0 : index
    %176 = vector.load %arg27[%175, %c0_50] : memref<16x256xf32, #tpu.memory_space<vmem>>, vector<2x256xf32>
    %177 = vector.extract_strided_slice %173 {offsets = [0, 0], sizes = [2, 128], strides = [1, 1]} : vector<2x256xf32> to vector<2x128xf32>
    %178 = vector.extract_strided_slice %170 {offsets = [0, 0], sizes = [2, 128], strides = [1, 1]} : vector<2x256xf32> to vector<2x128xf32>
    %179 = arith.addf %177, %178 : vector<2x128xf32>
    %180 = vector.extract_strided_slice %176 {offsets = [0, 128], sizes = [2, 128], strides = [1, 1]} : vector<2x256xf32> to vector<2x128xf32>
    %181 = vector.extract_strided_slice %170 {offsets = [0, 128], sizes = [2, 128], strides = [1, 1]} : vector<2x256xf32> to vector<2x128xf32>
    %182 = arith.addf %180, %181 : vector<2x128xf32>
    %183 = arith.negf %179 : vector<2x128xf32>
    %184 = math.exp %183 : vector<2x128xf32>
    %cst_51 = arith.constant 1.000000e+00 : f32
    %185 = vector.broadcast %cst_51 : f32 to vector<2x128xf32>
    %186 = arith.addf %185, %184 : vector<2x128xf32>
    %187 = arith.divf %185, %186 : vector<2x128xf32>
    %188 = math.tanh %179 : vector<2x128xf32>
    %189 = arith.negf %182 : vector<2x128xf32>
    %190 = math.exp %189 : vector<2x128xf32>
    %cst_52 = arith.constant 1.000000e+00 : f32
    %191 = vector.broadcast %cst_52 : f32 to vector<2x128xf32>
    %192 = arith.addf %191, %190 : vector<2x128xf32>
    %193 = arith.divf %191, %192 : vector<2x128xf32>
    %194 = math.tanh %182 : vector<2x128xf32>
    %195 = vector.extract_strided_slice %187 {offsets = [0, 32], sizes = [2, 32], strides = [1, 1]} : vector<2x128xf32> to vector<2x32xf32>
    %196 = arith.mulf %195, %147 : vector<2x32xf32>
    %197 = vector.extract_strided_slice %187 {offsets = [0, 0], sizes = [2, 32], strides = [1, 1]} : vector<2x128xf32> to vector<2x32xf32>
    %198 = vector.extract_strided_slice %188 {offsets = [0, 64], sizes = [2, 32], strides = [1, 1]} : vector<2x128xf32> to vector<2x32xf32>
    %199 = arith.mulf %197, %198 : vector<2x32xf32>
    %200 = arith.addf %196, %199 : vector<2x32xf32>
    %201 = vector.extract_strided_slice %193 {offsets = [0, 32], sizes = [2, 32], strides = [1, 1]} : vector<2x128xf32> to vector<2x32xf32>
    %202 = arith.mulf %201, %153 : vector<2x32xf32>
    %203 = vector.extract_strided_slice %193 {offsets = [0, 0], sizes = [2, 32], strides = [1, 1]} : vector<2x128xf32> to vector<2x32xf32>
    %204 = vector.extract_strided_slice %194 {offsets = [0, 64], sizes = [2, 32], strides = [1, 1]} : vector<2x128xf32> to vector<2x32xf32>
    %205 = arith.mulf %203, %204 : vector<2x32xf32>
    %206 = arith.addf %202, %205 : vector<2x32xf32>
    %207 = vector.extract_strided_slice %187 {offsets = [0, 96], sizes = [2, 32], strides = [1, 1]} : vector<2x128xf32> to vector<2x32xf32>
    %208 = math.tanh %200 : vector<2x32xf32>
    %209 = arith.mulf %207, %208 : vector<2x32xf32>
    %210 = vector.extract_strided_slice %193 {offsets = [0, 96], sizes = [2, 32], strides = [1, 1]} : vector<2x128xf32> to vector<2x32xf32>
    %211 = math.tanh %206 : vector<2x32xf32>
    %212 = arith.mulf %210, %211 : vector<2x32xf32>
    %213 = arith.index_cast %c3_i32 : i32 to index
    %c0_53 = arith.constant 0 : index
    %c0_54 = arith.constant 0 : index
    %214 = vector.load %arg28[%213, %c0_53, %c0_54] : memref<8x2x64xf32, #tpu.memory_space<vmem>>, vector<1x2x32xf32>
    %215 = vector.shape_cast %214 : vector<1x2x32xf32> to vector<2x32xf32>
    %216 = vector.shape_cast %209 : vector<2x32xf32> to vector<1x2x32xf32>
    tpu.vector_store %arg28[%213, %c0_53, %c0_54], %216 {strides = array<i32>} : memref<8x2x64xf32, #tpu.memory_space<vmem>>, vector<1x2x32xf32>,
    %217 = arith.index_cast %169 : i32 to index
    %c0_55 = arith.constant 0 : index
    %c32_56 = arith.constant 32 : index
    %218 = vector.load %arg28[%217, %c0_55, %c32_56] : memref<8x2x64xf32, #tpu.memory_space<vmem>>, vector<1x2x32xf32>
    %219 = vector.shape_cast %218 : vector<1x2x32xf32> to vector<2x32xf32>
    %220 = vector.shape_cast %212 : vector<2x32xf32> to vector<1x2x32xf32>
    tpu.vector_store %arg28[%217, %c0_55, %c32_56], %220 {strides = array<i32>} : memref<8x2x64xf32, #tpu.memory_space<vmem>>, vector<1x2x32xf32>,
    %221 = tpu.concatenate %209, %212 in 1 : vector<2x32xf32>, vector<2x32xf32> -> vector<2x64xf32>
    %c4_i32 = arith.constant 4 : i32
    %c7_i32_57 = arith.constant 7 : i32
    %222 = arith.subi %c7_i32_57, %c4_i32 : i32
    %cst_58 = arith.constant dense<0.000000e+00> : vector<2x256xf32>
    %223 = tpu.matmul %221, %7, %cst_58 {dimension_numbers = #tpu.dot_dimension_numbers<[1], [0], [0], [1], [0, 0, 1, 1], [], []>} : vector<2x64xf32>, vector<64x256xf32>, vector<2x256xf32> -> vector<2x256xf32>
    %c2_i32_59 = arith.constant 2 : i32
    %224 = arith.muli %c4_i32, %c2_i32_59 : i32
    %225 = arith.index_cast %224 : i32 to index
    %c0_60 = arith.constant 0 : index
    %226 = vector.load %arg27[%225, %c0_60] : memref<16x256xf32, #tpu.memory_space<vmem>>, vector<2x256xf32>
    %c2_i32_61 = arith.constant 2 : i32
    %227 = arith.muli %222, %c2_i32_61 : i32
    %228 = arith.index_cast %227 : i32 to index
    %c0_62 = arith.constant 0 : index
    %229 = vector.load %arg27[%228, %c0_62] : memref<16x256xf32, #tpu.memory_space<vmem>>, vector<2x256xf32>
    %230 = vector.extract_strided_slice %226 {offsets = [0, 0], sizes = [2, 128], strides = [1, 1]} : vector<2x256xf32> to vector<2x128xf32>
    %231 = vector.extract_strided_slice %223 {offsets = [0, 0], sizes = [2, 128], strides = [1, 1]} : vector<2x256xf32> to vector<2x128xf32>
    %232 = arith.addf %230, %231 : vector<2x128xf32>
    %233 = vector.extract_strided_slice %229 {offsets = [0, 128], sizes = [2, 128], strides = [1, 1]} : vector<2x256xf32> to vector<2x128xf32>
    %234 = vector.extract_strided_slice %223 {offsets = [0, 128], sizes = [2, 128], strides = [1, 1]} : vector<2x256xf32> to vector<2x128xf32>
    %235 = arith.addf %233, %234 : vector<2x128xf32>
    %236 = arith.negf %232 : vector<2x128xf32>
    %237 = math.exp %236 : vector<2x128xf32>
    %cst_63 = arith.constant 1.000000e+00 : f32
    %238 = vector.broadcast %cst_63 : f32 to vector<2x128xf32>
    %239 = arith.addf %238, %237 : vector<2x128xf32>
    %240 = arith.divf %238, %239 : vector<2x128xf32>
    %241 = math.tanh %232 : vector<2x128xf32>
    %242 = arith.negf %235 : vector<2x128xf32>
    %243 = math.exp %242 : vector<2x128xf32>
    %cst_64 = arith.constant 1.000000e+00 : f32
    %244 = vector.broadcast %cst_64 : f32 to vector<2x128xf32>
    %245 = arith.addf %244, %243 : vector<2x128xf32>
    %246 = arith.divf %244, %245 : vector<2x128xf32>
    %247 = math.tanh %235 : vector<2x128xf32>
    %248 = vector.extract_strided_slice %240 {offsets = [0, 32], sizes = [2, 32], strides = [1, 1]} : vector<2x128xf32> to vector<2x32xf32>
    %249 = arith.mulf %248, %200 : vector<2x32xf32>
    %250 = vector.extract_strided_slice %240 {offsets = [0, 0], sizes = [2, 32], strides = [1, 1]} : vector<2x128xf32> to vector<2x32xf32>
    %251 = vector.extract_strided_slice %241 {offsets = [0, 64], sizes = [2, 32], strides = [1, 1]} : vector<2x128xf32> to vector<2x32xf32>
    %252 = arith.mulf %250, %251 : vector<2x32xf32>
    %253 = arith.addf %249, %252 : vector<2x32xf32>
    %254 = vector.extract_strided_slice %246 {offsets = [0, 32], sizes = [2, 32], strides = [1, 1]} : vector<2x128xf32> to vector<2x32xf32>
    %255 = arith.mulf %254, %206 : vector<2x32xf32>
    %256 = vector.extract_strided_slice %246 {offsets = [0, 0], sizes = [2, 32], strides = [1, 1]} : vector<2x128xf32> to vector<2x32xf32>
    %257 = vector.extract_strided_slice %247 {offsets = [0, 64], sizes = [2, 32], strides = [1, 1]} : vector<2x128xf32> to vector<2x32xf32>
    %258 = arith.mulf %256, %257 : vector<2x32xf32>
    %259 = arith.addf %255, %258 : vector<2x32xf32>
    %260 = vector.extract_strided_slice %240 {offsets = [0, 96], sizes = [2, 32], strides = [1, 1]} : vector<2x128xf32> to vector<2x32xf32>
    %261 = math.tanh %253 : vector<2x32xf32>
    %262 = arith.mulf %260, %261 : vector<2x32xf32>
    %263 = vector.extract_strided_slice %246 {offsets = [0, 96], sizes = [2, 32], strides = [1, 1]} : vector<2x128xf32> to vector<2x32xf32>
    %264 = math.tanh %259 : vector<2x32xf32>
    %265 = arith.mulf %263, %264 : vector<2x32xf32>
    %266 = arith.index_cast %c4_i32 : i32 to index
    %c0_65 = arith.constant 0 : index
    %c0_66 = arith.constant 0 : index
    %267 = vector.load %arg28[%266, %c0_65, %c0_66] : memref<8x2x64xf32, #tpu.memory_space<vmem>>, vector<1x2x32xf32>
    %268 = vector.shape_cast %267 : vector<1x2x32xf32> to vector<2x32xf32>
    %269 = vector.shape_cast %262 : vector<2x32xf32> to vector<1x2x32xf32>
    tpu.vector_store %arg28[%266, %c0_65, %c0_66], %269 {strides = array<i32>} : memref<8x2x64xf32, #tpu.memory_space<vmem>>, vector<1x2x32xf32>,
    %270 = arith.index_cast %222 : i32 to index
    %c0_67 = arith.constant 0 : index
    %c32_68 = arith.constant 32 : index
    %271 = vector.load %arg28[%270, %c0_67, %c32_68] : memref<8x2x64xf32, #tpu.memory_space<vmem>>, vector<1x2x32xf32>
    %272 = vector.shape_cast %271 : vector<1x2x32xf32> to vector<2x32xf32>
    %273 = vector.shape_cast %265 : vector<2x32xf32> to vector<1x2x32xf32>
    tpu.vector_store %arg28[%270, %c0_67, %c32_68], %273 {strides = array<i32>} : memref<8x2x64xf32, #tpu.memory_space<vmem>>, vector<1x2x32xf32>,
    %274 = tpu.concatenate %262, %265 in 1 : vector<2x32xf32>, vector<2x32xf32> -> vector<2x64xf32>
    %c5_i32 = arith.constant 5 : i32
    %c7_i32_69 = arith.constant 7 : i32
    %275 = arith.subi %c7_i32_69, %c5_i32 : i32
    %cst_70 = arith.constant dense<0.000000e+00> : vector<2x256xf32>
    %276 = tpu.matmul %274, %7, %cst_70 {dimension_numbers = #tpu.dot_dimension_numbers<[1], [0], [0], [1], [0, 0, 1, 1], [], []>} : vector<2x64xf32>, vector<64x256xf32>, vector<2x256xf32> -> vector<2x256xf32>
    %c2_i32_71 = arith.constant 2 : i32
    %277 = arith.muli %c5_i32, %c2_i32_71 : i32
    %278 = arith.index_cast %277 : i32 to index
    %c0_72 = arith.constant 0 : index
    %279 = vector.load %arg27[%278, %c0_72] : memref<16x256xf32, #tpu.memory_space<vmem>>, vector<2x256xf32>
    %c2_i32_73 = arith.constant 2 : i32
    %280 = arith.muli %275, %c2_i32_73 : i32
    %281 = arith.index_cast %280 : i32 to index
    %c0_74 = arith.constant 0 : index
    %282 = vector.load %arg27[%281, %c0_74] : memref<16x256xf32, #tpu.memory_space<vmem>>, vector<2x256xf32>
    %283 = vector.extract_strided_slice %279 {offsets = [0, 0], sizes = [2, 128], strides = [1, 1]} : vector<2x256xf32> to vector<2x128xf32>
    %284 = vector.extract_strided_slice %276 {offsets = [0, 0], sizes = [2, 128], strides = [1, 1]} : vector<2x256xf32> to vector<2x128xf32>
    %285 = arith.addf %283, %284 : vector<2x128xf32>
    %286 = vector.extract_strided_slice %282 {offsets = [0, 128], sizes = [2, 128], strides = [1, 1]} : vector<2x256xf32> to vector<2x128xf32>
    %287 = vector.extract_strided_slice %276 {offsets = [0, 128], sizes = [2, 128], strides = [1, 1]} : vector<2x256xf32> to vector<2x128xf32>
    %288 = arith.addf %286, %287 : vector<2x128xf32>
    %289 = arith.negf %285 : vector<2x128xf32>
    %290 = math.exp %289 : vector<2x128xf32>
    %cst_75 = arith.constant 1.000000e+00 : f32
    %291 = vector.broadcast %cst_75 : f32 to vector<2x128xf32>
    %292 = arith.addf %291, %290 : vector<2x128xf32>
    %293 = arith.divf %291, %292 : vector<2x128xf32>
    %294 = math.tanh %285 : vector<2x128xf32>
    %295 = arith.negf %288 : vector<2x128xf32>
    %296 = math.exp %295 : vector<2x128xf32>
    %cst_76 = arith.constant 1.000000e+00 : f32
    %297 = vector.broadcast %cst_76 : f32 to vector<2x128xf32>
    %298 = arith.addf %297, %296 : vector<2x128xf32>
    %299 = arith.divf %297, %298 : vector<2x128xf32>
    %300 = math.tanh %288 : vector<2x128xf32>
    %301 = vector.extract_strided_slice %293 {offsets = [0, 32], sizes = [2, 32], strides = [1, 1]} : vector<2x128xf32> to vector<2x32xf32>
    %302 = arith.mulf %301, %253 : vector<2x32xf32>
    %303 = vector.extract_strided_slice %293 {offsets = [0, 0], sizes = [2, 32], strides = [1, 1]} : vector<2x128xf32> to vector<2x32xf32>
    %304 = vector.extract_strided_slice %294 {offsets = [0, 64], sizes = [2, 32], strides = [1, 1]} : vector<2x128xf32> to vector<2x32xf32>
    %305 = arith.mulf %303, %304 : vector<2x32xf32>
    %306 = arith.addf %302, %305 : vector<2x32xf32>
    %307 = vector.extract_strided_slice %299 {offsets = [0, 32], sizes = [2, 32], strides = [1, 1]} : vector<2x128xf32> to vector<2x32xf32>
    %308 = arith.mulf %307, %259 : vector<2x32xf32>
    %309 = vector.extract_strided_slice %299 {offsets = [0, 0], sizes = [2, 32], strides = [1, 1]} : vector<2x128xf32> to vector<2x32xf32>
    %310 = vector.extract_strided_slice %300 {offsets = [0, 64], sizes = [2, 32], strides = [1, 1]} : vector<2x128xf32> to vector<2x32xf32>
    %311 = arith.mulf %309, %310 : vector<2x32xf32>
    %312 = arith.addf %308, %311 : vector<2x32xf32>
    %313 = vector.extract_strided_slice %293 {offsets = [0, 96], sizes = [2, 32], strides = [1, 1]} : vector<2x128xf32> to vector<2x32xf32>
    %314 = math.tanh %306 : vector<2x32xf32>
    %315 = arith.mulf %313, %314 : vector<2x32xf32>
    %316 = vector.extract_strided_slice %299 {offsets = [0, 96], sizes = [2, 32], strides = [1, 1]} : vector<2x128xf32> to vector<2x32xf32>
    %317 = math.tanh %312 : vector<2x32xf32>
    %318 = arith.mulf %316, %317 : vector<2x32xf32>
    %319 = arith.index_cast %c5_i32 : i32 to index
    %c0_77 = arith.constant 0 : index
    %c0_78 = arith.constant 0 : index
    %320 = vector.load %arg28[%319, %c0_77, %c0_78] : memref<8x2x64xf32, #tpu.memory_space<vmem>>, vector<1x2x32xf32>
    %321 = vector.shape_cast %320 : vector<1x2x32xf32> to vector<2x32xf32>
    %322 = vector.shape_cast %315 : vector<2x32xf32> to vector<1x2x32xf32>
    tpu.vector_store %arg28[%319, %c0_77, %c0_78], %322 {strides = array<i32>} : memref<8x2x64xf32, #tpu.memory_space<vmem>>, vector<1x2x32xf32>,
    %323 = arith.index_cast %275 : i32 to index
    %c0_79 = arith.constant 0 : index
    %c32_80 = arith.constant 32 : index
    %324 = vector.load %arg28[%323, %c0_79, %c32_80] : memref<8x2x64xf32, #tpu.memory_space<vmem>>, vector<1x2x32xf32>
    %325 = vector.shape_cast %324 : vector<1x2x32xf32> to vector<2x32xf32>
    %326 = vector.shape_cast %318 : vector<2x32xf32> to vector<1x2x32xf32>
    tpu.vector_store %arg28[%323, %c0_79, %c32_80], %326 {strides = array<i32>} : memref<8x2x64xf32, #tpu.memory_space<vmem>>, vector<1x2x32xf32>,
    %327 = tpu.concatenate %315, %318 in 1 : vector<2x32xf32>, vector<2x32xf32> -> vector<2x64xf32>
    %c6_i32 = arith.constant 6 : i32
    %c7_i32_81 = arith.constant 7 : i32
    %328 = arith.subi %c7_i32_81, %c6_i32 : i32
    %cst_82 = arith.constant dense<0.000000e+00> : vector<2x256xf32>
    %329 = tpu.matmul %327, %7, %cst_82 {dimension_numbers = #tpu.dot_dimension_numbers<[1], [0], [0], [1], [0, 0, 1, 1], [], []>} : vector<2x64xf32>, vector<64x256xf32>, vector<2x256xf32> -> vector<2x256xf32>
    %c2_i32_83 = arith.constant 2 : i32
    %330 = arith.muli %c6_i32, %c2_i32_83 : i32
    %331 = arith.index_cast %330 : i32 to index
    %c0_84 = arith.constant 0 : index
    %332 = vector.load %arg27[%331, %c0_84] : memref<16x256xf32, #tpu.memory_space<vmem>>, vector<2x256xf32>
    %c2_i32_85 = arith.constant 2 : i32
    %333 = arith.muli %328, %c2_i32_85 : i32
    %334 = arith.index_cast %333 : i32 to index
    %c0_86 = arith.constant 0 : index
    %335 = vector.load %arg27[%334, %c0_86] : memref<16x256xf32, #tpu.memory_space<vmem>>, vector<2x256xf32>
    %336 = vector.extract_strided_slice %332 {offsets = [0, 0], sizes = [2, 128], strides = [1, 1]} : vector<2x256xf32> to vector<2x128xf32>
    %337 = vector.extract_strided_slice %329 {offsets = [0, 0], sizes = [2, 128], strides = [1, 1]} : vector<2x256xf32> to vector<2x128xf32>
    %338 = arith.addf %336, %337 : vector<2x128xf32>
    %339 = vector.extract_strided_slice %335 {offsets = [0, 128], sizes = [2, 128], strides = [1, 1]} : vector<2x256xf32> to vector<2x128xf32>
    %340 = vector.extract_strided_slice %329 {offsets = [0, 128], sizes = [2, 128], strides = [1, 1]} : vector<2x256xf32> to vector<2x128xf32>
    %341 = arith.addf %339, %340 : vector<2x128xf32>
    %342 = arith.negf %338 : vector<2x128xf32>
    %343 = math.exp %342 : vector<2x128xf32>
    %cst_87 = arith.constant 1.000000e+00 : f32
    %344 = vector.broadcast %cst_87 : f32 to vector<2x128xf32>
    %345 = arith.addf %344, %343 : vector<2x128xf32>
    %346 = arith.divf %344, %345 : vector<2x128xf32>
    %347 = math.tanh %338 : vector<2x128xf32>
    %348 = arith.negf %341 : vector<2x128xf32>
    %349 = math.exp %348 : vector<2x128xf32>
    %cst_88 = arith.constant 1.000000e+00 : f32
    %350 = vector.broadcast %cst_88 : f32 to vector<2x128xf32>
    %351 = arith.addf %350, %349 : vector<2x128xf32>
    %352 = arith.divf %350, %351 : vector<2x128xf32>
    %353 = math.tanh %341 : vector<2x128xf32>
    %354 = vector.extract_strided_slice %346 {offsets = [0, 32], sizes = [2, 32], strides = [1, 1]} : vector<2x128xf32> to vector<2x32xf32>
    %355 = arith.mulf %354, %306 : vector<2x32xf32>
    %356 = vector.extract_strided_slice %346 {offsets = [0, 0], sizes = [2, 32], strides = [1, 1]} : vector<2x128xf32> to vector<2x32xf32>
    %357 = vector.extract_strided_slice %347 {offsets = [0, 64], sizes = [2, 32], strides = [1, 1]} : vector<2x128xf32> to vector<2x32xf32>
    %358 = arith.mulf %356, %357 : vector<2x32xf32>
    %359 = arith.addf %355, %358 : vector<2x32xf32>
    %360 = vector.extract_strided_slice %352 {offsets = [0, 32], sizes = [2, 32], strides = [1, 1]} : vector<2x128xf32> to vector<2x32xf32>
    %361 = arith.mulf %360, %312 : vector<2x32xf32>
    %362 = vector.extract_strided_slice %352 {offsets = [0, 0], sizes = [2, 32], strides = [1, 1]} : vector<2x128xf32> to vector<2x32xf32>
    %363 = vector.extract_strided_slice %353 {offsets = [0, 64], sizes = [2, 32], strides = [1, 1]} : vector<2x128xf32> to vector<2x32xf32>
    %364 = arith.mulf %362, %363 : vector<2x32xf32>
    %365 = arith.addf %361, %364 : vector<2x32xf32>
    %366 = vector.extract_strided_slice %346 {offsets = [0, 96], sizes = [2, 32], strides = [1, 1]} : vector<2x128xf32> to vector<2x32xf32>
    %367 = math.tanh %359 : vector<2x32xf32>
    %368 = arith.mulf %366, %367 : vector<2x32xf32>
    %369 = vector.extract_strided_slice %352 {offsets = [0, 96], sizes = [2, 32], strides = [1, 1]} : vector<2x128xf32> to vector<2x32xf32>
    %370 = math.tanh %365 : vector<2x32xf32>
    %371 = arith.mulf %369, %370 : vector<2x32xf32>
    %372 = arith.index_cast %c6_i32 : i32 to index
    %c0_89 = arith.constant 0 : index
    %c0_90 = arith.constant 0 : index
    %373 = vector.load %arg28[%372, %c0_89, %c0_90] : memref<8x2x64xf32, #tpu.memory_space<vmem>>, vector<1x2x32xf32>
    %374 = vector.shape_cast %373 : vector<1x2x32xf32> to vector<2x32xf32>
    %375 = vector.shape_cast %368 : vector<2x32xf32> to vector<1x2x32xf32>
    tpu.vector_store %arg28[%372, %c0_89, %c0_90], %375 {strides = array<i32>} : memref<8x2x64xf32, #tpu.memory_space<vmem>>, vector<1x2x32xf32>,
    %376 = arith.index_cast %328 : i32 to index
    %c0_91 = arith.constant 0 : index
    %c32_92 = arith.constant 32 : index
    %377 = vector.load %arg28[%376, %c0_91, %c32_92] : memref<8x2x64xf32, #tpu.memory_space<vmem>>, vector<1x2x32xf32>
    %378 = vector.shape_cast %377 : vector<1x2x32xf32> to vector<2x32xf32>
    %379 = vector.shape_cast %371 : vector<2x32xf32> to vector<1x2x32xf32>
    tpu.vector_store %arg28[%376, %c0_91, %c32_92], %379 {strides = array<i32>} : memref<8x2x64xf32, #tpu.memory_space<vmem>>, vector<1x2x32xf32>,
    %380 = tpu.concatenate %368, %371 in 1 : vector<2x32xf32>, vector<2x32xf32> -> vector<2x64xf32>
    %c7_i32_93 = arith.constant 7 : i32
    %c7_i32_94 = arith.constant 7 : i32
    %381 = arith.subi %c7_i32_94, %c7_i32_93 : i32
    %cst_95 = arith.constant dense<0.000000e+00> : vector<2x256xf32>
    %382 = tpu.matmul %380, %7, %cst_95 {dimension_numbers = #tpu.dot_dimension_numbers<[1], [0], [0], [1], [0, 0, 1, 1], [], []>} : vector<2x64xf32>, vector<64x256xf32>, vector<2x256xf32> -> vector<2x256xf32>
    %c2_i32_96 = arith.constant 2 : i32
    %383 = arith.muli %c7_i32_93, %c2_i32_96 : i32
    %384 = arith.index_cast %383 : i32 to index
    %c0_97 = arith.constant 0 : index
    %385 = vector.load %arg27[%384, %c0_97] : memref<16x256xf32, #tpu.memory_space<vmem>>, vector<2x256xf32>
    %c2_i32_98 = arith.constant 2 : i32
    %386 = arith.muli %381, %c2_i32_98 : i32
    %387 = arith.index_cast %386 : i32 to index
    %c0_99 = arith.constant 0 : index
    %388 = vector.load %arg27[%387, %c0_99] : memref<16x256xf32, #tpu.memory_space<vmem>>, vector<2x256xf32>
    %389 = vector.extract_strided_slice %385 {offsets = [0, 0], sizes = [2, 128], strides = [1, 1]} : vector<2x256xf32> to vector<2x128xf32>
    %390 = vector.extract_strided_slice %382 {offsets = [0, 0], sizes = [2, 128], strides = [1, 1]} : vector<2x256xf32> to vector<2x128xf32>
    %391 = arith.addf %389, %390 : vector<2x128xf32>
    %392 = vector.extract_strided_slice %388 {offsets = [0, 128], sizes = [2, 128], strides = [1, 1]} : vector<2x256xf32> to vector<2x128xf32>
    %393 = vector.extract_strided_slice %382 {offsets = [0, 128], sizes = [2, 128], strides = [1, 1]} : vector<2x256xf32> to vector<2x128xf32>
    %394 = arith.addf %392, %393 : vector<2x128xf32>
    %395 = arith.negf %391 : vector<2x128xf32>
    %396 = math.exp %395 : vector<2x128xf32>
    %cst_100 = arith.constant 1.000000e+00 : f32
    %397 = vector.broadcast %cst_100 : f32 to vector<2x128xf32>
    %398 = arith.addf %397, %396 : vector<2x128xf32>
    %399 = arith.divf %397, %398 : vector<2x128xf32>
    %400 = math.tanh %391 : vector<2x128xf32>
    %401 = arith.negf %394 : vector<2x128xf32>
    %402 = math.exp %401 : vector<2x128xf32>
    %cst_101 = arith.constant 1.000000e+00 : f32
    %403 = vector.broadcast %cst_101 : f32 to vector<2x128xf32>
    %404 = arith.addf %403, %402 : vector<2x128xf32>
    %405 = arith.divf %403, %404 : vector<2x128xf32>
    %406 = math.tanh %394 : vector<2x128xf32>
    %407 = vector.extract_strided_slice %399 {offsets = [0, 32], sizes = [2, 32], strides = [1, 1]} : vector<2x128xf32> to vector<2x32xf32>
    %408 = arith.mulf %407, %359 : vector<2x32xf32>
    %409 = vector.extract_strided_slice %399 {offsets = [0, 0], sizes = [2, 32], strides = [1, 1]} : vector<2x128xf32> to vector<2x32xf32>
    %410 = vector.extract_strided_slice %400 {offsets = [0, 64], sizes = [2, 32], strides = [1, 1]} : vector<2x128xf32> to vector<2x32xf32>
    %411 = arith.mulf %409, %410 : vector<2x32xf32>
    %412 = arith.addf %408, %411 : vector<2x32xf32>
    %413 = vector.extract_strided_slice %405 {offsets = [0, 32], sizes = [2, 32], strides = [1, 1]} : vector<2x128xf32> to vector<2x32xf32>
    %414 = arith.mulf %413, %365 : vector<2x32xf32>
    %415 = vector.extract_strided_slice %405 {offsets = [0, 0], sizes = [2, 32], strides = [1, 1]} : vector<2x128xf32> to vector<2x32xf32>
    %416 = vector.extract_strided_slice %406 {offsets = [0, 64], sizes = [2, 32], strides = [1, 1]} : vector<2x128xf32> to vector<2x32xf32>
    %417 = arith.mulf %415, %416 : vector<2x32xf32>
    %418 = arith.addf %414, %417 : vector<2x32xf32>
    %419 = vector.extract_strided_slice %399 {offsets = [0, 96], sizes = [2, 32], strides = [1, 1]} : vector<2x128xf32> to vector<2x32xf32>
    %420 = math.tanh %412 : vector<2x32xf32>
    %421 = arith.mulf %419, %420 : vector<2x32xf32>
    %422 = vector.extract_strided_slice %405 {offsets = [0, 96], sizes = [2, 32], strides = [1, 1]} : vector<2x128xf32> to vector<2x32xf32>
    %423 = math.tanh %418 : vector<2x32xf32>
    %424 = arith.mulf %422, %423 : vector<2x32xf32>
    %425 = arith.index_cast %c7_i32_93 : i32 to index
    %c0_102 = arith.constant 0 : index
    %c0_103 = arith.constant 0 : index
    %426 = vector.load %arg28[%425, %c0_102, %c0_103] : memref<8x2x64xf32, #tpu.memory_space<vmem>>, vector<1x2x32xf32>
    %427 = vector.shape_cast %426 : vector<1x2x32xf32> to vector<2x32xf32>
    %428 = vector.shape_cast %421 : vector<2x32xf32> to vector<1x2x32xf32>
    tpu.vector_store %arg28[%425, %c0_102, %c0_103], %428 {strides = array<i32>} : memref<8x2x64xf32, #tpu.memory_space<vmem>>, vector<1x2x32xf32>,
    %429 = arith.index_cast %381 : i32 to index
    %c0_104 = arith.constant 0 : index
    %c32_105 = arith.constant 32 : index
    %430 = vector.load %arg28[%429, %c0_104, %c32_105] : memref<8x2x64xf32, #tpu.memory_space<vmem>>, vector<1x2x32xf32>
    %431 = vector.shape_cast %430 : vector<1x2x32xf32> to vector<2x32xf32>
    %432 = vector.shape_cast %424 : vector<2x32xf32> to vector<1x2x32xf32>
    tpu.vector_store %arg28[%429, %c0_104, %c32_105], %432 {strides = array<i32>} : memref<8x2x64xf32, #tpu.memory_space<vmem>>, vector<1x2x32xf32>,
    %433 = tpu.concatenate %421, %424 in 1 : vector<2x32xf32>, vector<2x32xf32> -> vector<2x64xf32>
    %c8_i32 = arith.constant 8 : i32
    %c0_106 = arith.constant 0 : index
    %c0_107 = arith.constant 0 : index
    %c0_108 = arith.constant 0 : index
    %434 = vector.load %arg28[%c0_106, %c0_107, %c0_108] : memref<8x2x64xf32, #tpu.memory_space<vmem>>, vector<8x2x64xf32>
    %435 = vector.shape_cast %434 : vector<8x2x64xf32> to vector<16x64xf32>
    %436 = arith.truncf %435 : vector<16x64xf32> to vector<16x64xbf16>
    %c0_109 = arith.constant 0 : index
    %c0_110 = arith.constant 0 : index
    %437 = vector.load %arg7[%c0_109, %c0_110] : memref<64x256xbf16, #tpu.memory_space<vmem>>, vector<64x256xbf16>
    %cst_111 = arith.constant dense<0.000000e+00> : vector<16x256xf32>
    %438 = tpu.matmul %436, %437, %cst_111 {dimension_numbers = #tpu.dot_dimension_numbers<[1], [0], [0], [1], [0, 0, 1, 1], [], []>} : vector<16x64xbf16>, vector<64x256xbf16>, vector<16x256xf32> -> vector<16x256xf32>
    %c0_112 = arith.constant 0 : index
    %c0_113 = arith.constant 0 : index
    %439 = vector.load %arg8[%c0_112, %c0_113] : memref<1x256xf32, #tpu.memory_space<vmem>>, vector<1x256xf32>
    %440 = vector.broadcast %439 : vector<1x256xf32> to vector<16x256xf32>
    %441 = arith.addf %438, %440 : vector<16x256xf32>
    %c0_114 = arith.constant 0 : index
    %c0_115 = arith.constant 0 : index
    %442 = vector.load %arg27[%c0_114, %c0_115] : memref<16x256xf32, #tpu.memory_space<vmem>>, vector<16x256xf32>
    tpu.vector_store %arg27[%c0_114, %c0_115], %441 {strides = array<i32>} : memref<16x256xf32, #tpu.memory_space<vmem>>, vector<16x256xf32>,
    %c0_116 = arith.constant 0 : index
    %c0_117 = arith.constant 0 : index
    %443 = vector.load %arg9[%c0_116, %c0_117] : memref<64x256xf32, #tpu.memory_space<vmem>>, vector<64x256xf32>
    %cst_118 = arith.constant 0.000000e+00 : f32
    %444 = vector.broadcast %cst_118 : f32 to vector<2x64xf32>
    %cst_119 = arith.constant 0.000000e+00 : f32
    %445 = vector.broadcast %cst_119 : f32 to vector<2x32xf32>
    %c0_i32_120 = arith.constant 0 : i32
    %c7_i32_121 = arith.constant 7 : i32
    %446 = arith.subi %c7_i32_121, %c0_i32_120 : i32
    %cst_122 = arith.constant dense<0.000000e+00> : vector<2x256xf32>
    %447 = tpu.matmul %444, %443, %cst_122 {dimension_numbers = #tpu.dot_dimension_numbers<[1], [0], [0], [1], [0, 0, 1, 1], [], []>} : vector<2x64xf32>, vector<64x256xf32>, vector<2x256xf32> -> vector<2x256xf32>
    %c2_i32_123 = arith.constant 2 : i32
    %448 = arith.muli %c0_i32_120, %c2_i32_123 : i32
    %449 = arith.index_cast %448 : i32 to index
    %c0_124 = arith.constant 0 : index
    %450 = vector.load %arg27[%449, %c0_124] : memref<16x256xf32, #tpu.memory_space<vmem>>, vector<2x256xf32>
    %c2_i32_125 = arith.constant 2 : i32
    %451 = arith.muli %446, %c2_i32_125 : i32
    %452 = arith.index_cast %451 : i32 to index
    %c0_126 = arith.constant 0 : index
    %453 = vector.load %arg27[%452, %c0_126] : memref<16x256xf32, #tpu.memory_space<vmem>>, vector<2x256xf32>
    %454 = vector.extract_strided_slice %450 {offsets = [0, 0], sizes = [2, 128], strides = [1, 1]} : vector<2x256xf32> to vector<2x128xf32>
    %455 = vector.extract_strided_slice %447 {offsets = [0, 0], sizes = [2, 128], strides = [1, 1]} : vector<2x256xf32> to vector<2x128xf32>
    %456 = arith.addf %454, %455 : vector<2x128xf32>
    %457 = vector.extract_strided_slice %453 {offsets = [0, 128], sizes = [2, 128], strides = [1, 1]} : vector<2x256xf32> to vector<2x128xf32>
    %458 = vector.extract_strided_slice %447 {offsets = [0, 128], sizes = [2, 128], strides = [1, 1]} : vector<2x256xf32> to vector<2x128xf32>
    %459 = arith.addf %457, %458 : vector<2x128xf32>
    %460 = arith.negf %456 : vector<2x128xf32>
    %461 = math.exp %460 : vector<2x128xf32>
    %cst_127 = arith.constant 1.000000e+00 : f32
    %462 = vector.broadcast %cst_127 : f32 to vector<2x128xf32>
    %463 = arith.addf %462, %461 : vector<2x128xf32>
    %464 = arith.divf %462, %463 : vector<2x128xf32>
    %465 = math.tanh %456 : vector<2x128xf32>
    %466 = arith.negf %459 : vector<2x128xf32>
    %467 = math.exp %466 : vector<2x128xf32>
    %cst_128 = arith.constant 1.000000e+00 : f32
    %468 = vector.broadcast %cst_128 : f32 to vector<2x128xf32>
    %469 = arith.addf %468, %467 : vector<2x128xf32>
    %470 = arith.divf %468, %469 : vector<2x128xf32>
    %471 = math.tanh %459 : vector<2x128xf32>
    %472 = vector.extract_strided_slice %464 {offsets = [0, 32], sizes = [2, 32], strides = [1, 1]} : vector<2x128xf32> to vector<2x32xf32>
    %473 = arith.mulf %472, %445 : vector<2x32xf32>
    %474 = vector.extract_strided_slice %464 {offsets = [0, 0], sizes = [2, 32], strides = [1, 1]} : vector<2x128xf32> to vector<2x32xf32>
    %475 = vector.extract_strided_slice %465 {offsets = [0, 64], sizes = [2, 32], strides = [1, 1]} : vector<2x128xf32> to vector<2x32xf32>
    %476 = arith.mulf %474, %475 : vector<2x32xf32>
    %477 = arith.addf %473, %476 : vector<2x32xf32>
    %478 = vector.extract_strided_slice %470 {offsets = [0, 32], sizes = [2, 32], strides = [1, 1]} : vector<2x128xf32> to vector<2x32xf32>
    %479 = arith.mulf %478, %445 : vector<2x32xf32>
    %480 = vector.extract_strided_slice %470 {offsets = [0, 0], sizes = [2, 32], strides = [1, 1]} : vector<2x128xf32> to vector<2x32xf32>
    %481 = vector.extract_strided_slice %471 {offsets = [0, 64], sizes = [2, 32], strides = [1, 1]} : vector<2x128xf32> to vector<2x32xf32>
    %482 = arith.mulf %480, %481 : vector<2x32xf32>
    %483 = arith.addf %479, %482 : vector<2x32xf32>
    %484 = vector.extract_strided_slice %464 {offsets = [0, 96], sizes = [2, 32], strides = [1, 1]} : vector<2x128xf32> to vector<2x32xf32>
    %485 = math.tanh %477 : vector<2x32xf32>
    %486 = arith.mulf %484, %485 : vector<2x32xf32>
    %487 = vector.extract_strided_slice %470 {offsets = [0, 96], sizes = [2, 32], strides = [1, 1]} : vector<2x128xf32> to vector<2x32xf32>
    %488 = math.tanh %483 : vector<2x32xf32>
    %489 = arith.mulf %487, %488 : vector<2x32xf32>
    %490 = arith.index_cast %c0_i32_120 : i32 to index
    %c0_129 = arith.constant 0 : index
    %c0_130 = arith.constant 0 : index
    %491 = vector.load %arg28[%490, %c0_129, %c0_130] : memref<8x2x64xf32, #tpu.memory_space<vmem>>, vector<1x2x32xf32>
    %492 = vector.shape_cast %491 : vector<1x2x32xf32> to vector<2x32xf32>
    %493 = vector.shape_cast %486 : vector<2x32xf32> to vector<1x2x32xf32>
    tpu.vector_store %arg28[%490, %c0_129, %c0_130], %493 {strides = array<i32>} : memref<8x2x64xf32, #tpu.memory_space<vmem>>, vector<1x2x32xf32>,
    %494 = arith.index_cast %446 : i32 to index
    %c0_131 = arith.constant 0 : index
    %c32_132 = arith.constant 32 : index
    %495 = vector.load %arg28[%494, %c0_131, %c32_132] : memref<8x2x64xf32, #tpu.memory_space<vmem>>, vector<1x2x32xf32>
    %496 = vector.shape_cast %495 : vector<1x2x32xf32> to vector<2x32xf32>
    %497 = vector.shape_cast %489 : vector<2x32xf32> to vector<1x2x32xf32>
    tpu.vector_store %arg28[%494, %c0_131, %c32_132], %497 {strides = array<i32>} : memref<8x2x64xf32, #tpu.memory_space<vmem>>, vector<1x2x32xf32>,
    %498 = tpu.concatenate %486, %489 in 1 : vector<2x32xf32>, vector<2x32xf32> -> vector<2x64xf32>
    %c1_i32_133 = arith.constant 1 : i32
    %c7_i32_134 = arith.constant 7 : i32
    %499 = arith.subi %c7_i32_134, %c1_i32_133 : i32
    %cst_135 = arith.constant dense<0.000000e+00> : vector<2x256xf32>
    %500 = tpu.matmul %498, %443, %cst_135 {dimension_numbers = #tpu.dot_dimension_numbers<[1], [0], [0], [1], [0, 0, 1, 1], [], []>} : vector<2x64xf32>, vector<64x256xf32>, vector<2x256xf32> -> vector<2x256xf32>
    %c2_i32_136 = arith.constant 2 : i32
    %501 = arith.muli %c1_i32_133, %c2_i32_136 : i32
    %502 = arith.index_cast %501 : i32 to index
    %c0_137 = arith.constant 0 : index
    %503 = vector.load %arg27[%502, %c0_137] : memref<16x256xf32, #tpu.memory_space<vmem>>, vector<2x256xf32>
    %c2_i32_138 = arith.constant 2 : i32
    %504 = arith.muli %499, %c2_i32_138 : i32
    %505 = arith.index_cast %504 : i32 to index
    %c0_139 = arith.constant 0 : index
    %506 = vector.load %arg27[%505, %c0_139] : memref<16x256xf32, #tpu.memory_space<vmem>>, vector<2x256xf32>
    %507 = vector.extract_strided_slice %503 {offsets = [0, 0], sizes = [2, 128], strides = [1, 1]} : vector<2x256xf32> to vector<2x128xf32>
    %508 = vector.extract_strided_slice %500 {offsets = [0, 0], sizes = [2, 128], strides = [1, 1]} : vector<2x256xf32> to vector<2x128xf32>
    %509 = arith.addf %507, %508 : vector<2x128xf32>
    %510 = vector.extract_strided_slice %506 {offsets = [0, 128], sizes = [2, 128], strides = [1, 1]} : vector<2x256xf32> to vector<2x128xf32>
    %511 = vector.extract_strided_slice %500 {offsets = [0, 128], sizes = [2, 128], strides = [1, 1]} : vector<2x256xf32> to vector<2x128xf32>
    %512 = arith.addf %510, %511 : vector<2x128xf32>
    %513 = arith.negf %509 : vector<2x128xf32>
    %514 = math.exp %513 : vector<2x128xf32>
    %cst_140 = arith.constant 1.000000e+00 : f32
    %515 = vector.broadcast %cst_140 : f32 to vector<2x128xf32>
    %516 = arith.addf %515, %514 : vector<2x128xf32>
    %517 = arith.divf %515, %516 : vector<2x128xf32>
    %518 = math.tanh %509 : vector<2x128xf32>
    %519 = arith.negf %512 : vector<2x128xf32>
    %520 = math.exp %519 : vector<2x128xf32>
    %cst_141 = arith.constant 1.000000e+00 : f32
    %521 = vector.broadcast %cst_141 : f32 to vector<2x128xf32>
    %522 = arith.addf %521, %520 : vector<2x128xf32>
    %523 = arith.divf %521, %522 : vector<2x128xf32>
    %524 = math.tanh %512 : vector<2x128xf32>
    %525 = vector.extract_strided_slice %517 {offsets = [0, 32], sizes = [2, 32], strides = [1, 1]} : vector<2x128xf32> to vector<2x32xf32>
    %526 = arith.mulf %525, %477 : vector<2x32xf32>
    %527 = vector.extract_strided_slice %517 {offsets = [0, 0], sizes = [2, 32], strides = [1, 1]} : vector<2x128xf32> to vector<2x32xf32>
    %528 = vector.extract_strided_slice %518 {offsets = [0, 64], sizes = [2, 32], strides = [1, 1]} : vector<2x128xf32> to vector<2x32xf32>
    %529 = arith.mulf %527, %528 : vector<2x32xf32>
    %530 = arith.addf %526, %529 : vector<2x32xf32>
    %531 = vector.extract_strided_slice %523 {offsets = [0, 32], sizes = [2, 32], strides = [1, 1]} : vector<2x128xf32> to vector<2x32xf32>
    %532 = arith.mulf %531, %483 : vector<2x32xf32>
    %533 = vector.extract_strided_slice %523 {offsets = [0, 0], sizes = [2, 32], strides = [1, 1]} : vector<2x128xf32> to vector<2x32xf32>
    %534 = vector.extract_strided_slice %524 {offsets = [0, 64], sizes = [2, 32], strides = [1, 1]} : vector<2x128xf32> to vector<2x32xf32>
    %535 = arith.mulf %533, %534 : vector<2x32xf32>
    %536 = arith.addf %532, %535 : vector<2x32xf32>
    %537 = vector.extract_strided_slice %517 {offsets = [0, 96], sizes = [2, 32], strides = [1, 1]} : vector<2x128xf32> to vector<2x32xf32>
    %538 = math.tanh %530 : vector<2x32xf32>
    %539 = arith.mulf %537, %538 : vector<2x32xf32>
    %540 = vector.extract_strided_slice %523 {offsets = [0, 96], sizes = [2, 32], strides = [1, 1]} : vector<2x128xf32> to vector<2x32xf32>
    %541 = math.tanh %536 : vector<2x32xf32>
    %542 = arith.mulf %540, %541 : vector<2x32xf32>
    %543 = arith.index_cast %c1_i32_133 : i32 to index
    %c0_142 = arith.constant 0 : index
    %c0_143 = arith.constant 0 : index
    %544 = vector.load %arg28[%543, %c0_142, %c0_143] : memref<8x2x64xf32, #tpu.memory_space<vmem>>, vector<1x2x32xf32>
    %545 = vector.shape_cast %544 : vector<1x2x32xf32> to vector<2x32xf32>
    %546 = vector.shape_cast %539 : vector<2x32xf32> to vector<1x2x32xf32>
    tpu.vector_store %arg28[%543, %c0_142, %c0_143], %546 {strides = array<i32>} : memref<8x2x64xf32, #tpu.memory_space<vmem>>, vector<1x2x32xf32>,
    %547 = arith.index_cast %499 : i32 to index
    %c0_144 = arith.constant 0 : index
    %c32_145 = arith.constant 32 : index
    %548 = vector.load %arg28[%547, %c0_144, %c32_145] : memref<8x2x64xf32, #tpu.memory_space<vmem>>, vector<1x2x32xf32>
    %549 = vector.shape_cast %548 : vector<1x2x32xf32> to vector<2x32xf32>
    %550 = vector.shape_cast %542 : vector<2x32xf32> to vector<1x2x32xf32>
    tpu.vector_store %arg28[%547, %c0_144, %c32_145], %550 {strides = array<i32>} : memref<8x2x64xf32, #tpu.memory_space<vmem>>, vector<1x2x32xf32>,
    %551 = tpu.concatenate %539, %542 in 1 : vector<2x32xf32>, vector<2x32xf32> -> vector<2x64xf32>
    %c2_i32_146 = arith.constant 2 : i32
    %c7_i32_147 = arith.constant 7 : i32
    %552 = arith.subi %c7_i32_147, %c2_i32_146 : i32
    %cst_148 = arith.constant dense<0.000000e+00> : vector<2x256xf32>
    %553 = tpu.matmul %551, %443, %cst_148 {dimension_numbers = #tpu.dot_dimension_numbers<[1], [0], [0], [1], [0, 0, 1, 1], [], []>} : vector<2x64xf32>, vector<64x256xf32>, vector<2x256xf32> -> vector<2x256xf32>
    %c2_i32_149 = arith.constant 2 : i32
    %554 = arith.muli %c2_i32_146, %c2_i32_149 : i32
    %555 = arith.index_cast %554 : i32 to index
    %c0_150 = arith.constant 0 : index
    %556 = vector.load %arg27[%555, %c0_150] : memref<16x256xf32, #tpu.memory_space<vmem>>, vector<2x256xf32>
    %c2_i32_151 = arith.constant 2 : i32
    %557 = arith.muli %552, %c2_i32_151 : i32
    %558 = arith.index_cast %557 : i32 to index
    %c0_152 = arith.constant 0 : index
    %559 = vector.load %arg27[%558, %c0_152] : memref<16x256xf32, #tpu.memory_space<vmem>>, vector<2x256xf32>
    %560 = vector.extract_strided_slice %556 {offsets = [0, 0], sizes = [2, 128], strides = [1, 1]} : vector<2x256xf32> to vector<2x128xf32>
    %561 = vector.extract_strided_slice %553 {offsets = [0, 0], sizes = [2, 128], strides = [1, 1]} : vector<2x256xf32> to vector<2x128xf32>
    %562 = arith.addf %560, %561 : vector<2x128xf32>
    %563 = vector.extract_strided_slice %559 {offsets = [0, 128], sizes = [2, 128], strides = [1, 1]} : vector<2x256xf32> to vector<2x128xf32>
    %564 = vector.extract_strided_slice %553 {offsets = [0, 128], sizes = [2, 128], strides = [1, 1]} : vector<2x256xf32> to vector<2x128xf32>
    %565 = arith.addf %563, %564 : vector<2x128xf32>
    %566 = arith.negf %562 : vector<2x128xf32>
    %567 = math.exp %566 : vector<2x128xf32>
    %cst_153 = arith.constant 1.000000e+00 : f32
    %568 = vector.broadcast %cst_153 : f32 to vector<2x128xf32>
    %569 = arith.addf %568, %567 : vector<2x128xf32>
    %570 = arith.divf %568, %569 : vector<2x128xf32>
    %571 = math.tanh %562 : vector<2x128xf32>
    %572 = arith.negf %565 : vector<2x128xf32>
    %573 = math.exp %572 : vector<2x128xf32>
    %cst_154 = arith.constant 1.000000e+00 : f32
    %574 = vector.broadcast %cst_154 : f32 to vector<2x128xf32>
    %575 = arith.addf %574, %573 : vector<2x128xf32>
    %576 = arith.divf %574, %575 : vector<2x128xf32>
    %577 = math.tanh %565 : vector<2x128xf32>
    %578 = vector.extract_strided_slice %570 {offsets = [0, 32], sizes = [2, 32], strides = [1, 1]} : vector<2x128xf32> to vector<2x32xf32>
    %579 = arith.mulf %578, %530 : vector<2x32xf32>
    %580 = vector.extract_strided_slice %570 {offsets = [0, 0], sizes = [2, 32], strides = [1, 1]} : vector<2x128xf32> to vector<2x32xf32>
    %581 = vector.extract_strided_slice %571 {offsets = [0, 64], sizes = [2, 32], strides = [1, 1]} : vector<2x128xf32> to vector<2x32xf32>
    %582 = arith.mulf %580, %581 : vector<2x32xf32>
    %583 = arith.addf %579, %582 : vector<2x32xf32>
    %584 = vector.extract_strided_slice %576 {offsets = [0, 32], sizes = [2, 32], strides = [1, 1]} : vector<2x128xf32> to vector<2x32xf32>
    %585 = arith.mulf %584, %536 : vector<2x32xf32>
    %586 = vector.extract_strided_slice %576 {offsets = [0, 0], sizes = [2, 32], strides = [1, 1]} : vector<2x128xf32> to vector<2x32xf32>
    %587 = vector.extract_strided_slice %577 {offsets = [0, 64], sizes = [2, 32], strides = [1, 1]} : vector<2x128xf32> to vector<2x32xf32>
    %588 = arith.mulf %586, %587 : vector<2x32xf32>
    %589 = arith.addf %585, %588 : vector<2x32xf32>
    %590 = vector.extract_strided_slice %570 {offsets = [0, 96], sizes = [2, 32], strides = [1, 1]} : vector<2x128xf32> to vector<2x32xf32>
    %591 = math.tanh %583 : vector<2x32xf32>
    %592 = arith.mulf %590, %591 : vector<2x32xf32>
    %593 = vector.extract_strided_slice %576 {offsets = [0, 96], sizes = [2, 32], strides = [1, 1]} : vector<2x128xf32> to vector<2x32xf32>
    %594 = math.tanh %589 : vector<2x32xf32>
    %595 = arith.mulf %593, %594 : vector<2x32xf32>
    %596 = arith.index_cast %c2_i32_146 : i32 to index
    %c0_155 = arith.constant 0 : index
    %c0_156 = arith.constant 0 : index
    %597 = vector.load %arg28[%596, %c0_155, %c0_156] : memref<8x2x64xf32, #tpu.memory_space<vmem>>, vector<1x2x32xf32>
    %598 = vector.shape_cast %597 : vector<1x2x32xf32> to vector<2x32xf32>
    %599 = vector.shape_cast %592 : vector<2x32xf32> to vector<1x2x32xf32>
    tpu.vector_store %arg28[%596, %c0_155, %c0_156], %599 {strides = array<i32>} : memref<8x2x64xf32, #tpu.memory_space<vmem>>, vector<1x2x32xf32>,
    %600 = arith.index_cast %552 : i32 to index
    %c0_157 = arith.constant 0 : index
    %c32_158 = arith.constant 32 : index
    %601 = vector.load %arg28[%600, %c0_157, %c32_158] : memref<8x2x64xf32, #tpu.memory_space<vmem>>, vector<1x2x32xf32>
    %602 = vector.shape_cast %601 : vector<1x2x32xf32> to vector<2x32xf32>
    %603 = vector.shape_cast %595 : vector<2x32xf32> to vector<1x2x32xf32>
    tpu.vector_store %arg28[%600, %c0_157, %c32_158], %603 {strides = array<i32>} : memref<8x2x64xf32, #tpu.memory_space<vmem>>, vector<1x2x32xf32>,
    %604 = tpu.concatenate %592, %595 in 1 : vector<2x32xf32>, vector<2x32xf32> -> vector<2x64xf32>
    %c3_i32_159 = arith.constant 3 : i32
    %c7_i32_160 = arith.constant 7 : i32
    %605 = arith.subi %c7_i32_160, %c3_i32_159 : i32
    %cst_161 = arith.constant dense<0.000000e+00> : vector<2x256xf32>
    %606 = tpu.matmul %604, %443, %cst_161 {dimension_numbers = #tpu.dot_dimension_numbers<[1], [0], [0], [1], [0, 0, 1, 1], [], []>} : vector<2x64xf32>, vector<64x256xf32>, vector<2x256xf32> -> vector<2x256xf32>
    %c2_i32_162 = arith.constant 2 : i32
    %607 = arith.muli %c3_i32_159, %c2_i32_162 : i32
    %608 = arith.index_cast %607 : i32 to index
    %c0_163 = arith.constant 0 : index
    %609 = vector.load %arg27[%608, %c0_163] : memref<16x256xf32, #tpu.memory_space<vmem>>, vector<2x256xf32>
    %c2_i32_164 = arith.constant 2 : i32
    %610 = arith.muli %605, %c2_i32_164 : i32
    %611 = arith.index_cast %610 : i32 to index
    %c0_165 = arith.constant 0 : index
    %612 = vector.load %arg27[%611, %c0_165] : memref<16x256xf32, #tpu.memory_space<vmem>>, vector<2x256xf32>
    %613 = vector.extract_strided_slice %609 {offsets = [0, 0], sizes = [2, 128], strides = [1, 1]} : vector<2x256xf32> to vector<2x128xf32>
    %614 = vector.extract_strided_slice %606 {offsets = [0, 0], sizes = [2, 128], strides = [1, 1]} : vector<2x256xf32> to vector<2x128xf32>
    %615 = arith.addf %613, %614 : vector<2x128xf32>
    %616 = vector.extract_strided_slice %612 {offsets = [0, 128], sizes = [2, 128], strides = [1, 1]} : vector<2x256xf32> to vector<2x128xf32>
    %617 = vector.extract_strided_slice %606 {offsets = [0, 128], sizes = [2, 128], strides = [1, 1]} : vector<2x256xf32> to vector<2x128xf32>
    %618 = arith.addf %616, %617 : vector<2x128xf32>
    %619 = arith.negf %615 : vector<2x128xf32>
    %620 = math.exp %619 : vector<2x128xf32>
    %cst_166 = arith.constant 1.000000e+00 : f32
    %621 = vector.broadcast %cst_166 : f32 to vector<2x128xf32>
    %622 = arith.addf %621, %620 : vector<2x128xf32>
    %623 = arith.divf %621, %622 : vector<2x128xf32>
    %624 = math.tanh %615 : vector<2x128xf32>
    %625 = arith.negf %618 : vector<2x128xf32>
    %626 = math.exp %625 : vector<2x128xf32>
    %cst_167 = arith.constant 1.000000e+00 : f32
    %627 = vector.broadcast %cst_167 : f32 to vector<2x128xf32>
    %628 = arith.addf %627, %626 : vector<2x128xf32>
    %629 = arith.divf %627, %628 : vector<2x128xf32>
    %630 = math.tanh %618 : vector<2x128xf32>
    %631 = vector.extract_strided_slice %623 {offsets = [0, 32], sizes = [2, 32], strides = [1, 1]} : vector<2x128xf32> to vector<2x32xf32>
    %632 = arith.mulf %631, %583 : vector<2x32xf32>
    %633 = vector.extract_strided_slice %623 {offsets = [0, 0], sizes = [2, 32], strides = [1, 1]} : vector<2x128xf32> to vector<2x32xf32>
    %634 = vector.extract_strided_slice %624 {offsets = [0, 64], sizes = [2, 32], strides = [1, 1]} : vector<2x128xf32> to vector<2x32xf32>
    %635 = arith.mulf %633, %634 : vector<2x32xf32>
    %636 = arith.addf %632, %635 : vector<2x32xf32>
    %637 = vector.extract_strided_slice %629 {offsets = [0, 32], sizes = [2, 32], strides = [1, 1]} : vector<2x128xf32> to vector<2x32xf32>
    %638 = arith.mulf %637, %589 : vector<2x32xf32>
    %639 = vector.extract_strided_slice %629 {offsets = [0, 0], sizes = [2, 32], strides = [1, 1]} : vector<2x128xf32> to vector<2x32xf32>
    %640 = vector.extract_strided_slice %630 {offsets = [0, 64], sizes = [2, 32], strides = [1, 1]} : vector<2x128xf32> to vector<2x32xf32>
    %641 = arith.mulf %639, %640 : vector<2x32xf32>
    %642 = arith.addf %638, %641 : vector<2x32xf32>
    %643 = vector.extract_strided_slice %623 {offsets = [0, 96], sizes = [2, 32], strides = [1, 1]} : vector<2x128xf32> to vector<2x32xf32>
    %644 = math.tanh %636 : vector<2x32xf32>
    %645 = arith.mulf %643, %644 : vector<2x32xf32>
    %646 = vector.extract_strided_slice %629 {offsets = [0, 96], sizes = [2, 32], strides = [1, 1]} : vector<2x128xf32> to vector<2x32xf32>
    %647 = math.tanh %642 : vector<2x32xf32>
    %648 = arith.mulf %646, %647 : vector<2x32xf32>
    %649 = arith.index_cast %c3_i32_159 : i32 to index
    %c0_168 = arith.constant 0 : index
    %c0_169 = arith.constant 0 : index
    %650 = vector.load %arg28[%649, %c0_168, %c0_169] : memref<8x2x64xf32, #tpu.memory_space<vmem>>, vector<1x2x32xf32>
    %651 = vector.shape_cast %650 : vector<1x2x32xf32> to vector<2x32xf32>
    %652 = vector.shape_cast %645 : vector<2x32xf32> to vector<1x2x32xf32>
    tpu.vector_store %arg28[%649, %c0_168, %c0_169], %652 {strides = array<i32>} : memref<8x2x64xf32, #tpu.memory_space<vmem>>, vector<1x2x32xf32>,
    %653 = arith.index_cast %605 : i32 to index
    %c0_170 = arith.constant 0 : index
    %c32_171 = arith.constant 32 : index
    %654 = vector.load %arg28[%653, %c0_170, %c32_171] : memref<8x2x64xf32, #tpu.memory_space<vmem>>, vector<1x2x32xf32>
    %655 = vector.shape_cast %654 : vector<1x2x32xf32> to vector<2x32xf32>
    %656 = vector.shape_cast %648 : vector<2x32xf32> to vector<1x2x32xf32>
    tpu.vector_store %arg28[%653, %c0_170, %c32_171], %656 {strides = array<i32>} : memref<8x2x64xf32, #tpu.memory_space<vmem>>, vector<1x2x32xf32>,
    %657 = tpu.concatenate %645, %648 in 1 : vector<2x32xf32>, vector<2x32xf32> -> vector<2x64xf32>
    %c4_i32_172 = arith.constant 4 : i32
    %c7_i32_173 = arith.constant 7 : i32
    %658 = arith.subi %c7_i32_173, %c4_i32_172 : i32
    %cst_174 = arith.constant dense<0.000000e+00> : vector<2x256xf32>
    %659 = tpu.matmul %657, %443, %cst_174 {dimension_numbers = #tpu.dot_dimension_numbers<[1], [0], [0], [1], [0, 0, 1, 1], [], []>} : vector<2x64xf32>, vector<64x256xf32>, vector<2x256xf32> -> vector<2x256xf32>
    %c2_i32_175 = arith.constant 2 : i32
    %660 = arith.muli %c4_i32_172, %c2_i32_175 : i32
    %661 = arith.index_cast %660 : i32 to index
    %c0_176 = arith.constant 0 : index
    %662 = vector.load %arg27[%661, %c0_176] : memref<16x256xf32, #tpu.memory_space<vmem>>, vector<2x256xf32>
    %c2_i32_177 = arith.constant 2 : i32
    %663 = arith.muli %658, %c2_i32_177 : i32
    %664 = arith.index_cast %663 : i32 to index
    %c0_178 = arith.constant 0 : index
    %665 = vector.load %arg27[%664, %c0_178] : memref<16x256xf32, #tpu.memory_space<vmem>>, vector<2x256xf32>
    %666 = vector.extract_strided_slice %662 {offsets = [0, 0], sizes = [2, 128], strides = [1, 1]} : vector<2x256xf32> to vector<2x128xf32>
    %667 = vector.extract_strided_slice %659 {offsets = [0, 0], sizes = [2, 128], strides = [1, 1]} : vector<2x256xf32> to vector<2x128xf32>
    %668 = arith.addf %666, %667 : vector<2x128xf32>
    %669 = vector.extract_strided_slice %665 {offsets = [0, 128], sizes = [2, 128], strides = [1, 1]} : vector<2x256xf32> to vector<2x128xf32>
    %670 = vector.extract_strided_slice %659 {offsets = [0, 128], sizes = [2, 128], strides = [1, 1]} : vector<2x256xf32> to vector<2x128xf32>
    %671 = arith.addf %669, %670 : vector<2x128xf32>
    %672 = arith.negf %668 : vector<2x128xf32>
    %673 = math.exp %672 : vector<2x128xf32>
    %cst_179 = arith.constant 1.000000e+00 : f32
    %674 = vector.broadcast %cst_179 : f32 to vector<2x128xf32>
    %675 = arith.addf %674, %673 : vector<2x128xf32>
    %676 = arith.divf %674, %675 : vector<2x128xf32>
    %677 = math.tanh %668 : vector<2x128xf32>
    %678 = arith.negf %671 : vector<2x128xf32>
    %679 = math.exp %678 : vector<2x128xf32>
    %cst_180 = arith.constant 1.000000e+00 : f32
    %680 = vector.broadcast %cst_180 : f32 to vector<2x128xf32>
    %681 = arith.addf %680, %679 : vector<2x128xf32>
    %682 = arith.divf %680, %681 : vector<2x128xf32>
    %683 = math.tanh %671 : vector<2x128xf32>
    %684 = vector.extract_strided_slice %676 {offsets = [0, 32], sizes = [2, 32], strides = [1, 1]} : vector<2x128xf32> to vector<2x32xf32>
    %685 = arith.mulf %684, %636 : vector<2x32xf32>
    %686 = vector.extract_strided_slice %676 {offsets = [0, 0], sizes = [2, 32], strides = [1, 1]} : vector<2x128xf32> to vector<2x32xf32>
    %687 = vector.extract_strided_slice %677 {offsets = [0, 64], sizes = [2, 32], strides = [1, 1]} : vector<2x128xf32> to vector<2x32xf32>
    %688 = arith.mulf %686, %687 : vector<2x32xf32>
    %689 = arith.addf %685, %688 : vector<2x32xf32>
    %690 = vector.extract_strided_slice %682 {offsets = [0, 32], sizes = [2, 32], strides = [1, 1]} : vector<2x128xf32> to vector<2x32xf32>
    %691 = arith.mulf %690, %642 : vector<2x32xf32>
    %692 = vector.extract_strided_slice %682 {offsets = [0, 0], sizes = [2, 32], strides = [1, 1]} : vector<2x128xf32> to vector<2x32xf32>
    %693 = vector.extract_strided_slice %683 {offsets = [0, 64], sizes = [2, 32], strides = [1, 1]} : vector<2x128xf32> to vector<2x32xf32>
    %694 = arith.mulf %692, %693 : vector<2x32xf32>
    %695 = arith.addf %691, %694 : vector<2x32xf32>
    %696 = vector.extract_strided_slice %676 {offsets = [0, 96], sizes = [2, 32], strides = [1, 1]} : vector<2x128xf32> to vector<2x32xf32>
    %697 = math.tanh %689 : vector<2x32xf32>
    %698 = arith.mulf %696, %697 : vector<2x32xf32>
    %699 = vector.extract_strided_slice %682 {offsets = [0, 96], sizes = [2, 32], strides = [1, 1]} : vector<2x128xf32> to vector<2x32xf32>
    %700 = math.tanh %695 : vector<2x32xf32>
    %701 = arith.mulf %699, %700 : vector<2x32xf32>
    %702 = arith.index_cast %c4_i32_172 : i32 to index
    %c0_181 = arith.constant 0 : index
    %c0_182 = arith.constant 0 : index
    %703 = vector.load %arg28[%702, %c0_181, %c0_182] : memref<8x2x64xf32, #tpu.memory_space<vmem>>, vector<1x2x32xf32>
    %704 = vector.shape_cast %703 : vector<1x2x32xf32> to vector<2x32xf32>
    %705 = vector.shape_cast %698 : vector<2x32xf32> to vector<1x2x32xf32>
    tpu.vector_store %arg28[%702, %c0_181, %c0_182], %705 {strides = array<i32>} : memref<8x2x64xf32, #tpu.memory_space<vmem>>, vector<1x2x32xf32>,
    %706 = arith.index_cast %658 : i32 to index
    %c0_183 = arith.constant 0 : index
    %c32_184 = arith.constant 32 : index
    %707 = vector.load %arg28[%706, %c0_183, %c32_184] : memref<8x2x64xf32, #tpu.memory_space<vmem>>, vector<1x2x32xf32>
    %708 = vector.shape_cast %707 : vector<1x2x32xf32> to vector<2x32xf32>
    %709 = vector.shape_cast %701 : vector<2x32xf32> to vector<1x2x32xf32>
    tpu.vector_store %arg28[%706, %c0_183, %c32_184], %709 {strides = array<i32>} : memref<8x2x64xf32, #tpu.memory_space<vmem>>, vector<1x2x32xf32>,
    %710 = tpu.concatenate %698, %701 in 1 : vector<2x32xf32>, vector<2x32xf32> -> vector<2x64xf32>
    %c5_i32_185 = arith.constant 5 : i32
    %c7_i32_186 = arith.constant 7 : i32
    %711 = arith.subi %c7_i32_186, %c5_i32_185 : i32
    %cst_187 = arith.constant dense<0.000000e+00> : vector<2x256xf32>
    %712 = tpu.matmul %710, %443, %cst_187 {dimension_numbers = #tpu.dot_dimension_numbers<[1], [0], [0], [1], [0, 0, 1, 1], [], []>} : vector<2x64xf32>, vector<64x256xf32>, vector<2x256xf32> -> vector<2x256xf32>
    %c2_i32_188 = arith.constant 2 : i32
    %713 = arith.muli %c5_i32_185, %c2_i32_188 : i32
    %714 = arith.index_cast %713 : i32 to index
    %c0_189 = arith.constant 0 : index
    %715 = vector.load %arg27[%714, %c0_189] : memref<16x256xf32, #tpu.memory_space<vmem>>, vector<2x256xf32>
    %c2_i32_190 = arith.constant 2 : i32
    %716 = arith.muli %711, %c2_i32_190 : i32
    %717 = arith.index_cast %716 : i32 to index
    %c0_191 = arith.constant 0 : index
    %718 = vector.load %arg27[%717, %c0_191] : memref<16x256xf32, #tpu.memory_space<vmem>>, vector<2x256xf32>
    %719 = vector.extract_strided_slice %715 {offsets = [0, 0], sizes = [2, 128], strides = [1, 1]} : vector<2x256xf32> to vector<2x128xf32>
    %720 = vector.extract_strided_slice %712 {offsets = [0, 0], sizes = [2, 128], strides = [1, 1]} : vector<2x256xf32> to vector<2x128xf32>
    %721 = arith.addf %719, %720 : vector<2x128xf32>
    %722 = vector.extract_strided_slice %718 {offsets = [0, 128], sizes = [2, 128], strides = [1, 1]} : vector<2x256xf32> to vector<2x128xf32>
    %723 = vector.extract_strided_slice %712 {offsets = [0, 128], sizes = [2, 128], strides = [1, 1]} : vector<2x256xf32> to vector<2x128xf32>
    %724 = arith.addf %722, %723 : vector<2x128xf32>
    %725 = arith.negf %721 : vector<2x128xf32>
    %726 = math.exp %725 : vector<2x128xf32>
    %cst_192 = arith.constant 1.000000e+00 : f32
    %727 = vector.broadcast %cst_192 : f32 to vector<2x128xf32>
    %728 = arith.addf %727, %726 : vector<2x128xf32>
    %729 = arith.divf %727, %728 : vector<2x128xf32>
    %730 = math.tanh %721 : vector<2x128xf32>
    %731 = arith.negf %724 : vector<2x128xf32>
    %732 = math.exp %731 : vector<2x128xf32>
    %cst_193 = arith.constant 1.000000e+00 : f32
    %733 = vector.broadcast %cst_193 : f32 to vector<2x128xf32>
    %734 = arith.addf %733, %732 : vector<2x128xf32>
    %735 = arith.divf %733, %734 : vector<2x128xf32>
    %736 = math.tanh %724 : vector<2x128xf32>
    %737 = vector.extract_strided_slice %729 {offsets = [0, 32], sizes = [2, 32], strides = [1, 1]} : vector<2x128xf32> to vector<2x32xf32>
    %738 = arith.mulf %737, %689 : vector<2x32xf32>
    %739 = vector.extract_strided_slice %729 {offsets = [0, 0], sizes = [2, 32], strides = [1, 1]} : vector<2x128xf32> to vector<2x32xf32>
    %740 = vector.extract_strided_slice %730 {offsets = [0, 64], sizes = [2, 32], strides = [1, 1]} : vector<2x128xf32> to vector<2x32xf32>
    %741 = arith.mulf %739, %740 : vector<2x32xf32>
    %742 = arith.addf %738, %741 : vector<2x32xf32>
    %743 = vector.extract_strided_slice %735 {offsets = [0, 32], sizes = [2, 32], strides = [1, 1]} : vector<2x128xf32> to vector<2x32xf32>
    %744 = arith.mulf %743, %695 : vector<2x32xf32>
    %745 = vector.extract_strided_slice %735 {offsets = [0, 0], sizes = [2, 32], strides = [1, 1]} : vector<2x128xf32> to vector<2x32xf32>
    %746 = vector.extract_strided_slice %736 {offsets = [0, 64], sizes = [2, 32], strides = [1, 1]} : vector<2x128xf32> to vector<2x32xf32>
    %747 = arith.mulf %745, %746 : vector<2x32xf32>
    %748 = arith.addf %744, %747 : vector<2x32xf32>
    %749 = vector.extract_strided_slice %729 {offsets = [0, 96], sizes = [2, 32], strides = [1, 1]} : vector<2x128xf32> to vector<2x32xf32>
    %750 = math.tanh %742 : vector<2x32xf32>
    %751 = arith.mulf %749, %750 : vector<2x32xf32>
    %752 = vector.extract_strided_slice %735 {offsets = [0, 96], sizes = [2, 32], strides = [1, 1]} : vector<2x128xf32> to vector<2x32xf32>
    %753 = math.tanh %748 : vector<2x32xf32>
    %754 = arith.mulf %752, %753 : vector<2x32xf32>
    %755 = arith.index_cast %c5_i32_185 : i32 to index
    %c0_194 = arith.constant 0 : index
    %c0_195 = arith.constant 0 : index
    %756 = vector.load %arg28[%755, %c0_194, %c0_195] : memref<8x2x64xf32, #tpu.memory_space<vmem>>, vector<1x2x32xf32>
    %757 = vector.shape_cast %756 : vector<1x2x32xf32> to vector<2x32xf32>
    %758 = vector.shape_cast %751 : vector<2x32xf32> to vector<1x2x32xf32>
    tpu.vector_store %arg28[%755, %c0_194, %c0_195], %758 {strides = array<i32>} : memref<8x2x64xf32, #tpu.memory_space<vmem>>, vector<1x2x32xf32>,
    %759 = arith.index_cast %711 : i32 to index
    %c0_196 = arith.constant 0 : index
    %c32_197 = arith.constant 32 : index
    %760 = vector.load %arg28[%759, %c0_196, %c32_197] : memref<8x2x64xf32, #tpu.memory_space<vmem>>, vector<1x2x32xf32>
    %761 = vector.shape_cast %760 : vector<1x2x32xf32> to vector<2x32xf32>
    %762 = vector.shape_cast %754 : vector<2x32xf32> to vector<1x2x32xf32>
    tpu.vector_store %arg28[%759, %c0_196, %c32_197], %762 {strides = array<i32>} : memref<8x2x64xf32, #tpu.memory_space<vmem>>, vector<1x2x32xf32>,
    %763 = tpu.concatenate %751, %754 in 1 : vector<2x32xf32>, vector<2x32xf32> -> vector<2x64xf32>
    %c6_i32_198 = arith.constant 6 : i32
    %c7_i32_199 = arith.constant 7 : i32
    %764 = arith.subi %c7_i32_199, %c6_i32_198 : i32
    %cst_200 = arith.constant dense<0.000000e+00> : vector<2x256xf32>
    %765 = tpu.matmul %763, %443, %cst_200 {dimension_numbers = #tpu.dot_dimension_numbers<[1], [0], [0], [1], [0, 0, 1, 1], [], []>} : vector<2x64xf32>, vector<64x256xf32>, vector<2x256xf32> -> vector<2x256xf32>
    %c2_i32_201 = arith.constant 2 : i32
    %766 = arith.muli %c6_i32_198, %c2_i32_201 : i32
    %767 = arith.index_cast %766 : i32 to index
    %c0_202 = arith.constant 0 : index
    %768 = vector.load %arg27[%767, %c0_202] : memref<16x256xf32, #tpu.memory_space<vmem>>, vector<2x256xf32>
    %c2_i32_203 = arith.constant 2 : i32
    %769 = arith.muli %764, %c2_i32_203 : i32
    %770 = arith.index_cast %769 : i32 to index
    %c0_204 = arith.constant 0 : index
    %771 = vector.load %arg27[%770, %c0_204] : memref<16x256xf32, #tpu.memory_space<vmem>>, vector<2x256xf32>
    %772 = vector.extract_strided_slice %768 {offsets = [0, 0], sizes = [2, 128], strides = [1, 1]} : vector<2x256xf32> to vector<2x128xf32>
    %773 = vector.extract_strided_slice %765 {offsets = [0, 0], sizes = [2, 128], strides = [1, 1]} : vector<2x256xf32> to vector<2x128xf32>
    %774 = arith.addf %772, %773 : vector<2x128xf32>
    %775 = vector.extract_strided_slice %771 {offsets = [0, 128], sizes = [2, 128], strides = [1, 1]} : vector<2x256xf32> to vector<2x128xf32>
    %776 = vector.extract_strided_slice %765 {offsets = [0, 128], sizes = [2, 128], strides = [1, 1]} : vector<2x256xf32> to vector<2x128xf32>
    %777 = arith.addf %775, %776 : vector<2x128xf32>
    %778 = arith.negf %774 : vector<2x128xf32>
    %779 = math.exp %778 : vector<2x128xf32>
    %cst_205 = arith.constant 1.000000e+00 : f32
    %780 = vector.broadcast %cst_205 : f32 to vector<2x128xf32>
    %781 = arith.addf %780, %779 : vector<2x128xf32>
    %782 = arith.divf %780, %781 : vector<2x128xf32>
    %783 = math.tanh %774 : vector<2x128xf32>
    %784 = arith.negf %777 : vector<2x128xf32>
    %785 = math.exp %784 : vector<2x128xf32>
    %cst_206 = arith.constant 1.000000e+00 : f32
    %786 = vector.broadcast %cst_206 : f32 to vector<2x128xf32>
    %787 = arith.addf %786, %785 : vector<2x128xf32>
    %788 = arith.divf %786, %787 : vector<2x128xf32>
    %789 = math.tanh %777 : vector<2x128xf32>
    %790 = vector.extract_strided_slice %782 {offsets = [0, 32], sizes = [2, 32], strides = [1, 1]} : vector<2x128xf32> to vector<2x32xf32>
    %791 = arith.mulf %790, %742 : vector<2x32xf32>
    %792 = vector.extract_strided_slice %782 {offsets = [0, 0], sizes = [2, 32], strides = [1, 1]} : vector<2x128xf32> to vector<2x32xf32>
    %793 = vector.extract_strided_slice %783 {offsets = [0, 64], sizes = [2, 32], strides = [1, 1]} : vector<2x128xf32> to vector<2x32xf32>
    %794 = arith.mulf %792, %793 : vector<2x32xf32>
    %795 = arith.addf %791, %794 : vector<2x32xf32>
    %796 = vector.extract_strided_slice %788 {offsets = [0, 32], sizes = [2, 32], strides = [1, 1]} : vector<2x128xf32> to vector<2x32xf32>
    %797 = arith.mulf %796, %748 : vector<2x32xf32>
    %798 = vector.extract_strided_slice %788 {offsets = [0, 0], sizes = [2, 32], strides = [1, 1]} : vector<2x128xf32> to vector<2x32xf32>
    %799 = vector.extract_strided_slice %789 {offsets = [0, 64], sizes = [2, 32], strides = [1, 1]} : vector<2x128xf32> to vector<2x32xf32>
    %800 = arith.mulf %798, %799 : vector<2x32xf32>
    %801 = arith.addf %797, %800 : vector<2x32xf32>
    %802 = vector.extract_strided_slice %782 {offsets = [0, 96], sizes = [2, 32], strides = [1, 1]} : vector<2x128xf32> to vector<2x32xf32>
    %803 = math.tanh %795 : vector<2x32xf32>
    %804 = arith.mulf %802, %803 : vector<2x32xf32>
    %805 = vector.extract_strided_slice %788 {offsets = [0, 96], sizes = [2, 32], strides = [1, 1]} : vector<2x128xf32> to vector<2x32xf32>
    %806 = math.tanh %801 : vector<2x32xf32>
    %807 = arith.mulf %805, %806 : vector<2x32xf32>
    %808 = arith.index_cast %c6_i32_198 : i32 to index
    %c0_207 = arith.constant 0 : index
    %c0_208 = arith.constant 0 : index
    %809 = vector.load %arg28[%808, %c0_207, %c0_208] : memref<8x2x64xf32, #tpu.memory_space<vmem>>, vector<1x2x32xf32>
    %810 = vector.shape_cast %809 : vector<1x2x32xf32> to vector<2x32xf32>
    %811 = vector.shape_cast %804 : vector<2x32xf32> to vector<1x2x32xf32>
    tpu.vector_store %arg28[%808, %c0_207, %c0_208], %811 {strides = array<i32>} : memref<8x2x64xf32, #tpu.memory_space<vmem>>, vector<1x2x32xf32>,
    %812 = arith.index_cast %764 : i32 to index
    %c0_209 = arith.constant 0 : index
    %c32_210 = arith.constant 32 : index
    %813 = vector.load %arg28[%812, %c0_209, %c32_210] : memref<8x2x64xf32, #tpu.memory_space<vmem>>, vector<1x2x32xf32>
    %814 = vector.shape_cast %813 : vector<1x2x32xf32> to vector<2x32xf32>
    %815 = vector.shape_cast %807 : vector<2x32xf32> to vector<1x2x32xf32>
    tpu.vector_store %arg28[%812, %c0_209, %c32_210], %815 {strides = array<i32>} : memref<8x2x64xf32, #tpu.memory_space<vmem>>, vector<1x2x32xf32>,
    %816 = tpu.concatenate %804, %807 in 1 : vector<2x32xf32>, vector<2x32xf32> -> vector<2x64xf32>
    %c7_i32_211 = arith.constant 7 : i32
    %c7_i32_212 = arith.constant 7 : i32
    %817 = arith.subi %c7_i32_212, %c7_i32_211 : i32
    %cst_213 = arith.constant dense<0.000000e+00> : vector<2x256xf32>
    %818 = tpu.matmul %816, %443, %cst_213 {dimension_numbers = #tpu.dot_dimension_numbers<[1], [0], [0], [1], [0, 0, 1, 1], [], []>} : vector<2x64xf32>, vector<64x256xf32>, vector<2x256xf32> -> vector<2x256xf32>
    %c2_i32_214 = arith.constant 2 : i32
    %819 = arith.muli %c7_i32_211, %c2_i32_214 : i32
    %820 = arith.index_cast %819 : i32 to index
    %c0_215 = arith.constant 0 : index
    %821 = vector.load %arg27[%820, %c0_215] : memref<16x256xf32, #tpu.memory_space<vmem>>, vector<2x256xf32>
    %c2_i32_216 = arith.constant 2 : i32
    %822 = arith.muli %817, %c2_i32_216 : i32
    %823 = arith.index_cast %822 : i32 to index
    %c0_217 = arith.constant 0 : index
    %824 = vector.load %arg27[%823, %c0_217] : memref<16x256xf32, #tpu.memory_space<vmem>>, vector<2x256xf32>
    %825 = vector.extract_strided_slice %821 {offsets = [0, 0], sizes = [2, 128], strides = [1, 1]} : vector<2x256xf32> to vector<2x128xf32>
    %826 = vector.extract_strided_slice %818 {offsets = [0, 0], sizes = [2, 128], strides = [1, 1]} : vector<2x256xf32> to vector<2x128xf32>
    %827 = arith.addf %825, %826 : vector<2x128xf32>
    %828 = vector.extract_strided_slice %824 {offsets = [0, 128], sizes = [2, 128], strides = [1, 1]} : vector<2x256xf32> to vector<2x128xf32>
    %829 = vector.extract_strided_slice %818 {offsets = [0, 128], sizes = [2, 128], strides = [1, 1]} : vector<2x256xf32> to vector<2x128xf32>
    %830 = arith.addf %828, %829 : vector<2x128xf32>
    %831 = arith.negf %827 : vector<2x128xf32>
    %832 = math.exp %831 : vector<2x128xf32>
    %cst_218 = arith.constant 1.000000e+00 : f32
    %833 = vector.broadcast %cst_218 : f32 to vector<2x128xf32>
    %834 = arith.addf %833, %832 : vector<2x128xf32>
    %835 = arith.divf %833, %834 : vector<2x128xf32>
    %836 = math.tanh %827 : vector<2x128xf32>
    %837 = arith.negf %830 : vector<2x128xf32>
    %838 = math.exp %837 : vector<2x128xf32>
    %cst_219 = arith.constant 1.000000e+00 : f32
    %839 = vector.broadcast %cst_219 : f32 to vector<2x128xf32>
    %840 = arith.addf %839, %838 : vector<2x128xf32>
    %841 = arith.divf %839, %840 : vector<2x128xf32>
    %842 = math.tanh %830 : vector<2x128xf32>
    %843 = vector.extract_strided_slice %835 {offsets = [0, 32], sizes = [2, 32], strides = [1, 1]} : vector<2x128xf32> to vector<2x32xf32>
    %844 = arith.mulf %843, %795 : vector<2x32xf32>
    %845 = vector.extract_strided_slice %835 {offsets = [0, 0], sizes = [2, 32], strides = [1, 1]} : vector<2x128xf32> to vector<2x32xf32>
    %846 = vector.extract_strided_slice %836 {offsets = [0, 64], sizes = [2, 32], strides = [1, 1]} : vector<2x128xf32> to vector<2x32xf32>
    %847 = arith.mulf %845, %846 : vector<2x32xf32>
    %848 = arith.addf %844, %847 : vector<2x32xf32>
    %849 = vector.extract_strided_slice %841 {offsets = [0, 32], sizes = [2, 32], strides = [1, 1]} : vector<2x128xf32> to vector<2x32xf32>
    %850 = arith.mulf %849, %801 : vector<2x32xf32>
    %851 = vector.extract_strided_slice %841 {offsets = [0, 0], sizes = [2, 32], strides = [1, 1]} : vector<2x128xf32> to vector<2x32xf32>
    %852 = vector.extract_strided_slice %842 {offsets = [0, 64], sizes = [2, 32], strides = [1, 1]} : vector<2x128xf32> to vector<2x32xf32>
    %853 = arith.mulf %851, %852 : vector<2x32xf32>
    %854 = arith.addf %850, %853 : vector<2x32xf32>
    %855 = vector.extract_strided_slice %835 {offsets = [0, 96], sizes = [2, 32], strides = [1, 1]} : vector<2x128xf32> to vector<2x32xf32>
    %856 = math.tanh %848 : vector<2x32xf32>
    %857 = arith.mulf %855, %856 : vector<2x32xf32>
    %858 = vector.extract_strided_slice %841 {offsets = [0, 96], sizes = [2, 32], strides = [1, 1]} : vector<2x128xf32> to vector<2x32xf32>
    %859 = math.tanh %854 : vector<2x32xf32>
    %860 = arith.mulf %858, %859 : vector<2x32xf32>
    %861 = arith.index_cast %c7_i32_211 : i32 to index
    %c0_220 = arith.constant 0 : index
    %c0_221 = arith.constant 0 : index
    %862 = vector.load %arg28[%861, %c0_220, %c0_221] : memref<8x2x64xf32, #tpu.memory_space<vmem>>, vector<1x2x32xf32>
    %863 = vector.shape_cast %862 : vector<1x2x32xf32> to vector<2x32xf32>
    %864 = vector.shape_cast %857 : vector<2x32xf32> to vector<1x2x32xf32>
    tpu.vector_store %arg28[%861, %c0_220, %c0_221], %864 {strides = array<i32>} : memref<8x2x64xf32, #tpu.memory_space<vmem>>, vector<1x2x32xf32>,
    %865 = arith.index_cast %817 : i32 to index
    %c0_222 = arith.constant 0 : index
    %c32_223 = arith.constant 32 : index
    %866 = vector.load %arg28[%865, %c0_222, %c32_223] : memref<8x2x64xf32, #tpu.memory_space<vmem>>, vector<1x2x32xf32>
    %867 = vector.shape_cast %866 : vector<1x2x32xf32> to vector<2x32xf32>
    %868 = vector.shape_cast %860 : vector<2x32xf32> to vector<1x2x32xf32>
    tpu.vector_store %arg28[%865, %c0_222, %c32_223], %868 {strides = array<i32>} : memref<8x2x64xf32, #tpu.memory_space<vmem>>, vector<1x2x32xf32>,
    %869 = tpu.concatenate %857, %860 in 1 : vector<2x32xf32>, vector<2x32xf32> -> vector<2x64xf32>
    %c8_i32_224 = arith.constant 8 : i32
    %c0_225 = arith.constant 0 : index
    %c0_226 = arith.constant 0 : index
    %c0_227 = arith.constant 0 : index
    %870 = vector.load %arg28[%c0_225, %c0_226, %c0_227] : memref<8x2x64xf32, #tpu.memory_space<vmem>>, vector<8x2x64xf32>
    %c0_228 = arith.constant 0 : index
    %c0_229 = arith.constant 0 : index
    %871 = vector.load %arg16[%c0_228, %c0_229] : memref<1x64xf32, #tpu.memory_space<vmem>>, vector<1x64xf32>
    %872 = vector.shape_cast %871 : vector<1x64xf32> to vector<1x1x64xf32>
    %873 = vector.broadcast %872 : vector<1x1x64xf32> to vector<8x2x64xf32>
    %874 = arith.mulf %870, %873 : vector<8x2x64xf32>
    %cst_230 = arith.constant dense<0.000000e+00> : vector<8x2xf32>
    %875 = vector.multi_reduction <add>, %874, %cst_230 [2] : vector<8x2x64xf32> to vector<8x2xf32>
    %c0_231 = arith.constant 0 : index
    %c0_232 = arith.constant 0 : index
    %876 = memref.load %arg17[%c0_231, %c0_232] : memref<1x1xf32, #tpu.memory_space<smem>>
    %877 = vector.broadcast %876 : f32 to vector<8x2xf32>
    %878 = arith.addf %875, %877 : vector<8x2xf32>
    %c0_233 = arith.constant 0 : index
    %c0_234 = arith.constant 0 : index
    %879 = vector.load %arg1[%c0_233, %c0_234] : memref<8x2xf32, #tpu.memory_space<vmem>>, vector<8x2xf32>
    %cst_235 = arith.constant 0.000000e+00 : f32
    %880 = vector.broadcast %cst_235 : f32 to vector<8x2xf32>
    %881 = arith.cmpf oeq, %879, %880 : vector<8x2xf32>
    %cst_236 = arith.constant -1.000000e+09 : f32
    %882 = vector.broadcast %cst_236 : f32 to vector<8x2xf32>
    %883 = arith.select %881, %882, %878 : vector<8x2xi1>, vector<8x2xf32>
    %cst_237 = arith.constant dense<0xFF800000> : vector<2xf32>
    %884 = vector.multi_reduction <maximumf>, %883, %cst_237 [0] : vector<8x2xf32> to vector<2xf32>
    %885 = vector.shape_cast %884 : vector<2xf32> to vector<1x2xf32>
    %886 = vector.broadcast %885 : vector<1x2xf32> to vector<8x2xf32>
    %887 = arith.subf %883, %886 : vector<8x2xf32>
    %888 = math.exp %887 : vector<8x2xf32>
    %cst_238 = arith.constant dense<0.000000e+00> : vector<2xf32>
    %889 = vector.multi_reduction <add>, %888, %cst_238 [0] : vector<8x2xf32> to vector<2xf32>
    %890 = vector.shape_cast %889 : vector<2xf32> to vector<1x2xf32>
    %891 = vector.broadcast %890 : vector<1x2xf32> to vector<8x2xf32>
    %892 = arith.divf %888, %891 : vector<8x2xf32>
    %c0_239 = arith.constant 0 : index
    %c0_240 = arith.constant 0 : index
    %893 = vector.load %arg25[%c0_239, %c0_240] : memref<8x2xf32, #tpu.memory_space<vmem>>, vector<8x2xf32>
    tpu.vector_store %arg25[%c0_239, %c0_240], %892 {strides = array<i32>} : memref<8x2xf32, #tpu.memory_space<vmem>>, vector<8x2xf32>,
    %894 = vector.shape_cast %892 : vector<8x2xf32> to vector<8x2x1xf32>
    %895 = vector.broadcast %894 : vector<8x2x1xf32> to vector<8x2x64xf32>
    %896 = arith.mulf %895, %870 : vector<8x2x64xf32>
    %cst_241 = arith.constant dense<0.000000e+00> : vector<2x64xf32>
    %897 = vector.multi_reduction <add>, %896, %cst_241 [0] : vector<8x2x64xf32> to vector<2x64xf32>
    %c0_242 = arith.constant 0 : index
    %c0_243 = arith.constant 0 : index
    %898 = vector.load %arg2[%c0_242, %c0_243] : memref<8x32xbf16, #tpu.memory_space<vmem>>, vector<8x32xbf16>
    %c0_244 = arith.constant 0 : index
    %c0_245 = arith.constant 0 : index
    %899 = vector.load %arg10[%c0_244, %c0_245] : memref<32x256xbf16, #tpu.memory_space<vmem>>, vector<32x256xbf16>
    %cst_246 = arith.constant dense<0.000000e+00> : vector<8x256xf32>
    %900 = tpu.matmul %898, %899, %cst_246 {dimension_numbers = #tpu.dot_dimension_numbers<[1], [0], [0], [1], [0, 0, 1, 1], [], []>} : vector<8x32xbf16>, vector<32x256xbf16>, vector<8x256xf32> -> vector<8x256xf32>
    %c0_247 = arith.constant 0 : index
    %c0_248 = arith.constant 0 : index
    %901 = vector.load %arg11[%c0_247, %c0_248] : memref<1x256xf32, #tpu.memory_space<vmem>>, vector<1x256xf32>
    %902 = vector.broadcast %901 : vector<1x256xf32> to vector<8x256xf32>
    %903 = arith.addf %900, %902 : vector<8x256xf32>
    %c0_249 = arith.constant 0 : index
    %c0_250 = arith.constant 0 : index
    %904 = vector.load %arg29[%c0_249, %c0_250] : memref<8x256xf32, #tpu.memory_space<vmem>>, vector<8x256xf32>
    tpu.vector_store %arg29[%c0_249, %c0_250], %903 {strides = array<i32>} : memref<8x256xf32, #tpu.memory_space<vmem>>, vector<8x256xf32>,
    %c0_251 = arith.constant 0 : index
    %c0_252 = arith.constant 0 : index
    %905 = vector.load %arg12[%c0_251, %c0_252] : memref<64x256xf32, #tpu.memory_space<vmem>>, vector<64x256xf32>
    %cst_253 = arith.constant 0.000000e+00 : f32
    %906 = vector.broadcast %cst_253 : f32 to vector<2x64xf32>
    %cst_254 = arith.constant 0.000000e+00 : f32
    %907 = vector.broadcast %cst_254 : f32 to vector<2x32xf32>
    %c0_i32_255 = arith.constant 0 : i32
    %c3_i32_256 = arith.constant 3 : i32
    %908 = arith.subi %c3_i32_256, %c0_i32_255 : i32
    %cst_257 = arith.constant dense<0.000000e+00> : vector<2x256xf32>
    %909 = tpu.matmul %906, %905, %cst_257 {dimension_numbers = #tpu.dot_dimension_numbers<[1], [0], [0], [1], [0, 0, 1, 1], [], []>} : vector<2x64xf32>, vector<64x256xf32>, vector<2x256xf32> -> vector<2x256xf32>
    %c2_i32_258 = arith.constant 2 : i32
    %910 = arith.muli %c0_i32_255, %c2_i32_258 : i32
    %911 = arith.index_cast %910 : i32 to index
    %c0_259 = arith.constant 0 : index
    %912 = vector.load %arg29[%911, %c0_259] : memref<8x256xf32, #tpu.memory_space<vmem>>, vector<2x256xf32>
    %c2_i32_260 = arith.constant 2 : i32
    %913 = arith.muli %908, %c2_i32_260 : i32
    %914 = arith.index_cast %913 : i32 to index
    %c0_261 = arith.constant 0 : index
    %915 = vector.load %arg29[%914, %c0_261] : memref<8x256xf32, #tpu.memory_space<vmem>>, vector<2x256xf32>
    %916 = vector.extract_strided_slice %912 {offsets = [0, 0], sizes = [2, 128], strides = [1, 1]} : vector<2x256xf32> to vector<2x128xf32>
    %917 = vector.extract_strided_slice %909 {offsets = [0, 0], sizes = [2, 128], strides = [1, 1]} : vector<2x256xf32> to vector<2x128xf32>
    %918 = arith.addf %916, %917 : vector<2x128xf32>
    %919 = vector.extract_strided_slice %915 {offsets = [0, 128], sizes = [2, 128], strides = [1, 1]} : vector<2x256xf32> to vector<2x128xf32>
    %920 = vector.extract_strided_slice %909 {offsets = [0, 128], sizes = [2, 128], strides = [1, 1]} : vector<2x256xf32> to vector<2x128xf32>
    %921 = arith.addf %919, %920 : vector<2x128xf32>
    %922 = arith.negf %918 : vector<2x128xf32>
    %923 = math.exp %922 : vector<2x128xf32>
    %cst_262 = arith.constant 1.000000e+00 : f32
    %924 = vector.broadcast %cst_262 : f32 to vector<2x128xf32>
    %925 = arith.addf %924, %923 : vector<2x128xf32>
    %926 = arith.divf %924, %925 : vector<2x128xf32>
    %927 = math.tanh %918 : vector<2x128xf32>
    %928 = arith.negf %921 : vector<2x128xf32>
    %929 = math.exp %928 : vector<2x128xf32>
    %cst_263 = arith.constant 1.000000e+00 : f32
    %930 = vector.broadcast %cst_263 : f32 to vector<2x128xf32>
    %931 = arith.addf %930, %929 : vector<2x128xf32>
    %932 = arith.divf %930, %931 : vector<2x128xf32>
    %933 = math.tanh %921 : vector<2x128xf32>
    %934 = vector.extract_strided_slice %926 {offsets = [0, 32], sizes = [2, 32], strides = [1, 1]} : vector<2x128xf32> to vector<2x32xf32>
    %935 = arith.mulf %934, %907 : vector<2x32xf32>
    %936 = vector.extract_strided_slice %926 {offsets = [0, 0], sizes = [2, 32], strides = [1, 1]} : vector<2x128xf32> to vector<2x32xf32>
    %937 = vector.extract_strided_slice %927 {offsets = [0, 64], sizes = [2, 32], strides = [1, 1]} : vector<2x128xf32> to vector<2x32xf32>
    %938 = arith.mulf %936, %937 : vector<2x32xf32>
    %939 = arith.addf %935, %938 : vector<2x32xf32>
    %940 = vector.extract_strided_slice %932 {offsets = [0, 32], sizes = [2, 32], strides = [1, 1]} : vector<2x128xf32> to vector<2x32xf32>
    %941 = arith.mulf %940, %907 : vector<2x32xf32>
    %942 = vector.extract_strided_slice %932 {offsets = [0, 0], sizes = [2, 32], strides = [1, 1]} : vector<2x128xf32> to vector<2x32xf32>
    %943 = vector.extract_strided_slice %933 {offsets = [0, 64], sizes = [2, 32], strides = [1, 1]} : vector<2x128xf32> to vector<2x32xf32>
    %944 = arith.mulf %942, %943 : vector<2x32xf32>
    %945 = arith.addf %941, %944 : vector<2x32xf32>
    %946 = vector.extract_strided_slice %926 {offsets = [0, 96], sizes = [2, 32], strides = [1, 1]} : vector<2x128xf32> to vector<2x32xf32>
    %947 = math.tanh %939 : vector<2x32xf32>
    %948 = arith.mulf %946, %947 : vector<2x32xf32>
    %949 = vector.extract_strided_slice %932 {offsets = [0, 96], sizes = [2, 32], strides = [1, 1]} : vector<2x128xf32> to vector<2x32xf32>
    %950 = math.tanh %945 : vector<2x32xf32>
    %951 = arith.mulf %949, %950 : vector<2x32xf32>
    %952 = arith.index_cast %c0_i32_255 : i32 to index
    %c0_264 = arith.constant 0 : index
    %c0_265 = arith.constant 0 : index
    %953 = vector.load %arg30[%952, %c0_264, %c0_265] : memref<4x2x64xf32, #tpu.memory_space<vmem>>, vector<1x2x32xf32>
    %954 = vector.shape_cast %953 : vector<1x2x32xf32> to vector<2x32xf32>
    %955 = vector.shape_cast %948 : vector<2x32xf32> to vector<1x2x32xf32>
    tpu.vector_store %arg30[%952, %c0_264, %c0_265], %955 {strides = array<i32>} : memref<4x2x64xf32, #tpu.memory_space<vmem>>, vector<1x2x32xf32>,
    %956 = arith.index_cast %908 : i32 to index
    %c0_266 = arith.constant 0 : index
    %c32_267 = arith.constant 32 : index
    %957 = vector.load %arg30[%956, %c0_266, %c32_267] : memref<4x2x64xf32, #tpu.memory_space<vmem>>, vector<1x2x32xf32>
    %958 = vector.shape_cast %957 : vector<1x2x32xf32> to vector<2x32xf32>
    %959 = vector.shape_cast %951 : vector<2x32xf32> to vector<1x2x32xf32>
    tpu.vector_store %arg30[%956, %c0_266, %c32_267], %959 {strides = array<i32>} : memref<4x2x64xf32, #tpu.memory_space<vmem>>, vector<1x2x32xf32>,
    %960 = tpu.concatenate %948, %951 in 1 : vector<2x32xf32>, vector<2x32xf32> -> vector<2x64xf32>
    %c1_i32_268 = arith.constant 1 : i32
    %c3_i32_269 = arith.constant 3 : i32
    %961 = arith.subi %c3_i32_269, %c1_i32_268 : i32
    %cst_270 = arith.constant dense<0.000000e+00> : vector<2x256xf32>
    %962 = tpu.matmul %960, %905, %cst_270 {dimension_numbers = #tpu.dot_dimension_numbers<[1], [0], [0], [1], [0, 0, 1, 1], [], []>} : vector<2x64xf32>, vector<64x256xf32>, vector<2x256xf32> -> vector<2x256xf32>
    %c2_i32_271 = arith.constant 2 : i32
    %963 = arith.muli %c1_i32_268, %c2_i32_271 : i32
    %964 = arith.index_cast %963 : i32 to index
    %c0_272 = arith.constant 0 : index
    %965 = vector.load %arg29[%964, %c0_272] : memref<8x256xf32, #tpu.memory_space<vmem>>, vector<2x256xf32>
    %c2_i32_273 = arith.constant 2 : i32
    %966 = arith.muli %961, %c2_i32_273 : i32
    %967 = arith.index_cast %966 : i32 to index
    %c0_274 = arith.constant 0 : index
    %968 = vector.load %arg29[%967, %c0_274] : memref<8x256xf32, #tpu.memory_space<vmem>>, vector<2x256xf32>
    %969 = vector.extract_strided_slice %965 {offsets = [0, 0], sizes = [2, 128], strides = [1, 1]} : vector<2x256xf32> to vector<2x128xf32>
    %970 = vector.extract_strided_slice %962 {offsets = [0, 0], sizes = [2, 128], strides = [1, 1]} : vector<2x256xf32> to vector<2x128xf32>
    %971 = arith.addf %969, %970 : vector<2x128xf32>
    %972 = vector.extract_strided_slice %968 {offsets = [0, 128], sizes = [2, 128], strides = [1, 1]} : vector<2x256xf32> to vector<2x128xf32>
    %973 = vector.extract_strided_slice %962 {offsets = [0, 128], sizes = [2, 128], strides = [1, 1]} : vector<2x256xf32> to vector<2x128xf32>
    %974 = arith.addf %972, %973 : vector<2x128xf32>
    %975 = arith.negf %971 : vector<2x128xf32>
    %976 = math.exp %975 : vector<2x128xf32>
    %cst_275 = arith.constant 1.000000e+00 : f32
    %977 = vector.broadcast %cst_275 : f32 to vector<2x128xf32>
    %978 = arith.addf %977, %976 : vector<2x128xf32>
    %979 = arith.divf %977, %978 : vector<2x128xf32>
    %980 = math.tanh %971 : vector<2x128xf32>
    %981 = arith.negf %974 : vector<2x128xf32>
    %982 = math.exp %981 : vector<2x128xf32>
    %cst_276 = arith.constant 1.000000e+00 : f32
    %983 = vector.broadcast %cst_276 : f32 to vector<2x128xf32>
    %984 = arith.addf %983, %982 : vector<2x128xf32>
    %985 = arith.divf %983, %984 : vector<2x128xf32>
    %986 = math.tanh %974 : vector<2x128xf32>
    %987 = vector.extract_strided_slice %979 {offsets = [0, 32], sizes = [2, 32], strides = [1, 1]} : vector<2x128xf32> to vector<2x32xf32>
    %988 = arith.mulf %987, %939 : vector<2x32xf32>
    %989 = vector.extract_strided_slice %979 {offsets = [0, 0], sizes = [2, 32], strides = [1, 1]} : vector<2x128xf32> to vector<2x32xf32>
    %990 = vector.extract_strided_slice %980 {offsets = [0, 64], sizes = [2, 32], strides = [1, 1]} : vector<2x128xf32> to vector<2x32xf32>
    %991 = arith.mulf %989, %990 : vector<2x32xf32>
    %992 = arith.addf %988, %991 : vector<2x32xf32>
    %993 = vector.extract_strided_slice %985 {offsets = [0, 32], sizes = [2, 32], strides = [1, 1]} : vector<2x128xf32> to vector<2x32xf32>
    %994 = arith.mulf %993, %945 : vector<2x32xf32>
    %995 = vector.extract_strided_slice %985 {offsets = [0, 0], sizes = [2, 32], strides = [1, 1]} : vector<2x128xf32> to vector<2x32xf32>
    %996 = vector.extract_strided_slice %986 {offsets = [0, 64], sizes = [2, 32], strides = [1, 1]} : vector<2x128xf32> to vector<2x32xf32>
    %997 = arith.mulf %995, %996 : vector<2x32xf32>
    %998 = arith.addf %994, %997 : vector<2x32xf32>
    %999 = vector.extract_strided_slice %979 {offsets = [0, 96], sizes = [2, 32], strides = [1, 1]} : vector<2x128xf32> to vector<2x32xf32>
    %1000 = math.tanh %992 : vector<2x32xf32>
    %1001 = arith.mulf %999, %1000 : vector<2x32xf32>
    %1002 = vector.extract_strided_slice %985 {offsets = [0, 96], sizes = [2, 32], strides = [1, 1]} : vector<2x128xf32> to vector<2x32xf32>
    %1003 = math.tanh %998 : vector<2x32xf32>
    %1004 = arith.mulf %1002, %1003 : vector<2x32xf32>
    %1005 = arith.index_cast %c1_i32_268 : i32 to index
    %c0_277 = arith.constant 0 : index
    %c0_278 = arith.constant 0 : index
    %1006 = vector.load %arg30[%1005, %c0_277, %c0_278] : memref<4x2x64xf32, #tpu.memory_space<vmem>>, vector<1x2x32xf32>
    %1007 = vector.shape_cast %1006 : vector<1x2x32xf32> to vector<2x32xf32>
    %1008 = vector.shape_cast %1001 : vector<2x32xf32> to vector<1x2x32xf32>
    tpu.vector_store %arg30[%1005, %c0_277, %c0_278], %1008 {strides = array<i32>} : memref<4x2x64xf32, #tpu.memory_space<vmem>>, vector<1x2x32xf32>,
    %1009 = arith.index_cast %961 : i32 to index
    %c0_279 = arith.constant 0 : index
    %c32_280 = arith.constant 32 : index
    %1010 = vector.load %arg30[%1009, %c0_279, %c32_280] : memref<4x2x64xf32, #tpu.memory_space<vmem>>, vector<1x2x32xf32>
    %1011 = vector.shape_cast %1010 : vector<1x2x32xf32> to vector<2x32xf32>
    %1012 = vector.shape_cast %1004 : vector<2x32xf32> to vector<1x2x32xf32>
    tpu.vector_store %arg30[%1009, %c0_279, %c32_280], %1012 {strides = array<i32>} : memref<4x2x64xf32, #tpu.memory_space<vmem>>, vector<1x2x32xf32>,
    %1013 = tpu.concatenate %1001, %1004 in 1 : vector<2x32xf32>, vector<2x32xf32> -> vector<2x64xf32>
    %c2_i32_281 = arith.constant 2 : i32
    %c3_i32_282 = arith.constant 3 : i32
    %1014 = arith.subi %c3_i32_282, %c2_i32_281 : i32
    %cst_283 = arith.constant dense<0.000000e+00> : vector<2x256xf32>
    %1015 = tpu.matmul %1013, %905, %cst_283 {dimension_numbers = #tpu.dot_dimension_numbers<[1], [0], [0], [1], [0, 0, 1, 1], [], []>} : vector<2x64xf32>, vector<64x256xf32>, vector<2x256xf32> -> vector<2x256xf32>
    %c2_i32_284 = arith.constant 2 : i32
    %1016 = arith.muli %c2_i32_281, %c2_i32_284 : i32
    %1017 = arith.index_cast %1016 : i32 to index
    %c0_285 = arith.constant 0 : index
    %1018 = vector.load %arg29[%1017, %c0_285] : memref<8x256xf32, #tpu.memory_space<vmem>>, vector<2x256xf32>
    %c2_i32_286 = arith.constant 2 : i32
    %1019 = arith.muli %1014, %c2_i32_286 : i32
    %1020 = arith.index_cast %1019 : i32 to index
    %c0_287 = arith.constant 0 : index
    %1021 = vector.load %arg29[%1020, %c0_287] : memref<8x256xf32, #tpu.memory_space<vmem>>, vector<2x256xf32>
    %1022 = vector.extract_strided_slice %1018 {offsets = [0, 0], sizes = [2, 128], strides = [1, 1]} : vector<2x256xf32> to vector<2x128xf32>
    %1023 = vector.extract_strided_slice %1015 {offsets = [0, 0], sizes = [2, 128], strides = [1, 1]} : vector<2x256xf32> to vector<2x128xf32>
    %1024 = arith.addf %1022, %1023 : vector<2x128xf32>
    %1025 = vector.extract_strided_slice %1021 {offsets = [0, 128], sizes = [2, 128], strides = [1, 1]} : vector<2x256xf32> to vector<2x128xf32>
    %1026 = vector.extract_strided_slice %1015 {offsets = [0, 128], sizes = [2, 128], strides = [1, 1]} : vector<2x256xf32> to vector<2x128xf32>
    %1027 = arith.addf %1025, %1026 : vector<2x128xf32>
    %1028 = arith.negf %1024 : vector<2x128xf32>
    %1029 = math.exp %1028 : vector<2x128xf32>
    %cst_288 = arith.constant 1.000000e+00 : f32
    %1030 = vector.broadcast %cst_288 : f32 to vector<2x128xf32>
    %1031 = arith.addf %1030, %1029 : vector<2x128xf32>
    %1032 = arith.divf %1030, %1031 : vector<2x128xf32>
    %1033 = math.tanh %1024 : vector<2x128xf32>
    %1034 = arith.negf %1027 : vector<2x128xf32>
    %1035 = math.exp %1034 : vector<2x128xf32>
    %cst_289 = arith.constant 1.000000e+00 : f32
    %1036 = vector.broadcast %cst_289 : f32 to vector<2x128xf32>
    %1037 = arith.addf %1036, %1035 : vector<2x128xf32>
    %1038 = arith.divf %1036, %1037 : vector<2x128xf32>
    %1039 = math.tanh %1027 : vector<2x128xf32>
    %1040 = vector.extract_strided_slice %1032 {offsets = [0, 32], sizes = [2, 32], strides = [1, 1]} : vector<2x128xf32> to vector<2x32xf32>
    %1041 = arith.mulf %1040, %992 : vector<2x32xf32>
    %1042 = vector.extract_strided_slice %1032 {offsets = [0, 0], sizes = [2, 32], strides = [1, 1]} : vector<2x128xf32> to vector<2x32xf32>
    %1043 = vector.extract_strided_slice %1033 {offsets = [0, 64], sizes = [2, 32], strides = [1, 1]} : vector<2x128xf32> to vector<2x32xf32>
    %1044 = arith.mulf %1042, %1043 : vector<2x32xf32>
    %1045 = arith.addf %1041, %1044 : vector<2x32xf32>
    %1046 = vector.extract_strided_slice %1038 {offsets = [0, 32], sizes = [2, 32], strides = [1, 1]} : vector<2x128xf32> to vector<2x32xf32>
    %1047 = arith.mulf %1046, %998 : vector<2x32xf32>
    %1048 = vector.extract_strided_slice %1038 {offsets = [0, 0], sizes = [2, 32], strides = [1, 1]} : vector<2x128xf32> to vector<2x32xf32>
    %1049 = vector.extract_strided_slice %1039 {offsets = [0, 64], sizes = [2, 32], strides = [1, 1]} : vector<2x128xf32> to vector<2x32xf32>
    %1050 = arith.mulf %1048, %1049 : vector<2x32xf32>
    %1051 = arith.addf %1047, %1050 : vector<2x32xf32>
    %1052 = vector.extract_strided_slice %1032 {offsets = [0, 96], sizes = [2, 32], strides = [1, 1]} : vector<2x128xf32> to vector<2x32xf32>
    %1053 = math.tanh %1045 : vector<2x32xf32>
    %1054 = arith.mulf %1052, %1053 : vector<2x32xf32>
    %1055 = vector.extract_strided_slice %1038 {offsets = [0, 96], sizes = [2, 32], strides = [1, 1]} : vector<2x128xf32> to vector<2x32xf32>
    %1056 = math.tanh %1051 : vector<2x32xf32>
    %1057 = arith.mulf %1055, %1056 : vector<2x32xf32>
    %1058 = arith.index_cast %c2_i32_281 : i32 to index
    %c0_290 = arith.constant 0 : index
    %c0_291 = arith.constant 0 : index
    %1059 = vector.load %arg30[%1058, %c0_290, %c0_291] : memref<4x2x64xf32, #tpu.memory_space<vmem>>, vector<1x2x32xf32>
    %1060 = vector.shape_cast %1059 : vector<1x2x32xf32> to vector<2x32xf32>
    %1061 = vector.shape_cast %1054 : vector<2x32xf32> to vector<1x2x32xf32>
    tpu.vector_store %arg30[%1058, %c0_290, %c0_291], %1061 {strides = array<i32>} : memref<4x2x64xf32, #tpu.memory_space<vmem>>, vector<1x2x32xf32>,
    %1062 = arith.index_cast %1014 : i32 to index
    %c0_292 = arith.constant 0 : index
    %c32_293 = arith.constant 32 : index
    %1063 = vector.load %arg30[%1062, %c0_292, %c32_293] : memref<4x2x64xf32, #tpu.memory_space<vmem>>, vector<1x2x32xf32>
    %1064 = vector.shape_cast %1063 : vector<1x2x32xf32> to vector<2x32xf32>
    %1065 = vector.shape_cast %1057 : vector<2x32xf32> to vector<1x2x32xf32>
    tpu.vector_store %arg30[%1062, %c0_292, %c32_293], %1065 {strides = array<i32>} : memref<4x2x64xf32, #tpu.memory_space<vmem>>, vector<1x2x32xf32>,
    %1066 = tpu.concatenate %1054, %1057 in 1 : vector<2x32xf32>, vector<2x32xf32> -> vector<2x64xf32>
    %c3_i32_294 = arith.constant 3 : i32
    %c3_i32_295 = arith.constant 3 : i32
    %1067 = arith.subi %c3_i32_295, %c3_i32_294 : i32
    %cst_296 = arith.constant dense<0.000000e+00> : vector<2x256xf32>
    %1068 = tpu.matmul %1066, %905, %cst_296 {dimension_numbers = #tpu.dot_dimension_numbers<[1], [0], [0], [1], [0, 0, 1, 1], [], []>} : vector<2x64xf32>, vector<64x256xf32>, vector<2x256xf32> -> vector<2x256xf32>
    %c2_i32_297 = arith.constant 2 : i32
    %1069 = arith.muli %c3_i32_294, %c2_i32_297 : i32
    %1070 = arith.index_cast %1069 : i32 to index
    %c0_298 = arith.constant 0 : index
    %1071 = vector.load %arg29[%1070, %c0_298] : memref<8x256xf32, #tpu.memory_space<vmem>>, vector<2x256xf32>
    %c2_i32_299 = arith.constant 2 : i32
    %1072 = arith.muli %1067, %c2_i32_299 : i32
    %1073 = arith.index_cast %1072 : i32 to index
    %c0_300 = arith.constant 0 : index
    %1074 = vector.load %arg29[%1073, %c0_300] : memref<8x256xf32, #tpu.memory_space<vmem>>, vector<2x256xf32>
    %1075 = vector.extract_strided_slice %1071 {offsets = [0, 0], sizes = [2, 128], strides = [1, 1]} : vector<2x256xf32> to vector<2x128xf32>
    %1076 = vector.extract_strided_slice %1068 {offsets = [0, 0], sizes = [2, 128], strides = [1, 1]} : vector<2x256xf32> to vector<2x128xf32>
    %1077 = arith.addf %1075, %1076 : vector<2x128xf32>
    %1078 = vector.extract_strided_slice %1074 {offsets = [0, 128], sizes = [2, 128], strides = [1, 1]} : vector<2x256xf32> to vector<2x128xf32>
    %1079 = vector.extract_strided_slice %1068 {offsets = [0, 128], sizes = [2, 128], strides = [1, 1]} : vector<2x256xf32> to vector<2x128xf32>
    %1080 = arith.addf %1078, %1079 : vector<2x128xf32>
    %1081 = arith.negf %1077 : vector<2x128xf32>
    %1082 = math.exp %1081 : vector<2x128xf32>
    %cst_301 = arith.constant 1.000000e+00 : f32
    %1083 = vector.broadcast %cst_301 : f32 to vector<2x128xf32>
    %1084 = arith.addf %1083, %1082 : vector<2x128xf32>
    %1085 = arith.divf %1083, %1084 : vector<2x128xf32>
    %1086 = math.tanh %1077 : vector<2x128xf32>
    %1087 = arith.negf %1080 : vector<2x128xf32>
    %1088 = math.exp %1087 : vector<2x128xf32>
    %cst_302 = arith.constant 1.000000e+00 : f32
    %1089 = vector.broadcast %cst_302 : f32 to vector<2x128xf32>
    %1090 = arith.addf %1089, %1088 : vector<2x128xf32>
    %1091 = arith.divf %1089, %1090 : vector<2x128xf32>
    %1092 = math.tanh %1080 : vector<2x128xf32>
    %1093 = vector.extract_strided_slice %1085 {offsets = [0, 32], sizes = [2, 32], strides = [1, 1]} : vector<2x128xf32> to vector<2x32xf32>
    %1094 = arith.mulf %1093, %1045 : vector<2x32xf32>
    %1095 = vector.extract_strided_slice %1085 {offsets = [0, 0], sizes = [2, 32], strides = [1, 1]} : vector<2x128xf32> to vector<2x32xf32>
    %1096 = vector.extract_strided_slice %1086 {offsets = [0, 64], sizes = [2, 32], strides = [1, 1]} : vector<2x128xf32> to vector<2x32xf32>
    %1097 = arith.mulf %1095, %1096 : vector<2x32xf32>
    %1098 = arith.addf %1094, %1097 : vector<2x32xf32>
    %1099 = vector.extract_strided_slice %1091 {offsets = [0, 32], sizes = [2, 32], strides = [1, 1]} : vector<2x128xf32> to vector<2x32xf32>
    %1100 = arith.mulf %1099, %1051 : vector<2x32xf32>
    %1101 = vector.extract_strided_slice %1091 {offsets = [0, 0], sizes = [2, 32], strides = [1, 1]} : vector<2x128xf32> to vector<2x32xf32>
    %1102 = vector.extract_strided_slice %1092 {offsets = [0, 64], sizes = [2, 32], strides = [1, 1]} : vector<2x128xf32> to vector<2x32xf32>
    %1103 = arith.mulf %1101, %1102 : vector<2x32xf32>
    %1104 = arith.addf %1100, %1103 : vector<2x32xf32>
    %1105 = vector.extract_strided_slice %1085 {offsets = [0, 96], sizes = [2, 32], strides = [1, 1]} : vector<2x128xf32> to vector<2x32xf32>
    %1106 = math.tanh %1098 : vector<2x32xf32>
    %1107 = arith.mulf %1105, %1106 : vector<2x32xf32>
    %1108 = vector.extract_strided_slice %1091 {offsets = [0, 96], sizes = [2, 32], strides = [1, 1]} : vector<2x128xf32> to vector<2x32xf32>
    %1109 = math.tanh %1104 : vector<2x32xf32>
    %1110 = arith.mulf %1108, %1109 : vector<2x32xf32>
    %1111 = arith.index_cast %c3_i32_294 : i32 to index
    %c0_303 = arith.constant 0 : index
    %c0_304 = arith.constant 0 : index
    %1112 = vector.load %arg30[%1111, %c0_303, %c0_304] : memref<4x2x64xf32, #tpu.memory_space<vmem>>, vector<1x2x32xf32>
    %1113 = vector.shape_cast %1112 : vector<1x2x32xf32> to vector<2x32xf32>
    %1114 = vector.shape_cast %1107 : vector<2x32xf32> to vector<1x2x32xf32>
    tpu.vector_store %arg30[%1111, %c0_303, %c0_304], %1114 {strides = array<i32>} : memref<4x2x64xf32, #tpu.memory_space<vmem>>, vector<1x2x32xf32>,
    %1115 = arith.index_cast %1067 : i32 to index
    %c0_305 = arith.constant 0 : index
    %c32_306 = arith.constant 32 : index
    %1116 = vector.load %arg30[%1115, %c0_305, %c32_306] : memref<4x2x64xf32, #tpu.memory_space<vmem>>, vector<1x2x32xf32>
    %1117 = vector.shape_cast %1116 : vector<1x2x32xf32> to vector<2x32xf32>
    %1118 = vector.shape_cast %1110 : vector<2x32xf32> to vector<1x2x32xf32>
    tpu.vector_store %arg30[%1115, %c0_305, %c32_306], %1118 {strides = array<i32>} : memref<4x2x64xf32, #tpu.memory_space<vmem>>, vector<1x2x32xf32>,
    %1119 = tpu.concatenate %1107, %1110 in 1 : vector<2x32xf32>, vector<2x32xf32> -> vector<2x64xf32>
    %c4_i32_307 = arith.constant 4 : i32
    %c0_308 = arith.constant 0 : index
    %c0_309 = arith.constant 0 : index
    %c0_310 = arith.constant 0 : index
    %1120 = vector.load %arg30[%c0_308, %c0_309, %c0_310] : memref<4x2x64xf32, #tpu.memory_space<vmem>>, vector<4x2x64xf32>
    %1121 = vector.shape_cast %1120 : vector<4x2x64xf32> to vector<8x64xf32>
    %1122 = arith.truncf %1121 : vector<8x64xf32> to vector<8x64xbf16>
    %c0_311 = arith.constant 0 : index
    %c0_312 = arith.constant 0 : index
    %1123 = vector.load %arg13[%c0_311, %c0_312] : memref<64x256xbf16, #tpu.memory_space<vmem>>, vector<64x256xbf16>
    %cst_313 = arith.constant dense<0.000000e+00> : vector<8x256xf32>
    %1124 = tpu.matmul %1122, %1123, %cst_313 {dimension_numbers = #tpu.dot_dimension_numbers<[1], [0], [0], [1], [0, 0, 1, 1], [], []>} : vector<8x64xbf16>, vector<64x256xbf16>, vector<8x256xf32> -> vector<8x256xf32>
    %c0_314 = arith.constant 0 : index
    %c0_315 = arith.constant 0 : index
    %1125 = vector.load %arg14[%c0_314, %c0_315] : memref<1x256xf32, #tpu.memory_space<vmem>>, vector<1x256xf32>
    %1126 = vector.broadcast %1125 : vector<1x256xf32> to vector<8x256xf32>
    %1127 = arith.addf %1124, %1126 : vector<8x256xf32>
    %c0_316 = arith.constant 0 : index
    %c0_317 = arith.constant 0 : index
    %1128 = vector.load %arg29[%c0_316, %c0_317] : memref<8x256xf32, #tpu.memory_space<vmem>>, vector<8x256xf32>
    tpu.vector_store %arg29[%c0_316, %c0_317], %1127 {strides = array<i32>} : memref<8x256xf32, #tpu.memory_space<vmem>>, vector<8x256xf32>,
    %c0_318 = arith.constant 0 : index
    %c0_319 = arith.constant 0 : index
    %1129 = vector.load %arg15[%c0_318, %c0_319] : memref<64x256xf32, #tpu.memory_space<vmem>>, vector<64x256xf32>
    %cst_320 = arith.constant 0.000000e+00 : f32
    %1130 = vector.broadcast %cst_320 : f32 to vector<2x64xf32>
    %cst_321 = arith.constant 0.000000e+00 : f32
    %1131 = vector.broadcast %cst_321 : f32 to vector<2x32xf32>
    %c0_i32_322 = arith.constant 0 : i32
    %c3_i32_323 = arith.constant 3 : i32
    %1132 = arith.subi %c3_i32_323, %c0_i32_322 : i32
    %cst_324 = arith.constant dense<0.000000e+00> : vector<2x256xf32>
    %1133 = tpu.matmul %1130, %1129, %cst_324 {dimension_numbers = #tpu.dot_dimension_numbers<[1], [0], [0], [1], [0, 0, 1, 1], [], []>} : vector<2x64xf32>, vector<64x256xf32>, vector<2x256xf32> -> vector<2x256xf32>
    %c2_i32_325 = arith.constant 2 : i32
    %1134 = arith.muli %c0_i32_322, %c2_i32_325 : i32
    %1135 = arith.index_cast %1134 : i32 to index
    %c0_326 = arith.constant 0 : index
    %1136 = vector.load %arg29[%1135, %c0_326] : memref<8x256xf32, #tpu.memory_space<vmem>>, vector<2x256xf32>
    %c2_i32_327 = arith.constant 2 : i32
    %1137 = arith.muli %1132, %c2_i32_327 : i32
    %1138 = arith.index_cast %1137 : i32 to index
    %c0_328 = arith.constant 0 : index
    %1139 = vector.load %arg29[%1138, %c0_328] : memref<8x256xf32, #tpu.memory_space<vmem>>, vector<2x256xf32>
    %1140 = vector.extract_strided_slice %1136 {offsets = [0, 0], sizes = [2, 128], strides = [1, 1]} : vector<2x256xf32> to vector<2x128xf32>
    %1141 = vector.extract_strided_slice %1133 {offsets = [0, 0], sizes = [2, 128], strides = [1, 1]} : vector<2x256xf32> to vector<2x128xf32>
    %1142 = arith.addf %1140, %1141 : vector<2x128xf32>
    %1143 = vector.extract_strided_slice %1139 {offsets = [0, 128], sizes = [2, 128], strides = [1, 1]} : vector<2x256xf32> to vector<2x128xf32>
    %1144 = vector.extract_strided_slice %1133 {offsets = [0, 128], sizes = [2, 128], strides = [1, 1]} : vector<2x256xf32> to vector<2x128xf32>
    %1145 = arith.addf %1143, %1144 : vector<2x128xf32>
    %1146 = arith.negf %1142 : vector<2x128xf32>
    %1147 = math.exp %1146 : vector<2x128xf32>
    %cst_329 = arith.constant 1.000000e+00 : f32
    %1148 = vector.broadcast %cst_329 : f32 to vector<2x128xf32>
    %1149 = arith.addf %1148, %1147 : vector<2x128xf32>
    %1150 = arith.divf %1148, %1149 : vector<2x128xf32>
    %1151 = math.tanh %1142 : vector<2x128xf32>
    %1152 = arith.negf %1145 : vector<2x128xf32>
    %1153 = math.exp %1152 : vector<2x128xf32>
    %cst_330 = arith.constant 1.000000e+00 : f32
    %1154 = vector.broadcast %cst_330 : f32 to vector<2x128xf32>
    %1155 = arith.addf %1154, %1153 : vector<2x128xf32>
    %1156 = arith.divf %1154, %1155 : vector<2x128xf32>
    %1157 = math.tanh %1145 : vector<2x128xf32>
    %1158 = vector.extract_strided_slice %1150 {offsets = [0, 32], sizes = [2, 32], strides = [1, 1]} : vector<2x128xf32> to vector<2x32xf32>
    %1159 = arith.mulf %1158, %1131 : vector<2x32xf32>
    %1160 = vector.extract_strided_slice %1150 {offsets = [0, 0], sizes = [2, 32], strides = [1, 1]} : vector<2x128xf32> to vector<2x32xf32>
    %1161 = vector.extract_strided_slice %1151 {offsets = [0, 64], sizes = [2, 32], strides = [1, 1]} : vector<2x128xf32> to vector<2x32xf32>
    %1162 = arith.mulf %1160, %1161 : vector<2x32xf32>
    %1163 = arith.addf %1159, %1162 : vector<2x32xf32>
    %1164 = vector.extract_strided_slice %1156 {offsets = [0, 32], sizes = [2, 32], strides = [1, 1]} : vector<2x128xf32> to vector<2x32xf32>
    %1165 = arith.mulf %1164, %1131 : vector<2x32xf32>
    %1166 = vector.extract_strided_slice %1156 {offsets = [0, 0], sizes = [2, 32], strides = [1, 1]} : vector<2x128xf32> to vector<2x32xf32>
    %1167 = vector.extract_strided_slice %1157 {offsets = [0, 64], sizes = [2, 32], strides = [1, 1]} : vector<2x128xf32> to vector<2x32xf32>
    %1168 = arith.mulf %1166, %1167 : vector<2x32xf32>
    %1169 = arith.addf %1165, %1168 : vector<2x32xf32>
    %1170 = vector.extract_strided_slice %1150 {offsets = [0, 96], sizes = [2, 32], strides = [1, 1]} : vector<2x128xf32> to vector<2x32xf32>
    %1171 = math.tanh %1163 : vector<2x32xf32>
    %1172 = arith.mulf %1170, %1171 : vector<2x32xf32>
    %1173 = vector.extract_strided_slice %1156 {offsets = [0, 96], sizes = [2, 32], strides = [1, 1]} : vector<2x128xf32> to vector<2x32xf32>
    %1174 = math.tanh %1169 : vector<2x32xf32>
    %1175 = arith.mulf %1173, %1174 : vector<2x32xf32>
    %1176 = arith.index_cast %c0_i32_322 : i32 to index
    %c0_331 = arith.constant 0 : index
    %c0_332 = arith.constant 0 : index
    %1177 = vector.load %arg30[%1176, %c0_331, %c0_332] : memref<4x2x64xf32, #tpu.memory_space<vmem>>, vector<1x2x32xf32>
    %1178 = vector.shape_cast %1177 : vector<1x2x32xf32> to vector<2x32xf32>
    %1179 = vector.shape_cast %1172 : vector<2x32xf32> to vector<1x2x32xf32>
    tpu.vector_store %arg30[%1176, %c0_331, %c0_332], %1179 {strides = array<i32>} : memref<4x2x64xf32, #tpu.memory_space<vmem>>, vector<1x2x32xf32>,
    %1180 = arith.index_cast %1132 : i32 to index
    %c0_333 = arith.constant 0 : index
    %c32_334 = arith.constant 32 : index
    %1181 = vector.load %arg30[%1180, %c0_333, %c32_334] : memref<4x2x64xf32, #tpu.memory_space<vmem>>, vector<1x2x32xf32>
    %1182 = vector.shape_cast %1181 : vector<1x2x32xf32> to vector<2x32xf32>
    %1183 = vector.shape_cast %1175 : vector<2x32xf32> to vector<1x2x32xf32>
    tpu.vector_store %arg30[%1180, %c0_333, %c32_334], %1183 {strides = array<i32>} : memref<4x2x64xf32, #tpu.memory_space<vmem>>, vector<1x2x32xf32>,
    %1184 = tpu.concatenate %1172, %1175 in 1 : vector<2x32xf32>, vector<2x32xf32> -> vector<2x64xf32>
    %c1_i32_335 = arith.constant 1 : i32
    %c3_i32_336 = arith.constant 3 : i32
    %1185 = arith.subi %c3_i32_336, %c1_i32_335 : i32
    %cst_337 = arith.constant dense<0.000000e+00> : vector<2x256xf32>
    %1186 = tpu.matmul %1184, %1129, %cst_337 {dimension_numbers = #tpu.dot_dimension_numbers<[1], [0], [0], [1], [0, 0, 1, 1], [], []>} : vector<2x64xf32>, vector<64x256xf32>, vector<2x256xf32> -> vector<2x256xf32>
    %c2_i32_338 = arith.constant 2 : i32
    %1187 = arith.muli %c1_i32_335, %c2_i32_338 : i32
    %1188 = arith.index_cast %1187 : i32 to index
    %c0_339 = arith.constant 0 : index
    %1189 = vector.load %arg29[%1188, %c0_339] : memref<8x256xf32, #tpu.memory_space<vmem>>, vector<2x256xf32>
    %c2_i32_340 = arith.constant 2 : i32
    %1190 = arith.muli %1185, %c2_i32_340 : i32
    %1191 = arith.index_cast %1190 : i32 to index
    %c0_341 = arith.constant 0 : index
    %1192 = vector.load %arg29[%1191, %c0_341] : memref<8x256xf32, #tpu.memory_space<vmem>>, vector<2x256xf32>
    %1193 = vector.extract_strided_slice %1189 {offsets = [0, 0], sizes = [2, 128], strides = [1, 1]} : vector<2x256xf32> to vector<2x128xf32>
    %1194 = vector.extract_strided_slice %1186 {offsets = [0, 0], sizes = [2, 128], strides = [1, 1]} : vector<2x256xf32> to vector<2x128xf32>
    %1195 = arith.addf %1193, %1194 : vector<2x128xf32>
    %1196 = vector.extract_strided_slice %1192 {offsets = [0, 128], sizes = [2, 128], strides = [1, 1]} : vector<2x256xf32> to vector<2x128xf32>
    %1197 = vector.extract_strided_slice %1186 {offsets = [0, 128], sizes = [2, 128], strides = [1, 1]} : vector<2x256xf32> to vector<2x128xf32>
    %1198 = arith.addf %1196, %1197 : vector<2x128xf32>
    %1199 = arith.negf %1195 : vector<2x128xf32>
    %1200 = math.exp %1199 : vector<2x128xf32>
    %cst_342 = arith.constant 1.000000e+00 : f32
    %1201 = vector.broadcast %cst_342 : f32 to vector<2x128xf32>
    %1202 = arith.addf %1201, %1200 : vector<2x128xf32>
    %1203 = arith.divf %1201, %1202 : vector<2x128xf32>
    %1204 = math.tanh %1195 : vector<2x128xf32>
    %1205 = arith.negf %1198 : vector<2x128xf32>
    %1206 = math.exp %1205 : vector<2x128xf32>
    %cst_343 = arith.constant 1.000000e+00 : f32
    %1207 = vector.broadcast %cst_343 : f32 to vector<2x128xf32>
    %1208 = arith.addf %1207, %1206 : vector<2x128xf32>
    %1209 = arith.divf %1207, %1208 : vector<2x128xf32>
    %1210 = math.tanh %1198 : vector<2x128xf32>
    %1211 = vector.extract_strided_slice %1203 {offsets = [0, 32], sizes = [2, 32], strides = [1, 1]} : vector<2x128xf32> to vector<2x32xf32>
    %1212 = arith.mulf %1211, %1163 : vector<2x32xf32>
    %1213 = vector.extract_strided_slice %1203 {offsets = [0, 0], sizes = [2, 32], strides = [1, 1]} : vector<2x128xf32> to vector<2x32xf32>
    %1214 = vector.extract_strided_slice %1204 {offsets = [0, 64], sizes = [2, 32], strides = [1, 1]} : vector<2x128xf32> to vector<2x32xf32>
    %1215 = arith.mulf %1213, %1214 : vector<2x32xf32>
    %1216 = arith.addf %1212, %1215 : vector<2x32xf32>
    %1217 = vector.extract_strided_slice %1209 {offsets = [0, 32], sizes = [2, 32], strides = [1, 1]} : vector<2x128xf32> to vector<2x32xf32>
    %1218 = arith.mulf %1217, %1169 : vector<2x32xf32>
    %1219 = vector.extract_strided_slice %1209 {offsets = [0, 0], sizes = [2, 32], strides = [1, 1]} : vector<2x128xf32> to vector<2x32xf32>
    %1220 = vector.extract_strided_slice %1210 {offsets = [0, 64], sizes = [2, 32], strides = [1, 1]} : vector<2x128xf32> to vector<2x32xf32>
    %1221 = arith.mulf %1219, %1220 : vector<2x32xf32>
    %1222 = arith.addf %1218, %1221 : vector<2x32xf32>
    %1223 = vector.extract_strided_slice %1203 {offsets = [0, 96], sizes = [2, 32], strides = [1, 1]} : vector<2x128xf32> to vector<2x32xf32>
    %1224 = math.tanh %1216 : vector<2x32xf32>
    %1225 = arith.mulf %1223, %1224 : vector<2x32xf32>
    %1226 = vector.extract_strided_slice %1209 {offsets = [0, 96], sizes = [2, 32], strides = [1, 1]} : vector<2x128xf32> to vector<2x32xf32>
    %1227 = math.tanh %1222 : vector<2x32xf32>
    %1228 = arith.mulf %1226, %1227 : vector<2x32xf32>
    %1229 = arith.index_cast %c1_i32_335 : i32 to index
    %c0_344 = arith.constant 0 : index
    %c0_345 = arith.constant 0 : index
    %1230 = vector.load %arg30[%1229, %c0_344, %c0_345] : memref<4x2x64xf32, #tpu.memory_space<vmem>>, vector<1x2x32xf32>
    %1231 = vector.shape_cast %1230 : vector<1x2x32xf32> to vector<2x32xf32>
    %1232 = vector.shape_cast %1225 : vector<2x32xf32> to vector<1x2x32xf32>
    tpu.vector_store %arg30[%1229, %c0_344, %c0_345], %1232 {strides = array<i32>} : memref<4x2x64xf32, #tpu.memory_space<vmem>>, vector<1x2x32xf32>,
    %1233 = arith.index_cast %1185 : i32 to index
    %c0_346 = arith.constant 0 : index
    %c32_347 = arith.constant 32 : index
    %1234 = vector.load %arg30[%1233, %c0_346, %c32_347] : memref<4x2x64xf32, #tpu.memory_space<vmem>>, vector<1x2x32xf32>
    %1235 = vector.shape_cast %1234 : vector<1x2x32xf32> to vector<2x32xf32>
    %1236 = vector.shape_cast %1228 : vector<2x32xf32> to vector<1x2x32xf32>
    tpu.vector_store %arg30[%1233, %c0_346, %c32_347], %1236 {strides = array<i32>} : memref<4x2x64xf32, #tpu.memory_space<vmem>>, vector<1x2x32xf32>,
    %1237 = tpu.concatenate %1225, %1228 in 1 : vector<2x32xf32>, vector<2x32xf32> -> vector<2x64xf32>
    %c2_i32_348 = arith.constant 2 : i32
    %c3_i32_349 = arith.constant 3 : i32
    %1238 = arith.subi %c3_i32_349, %c2_i32_348 : i32
    %cst_350 = arith.constant dense<0.000000e+00> : vector<2x256xf32>
    %1239 = tpu.matmul %1237, %1129, %cst_350 {dimension_numbers = #tpu.dot_dimension_numbers<[1], [0], [0], [1], [0, 0, 1, 1], [], []>} : vector<2x64xf32>, vector<64x256xf32>, vector<2x256xf32> -> vector<2x256xf32>
    %c2_i32_351 = arith.constant 2 : i32
    %1240 = arith.muli %c2_i32_348, %c2_i32_351 : i32
    %1241 = arith.index_cast %1240 : i32 to index
    %c0_352 = arith.constant 0 : index
    %1242 = vector.load %arg29[%1241, %c0_352] : memref<8x256xf32, #tpu.memory_space<vmem>>, vector<2x256xf32>
    %c2_i32_353 = arith.constant 2 : i32
    %1243 = arith.muli %1238, %c2_i32_353 : i32
    %1244 = arith.index_cast %1243 : i32 to index
    %c0_354 = arith.constant 0 : index
    %1245 = vector.load %arg29[%1244, %c0_354] : memref<8x256xf32, #tpu.memory_space<vmem>>, vector<2x256xf32>
    %1246 = vector.extract_strided_slice %1242 {offsets = [0, 0], sizes = [2, 128], strides = [1, 1]} : vector<2x256xf32> to vector<2x128xf32>
    %1247 = vector.extract_strided_slice %1239 {offsets = [0, 0], sizes = [2, 128], strides = [1, 1]} : vector<2x256xf32> to vector<2x128xf32>
    %1248 = arith.addf %1246, %1247 : vector<2x128xf32>
    %1249 = vector.extract_strided_slice %1245 {offsets = [0, 128], sizes = [2, 128], strides = [1, 1]} : vector<2x256xf32> to vector<2x128xf32>
    %1250 = vector.extract_strided_slice %1239 {offsets = [0, 128], sizes = [2, 128], strides = [1, 1]} : vector<2x256xf32> to vector<2x128xf32>
    %1251 = arith.addf %1249, %1250 : vector<2x128xf32>
    %1252 = arith.negf %1248 : vector<2x128xf32>
    %1253 = math.exp %1252 : vector<2x128xf32>
    %cst_355 = arith.constant 1.000000e+00 : f32
    %1254 = vector.broadcast %cst_355 : f32 to vector<2x128xf32>
    %1255 = arith.addf %1254, %1253 : vector<2x128xf32>
    %1256 = arith.divf %1254, %1255 : vector<2x128xf32>
    %1257 = math.tanh %1248 : vector<2x128xf32>
    %1258 = arith.negf %1251 : vector<2x128xf32>
    %1259 = math.exp %1258 : vector<2x128xf32>
    %cst_356 = arith.constant 1.000000e+00 : f32
    %1260 = vector.broadcast %cst_356 : f32 to vector<2x128xf32>
    %1261 = arith.addf %1260, %1259 : vector<2x128xf32>
    %1262 = arith.divf %1260, %1261 : vector<2x128xf32>
    %1263 = math.tanh %1251 : vector<2x128xf32>
    %1264 = vector.extract_strided_slice %1256 {offsets = [0, 32], sizes = [2, 32], strides = [1, 1]} : vector<2x128xf32> to vector<2x32xf32>
    %1265 = arith.mulf %1264, %1216 : vector<2x32xf32>
    %1266 = vector.extract_strided_slice %1256 {offsets = [0, 0], sizes = [2, 32], strides = [1, 1]} : vector<2x128xf32> to vector<2x32xf32>
    %1267 = vector.extract_strided_slice %1257 {offsets = [0, 64], sizes = [2, 32], strides = [1, 1]} : vector<2x128xf32> to vector<2x32xf32>
    %1268 = arith.mulf %1266, %1267 : vector<2x32xf32>
    %1269 = arith.addf %1265, %1268 : vector<2x32xf32>
    %1270 = vector.extract_strided_slice %1262 {offsets = [0, 32], sizes = [2, 32], strides = [1, 1]} : vector<2x128xf32> to vector<2x32xf32>
    %1271 = arith.mulf %1270, %1222 : vector<2x32xf32>
    %1272 = vector.extract_strided_slice %1262 {offsets = [0, 0], sizes = [2, 32], strides = [1, 1]} : vector<2x128xf32> to vector<2x32xf32>
    %1273 = vector.extract_strided_slice %1263 {offsets = [0, 64], sizes = [2, 32], strides = [1, 1]} : vector<2x128xf32> to vector<2x32xf32>
    %1274 = arith.mulf %1272, %1273 : vector<2x32xf32>
    %1275 = arith.addf %1271, %1274 : vector<2x32xf32>
    %1276 = vector.extract_strided_slice %1256 {offsets = [0, 96], sizes = [2, 32], strides = [1, 1]} : vector<2x128xf32> to vector<2x32xf32>
    %1277 = math.tanh %1269 : vector<2x32xf32>
    %1278 = arith.mulf %1276, %1277 : vector<2x32xf32>
    %1279 = vector.extract_strided_slice %1262 {offsets = [0, 96], sizes = [2, 32], strides = [1, 1]} : vector<2x128xf32> to vector<2x32xf32>
    %1280 = math.tanh %1275 : vector<2x32xf32>
    %1281 = arith.mulf %1279, %1280 : vector<2x32xf32>
    %1282 = arith.index_cast %c2_i32_348 : i32 to index
    %c0_357 = arith.constant 0 : index
    %c0_358 = arith.constant 0 : index
    %1283 = vector.load %arg30[%1282, %c0_357, %c0_358] : memref<4x2x64xf32, #tpu.memory_space<vmem>>, vector<1x2x32xf32>
    %1284 = vector.shape_cast %1283 : vector<1x2x32xf32> to vector<2x32xf32>
    %1285 = vector.shape_cast %1278 : vector<2x32xf32> to vector<1x2x32xf32>
    tpu.vector_store %arg30[%1282, %c0_357, %c0_358], %1285 {strides = array<i32>} : memref<4x2x64xf32, #tpu.memory_space<vmem>>, vector<1x2x32xf32>,
    %1286 = arith.index_cast %1238 : i32 to index
    %c0_359 = arith.constant 0 : index
    %c32_360 = arith.constant 32 : index
    %1287 = vector.load %arg30[%1286, %c0_359, %c32_360] : memref<4x2x64xf32, #tpu.memory_space<vmem>>, vector<1x2x32xf32>
    %1288 = vector.shape_cast %1287 : vector<1x2x32xf32> to vector<2x32xf32>
    %1289 = vector.shape_cast %1281 : vector<2x32xf32> to vector<1x2x32xf32>
    tpu.vector_store %arg30[%1286, %c0_359, %c32_360], %1289 {strides = array<i32>} : memref<4x2x64xf32, #tpu.memory_space<vmem>>, vector<1x2x32xf32>,
    %1290 = tpu.concatenate %1278, %1281 in 1 : vector<2x32xf32>, vector<2x32xf32> -> vector<2x64xf32>
    %c3_i32_361 = arith.constant 3 : i32
    %c3_i32_362 = arith.constant 3 : i32
    %1291 = arith.subi %c3_i32_362, %c3_i32_361 : i32
    %cst_363 = arith.constant dense<0.000000e+00> : vector<2x256xf32>
    %1292 = tpu.matmul %1290, %1129, %cst_363 {dimension_numbers = #tpu.dot_dimension_numbers<[1], [0], [0], [1], [0, 0, 1, 1], [], []>} : vector<2x64xf32>, vector<64x256xf32>, vector<2x256xf32> -> vector<2x256xf32>
    %c2_i32_364 = arith.constant 2 : i32
    %1293 = arith.muli %c3_i32_361, %c2_i32_364 : i32
    %1294 = arith.index_cast %1293 : i32 to index
    %c0_365 = arith.constant 0 : index
    %1295 = vector.load %arg29[%1294, %c0_365] : memref<8x256xf32, #tpu.memory_space<vmem>>, vector<2x256xf32>
    %c2_i32_366 = arith.constant 2 : i32
    %1296 = arith.muli %1291, %c2_i32_366 : i32
    %1297 = arith.index_cast %1296 : i32 to index
    %c0_367 = arith.constant 0 : index
    %1298 = vector.load %arg29[%1297, %c0_367] : memref<8x256xf32, #tpu.memory_space<vmem>>, vector<2x256xf32>
    %1299 = vector.extract_strided_slice %1295 {offsets = [0, 0], sizes = [2, 128], strides = [1, 1]} : vector<2x256xf32> to vector<2x128xf32>
    %1300 = vector.extract_strided_slice %1292 {offsets = [0, 0], sizes = [2, 128], strides = [1, 1]} : vector<2x256xf32> to vector<2x128xf32>
    %1301 = arith.addf %1299, %1300 : vector<2x128xf32>
    %1302 = vector.extract_strided_slice %1298 {offsets = [0, 128], sizes = [2, 128], strides = [1, 1]} : vector<2x256xf32> to vector<2x128xf32>
    %1303 = vector.extract_strided_slice %1292 {offsets = [0, 128], sizes = [2, 128], strides = [1, 1]} : vector<2x256xf32> to vector<2x128xf32>
    %1304 = arith.addf %1302, %1303 : vector<2x128xf32>
    %1305 = arith.negf %1301 : vector<2x128xf32>
    %1306 = math.exp %1305 : vector<2x128xf32>
    %cst_368 = arith.constant 1.000000e+00 : f32
    %1307 = vector.broadcast %cst_368 : f32 to vector<2x128xf32>
    %1308 = arith.addf %1307, %1306 : vector<2x128xf32>
    %1309 = arith.divf %1307, %1308 : vector<2x128xf32>
    %1310 = math.tanh %1301 : vector<2x128xf32>
    %1311 = arith.negf %1304 : vector<2x128xf32>
    %1312 = math.exp %1311 : vector<2x128xf32>
    %cst_369 = arith.constant 1.000000e+00 : f32
    %1313 = vector.broadcast %cst_369 : f32 to vector<2x128xf32>
    %1314 = arith.addf %1313, %1312 : vector<2x128xf32>
    %1315 = arith.divf %1313, %1314 : vector<2x128xf32>
    %1316 = math.tanh %1304 : vector<2x128xf32>
    %1317 = vector.extract_strided_slice %1309 {offsets = [0, 32], sizes = [2, 32], strides = [1, 1]} : vector<2x128xf32> to vector<2x32xf32>
    %1318 = arith.mulf %1317, %1269 : vector<2x32xf32>
    %1319 = vector.extract_strided_slice %1309 {offsets = [0, 0], sizes = [2, 32], strides = [1, 1]} : vector<2x128xf32> to vector<2x32xf32>
    %1320 = vector.extract_strided_slice %1310 {offsets = [0, 64], sizes = [2, 32], strides = [1, 1]} : vector<2x128xf32> to vector<2x32xf32>
    %1321 = arith.mulf %1319, %1320 : vector<2x32xf32>
    %1322 = arith.addf %1318, %1321 : vector<2x32xf32>
    %1323 = vector.extract_strided_slice %1315 {offsets = [0, 32], sizes = [2, 32], strides = [1, 1]} : vector<2x128xf32> to vector<2x32xf32>
    %1324 = arith.mulf %1323, %1275 : vector<2x32xf32>
    %1325 = vector.extract_strided_slice %1315 {offsets = [0, 0], sizes = [2, 32], strides = [1, 1]} : vector<2x128xf32> to vector<2x32xf32>
    %1326 = vector.extract_strided_slice %1316 {offsets = [0, 64], sizes = [2, 32], strides = [1, 1]} : vector<2x128xf32> to vector<2x32xf32>
    %1327 = arith.mulf %1325, %1326 : vector<2x32xf32>
    %1328 = arith.addf %1324, %1327 : vector<2x32xf32>
    %1329 = vector.extract_strided_slice %1309 {offsets = [0, 96], sizes = [2, 32], strides = [1, 1]} : vector<2x128xf32> to vector<2x32xf32>
    %1330 = math.tanh %1322 : vector<2x32xf32>
    %1331 = arith.mulf %1329, %1330 : vector<2x32xf32>
    %1332 = vector.extract_strided_slice %1315 {offsets = [0, 96], sizes = [2, 32], strides = [1, 1]} : vector<2x128xf32> to vector<2x32xf32>
    %1333 = math.tanh %1328 : vector<2x32xf32>
    %1334 = arith.mulf %1332, %1333 : vector<2x32xf32>
    %1335 = arith.index_cast %c3_i32_361 : i32 to index
    %c0_370 = arith.constant 0 : index
    %c0_371 = arith.constant 0 : index
    %1336 = vector.load %arg30[%1335, %c0_370, %c0_371] : memref<4x2x64xf32, #tpu.memory_space<vmem>>, vector<1x2x32xf32>
    %1337 = vector.shape_cast %1336 : vector<1x2x32xf32> to vector<2x32xf32>
    %1338 = vector.shape_cast %1331 : vector<2x32xf32> to vector<1x2x32xf32>
    tpu.vector_store %arg30[%1335, %c0_370, %c0_371], %1338 {strides = array<i32>} : memref<4x2x64xf32, #tpu.memory_space<vmem>>, vector<1x2x32xf32>,
    %1339 = arith.index_cast %1291 : i32 to index
    %c0_372 = arith.constant 0 : index
    %c32_373 = arith.constant 32 : index
    %1340 = vector.load %arg30[%1339, %c0_372, %c32_373] : memref<4x2x64xf32, #tpu.memory_space<vmem>>, vector<1x2x32xf32>
    %1341 = vector.shape_cast %1340 : vector<1x2x32xf32> to vector<2x32xf32>
    %1342 = vector.shape_cast %1334 : vector<2x32xf32> to vector<1x2x32xf32>
    tpu.vector_store %arg30[%1339, %c0_372, %c32_373], %1342 {strides = array<i32>} : memref<4x2x64xf32, #tpu.memory_space<vmem>>, vector<1x2x32xf32>,
    %1343 = tpu.concatenate %1331, %1334 in 1 : vector<2x32xf32>, vector<2x32xf32> -> vector<2x64xf32>
    %c4_i32_374 = arith.constant 4 : i32
    %c0_375 = arith.constant 0 : index
    %c0_376 = arith.constant 0 : index
    %c0_377 = arith.constant 0 : index
    %1344 = vector.load %arg30[%c0_375, %c0_376, %c0_377] : memref<4x2x64xf32, #tpu.memory_space<vmem>>, vector<4x2x64xf32>
    %c0_378 = arith.constant 0 : index
    %c0_379 = arith.constant 0 : index
    %1345 = vector.load %arg18[%c0_378, %c0_379] : memref<1x64xf32, #tpu.memory_space<vmem>>, vector<1x64xf32>
    %1346 = vector.shape_cast %1345 : vector<1x64xf32> to vector<1x1x64xf32>
    %1347 = vector.broadcast %1346 : vector<1x1x64xf32> to vector<4x2x64xf32>
    %1348 = arith.mulf %1344, %1347 : vector<4x2x64xf32>
    %cst_380 = arith.constant dense<0.000000e+00> : vector<4x2xf32>
    %1349 = vector.multi_reduction <add>, %1348, %cst_380 [2] : vector<4x2x64xf32> to vector<4x2xf32>
    %c0_381 = arith.constant 0 : index
    %c0_382 = arith.constant 0 : index
    %1350 = memref.load %arg19[%c0_381, %c0_382] : memref<1x1xf32, #tpu.memory_space<smem>>
    %1351 = vector.broadcast %1350 : f32 to vector<4x2xf32>
    %1352 = arith.addf %1349, %1351 : vector<4x2xf32>
    %c0_383 = arith.constant 0 : index
    %c0_384 = arith.constant 0 : index
    %1353 = vector.load %arg3[%c0_383, %c0_384] : memref<4x2xf32, #tpu.memory_space<vmem>>, vector<4x2xf32>
    %cst_385 = arith.constant 0.000000e+00 : f32
    %1354 = vector.broadcast %cst_385 : f32 to vector<4x2xf32>
    %1355 = arith.cmpf oeq, %1353, %1354 : vector<4x2xf32>
    %cst_386 = arith.constant -1.000000e+09 : f32
    %1356 = vector.broadcast %cst_386 : f32 to vector<4x2xf32>
    %1357 = arith.select %1355, %1356, %1352 : vector<4x2xi1>, vector<4x2xf32>
    %cst_387 = arith.constant dense<0xFF800000> : vector<2xf32>
    %1358 = vector.multi_reduction <maximumf>, %1357, %cst_387 [0] : vector<4x2xf32> to vector<2xf32>
    %1359 = vector.shape_cast %1358 : vector<2xf32> to vector<1x2xf32>
    %1360 = vector.broadcast %1359 : vector<1x2xf32> to vector<4x2xf32>
    %1361 = arith.subf %1357, %1360 : vector<4x2xf32>
    %1362 = math.exp %1361 : vector<4x2xf32>
    %cst_388 = arith.constant dense<0.000000e+00> : vector<2xf32>
    %1363 = vector.multi_reduction <add>, %1362, %cst_388 [0] : vector<4x2xf32> to vector<2xf32>
    %1364 = vector.shape_cast %1363 : vector<2xf32> to vector<1x2xf32>
    %1365 = vector.broadcast %1364 : vector<1x2xf32> to vector<4x2xf32>
    %1366 = arith.divf %1362, %1365 : vector<4x2xf32>
    %c0_389 = arith.constant 0 : index
    %c0_390 = arith.constant 0 : index
    %1367 = vector.load %arg26[%c0_389, %c0_390] : memref<4x2xf32, #tpu.memory_space<vmem>>, vector<4x2xf32>
    tpu.vector_store %arg26[%c0_389, %c0_390], %1366 {strides = array<i32>} : memref<4x2xf32, #tpu.memory_space<vmem>>, vector<4x2xf32>,
    %1368 = vector.shape_cast %1366 : vector<4x2xf32> to vector<4x2x1xf32>
    %1369 = vector.broadcast %1368 : vector<4x2x1xf32> to vector<4x2x64xf32>
    %1370 = arith.mulf %1369, %1344 : vector<4x2x64xf32>
    %cst_391 = arith.constant dense<0.000000e+00> : vector<2x64xf32>
    %1371 = vector.multi_reduction <add>, %1370, %cst_391 [0] : vector<4x2x64xf32> to vector<2x64xf32>
    %1372 = tpu.concatenate %897, %1371 in 1 : vector<2x64xf32>, vector<2x64xf32> -> vector<2x128xf32>
    %c0_392 = arith.constant 0 : index
    %c0_393 = arith.constant 0 : index
    %1373 = vector.load %arg20[%c0_392, %c0_393] : memref<128x32xf32, #tpu.memory_space<vmem>>, vector<128x32xf32>
    %cst_394 = arith.constant dense<0.000000e+00> : vector<2x32xf32>
    %1374 = tpu.matmul %1372, %1373, %cst_394 {dimension_numbers = #tpu.dot_dimension_numbers<[1], [0], [0], [1], [0, 0, 1, 1], [], []>} : vector<2x128xf32>, vector<128x32xf32>, vector<2x32xf32> -> vector<2x32xf32>
    %c0_395 = arith.constant 0 : index
    %c0_396 = arith.constant 0 : index
    %1375 = vector.load %arg21[%c0_395, %c0_396] : memref<1x32xf32, #tpu.memory_space<vmem>>, vector<1x32xf32>
    %1376 = vector.broadcast %1375 : vector<1x32xf32> to vector<2x32xf32>
    %1377 = arith.addf %1374, %1376 : vector<2x32xf32>
    %cst_397 = arith.constant 0.000000e+00 : f32
    %1378 = vector.broadcast %cst_397 : f32 to vector<2x32xf32>
    %1379 = arith.maximumf %1377, %1378 : vector<2x32xf32>
    %c0_398 = arith.constant 0 : index
    %c0_399 = arith.constant 0 : index
    %1380 = vector.load %arg22[%c0_398, %c0_399] : memref<32x3xf32, #tpu.memory_space<vmem>>, vector<32x3xf32>
    %cst_400 = arith.constant dense<0.000000e+00> : vector<2x3xf32>
    %1381 = tpu.matmul %1379, %1380, %cst_400 {dimension_numbers = #tpu.dot_dimension_numbers<[1], [0], [0], [1], [0, 0, 1, 1], [], []>} : vector<2x32xf32>, vector<32x3xf32>, vector<2x3xf32> -> vector<2x3xf32>
    %c0_401 = arith.constant 0 : index
    %c0_402 = arith.constant 0 : index
    %1382 = vector.load %arg23[%c0_401, %c0_402] : memref<1x3xf32, #tpu.memory_space<vmem>>, vector<1x3xf32>
    %1383 = vector.broadcast %1382 : vector<1x3xf32> to vector<2x3xf32>
    %1384 = arith.addf %1381, %1383 : vector<2x3xf32>
    %c0_403 = arith.constant 0 : index
    %c0_404 = arith.constant 0 : index
    %1385 = vector.load %arg24[%c0_403, %c0_404] : memref<2x3xf32, #tpu.memory_space<vmem>>, vector<2x3xf32>
    tpu.vector_store %arg24[%c0_403, %c0_404], %1384 {strides = array<i32>} : memref<2x3xf32, #tpu.memory_space<vmem>>, vector<2x3xf32>,
    return
  }
}

</mosaic_0001>

<bundles_post_ra>
// kernel: aspect_attention_lstm_forward.1
= control target key start
LH: loop header
LB: loop body
LE: loop exit
PB: predicated region body
PF: predicated region fallthrough
CT: control target
= control target key end

     0   :  { %s7461_s0 = inlined_call_operand.vmem [shape: bf16[16,32], index: 0, kind: input, shape index: {}]   ;;  %s7462_s1 = inlined_call_operand.vmem [shape: f32[8,2], index: 1, kind: input, shape index: {}]   ;;  %s7463_s2 = inlined_call_operand.vmem [shape: bf16[8,32], index: 2, kind: input, shape index: {}]   ;;  %s7464_s3 = inlined_call_operand.vmem [shape: f32[4,2], index: 3, kind: input, shape index: {}]   ;;  %s7465_s4 = inlined_call_operand.hbm [shape: bf16[32,256], index: 4, kind: input, shape index: {}]   ;;  %s7466_s5 = inlined_call_operand.vmem [shape: f32[1,256], index: 5, kind: input, shape index: {}]   ;;  %s7467_s6 = inlined_call_operand.vmem [shape: f32[64,256], index: 6, kind: input, shape index: {}]   ;;  %s7468_s7 = inlined_call_operand.vmem [shape: bf16[64,256], index: 7, kind: input, shape index: {}]   ;;  %s7469_s8 = inlined_call_operand.vmem [shape: f32[1,256], index: 8, kind: input, shape index: {}]   ;;  %s7470_s9 = inlined_call_operand.vmem [shape: f32[64,256], index: 9, kind: input, shape index: {}]   ;;  %s7471_s10 = inlined_call_operand.hbm [shape: bf16[32,256], index: 10, kind: input, shape index: {}]   ;;  %s7472_s11 = inlined_call_operand.hbm [shape: f32[1,256], index: 11, kind: input, shape index: {}]   ;;  %s7473_s12 = inlined_call_operand.vmem [shape: f32[64,256], index: 12, kind: input, shape index: {}]   ;;  %s7474_s13 = inlined_call_operand.hbm [shape: bf16[64,256], index: 13, kind: input, shape index: {}]   ;;  %s7475_s14 = inlined_call_operand.hbm [shape: f32[1,256], index: 14, kind: input, shape index: {}]   ;;  %s7476_s15 = inlined_call_operand.hbm [shape: f32[64,256], index: 15, kind: input, shape index: {}]   ;;  %s7477_s16 = inlined_call_operand.hbm [shape: f32[1,64], index: 16, kind: input, shape index: {}]   ;;  %s7478_s17 = inlined_call_operand.<no memory space> [shape: f32[1,1], index: 17, kind: input, shape index: {}]   ;;  %s7479_s18 = inlined_call_operand.hbm [shape: f32[1,64], index: 18, kind: input, shape index: {}]   ;;  %s7480_s19 = inlined_call_operand.<no memory space> [shape: f32[1,1], index: 19, kind: input, shape index: {}]   ;;  %s7481_s20 = inlined_call_operand.vmem [shape: f32[128,32], index: 20, kind: input, shape index: {}]   ;;  %s7482_s21 = inlined_call_operand.hbm [shape: f32[1,32], index: 21, kind: input, shape index: {}]   ;;  %s7483_s22 = inlined_call_operand.vmem [shape: f32[32,3], index: 22, kind: input, shape index: {}]   ;;  %s7484_s23 = inlined_call_operand.hbm [shape: f32[1,3], index: 23, kind: input, shape index: {}]   ;;  %s7485_s24 = inlined_call_operand.hbm [shape: f32[2,3], index: 24, kind: output, shape index: {0}]   ;;  %s7486_s25 = inlined_call_operand.vmem [shape: f32[8,2], index: 25, kind: output, shape index: {1}]   ;;  %s7487_s26 = inlined_call_operand.vmem [shape: f32[4,2], index: 26, kind: output, shape index: {2}]  }
   0x1   :  { %7491 = sst [smem:[#allocation33_spill]] %s7461_s0 }
   0x2   :  { %7492 = sst [smem:[#allocation34_spill]] %s7462_s1 }
   0x3   :  { %7493 = sst [smem:[#allocation35_spill]] %s7463_s2 }
   0x4   :  { %7494 = sst [smem:[#allocation36_spill]] %s7464_s3 }
   0x5   :  { %7495 = sst [smem:[#allocation37_spill]] %s7465_s4 }
   0x6   :  { %7496 = sst [smem:[#allocation38_spill]] %s7466_s5 }
   0x7   :  { %7497 = sst [smem:[#allocation39_spill]] %s7467_s6 }
   0x8   :  { %7498 = sst [smem:[#allocation40_spill]] %s7468_s7 }
   0x9   :  { %7499 = sst [smem:[#allocation41_spill]] %s7469_s8 }
   0xa   :  { %7500 = sst [smem:[#allocation42_spill]] %s7470_s9 }
   0xb   :  { %7501 = sst [smem:[#allocation43_spill]] %s7471_s10 }
   0xc   :  { %34 = vsyncpa [#allocation9], 0 }
   0xd   :  { %35 = vsyncpa [#allocation12], 0 }
   0xe   :  { %36 = vsyncpa [#allocation15], 0 }
   0xf   :  { %37 = vsyncpa [#allocation18], 0 }
  0x10   :  { %38 = vsyncpa [#allocation21], 0 }
  0x11   :  { %39 = vsyncpa [#allocation24], 0 }
  0x12   :  { %40 = vsyncpa [#allocation10], 0  ;;  %s5766_s27 = smov [#allocation11]   ;;  %s5767_s7 = smov [#allocation14]  }
  0x13   :  { %s76_s3 = sshll.u32 %s5766_s27, 4  ;;  %s100_s28 = sshll.u32 %s5767_s7, 4  ;;  %s77_s3 = int_to_ptr.vmem [resolvable:$true] %s76_s3  ;;  %s101_s28 = int_to_ptr.vmem [resolvable:$true] %s100_s28 }
  0x14   :  { %s5540_s8 = scalar_lea.vmem %s77_s3, 512  ;;  %p5545_p1 = scmp.lt.s32.totalorder %s77_s3, %s77_s3 }
  0x15   :  { %p5541_p0 = scmp.ne.s32.totalorder %s77_s3, %s5540_s8  ;;  %p5546_p2 = scmp.lt.s32.totalorder %s5540_s8, %s5540_s8 }
  0x17   :  { %p5547_p3 = por %p5546_p2, %p5545_p1 }
  0x19   :  { %p5548_p4 = pnand %p5547_p3, %p5541_p0 }
  0x1b   :  { %5551 = shalt.err (!%p5548_p4)
}
  0x1c   :  { %s5768_s4 = smov 128   ;;  %s5769_s29 = smov 8  }
  0x1d   :  { %s7502_s30 = sld [smem:[#allocation43_spill]]  ;;  %s5560_s2 = scalar_lea.vmem %s101_s28, 1024 }
  0x1e   :  { %p5561_p5 = scmp.ne.s32.totalorder %s101_s28, %s5560_s2  ;;  %p5565_p6 = scmp.lt.s32.totalorder %s101_s28, %s101_s28 }
  0x1f   :  { %p5566_p7 = scmp.lt.s32.totalorder %s5560_s2, %s5560_s2 }
  0x21   :  { %p5567_p8 = por %p5566_p7, %p5565_p6 }
  0x23   :  { %82 = dma.hbm_to_vmem [thread:$0]  %s7502_s30, 512, %s77_s3, [#allocation12], %s5768_s4, %s5768_s4, %s5769_s29  }
  0x24   :  { %p5568_p9 = pnand %p5567_p8, %p5561_p5 }
  0x26   :  { %5571 = shalt.err (!%p5568_p9)
}
  0x27   :  { %106 = dma.hbm_to_vmem [thread:$0]  %s7474_s13, 1024, %s101_s28, [#allocation15], %s5768_s4, %s5768_s4, %s5769_s29  }
  0x28   :  { %s5770_s6 = smov [#allocation17]  }
  0x29   :  { %s122_s1 = sshll.u32 %s5770_s6, 4  ;;  %s123_s1 = int_to_ptr.vmem [resolvable:$true] %s122_s1 }
  0x2a   :  { %s5580_s27 = scalar_lea.vmem %s123_s1, 2048  ;;  %p5585_p11 = scmp.lt.s32.totalorder %s123_s1, %s123_s1 }
  0x2b   :  { %p5581_p10 = scmp.ne.s32.totalorder %s123_s1, %s5580_s27  ;;  %p5586_p12 = scmp.lt.s32.totalorder %s5580_s27, %s5580_s27 }
  0x2d   :  { %p5587_p13 = por %p5586_p12, %p5585_p11 }
  0x2f   :  { %p5588_p0 = pnand %p5587_p13, %p5581_p10 }
  0x31   :  { %5591 = shalt.err (!%p5588_p0)
}
  0x32   :  { %s5771_s3 = smov 256   ;;  %s5772_s7 = smov 16  }
  0x33   :  { %128 = dma.hbm_to_vmem [thread:$0]  %s7476_s15, 2048, %s123_s1, [#allocation18], %s5771_s3, %s5771_s3, %s5772_s7  }
  0x34   :  { %s5773_s9 = smov [#allocation20]   ;;  %s5774_s13 = smov [#allocation8]  }
  0x35   :  { %s147_s30 = sshll.u32 %s5773_s9, 4  ;;  %s54_s28 = sshll.u32 %s5774_s13, 4  ;;  %s148_s30 = int_to_ptr.vmem [resolvable:$true] %s147_s30  ;;  %s55_s28 = int_to_ptr.vmem [resolvable:$true] %s54_s28 }
  0x36   :  { %s5600_s2 = scalar_lea.vmem %s148_s30, 16  ;;  %s5604_s5 = scalar_lea.vmem %s148_s30, 32 }
  0x37   :  { %p5601_p1 = scmp.ne.s32.totalorder %s148_s30, %s5600_s2  ;;  %p5605_p2 = scmp.lt.s32.totalorder %s148_s30, %s148_s30 }
  0x38   :  { %p5606_p3 = scmp.lt.s32.totalorder %s5604_s5, %s5600_s2 }
  0x3a   :  { %p5607_p4 = por %p5606_p3, %p5605_p2 }
  0x3c   :  { %p5608_p5 = pnand %p5607_p4, %p5601_p1 }
  0x3e   :  { %5611 = shalt.err (!%p5608_p5)
}
  0x3f   :  { %150 = dma.hbm_to_vmem [thread:$0]  %s7479_s18, 16, %s148_s30, [#allocation21]  }
  0x40   :  { %s5620_s27 = scalar_lea.vmem %s55_s28, 512  ;;  %p5625_p7 = scmp.lt.s32.totalorder %s55_s28, %s55_s28 }
  0x41   :  { %p5621_p6 = scmp.ne.s32.totalorder %s55_s28, %s5620_s27  ;;  %p5626_p8 = scmp.lt.s32.totalorder %s5620_s27, %s5620_s27 }
  0x43   :  { %p5627_p9 = por %p5626_p8, %p5625_p7 }
  0x45   :  { %p5628_p10 = pnand %p5627_p9, %p5621_p6 }
  0x47   :  { %5631 = shalt.err (!%p5628_p10)
}
  0x48   :  { %s7503_s3 = sld [smem:[#allocation37_spill]]  ;;  %s5775_s7 = smov [#allocation13]  }
  0x49   :  { %s89_s8 = sshll.u32 %s5775_s7, 4  ;;  %s5776_s0 = smov [#allocation16]   ;;  %s90_s8 = int_to_ptr.vmem [resolvable:$true] %s89_s8 }
  0x4a   :  { %s113_s18 = sshll.u32 %s5776_s0, 4  ;;  %s5640_s9 = scalar_lea.vmem %s90_s8, 32  ;;  %s114_s18 = int_to_ptr.vmem [resolvable:$true] %s113_s18 }
  0x4b   :  { %p5641_p11 = scmp.ne.s32.totalorder %s90_s8, %s5640_s9  ;;  %p5645_p12 = scmp.lt.s32.totalorder %s90_s8, %s90_s8 }
  0x4c   :  { %p5646_p13 = scmp.lt.s32.totalorder %s5640_s9, %s5640_s9 }
  0x4e   :  { %60 = dma.hbm_to_vmem [thread:$0]  %s7503_s3, 512, %s55_s28, [#allocation9], %s5768_s4, %s5768_s4, %s5769_s29  }
  0x4f   :  { %p5647_p0 = por %p5646_p13, %p5645_p12 }
  0x51   :  { %p5648_p1 = pnand %p5647_p0, %p5641_p11 }
  0x53   :  { %5651 = shalt.err (!%p5648_p1)
}
  0x54   :  { %92 = dma.hbm_to_vmem [thread:$0]  %s7472_s11, 32, %s90_s8, [#allocation12]  }
  0x55   :  { %s5660_s2 = scalar_lea.vmem %s114_s18, 32  ;;  %p5665_p3 = scmp.lt.s32.totalorder %s114_s18, %s114_s18 }
  0x56   :  { %p5661_p2 = scmp.ne.s32.totalorder %s114_s18, %s5660_s2  ;;  %p5666_p4 = scmp.lt.s32.totalorder %s5660_s2, %s5660_s2 }
  0x58   :  { %p5667_p5 = por %p5666_p4, %p5665_p3 }
  0x5a   :  { %p5668_p6 = pnand %p5667_p5, %p5661_p2 }
  0x5c   :  { %5671 = shalt.err (!%p5668_p6)
}
  0x5d   :  { %116 = dma.hbm_to_vmem [thread:$0]  %s7475_s14, 32, %s114_s18, [#allocation15]  }
  0x5e   :  { %s5777_s28 = smov [#allocation19]   ;;  %s5778_s10 = smov [#allocation22]  }
  0x5f   :  { %s135_s5 = sshll.u32 %s5777_s28, 4  ;;  %s161_s6 = sshll.u32 %s5778_s10, 4  ;;  %s136_s5 = int_to_ptr.vmem [resolvable:$true] %s135_s5  ;;  %s162_s6 = int_to_ptr.vmem [resolvable:$true] %s161_s6 }
  0x60   :  { %s5680_s27 = scalar_lea.vmem %s136_s5, 16  ;;  %s5684_s11 = scalar_lea.vmem %s136_s5, 32 }
  0x61   :  { %p5681_p7 = scmp.ne.s32.totalorder %s136_s5, %s5680_s27  ;;  %p5685_p8 = scmp.lt.s32.totalorder %s136_s5, %s136_s5 }
  0x62   :  { %p5686_p9 = scmp.lt.s32.totalorder %s5684_s11, %s5680_s27 }
  0x64   :  { %p5687_p10 = por %p5686_p9, %p5685_p8 }
  0x66   :  { %p5688_p11 = pnand %p5687_p10, %p5681_p7 }
  0x68   :  { %5691 = shalt.err (!%p5688_p11)
}
  0x69   :  { %138 = dma.hbm_to_vmem [thread:$0]  %s7477_s16, 16, %s136_s5, [#allocation18]  }
  0x6a   :  { %s5700_s3 = scalar_lea.vmem %s162_s6, 16  ;;  %s5704_s14 = scalar_lea.vmem %s162_s6, 32 }
  0x6b   :  { %p5701_p12 = scmp.ne.s32.totalorder %s162_s6, %s5700_s3  ;;  %p5705_p13 = scmp.lt.s32.totalorder %s162_s6, %s162_s6 }
  0x6c   :  { %p5706_p0 = scmp.lt.s32.totalorder %s5704_s14, %s5700_s3 }
  0x6e   :  { %p5707_p1 = por %p5706_p0, %p5705_p13 }
  0x70   :  { %p5708_p2 = pnand %p5707_p1, %p5701_p12 }
  0x72   :  { %5711 = shalt.err (!%p5708_p2)
}
  0x73   :  { %164 = dma.hbm_to_vmem [thread:$0]  %s7482_s21, 16, %s162_s6, [#allocation21]  }
  0x74   :  { %s5779_s0 = smov [#allocation23]  }
  0x75   :  { %s173_s18 = sshll.u32 %s5779_s0, 4  ;;  %s174_s18 = int_to_ptr.vmem [resolvable:$true] %s173_s18 }
  0x76   :  { %s5720_s9 = scalar_lea.vmem %s174_s18, 16  ;;  %s5724_s30 = scalar_lea.vmem %s174_s18, 32 }
  0x77   :  { %p5721_p3 = scmp.ne.s32.totalorder %s174_s18, %s5720_s9  ;;  %p5725_p4 = scmp.lt.s32.totalorder %s174_s18, %s174_s18 }
  0x78   :  { %p5726_p5 = scmp.lt.s32.totalorder %s5724_s30, %s5720_s9 }
  0x7a   :  { %p5727_p6 = por %p5726_p5, %p5725_p4 }
  0x7c   :  { %p5728_p7 = pnand %p5727_p6, %p5721_p3 }
  0x7e   :  { %5731 = shalt.err (!%p5728_p7)
}
  0x7f   :  { %176 = dma.hbm_to_vmem [thread:$0]  %s7484_s23, 16, %s174_s18, [#allocation24]  }
  0x80   :  { %5752 = dma.done.wait [#allocation9], 512  }
  0x81   :  { %5753 = vsyncadd [#allocation9], 4294966784 }
  0x82   :  { %5754 = dma.done.wait [#allocation12], 544  }
  0x83   :  { %5755 = vsyncadd [#allocation12], 4294966752 }
  0x84   :  { %5756 = dma.done.wait [#allocation15], 1056  }
  0x85   :  { %5757 = vsyncadd [#allocation15], 4294966240 }
  0x86   :  { %5758 = dma.done.wait [#allocation18], 2064  }
  0x87   :  { %5759 = vsyncadd [#allocation18], 4294965232 }
  0x88   :  { %5760 = dma.done.wait [#allocation21], 32  }
  0x89   :  { %5761 = vsyncadd [#allocation21], 4294967264 }
  0x8a   :  { %5762 = dma.done.wait [#allocation24], 16  }
  0x8b   :  { %5763 = vsyncadd [#allocation24], 4294967280  ;;  %v5780_v0 = vmov 0   ;;  %v5781_v1 = vmov 0.0   ;;  %v5103_v2 = vld [vmem:[#allocation8 + $0x14] ss:$8 sps:$4 sm:$0xff]   ;;  %v216_v23 = vlaneseq }
  0x8c   :  { %287 = vmatprep.mubr.bf16.mxu0 %v5780_v0  ;;  %386 = vmatprep.mubr.f32.mxu1 %v5781_v1  ;;  %v5105_v3 = vld [vmem:[#allocation8 + $0x10] ss:$8 sps:$4 sm:$0xff]   ;;  %s7504_s2 = sld [smem:[#allocation39_spill]]  ;;  %v5106_v6 = vld [vmem:[#allocation8 + $0x4] ss:$8 sps:$4 sm:$0xff]   ;;  %vm251_vm0 = vcmask 261120  }
  0x8d   :  { %267 = vmatprep.subr.bf16.mxu0 %v5103_v2  ;;  %v5108_v8 = vld [vmem:[#allocation8] ss:$8 sps:$4 sm:$0xff]   ;;  %s7505_s0 = sld [smem:[#allocation33_spill]]  ;;  %v6101_v24 = vshrl.u32 %v216_v23, 7  ;;  %s5782_s8 = smov 64   ;;  %vm452_vm1 = vcmask 254976  }
  0x8e   :  { %268 = vmatpush1.bf16.msra.mxu0 %v5105_v3  ;;  %s7506_s7 = sld [smem:[#allocation38_spill]]  ;;  %vm318_vm2 = vcmask 523264   ;;  %vm609_vm3 = vcmask 257026   ;;  %vm767_vm4 = vcmask 259076   ;;  %vm922_vm5 = vcmask 261126   ;;  %s5786_s13 = smov [#allocation25]  }
  0x8f   :  { %269 = vmatprep.subr.bf16.mxu0 %v5106_v6  ;;  %v6104_v25 = vsub.s32 0, %v6101_v24  ;;  %v6110_v27 = vsub.s32 1, %v6101_v24  ;;  %s7507_s30 = sld [smem:[#allocation40_spill]]  ;;  %vm459_vm6 = vcmask 523526   ;;  %vm616_vm7 = vcmask 521476   ;;  %s4890_s21 = sshll.u32 %s5786_s13, 4  ;;  %s4891_s21 = int_to_ptr.vmem [resolvable:$true] %s4890_s21 }
  0x90   :  { %s7508_s10 = sld [smem:[#allocation42_spill]]  ;;  %vm774_vm8 = vcmask 519426   ;;  %vm929_vm9 = vcmask 517376   ;;  %vm2945_vm10 = vcmask 517120   ;;  %vm3024_vm11 = vcmask 1041409   ;;  %p5737_p9 = scmp.lt.s32.totalorder %s4891_s21, %s4891_s21 }
  0x91   :  { %s7509_s5 = sld [smem:[#allocation41_spill]]  ;;  %vm3026_vm12 = vcmask 1042434   ;;  %vm3028_vm13 = vcmask 1043459   ;;  %vm4639_vm15 = vcmask 11264  }
  0x92   :  { %v5966_v4 = vld [vmem:[%s7504_s2 + $0x78] sm:$0xff]  ;;  %v5971_v5 = vld [vmem:[%s7504_s2 + $0x70] sm:$0xff]  ;;  %v5978_v7 = vld [vmem:[%s7504_s2 + $0x68] sm:$0xff]  ;;  %270 = vmatpush1.bf16.msra.mxu0 %v5108_v8  ;;  %s7510_s1 = sld [smem:[#allocation35_spill]] }
  0x93   :  { %338 = vmatprep.subr.mxu1 %v5966_v4  ;;  %v5983_v9 = vld [vmem:[%s7504_s2 + $0x60] sm:$0xff]  ;;  %v5989_v10 = vld [vmem:[%s7504_s2 + $0x58] sm:$0xff]  ;;  %v5994_v11 = vld [vmem:[%s7504_s2 + $0x50] sm:$0xff]  ;;  %485 = vmatprep.subr.mxu0 %v5966_v4  ;;  %s7511_s29 = sld [smem:[#allocation36_spill]] }
  0x94   :  { %339 = vmatpush1.msra.mxu1 %v5971_v5  ;;  %v6000_v12 = vld [vmem:[%s7504_s2 + $0x48] sm:$0xff]  ;;  %v5109_v13 = vld [vmem:[%s7505_s0] sm:$0xff]   ;;  %v6015_v15 = vld [vmem:[%s7504_s2 + $0x38] sm:$0xff]  ;;  %s5783_s0 = smov 32  }
  0x95   :  { %340 = vmatprep.subr.mxu1 %v5978_v7  ;;  %v6009_v14 = vld [vmem:[%s7504_s2 + $0x40] sm:$0xff]  ;;  %v6021_v16 = vld [vmem:[%s7504_s2 + $0x30] sm:$0xff]  ;;  %v6026_v17 = vld [vmem:[%s7504_s2 + $0x28] sm:$0xff]  ;;  %4917 = vmatmul.mubr.msk.bf16.vlgmr.msra.gmra.mxu0 %vm251_vm0, %v5109_v13 }
  0x96   :  { %341 = vmatpush1.msra.mxu1 %v5983_v9  ;;  %v6031_v18 = vld [vmem:[%s7504_s2 + $0x20] sm:$0xff]  ;;  %v6038_v19 = vld [vmem:[%s7504_s2 + $0x18] sm:$0xff]  ;;  %v6045_v20 = vld [vmem:[%s7504_s2 + $0x10] sm:$0xff]  ;;  %486 = vmatpush1.msra.mxu0 %v5971_v5 }
  0x97   :  { %342 = vmatprep.subr.mxu1 %v5989_v10  ;;  %v6051_v21 = vld [vmem:[%s7504_s2 + $0x8] sm:$0xff]  ;;  %v6058_v22 = vld [vmem:[%s7504_s2] sm:$0xff]  ;;  %487 = vmatprep.subr.mxu0 %v5978_v7 }
  0x98   :  { %343 = vmatpush1.msra.mxu1 %v5994_v11  ;;  %488 = vmatpush1.msra.mxu0 %v5983_v9  ;;  %v214_v26 = vld [vmem:[%s7506_s7] sm:$0x3] }
  0x99   :  { %344 = vmatprep.subr.mxu1 %v6000_v12  ;;  %489 = vmatprep.subr.mxu0 %v5989_v10  ;;  %v219_v28 = vrot.slane %v214_v26, %v6104_v25  ;;  %v223_v29 = vrot.slane %v214_v26, %v6110_v27 }
  0x9a   :  { %345 = vmatpush1.msra.mxu1 %v6009_v14  ;;  %490 = vmatpush1.msra.mxu0 %v5994_v11 }
  0x9b   :  { %346 = vmatprep.subr.mxu1 %v6015_v15  ;;  %491 = vmatprep.subr.mxu0 %v6000_v12 }
  0x9c   :  { %347 = vmatpush1.msra.mxu1 %v6021_v16  ;;  %492 = vmatpush1.msra.mxu0 %v6009_v14 }
  0x9d   :  { %348 = vmatprep.subr.mxu1 %v6026_v17  ;;  %493 = vmatprep.subr.mxu0 %v6015_v15 }
  0x9e   :  { %349 = vmatpush1.msra.mxu1 %v6031_v18  ;;  %494 = vmatpush1.msra.mxu0 %v6021_v16 }
  0x9f   :  { %350 = vmatprep.subr.mxu1 %v6038_v19  ;;  %533 = vmatprep.mubr.f32.mxu0 %v5781_v1 }
  0xa0   :  { %351 = vmatpush1.msra.mxu1 %v6045_v20  ;;  %495 = vmatprep.subr.mxu0 %v6026_v17 }
  0xa1   :  { %352 = vmatprep.subr.mxu1 %v6051_v21  ;;  %496 = vmatpush1.msra.mxu0 %v6031_v18 }
  0xa2   :  { %353 = vmatpush1.msra.mxu1 %v6058_v22  ;;  %497 = vmatprep.subr.mxu0 %v6038_v19 }
  0xa3   :  { %387 = vmatmul.mubr.f32.vlgmr.msra.gmra.mxu1 %v5781_v1  ;;  %643 = vmatprep.subr.mxu1 %v5966_v4 }
  0xa4   :  { %644 = vmatpush1.msra.mxu1 %v5971_v5  ;;  %498 = vmatpush1.msra.mxu0 %v6045_v20 }
  0xa5   :  { %645 = vmatprep.subr.mxu1 %v5978_v7  ;;  %499 = vmatprep.subr.mxu0 %v6051_v21 }
  0xa6   :  { %646 = vmatpush1.msra.mxu1 %v5983_v9  ;;  %500 = vmatpush1.msra.mxu0 %v6058_v22 }
  0xa7   :  { %647 = vmatprep.subr.mxu1 %v5989_v10  ;;  %691 = vmatprep.mubr.f32.mxu1 %v5781_v1 }
  0xa8   :  { %648 = vmatpush1.msra.mxu1 %v5994_v11  ;;  %801 = vmatprep.subr.mxu0 %v5966_v4 }
  0xa9   :  { %649 = vmatprep.subr.mxu1 %v6000_v12 }
  0xaa   :  { %650 = vmatpush1.msra.mxu1 %v6009_v14 }
  0xab   :  { %651 = vmatprep.subr.mxu1 %v6015_v15 }
  0xac   :  { %652 = vmatpush1.msra.mxu1 %v6021_v16 }
  0xad   :  { %653 = vmatprep.subr.mxu1 %v6026_v17 }
  0xae   :  { %654 = vmatpush1.msra.mxu1 %v6031_v18 }
  0xaf   :  { %655 = vmatprep.subr.mxu1 %v6038_v19 }
  0xb0   :  { %656 = vmatpush1.msra.mxu1 %v6045_v20 }
  0xb1   :  { %657 = vmatprep.subr.mxu1 %v6051_v21 }
  0xb2   :  { %658 = vmatpush1.msra.mxu1 %v6058_v22 }
  0xb3   :  { %956 = vmatprep.subr.mxu1 %v5966_v4 }
 0x155   :  { %v289_v30 = vpop.f32.mrf.mxu0 }
 0x156   :  { %v290_v31 = vadd.f32 %v289_v30, %v219_v28 }
 0x157   :  { %v291_v32 = vpop.f32.mrf.mxu0 }
 0x158   :  { %298 = vst [vmem:[#allocation2 + $0x10] sm:$0xff] %v290_v31  ;;  %v292_v33 = vadd.f32 %v291_v32, %v223_v29 }
 0x159   :  { %v293_v34 = vpop.f32.mrf.mxu0 }
 0x15a   :  { %299 = vst [vmem:[#allocation2] sm:$0xff] %v292_v33  ;;  %v294_v35 = vadd.f32 %v293_v34, %v219_v28 }
 0x15b   :  { %v295_v36 = vpop.f32.mrf.mxu0 }
 0x15c   :  { %300 = vst [vmem:[#allocation2 + $0x18] sm:$0xff] %v294_v35  ;;  %v296_v37 = vadd.f32 %v295_v36, %v223_v29 }
 0x15e   :  { %301 = vst [vmem:[#allocation2 + $0x8] sm:$0xff] %v296_v37 }
 0x15f   :  { %v393_v41 = vld [vmem:[#allocation2 + $0x10] sm:$0x3]  ;;  %v540_v35 = vld [vmem:[#allocation2 + $0x10] sm:$0xc] }
 0x163   :  { %v388_v38 = vpop.f32.mrf.mxu1 }
 0x164   :  { %v395_v44 = vadd.f32 %v393_v41, %v388_v38 }
 0x165   :  { %v390_v39 = vpop.f32.mrf.mxu1  ;;  %v394_v42 = vld [vmem:[#allocation2 + $0x8] sm:$0xc0] }
 0x166   :  { %v397_v40 = vrot.slane %v390_v39, 2  ;;  %v4918_v48 = vmul.f32 -1.442695, %v395_v44  ;;  %v541_v39 = vld [vmem:[#allocation2 + $0x8] sm:$0x30] }
 0x168   :  { %v399_v43 = vadd.f32 %v397_v40, %v394_v42 }
 0x16a   :  { %5140 = vtanh.f32 %v399_v43  ;;  %v4919_v47 = vmul.f32 -1.442695, %v399_v43 }
 0x16b   :  { %5142 = vtanh.f32 %v395_v44 }
 0x16c   :  { %5144 = vpow2.f32 %v4919_v47 }
 0x16d   :  { %5146 = vpow2.f32 %v4918_v48 }
 0x177   :  { %v5141_v45 = vpop.eup %5140 }
 0x178   :  { %427 = vrot.lane.b32.xlu0 %v5141_v45, %s5782_s8  ;;  %v5143_v46 = vpop.eup %5142 }
 0x179   :  { %v5145_v49 = vpop.eup %5144 }
 0x17a   :  { %v410_v50 = vadd.f32 1.0, %v5145_v49  ;;  %v5147_v51 = vpop.eup %5146 }
 0x17b   :  { %v403_v52 = vadd.f32 1.0, %v5147_v51 }
 0x17c   :  { %416 = vrot.lane.b32.xlu0 %v5143_v46, %s5782_s8  ;;  %5148 = vrcp.f32 %v410_v50 }
 0x17d   :  { %5150 = vrcp.f32 %v403_v52 }
 0x189   :  { %v5149_v53 = vpop.eup %5148 }
 0x18a   :  { %v5151_v56 = vpop.eup %5150  ;;  %v425_v59 = vmul.f32 0.0, %v5149_v53 }
 0x18b   :  { %v414_v62 = vmul.f32 0.0, %v5151_v56 }
 0x1ea   :  { %v428_v54 = vpop.permute.xlu0 %427 }
 0x1eb   :  { %v430_v55 = vmul.f32 %v5149_v53, %v428_v54 }
 0x1ed   :  { %432 = vrot.lane.b32.xlu1 %v430_v55, %s5783_s0 }
 0x1ee   :  { %v417_v57 = vpop.permute.xlu0 %416 }
 0x1ef   :  { %v419_v58 = vmul.f32 %v5151_v56, %v417_v57 }
 0x1f1   :  { %421 = vrot.lane.b32.xlu1 %v419_v58, %s5783_s0 }
 0x25f   :  { %v433_v60 = vpop.permute.xlu1 %432 }
 0x260   :  { %v6118_v61 = vadd.f32 %v433_v60, %v425_v59 }
 0x262   :  { %5152 = vtanh.f32 %v6118_v61  ;;  %v579_v57 = vrot.slane %v6118_v61, 2 }
 0x263   :  { %v422_v63 = vpop.permute.xlu1 %421 }
 0x264   :  { %v6121_v2 = vadd.f32 %v422_v63, %v414_v62 }
 0x266   :  { %5154 = vtanh.f32 %v6121_v2  ;;  %v565_v55 = vrot.slane %v6121_v2, 6 }
 0x26f   :  { %v5153_v3 = vpop.eup %5152 }
 0x270   :  { %444 = vrot.lane.b32.xlu0 %v5153_v3, %s5782_s8 }
 0x273   :  { %v5155_v6 = vpop.eup %5154 }
 0x274   :  { %438 = vrot.lane.b32.xlu1 %v5155_v6, %s5782_s8 }
 0x2e2   :  { %v445_v8 = vpop.permute.xlu0 %444 }
 0x2e3   :  { %v6126_v13 = vmul.f32 %v5149_v53, %v445_v8 }
 0x2e5   :  { %v461_v26 = vrot.slane %v6126_v13, 6 }
 0x2e6   :  { %v439_v28 = vpop.permute.xlu1 %438 }
 0x2e7   :  { %v441_v29 = vmul.f32 %v5151_v56, %v439_v28  ;;  %462 = vrot.lane.b32.xlu1 %v461_v26, %s5782_s8 }
 0x2e9   :  { %449 = vrot.lane.b32.xlu0 %v441_v29, %s5783_s0 }
 0x359   :  { %v463_v30 = vpop.permute.xlu1 %462 }
 0x35b   :  { %v450_v31 = vpop.permute.xlu0 %449 }
 0x35c   :  { %453 = vst.msk [vmem:[#allocation3] sm:$0x3] %vm452_vm1, %v450_v31  ;;  %v465_v32 = vsel %vm251_vm0, %v450_v31, %v463_v30 }
 0x35d   :  { %4920 = vmatmul.mubr.msk.f32.vlgmr.msra.gmra.mxu0 %vm318_vm2, %v465_v32 }
 0x35e   :  { %802 = vmatpush1.msra.mxu0 %v5971_v5  ;;  %849 = vmatprep.mubr.f32.mxu0 %v5781_v1 }
 0x35f   :  { %803 = vmatprep.subr.mxu0 %v5978_v7 }
 0x360   :  { %804 = vmatpush1.msra.mxu0 %v5983_v9 }
 0x361   :  { %805 = vmatprep.subr.mxu0 %v5989_v10 }
 0x362   :  { %806 = vmatpush1.msra.mxu0 %v5994_v11 }
 0x363   :  { %807 = vmatprep.subr.mxu0 %v6000_v12 }
 0x364   :  { %808 = vmatpush1.msra.mxu0 %v6009_v14 }
 0x365   :  { %809 = vmatprep.subr.mxu0 %v6015_v15 }
 0x366   :  { %810 = vmatpush1.msra.mxu0 %v6021_v16 }
 0x367   :  { %811 = vmatprep.subr.mxu0 %v6026_v17 }
 0x368   :  { %812 = vmatpush1.msra.mxu0 %v6031_v18 }
 0x369   :  { %813 = vmatprep.subr.mxu0 %v6038_v19 }
 0x36a   :  { %814 = vmatpush1.msra.mxu0 %v6045_v20 }
 0x36b   :  { %815 = vmatprep.subr.mxu0 %v6051_v21 }
 0x36c   :  { %816 = vmatpush1.msra.mxu0 %v6058_v22 }
 0x36d   :  { %1106 = vmatprep.subr.mxu0 %v5966_v4 }
 0x41d   :  { %v535_v33 = vpop.f32.mrf.mxu0 }
 0x41e   :  { %v543_v34 = vrot.slane %v535_v33, 6 }
 0x41f   :  { %v537_v36 = vpop.f32.mrf.mxu0 }
 0x420   :  { %v545_v37 = vadd.f32 %v543_v34, %v540_v35  ;;  %v547_v38 = vrot.slane %v537_v36, 4  ;;  %v698_v35 = vld [vmem:[#allocation2 + $0x10] sm:$0x30] }
 0x422   :  { %5156 = vtanh.f32 %v545_v37  ;;  %v549_v40 = vadd.f32 %v547_v38, %v541_v39  ;;  %v4921_v43 = vmul.f32 -1.442695, %v545_v37  ;;  %v699_v39 = vld [vmem:[#allocation2 + $0x8] sm:$0xc] }
 0x424   :  { %5158 = vtanh.f32 %v549_v40  ;;  %v4922_v44 = vmul.f32 -1.442695, %v549_v40 }
 0x425   :  { %5160 = vpow2.f32 %v4921_v43 }
 0x426   :  { %5162 = vpow2.f32 %v4922_v44 }
 0x42f   :  { %v5157_v41 = vpop.eup %5156 }
 0x430   :  { %569 = vrot.lane.b32.xlu1 %v5157_v41, %s5782_s8 }
 0x431   :  { %v5159_v42 = vpop.eup %5158 }
 0x432   :  { %583 = vrot.lane.b32.xlu0 %v5159_v42, %s5782_s8  ;;  %v5161_v45 = vpop.eup %5160 }
 0x433   :  { %v5163_v46 = vpop.eup %5162  ;;  %v553_v47 = vadd.f32 1.0, %v5161_v45 }
 0x434   :  { %v560_v48 = vadd.f32 1.0, %v5163_v46 }
 0x435   :  { %5164 = vrcp.f32 %v553_v47 }
 0x436   :  { %5166 = vrcp.f32 %v560_v48 }
 0x442   :  { %v5165_v49 = vpop.eup %5164 }
 0x443   :  { %v5167_v52 = vpop.eup %5166  ;;  %v567_v56 = vmul.f32 %v5165_v49, %v565_v55 }
 0x444   :  { %v581_v60 = vmul.f32 %v5167_v52, %v579_v57 }
 0x4a2   :  { %v570_v50 = vpop.permute.xlu1 %569 }
 0x4a3   :  { %v572_v51 = vmul.f32 %v5165_v49, %v570_v50 }
 0x4a4   :  { %v584_v53 = vpop.permute.xlu0 %583 }
 0x4a5   :  { %574 = vrot.lane.b32.xlu1 %v572_v51, %s5783_s0  ;;  %v586_v54 = vmul.f32 %v5167_v52, %v584_v53 }
 0x4a7   :  { %588 = vrot.lane.b32.xlu0 %v586_v54, %s5783_s0 }
 0x517   :  { %v575_v58 = vpop.permute.xlu1 %574 }
 0x518   :  { %v6157_v59 = vadd.f32 %v575_v58, %v567_v56 }
 0x519   :  { %v589_v62 = vpop.permute.xlu0 %588 }
 0x51a   :  { %5168 = vtanh.f32 %v6157_v59  ;;  %v6160_v63 = vadd.f32 %v589_v62, %v581_v60  ;;  %v723_v55 = vrot.slane %v6157_v59, 6 }
 0x51c   :  { %5170 = vtanh.f32 %v6160_v63  ;;  %v737_v57 = vrot.slane %v6160_v63, 2 }
 0x527   :  { %v5169_v3 = vpop.eup %5168 }
 0x528   :  { %594 = vrot.lane.b32.xlu1 %v5169_v3, %s5782_s8 }
 0x529   :  { %v5171_v6 = vpop.eup %5170 }
 0x52a   :  { %600 = vrot.lane.b32.xlu0 %v5171_v6, %s5782_s8 }
 0x59a   :  { %v595_v2 = vpop.permute.xlu1 %594 }
 0x59b   :  { %v597_v8 = vmul.f32 %v5165_v49, %v595_v2 }
 0x59c   :  { %v601_v61 = vpop.permute.xlu0 %600 }
 0x59d   :  { %605 = vrot.lane.b32.xlu0 %v597_v8, %s5783_s0  ;;  %v6166_v26 = vmul.f32 %v5167_v52, %v601_v61 }
 0x59f   :  { %v618_v28 = vrot.slane %v6166_v26, 2 }
 0x5a1   :  { %619 = vrot.lane.b32.xlu1 %v618_v28, %s5782_s8 }
 0x60f   :  { %v606_v29 = vpop.permute.xlu0 %605 }
 0x610   :  { %610 = vst.msk [vmem:[#allocation3] sm:$0xc] %vm609_vm3, %v606_v29 }
 0x613   :  { %v620_v30 = vpop.permute.xlu1 %619 }
 0x614   :  { %v622_v31 = vsel %vm251_vm0, %v606_v29, %v620_v30 }
 0x615   :  { %v624_v32 = vrot.slane %v622_v31, 2 }
 0x617   :  { %4923 = vmatmul.mubr.msk.f32.vlgmr.msra.gmra.mxu1 %vm318_vm2, %v624_v32 }
 0x618   :  { %957 = vmatpush1.msra.mxu1 %v5971_v5  ;;  %1004 = vmatprep.mubr.f32.mxu1 %v5781_v1 }
 0x619   :  { %958 = vmatprep.subr.mxu1 %v5978_v7 }
 0x61a   :  { %959 = vmatpush1.msra.mxu1 %v5983_v9 }
 0x61b   :  { %960 = vmatprep.subr.mxu1 %v5989_v10 }
 0x61c   :  { %961 = vmatpush1.msra.mxu1 %v5994_v11 }
 0x61d   :  { %962 = vmatprep.subr.mxu1 %v6000_v12 }
 0x61e   :  { %963 = vmatpush1.msra.mxu1 %v6009_v14 }
 0x61f   :  { %964 = vmatprep.subr.mxu1 %v6015_v15 }
 0x620   :  { %965 = vmatpush1.msra.mxu1 %v6021_v16 }
 0x621   :  { %966 = vmatprep.subr.mxu1 %v6026_v17 }
 0x622   :  { %967 = vmatpush1.msra.mxu1 %v6031_v18 }
 0x623   :  { %968 = vmatprep.subr.mxu1 %v6038_v19 }
 0x624   :  { %969 = vmatpush1.msra.mxu1 %v6045_v20 }
 0x625   :  { %970 = vmatprep.subr.mxu1 %v6051_v21 }
 0x626   :  { %971 = vmatpush1.msra.mxu1 %v6058_v22 }
 0x627   :  { %1260 = vmatprep.subr.mxu1 %v5966_v4 }
 0x6d7   :  { %v693_v33 = vpop.f32.mrf.mxu1 }
 0x6d8   :  { %v701_v34 = vrot.slane %v693_v33, 4 }
 0x6d9   :  { %v695_v36 = vpop.f32.mrf.mxu1 }
 0x6da   :  { %v703_v37 = vadd.f32 %v701_v34, %v698_v35  ;;  %v705_v38 = vrot.slane %v695_v36, 6  ;;  %v856_v36 = vld [vmem:[#allocation2 + $0x10] sm:$0xc0] }
 0x6dc   :  { %5172 = vtanh.f32 %v703_v37  ;;  %v707_v40 = vadd.f32 %v705_v38, %v699_v39  ;;  %v4924_v43 = vmul.f32 -1.442695, %v703_v37  ;;  %v857_v38 = vld [vmem:[#allocation2 + $0x8] sm:$0x3] }
 0x6de   :  { %5174 = vtanh.f32 %v707_v40  ;;  %v4925_v44 = vmul.f32 -1.442695, %v707_v40 }
 0x6df   :  { %5176 = vpow2.f32 %v4924_v43 }
 0x6e0   :  { %5178 = vpow2.f32 %v4925_v44 }
 0x6e9   :  { %v5173_v41 = vpop.eup %5172 }
 0x6ea   :  { %727 = vrot.lane.b32.xlu1 %v5173_v41, %s5782_s8 }
 0x6eb   :  { %v5175_v42 = vpop.eup %5174 }
 0x6ec   :  { %741 = vrot.lane.b32.xlu0 %v5175_v42, %s5782_s8  ;;  %v5177_v45 = vpop.eup %5176 }
 0x6ed   :  { %v5179_v46 = vpop.eup %5178  ;;  %v711_v47 = vadd.f32 1.0, %v5177_v45 }
 0x6ee   :  { %v718_v48 = vadd.f32 1.0, %v5179_v46 }
 0x6ef   :  { %5180 = vrcp.f32 %v711_v47 }
 0x6f0   :  { %5182 = vrcp.f32 %v718_v48 }
 0x6fc   :  { %v5181_v49 = vpop.eup %5180 }
 0x6fd   :  { %v5183_v52 = vpop.eup %5182  ;;  %v725_v56 = vmul.f32 %v5181_v49, %v723_v55 }
 0x6fe   :  { %v739_v62 = vmul.f32 %v5183_v52, %v737_v57 }
 0x75c   :  { %v728_v50 = vpop.permute.xlu1 %727 }
 0x75d   :  { %v730_v51 = vmul.f32 %v5181_v49, %v728_v50 }
 0x75e   :  { %v742_v53 = vpop.permute.xlu0 %741 }
 0x75f   :  { %732 = vrot.lane.b32.xlu1 %v730_v51, %s5783_s0  ;;  %v744_v54 = vmul.f32 %v5183_v52, %v742_v53 }
 0x761   :  { %746 = vrot.lane.b32.xlu0 %v744_v54, %s5783_s0 }
 0x7d1   :  { %v733_v58 = vpop.permute.xlu1 %732 }
 0x7d2   :  { %v6196_v60 = vadd.f32 %v733_v58, %v725_v56 }
 0x7d3   :  { %v747_v3 = vpop.permute.xlu0 %746 }
 0x7d4   :  { %5184 = vtanh.f32 %v6196_v60  ;;  %v6199_v6 = vadd.f32 %v747_v3, %v739_v62  ;;  %v878_v54 = vrot.slane %v6196_v60, 6 }
 0x7d6   :  { %5186 = vtanh.f32 %v6199_v6  ;;  %v892_v55 = vrot.slane %v6199_v6, 2 }
 0x7e1   :  { %v5185_v2 = vpop.eup %5184 }
 0x7e2   :  { %752 = vrot.lane.b32.xlu1 %v5185_v2, %s5782_s8 }
 0x7e3   :  { %v5187_v8 = vpop.eup %5186 }
 0x7e4   :  { %758 = vrot.lane.b32.xlu0 %v5187_v8, %s5782_s8 }
 0x854   :  { %v753_v59 = vpop.permute.xlu1 %752 }
 0x855   :  { %v755_v61 = vmul.f32 %v5181_v49, %v753_v59 }
 0x856   :  { %v759_v63 = vpop.permute.xlu0 %758 }
 0x857   :  { %763 = vrot.lane.b32.xlu0 %v755_v61, %s5783_s0  ;;  %v6205_v28 = vmul.f32 %v5183_v52, %v759_v63 }
 0x859   :  { %v776_v29 = vrot.slane %v6205_v28, 6 }
 0x85b   :  { %777 = vrot.lane.b32.xlu1 %v776_v29, %s5782_s8 }
 0x8c9   :  { %v764_v30 = vpop.permute.xlu0 %763 }
 0x8ca   :  { %768 = vst.msk [vmem:[#allocation3] sm:$0x30] %vm767_vm4, %v764_v30 }
 0x8cd   :  { %v778_v31 = vpop.permute.xlu1 %777 }
 0x8ce   :  { %v780_v32 = vsel %vm251_vm0, %v764_v30, %v778_v31 }
 0x8cf   :  { %v782_v33 = vrot.slane %v780_v32, 4 }
 0x8d1   :  { %4926 = vmatmul.mubr.msk.f32.vlgmr.msra.gmra.mxu0 %vm318_vm2, %v782_v33 }
 0x8d2   :  { %1107 = vmatpush1.msra.mxu0 %v5971_v5  ;;  %1154 = vmatprep.mubr.f32.mxu0 %v5781_v1 }
 0x8d3   :  { %1108 = vmatprep.subr.mxu0 %v5978_v7 }
 0x8d4   :  { %1109 = vmatpush1.msra.mxu0 %v5983_v9 }
 0x8d5   :  { %1110 = vmatprep.subr.mxu0 %v5989_v10 }
 0x8d6   :  { %1111 = vmatpush1.msra.mxu0 %v5994_v11 }
 0x8d7   :  { %1112 = vmatprep.subr.mxu0 %v6000_v12 }
 0x8d8   :  { %1113 = vmatpush1.msra.mxu0 %v6009_v14 }
 0x8d9   :  { %1114 = vmatprep.subr.mxu0 %v6015_v15 }
 0x8da   :  { %1115 = vmatpush1.msra.mxu0 %v6021_v16 }
 0x8db   :  { %1116 = vmatprep.subr.mxu0 %v6026_v17 }
 0x8dc   :  { %1117 = vmatpush1.msra.mxu0 %v6031_v18 }
 0x8dd   :  { %1118 = vmatprep.subr.mxu0 %v6038_v19 }
 0x8de   :  { %1119 = vmatpush1.msra.mxu0 %v6045_v20 }
 0x8df   :  { %1120 = vmatprep.subr.mxu0 %v6051_v21 }
 0x8e0   :  { %1121 = vmatpush1.msra.mxu0 %v6058_v22 }
 0x8e1   :  { %1414 = vmatprep.subr.mxu0 %v5966_v4 }
 0x991   :  { %v851_v34 = vpop.f32.mrf.mxu0 }
 0x992   :  { %v859_v35 = vrot.slane %v851_v34, 2 }
 0x993   :  { %v853_v37 = vpop.f32.mrf.mxu0 }
 0x994   :  { %v861_v39 = vadd.f32 %v859_v35, %v856_v36  ;;  %v862_v40 = vadd.f32 %v857_v38, %v853_v37  ;;  %v1011_v35 = vld [vmem:[#allocation2 + $0x18] sm:$0x3] }
 0x996   :  { %5188 = vtanh.f32 %v861_v39  ;;  %v4927_v43 = vmul.f32 -1.442695, %v861_v39  ;;  %v4928_v44 = vmul.f32 -1.442695, %v862_v40  ;;  %v1012_v39 = vld [vmem:[#allocation2] sm:$0xc0] }
 0x997   :  { %5190 = vtanh.f32 %v862_v40 }
 0x998   :  { %5192 = vpow2.f32 %v4927_v43 }
 0x999   :  { %5194 = vpow2.f32 %v4928_v44 }
 0x9a3   :  { %v5189_v41 = vpop.eup %5188 }
 0x9a4   :  { %v5191_v42 = vpop.eup %5190  ;;  %882 = vrot.lane.b32.xlu1 %v5189_v41, %s5782_s8 }
 0x9a5   :  { %896 = vrot.lane.b32.xlu0 %v5191_v42, %s5782_s8  ;;  %v5193_v4 = vpop.eup %5192 }
 0x9a6   :  { %v5195_v45 = vpop.eup %5194  ;;  %v866_v46 = vadd.f32 1.0, %v5193_v4 }
 0x9a7   :  { %v873_v47 = vadd.f32 1.0, %v5195_v45 }
 0x9a8   :  { %5196 = vrcp.f32 %v866_v46 }
 0x9a9   :  { %5198 = vrcp.f32 %v873_v47 }
 0x9b5   :  { %v5197_v48 = vpop.eup %5196 }
 0x9b6   :  { %v5199_v50 = vpop.eup %5198  ;;  %v880_v56 = vmul.f32 %v5197_v48, %v878_v54 }
 0x9b7   :  { %v894_v58 = vmul.f32 %v5199_v50, %v892_v55 }
 0xa16   :  { %v883_v49 = vpop.permute.xlu1 %882 }
 0xa17   :  { %v885_v51 = vmul.f32 %v5197_v48, %v883_v49  ;;  %v897_v52 = vpop.permute.xlu0 %896 }
 0xa18   :  { %v899_v53 = vmul.f32 %v5199_v50, %v897_v52 }
 0xa19   :  { %887 = vrot.lane.b32.xlu1 %v885_v51, %s5783_s0 }
 0xa1a   :  { %901 = vrot.lane.b32.xlu0 %v899_v53, %s5783_s0 }
 0xa8b   :  { %v888_v57 = vpop.permute.xlu1 %887 }
 0xa8c   :  { %v6235_v62 = vadd.f32 %v888_v57, %v880_v56  ;;  %v902_v3 = vpop.permute.xlu0 %901 }
 0xa8d   :  { %v6237_v2 = vadd.f32 %v902_v3, %v894_v58 }
 0xa8e   :  { %5200 = vtanh.f32 %v6235_v62  ;;  %v1033_v54 = vrot.slane %v6235_v62, 6 }
 0xa8f   :  { %5202 = vtanh.f32 %v6237_v2  ;;  %v1047_v57 = vrot.slane %v6237_v2, 2 }
 0xa9b   :  { %v5201_v8 = vpop.eup %5200 }
 0xa9c   :  { %v5203_v59 = vpop.eup %5202  ;;  %907 = vrot.lane.b32.xlu1 %v5201_v8, %s5782_s8 }
 0xa9d   :  { %913 = vrot.lane.b32.xlu0 %v5203_v59, %s5782_s8 }
 0xb0e   :  { %v908_v60 = vpop.permute.xlu1 %907 }
 0xb0f   :  { %v910_v6 = vmul.f32 %v5197_v48, %v908_v60  ;;  %v914_v61 = vpop.permute.xlu0 %913 }
 0xb10   :  { %v6243_v63 = vmul.f32 %v5199_v50, %v914_v61 }
 0xb11   :  { %918 = vrot.lane.b32.xlu0 %v910_v6, %s5783_s0 }
 0xb12   :  { %v931_v29 = vrot.slane %v6243_v63, 2 }
 0xb14   :  { %932 = vrot.lane.b32.xlu1 %v931_v29, %s5782_s8 }
 0xb83   :  { %v919_v30 = vpop.permute.xlu0 %918 }
 0xb84   :  { %923 = vst.msk [vmem:[#allocation3] sm:$0xc0] %vm922_vm5, %v919_v30 }
 0xb86   :  { %v933_v31 = vpop.permute.xlu1 %932 }
 0xb87   :  { %v935_v32 = vsel %vm251_vm0, %v919_v30, %v933_v31 }
 0xb88   :  { %v937_v33 = vrot.slane %v935_v32, 6 }
 0xb8a   :  { %4929 = vmatmul.mubr.msk.f32.vlgmr.msra.gmra.mxu1 %vm318_vm2, %v937_v33 }
 0xb8b   :  { %1261 = vmatpush1.msra.mxu1 %v5971_v5  ;;  %1308 = vmatprep.mubr.f32.mxu1 %v5781_v1 }
 0xb8c   :  { %1262 = vmatprep.subr.mxu1 %v5978_v7 }
 0xb8d   :  { %1263 = vmatpush1.msra.mxu1 %v5983_v9 }
 0xb8e   :  { %1264 = vmatprep.subr.mxu1 %v5989_v10 }
 0xb8f   :  { %1265 = vmatpush1.msra.mxu1 %v5994_v11 }
 0xb90   :  { %1266 = vmatprep.subr.mxu1 %v6000_v12 }
 0xb91   :  { %1267 = vmatpush1.msra.mxu1 %v6009_v14 }
 0xb92   :  { %1268 = vmatprep.subr.mxu1 %v6015_v15 }
 0xb93   :  { %1269 = vmatpush1.msra.mxu1 %v6021_v16 }
 0xb94   :  { %1270 = vmatprep.subr.mxu1 %v6026_v17 }
 0xb95   :  { %1271 = vmatpush1.msra.mxu1 %v6031_v18 }
 0xb96   :  { %1272 = vmatprep.subr.mxu1 %v6038_v19 }
 0xb97   :  { %1273 = vmatpush1.msra.mxu1 %v6045_v20 }
 0xb98   :  { %1274 = vmatprep.subr.mxu1 %v6051_v21 }
 0xb99   :  { %1275 = vmatpush1.msra.mxu1 %v6058_v22 }
 0xc4a   :  { %v1006_v34 = vpop.f32.mrf.mxu1 }
 0xc4b   :  { %v1013_v36 = vadd.f32 %v1011_v35, %v1006_v34 }
 0xc4c   :  { %v1008_v37 = vpop.f32.mrf.mxu1 }
 0xc4d   :  { %5204 = vtanh.f32 %v1013_v36  ;;  %v1015_v38 = vrot.slane %v1008_v37, 2  ;;  %v4930_v43 = vmul.f32 -1.442695, %v1013_v36 }
 0xc4f   :  { %v1017_v40 = vadd.f32 %v1015_v38, %v1012_v39 }
 0xc51   :  { %5206 = vtanh.f32 %v1017_v40  ;;  %v4931_v44 = vmul.f32 -1.442695, %v1017_v40 }
 0xc52   :  { %5208 = vpow2.f32 %v4930_v43 }
 0xc53   :  { %5210 = vpow2.f32 %v4931_v44 }
 0xc5a   :  { %v5205_v41 = vpop.eup %5204 }
 0xc5b   :  { %1037 = vrot.lane.b32.xlu1 %v5205_v41, %s5782_s8 }
 0xc5e   :  { %v5207_v42 = vpop.eup %5206 }
 0xc5f   :  { %1051 = vrot.lane.b32.xlu0 %v5207_v42, %s5782_s8  ;;  %v5209_v4 = vpop.eup %5208 }
 0xc60   :  { %v1021_v45 = vadd.f32 1.0, %v5209_v4  ;;  %v5211_v46 = vpop.eup %5210 }
 0xc61   :  { %v1028_v47 = vadd.f32 1.0, %v5211_v46 }
 0xc62   :  { %5212 = vrcp.f32 %v1021_v45 }
 0xc63   :  { %5214 = vrcp.f32 %v1028_v47 }
 0xc6f   :  { %v5213_v48 = vpop.eup %5212 }
 0xc70   :  { %v5215_v51 = vpop.eup %5214  ;;  %v1035_v55 = vmul.f32 %v5213_v48, %v1033_v54 }
 0xc71   :  { %v1049_v3 = vmul.f32 %v5215_v51, %v1047_v57 }
 0xccd   :  { %v1038_v49 = vpop.permute.xlu1 %1037 }
 0xcce   :  { %v1040_v50 = vmul.f32 %v5213_v48, %v1038_v49 }
 0xcd0   :  { %1042 = vrot.lane.b32.xlu1 %v1040_v50, %s5783_s0 }
 0xcd1   :  { %v1052_v52 = vpop.permute.xlu0 %1051 }
 0xcd2   :  { %v1054_v53 = vmul.f32 %v5215_v51, %v1052_v52 }
 0xcd4   :  { %1056 = vrot.lane.b32.xlu0 %v1054_v53, %s5783_s0 }
 0xd42   :  { %v1043_v56 = vpop.permute.xlu1 %1042 }
 0xd43   :  { %v6273_v58 = vadd.f32 %v1043_v56, %v1035_v55 }
 0xd45   :  { %5216 = vtanh.f32 %v6273_v58  ;;  %v1186_v41 = vrot.slane %v6273_v58, 6 }
 0xd46   :  { %v1057_v8 = vpop.permute.xlu0 %1056 }
 0xd47   :  { %v6276_v59 = vadd.f32 %v1057_v8, %v1049_v3 }
 0xd49   :  { %5218 = vtanh.f32 %v6276_v59  ;;  %v1200_v43 = vrot.slane %v6276_v59, 2  ;;  %v1315_v59 = vld [vmem:[#allocation2 + $0x18] sm:$0x30] }
 0xd52   :  { %v5217_v60 = vpop.eup %5216 }
 0xd53   :  { %1062 = vrot.lane.b32.xlu1 %v5217_v60, %s5782_s8 }
 0xd56   :  { %v5219_v6 = vpop.eup %5218 }
 0xd57   :  { %1068 = vrot.lane.b32.xlu0 %v5219_v6, %s5782_s8 }
 0xdc5   :  { %v1063_v62 = vpop.permute.xlu1 %1062 }
 0xdc6   :  { %v1065_v61 = vmul.f32 %v5213_v48, %v1063_v62 }
 0xdc8   :  { %1073 = vrot.lane.b32.xlu0 %v1065_v61, %s5783_s0  ;;  %v1316_v61 = vld [vmem:[#allocation2] sm:$0xc] }
 0xdc9   :  { %v1069_v2 = vpop.permute.xlu0 %1068 }
 0xdca   :  { %v6282_v29 = vmul.f32 %v5215_v51, %v1069_v2 }
 0xdcc   :  { %v1082_v30 = vrot.slane %v6282_v29, 6 }
 0xdce   :  { %1083 = vrot.lane.b32.xlu1 %v1082_v30, %s5782_s8 }
 0xe3a   :  { %v6286_v31 = vpop.permute.xlu0 %1073 }
 0xe40   :  { %v1084_v32 = vpop.permute.xlu1 %1083 }
 0xe41   :  { %v1086_v33 = vsel %vm251_vm0, %v6286_v31, %v1084_v32 }
 0xe42   :  { %4932 = vmatmul.mubr.msk.f32.vlgmr.msra.gmra.mxu0 %vm318_vm2, %v1086_v33 }
 0xe43   :  { %1415 = vmatpush1.msra.mxu0 %v5971_v5  ;;  %1462 = vmatprep.mubr.f32.mxu0 %v5781_v1 }
 0xe44   :  { %1416 = vmatprep.subr.mxu0 %v5978_v7 }
 0xe45   :  { %1417 = vmatpush1.msra.mxu0 %v5983_v9  ;;  %v1161_v9 = vld [vmem:[#allocation2 + $0x18] sm:$0xc] }
 0xe46   :  { %1418 = vmatprep.subr.mxu0 %v5989_v10 }
 0xe47   :  { %1419 = vmatpush1.msra.mxu0 %v5994_v11 }
 0xe48   :  { %1420 = vmatprep.subr.mxu0 %v6000_v12 }
 0xe49   :  { %1421 = vmatpush1.msra.mxu0 %v6009_v14  ;;  %v1162_v14 = vld [vmem:[#allocation2] sm:$0x30] }
 0xe4a   :  { %1422 = vmatprep.subr.mxu0 %v6015_v15 }
 0xe4b   :  { %1423 = vmatpush1.msra.mxu0 %v6021_v16 }
 0xe4c   :  { %1424 = vmatprep.subr.mxu0 %v6026_v17 }
 0xe4d   :  { %1425 = vmatpush1.msra.mxu0 %v6031_v18 }
 0xe4e   :  { %1426 = vmatprep.subr.mxu0 %v6038_v19 }
 0xe4f   :  { %1427 = vmatpush1.msra.mxu0 %v6045_v20 }
 0xe50   :  { %1428 = vmatprep.subr.mxu0 %v6051_v21 }
 0xe51   :  { %1429 = vmatpush1.msra.mxu0 %v6058_v22 }
 0xf02   :  { %v1156_v5 = vpop.f32.mrf.mxu0 }
 0xf03   :  { %v1164_v7 = vrot.slane %v1156_v5, 6 }
 0xf04   :  { %v1158_v10 = vpop.f32.mrf.mxu0 }
 0xf05   :  { %v1166_v11 = vadd.f32 %v1164_v7, %v1161_v9  ;;  %v1168_v12 = vrot.slane %v1158_v10, 4 }
 0xf07   :  { %5220 = vtanh.f32 %v1166_v11  ;;  %v1170_v15 = vadd.f32 %v1168_v12, %v1162_v14  ;;  %v4933_v18 = vmul.f32 -1.442695, %v1166_v11 }
 0xf09   :  { %5222 = vtanh.f32 %v1170_v15  ;;  %v4934_v19 = vmul.f32 -1.442695, %v1170_v15 }
 0xf0a   :  { %5224 = vpow2.f32 %v4933_v18 }
 0xf0b   :  { %5226 = vpow2.f32 %v4934_v19 }
 0xf14   :  { %v5221_v16 = vpop.eup %5220 }
 0xf15   :  { %1190 = vrot.lane.b32.xlu1 %v5221_v16, %s5782_s8 }
 0xf16   :  { %v5223_v17 = vpop.eup %5222 }
 0xf17   :  { %1204 = vrot.lane.b32.xlu0 %v5223_v17, %s5782_s8  ;;  %v5225_v20 = vpop.eup %5224 }
 0xf18   :  { %v5227_v21 = vpop.eup %5226  ;;  %v1174_v22 = vadd.f32 1.0, %v5225_v20 }
 0xf19   :  { %v1181_v34 = vadd.f32 1.0, %v5227_v21 }
 0xf1a   :  { %5228 = vrcp.f32 %v1174_v22 }
 0xf1b   :  { %5230 = vrcp.f32 %v1181_v34 }
 0xf27   :  { %v5229_v35 = vpop.eup %5228 }
 0xf28   :  { %v5231_v38 = vpop.eup %5230  ;;  %v1188_v42 = vmul.f32 %v5229_v35, %v1186_v41 }
 0xf29   :  { %v1202_v45 = vmul.f32 %v5231_v38, %v1200_v43 }
 0xf87   :  { %v1191_v36 = vpop.permute.xlu1 %1190 }
 0xf88   :  { %v1193_v37 = vmul.f32 %v5229_v35, %v1191_v36 }
 0xf89   :  { %v1205_v39 = vpop.permute.xlu0 %1204 }
 0xf8a   :  { %1195 = vrot.lane.b32.xlu1 %v1193_v37, %s5783_s0  ;;  %v1207_v40 = vmul.f32 %v5231_v38, %v1205_v39 }
 0xf8c   :  { %1209 = vrot.lane.b32.xlu0 %v1207_v40, %s5783_s0 }
 0xffc   :  { %v1196_v44 = vpop.permute.xlu1 %1195 }
 0xffd   :  { %v1198_v4 = vadd.f32 %v1196_v44, %v1188_v42 }
 0xffe   :  { %v1210_v46 = vpop.permute.xlu0 %1209 }
 0xfff   :  { %5232 = vtanh.f32 %v1198_v4  ;;  %v1212_v47 = vadd.f32 %v1210_v46, %v1202_v45  ;;  %v1340_v19 = vrot.slane %v1198_v4, 6 }
0x1001   :  { %5234 = vtanh.f32 %v1212_v47  ;;  %v1354_v21 = vrot.slane %v1212_v47, 2 }
0x100c   :  { %v5233_v48 = vpop.eup %5232 }
0x100d   :  { %1215 = vrot.lane.b32.xlu1 %v5233_v48, %s5782_s8 }
0x100e   :  { %v5235_v49 = vpop.eup %5234 }
0x100f   :  { %1221 = vrot.lane.b32.xlu0 %v5235_v49, %s5782_s8 }
0x107f   :  { %v1216_v50 = vpop.permute.xlu1 %1215 }
0x1080   :  { %v1218_v51 = vmul.f32 %v5229_v35, %v1216_v50  ;;  %v1469_v50 = vld [vmem:[#allocation2 + $0x18] sm:$0xc0] }
0x1081   :  { %v1222_v52 = vpop.permute.xlu0 %1221 }
0x1082   :  { %1226 = vrot.lane.b32.xlu0 %v1218_v51, %s5783_s0  ;;  %v6316_v53 = vmul.f32 %v5231_v38, %v1222_v52  ;;  %v1470_v52 = vld [vmem:[#allocation2] sm:$0x3] }
0x1084   :  { %v1235_v54 = vrot.slane %v6316_v53, 2 }
0x1086   :  { %1236 = vrot.lane.b32.xlu1 %v1235_v54, %s5782_s8 }
0x10f4   :  { %v6320_v55 = vpop.permute.xlu0 %1226 }
0x10f8   :  { %v1237_v56 = vpop.permute.xlu1 %1236 }
0x10f9   :  { %v1239_v57 = vsel %vm251_vm0, %v6320_v55, %v1237_v56 }
0x10fa   :  { %v1241_v58 = vrot.slane %v1239_v57, 2 }
0x10fc   :  { %4935 = vmatmul.mubr.msk.f32.vlgmr.msra.gmra.mxu1 %vm318_vm2, %v1241_v58 }
0x10fd   :  { %1688 = vmatprep.mubr.bf16.mxu1 %v5780_v0 }
0x11bc   :  { %v1310_v3 = vpop.f32.mrf.mxu1 }
0x11bd   :  { %v1318_v8 = vrot.slane %v1310_v3, 4 }
0x11be   :  { %v1312_v60 = vpop.f32.mrf.mxu1 }
0x11bf   :  { %v1320_v6 = vadd.f32 %v1318_v8, %v1315_v59  ;;  %v1322_v62 = vrot.slane %v1312_v60, 6 }
0x11c1   :  { %5236 = vtanh.f32 %v1320_v6  ;;  %v1324_v2 = vadd.f32 %v1322_v62, %v1316_v61  ;;  %v4936_v33 = vmul.f32 -1.442695, %v1320_v6 }
0x11c3   :  { %5238 = vtanh.f32 %v1324_v2  ;;  %v4937_v5 = vmul.f32 -1.442695, %v1324_v2 }
0x11c4   :  { %5240 = vpow2.f32 %v4936_v33 }
0x11c5   :  { %5242 = vpow2.f32 %v4937_v5 }
0x11ce   :  { %v5237_v30 = vpop.eup %5236 }
0x11cf   :  { %1344 = vrot.lane.b32.xlu1 %v5237_v30, %s5782_s8 }
0x11d0   :  { %v5239_v32 = vpop.eup %5238 }
0x11d1   :  { %1358 = vrot.lane.b32.xlu0 %v5239_v32, %s5782_s8  ;;  %v5241_v7 = vpop.eup %5240 }
0x11d2   :  { %v5243_v9 = vpop.eup %5242  ;;  %v1328_v10 = vadd.f32 1.0, %v5241_v7 }
0x11d3   :  { %v1335_v11 = vadd.f32 1.0, %v5243_v9 }
0x11d4   :  { %5244 = vrcp.f32 %v1328_v10 }
0x11d5   :  { %5246 = vrcp.f32 %v1335_v11 }
0x11e1   :  { %v5245_v12 = vpop.eup %5244 }
0x11e2   :  { %v5247_v16 = vpop.eup %5246  ;;  %v1342_v20 = vmul.f32 %v5245_v12, %v1340_v19  ;;  %v5118_v19 = vld [vmem:[%s7507_s30 + $0x14] ss:$8 sps:$4 sm:$0xff]  }
0x11e3   :  { %v1356_v35 = vmul.f32 %v5247_v16, %v1354_v21  ;;  %v6394_v21 = vld [vmem:[%s7508_s10 + $0x60] sm:$0xff] }
0x1241   :  { %v1345_v14 = vpop.permute.xlu1 %1344 }
0x1242   :  { %v1347_v15 = vmul.f32 %v5245_v12, %v1345_v14 }
0x1243   :  { %v1359_v17 = vpop.permute.xlu0 %1358 }
0x1244   :  { %1349 = vrot.lane.b32.xlu1 %v1347_v15, %s5783_s0  ;;  %v1361_v18 = vmul.f32 %v5247_v16, %v1359_v17 }
0x1246   :  { %1363 = vrot.lane.b32.xlu0 %v1361_v18, %s5783_s0 }
0x12b6   :  { %v1350_v22 = vpop.permute.xlu1 %1349 }
0x12b7   :  { %v1352_v34 = vadd.f32 %v1350_v22, %v1342_v20  ;;  %v6388_v20 = vld [vmem:[%s7508_s10 + $0x68] sm:$0xff]  ;;  %v6399_v22 = vld [vmem:[%s7508_s10 + $0x58] sm:$0xff] }
0x12b8   :  { %v1364_v36 = vpop.permute.xlu0 %1363 }
0x12b9   :  { %5248 = vtanh.f32 %v1352_v34  ;;  %v1366_v37 = vadd.f32 %v1364_v36, %v1356_v35  ;;  %v1491_v7 = vrot.slane %v1352_v34, 6  ;;  %v6405_v34 = vld [vmem:[%s7508_s10 + $0x50] sm:$0xff]  ;;  %v5121_v36 = vld [vmem:[%s7507_s30 + $0x4] ss:$8 sps:$4 sm:$0xff]  }
0x12ba   :  { %v5116_v35 = vld [vmem:[%s7507_s30 + $0x10] ss:$8 sps:$4 sm:$0xff]  }
0x12bb   :  { %5250 = vtanh.f32 %v1366_v37  ;;  %v1505_v9 = vrot.slane %v1366_v37, 2 }
0x12c6   :  { %v5249_v38 = vpop.eup %5248 }
0x12c7   :  { %1369 = vrot.lane.b32.xlu1 %v5249_v38, %s5782_s8  ;;  %v5119_v38 = vld [vmem:[%s7507_s30] ss:$8 sps:$4 sm:$0xff]  }
0x12c8   :  { %v5251_v39 = vpop.eup %5250 }
0x12c9   :  { %1375 = vrot.lane.b32.xlu0 %v5251_v39, %s5782_s8 }
0x1339   :  { %v1370_v40 = vpop.permute.xlu1 %1369 }
0x133a   :  { %v1372_v41 = vmul.f32 %v5245_v12, %v1370_v40 }
0x133b   :  { %v1376_v42 = vpop.permute.xlu0 %1375 }
0x133c   :  { %1380 = vrot.lane.b32.xlu0 %v1372_v41, %s5783_s0  ;;  %v1378_v43 = vmul.f32 %v5247_v16, %v1376_v42 }
0x133e   :  { %v1389_v44 = vrot.slane %v1378_v43, 6 }
0x1340   :  { %1390 = vrot.lane.b32.xlu1 %v1389_v44, %s5782_s8  ;;  %v6427_v44 = vld [vmem:[%s7508_s10 + $0x48] sm:$0xff] }
0x13ae   :  { %v6334_v4 = vpop.permute.xlu0 %1380 }
0x13b2   :  { %v1391_v45 = vpop.permute.xlu1 %1390 }
0x13b3   :  { %v1393_v46 = vsel %vm251_vm0, %v6334_v4, %v1391_v45  ;;  %v6435_v45 = vld [vmem:[%s7508_s10 + $0x40] sm:$0xff] }
0x13b4   :  { %v1395_v47 = vrot.slane %v1393_v46, 4  ;;  %v6440_v46 = vld [vmem:[%s7508_s10 + $0x38] sm:$0xff] }
0x13b6   :  { %4938 = vmatmul.mubr.msk.f32.vlgmr.msra.gmra.mxu0 %vm318_vm2, %v1395_v47  ;;  %v6445_v47 = vld [vmem:[%s7508_s10 + $0x30] sm:$0xff] }
0x13b7   :  { %1783 = vmatprep.mubr.f32.mxu0 %v5781_v1 }
0x1476   :  { %v1464_v48 = vpop.f32.mrf.mxu0 }
0x1477   :  { %v1472_v49 = vrot.slane %v1464_v48, 2 }
0x1478   :  { %v1466_v51 = vpop.f32.mrf.mxu0 }
0x1479   :  { %v1474_v54 = vadd.f32 %v1472_v49, %v1469_v50  ;;  %v1475_v56 = vadd.f32 %v1470_v52, %v1466_v51  ;;  %v6458_v50 = vld [vmem:[%s7508_s10 + $0x20] sm:$0xff]  ;;  %v6467_v51 = vld [vmem:[%s7508_s10 + $0x18] sm:$0xff]  ;;  %v6475_v52 = vld [vmem:[%s7508_s10 + $0x10] sm:$0xff] }
0x147b   :  { %5252 = vtanh.f32 %v1474_v54  ;;  %v4939_v3 = vmul.f32 -1.442695, %v1474_v54  ;;  %v4940_v8 = vmul.f32 -1.442695, %v1475_v56  ;;  %v6481_v54 = vld [vmem:[%s7508_s10 + $0x8] sm:$0xff] }
0x147c   :  { %5254 = vtanh.f32 %v1475_v56 }
0x147d   :  { %5256 = vpow2.f32 %v4939_v3 }
0x147e   :  { %5258 = vpow2.f32 %v4940_v8 }
0x1488   :  { %v5253_v57 = vpop.eup %5252 }
0x1489   :  { %v5255_v58 = vpop.eup %5254  ;;  %1495 = vrot.lane.b32.xlu0 %v5253_v57, %s5782_s8 }
0x148a   :  { %1509 = vrot.lane.b32.xlu1 %v5255_v58, %s5782_s8  ;;  %v5257_v59 = vpop.eup %5256  ;;  %v5784_v58 = vmov 1983009808  }
0x148b   :  { %v5259_v60 = vpop.eup %5258  ;;  %v1479_v6 = vadd.f32 1.0, %v5257_v59  ;;  %v1559_v3 = vunpack.c.l.s4 %v5784_v58 }
0x148c   :  { %v1486_v62 = vadd.f32 1.0, %v5259_v60 }
0x148d   :  { %5260 = vrcp.f32 %v1479_v6  ;;  %v1560_v60 = vunpack.c.0.s8 %v1559_v3 }
0x148e   :  { %5262 = vrcp.f32 %v1486_v62 }
0x149a   :  { %v5261_v61 = vpop.eup %5260 }
0x149b   :  { %v5263_v30 = vpop.eup %5262  ;;  %v1493_v10 = vmul.f32 %v5261_v61, %v1491_v7 }
0x149c   :  { %v1507_v12 = vmul.f32 %v5263_v30, %v1505_v9 }
0x14fb   :  { %v1496_v2 = vpop.permute.xlu0 %1495 }
0x14fc   :  { %v1498_v32 = vmul.f32 %v5261_v61, %v1496_v2  ;;  %v1510_v33 = vpop.permute.xlu1 %1509 }
0x14fd   :  { %v1512_v5 = vmul.f32 %v5263_v30, %v1510_v33 }
0x14fe   :  { %1500 = vrot.lane.b32.xlu0 %v1498_v32, %s5783_s0 }
0x14ff   :  { %1514 = vrot.lane.b32.xlu1 %v1512_v5, %s5783_s0 }
0x1570   :  { %v1501_v11 = vpop.permute.xlu0 %1500 }
0x1571   :  { %v1503_v14 = vadd.f32 %v1501_v11, %v1493_v10  ;;  %v1515_v15 = vpop.permute.xlu1 %1514 }
0x1572   :  { %v1517_v16 = vadd.f32 %v1515_v15, %v1507_v12 }
0x1573   :  { %5264 = vtanh.f32 %v1503_v14 }
0x1574   :  { %5266 = vtanh.f32 %v1517_v16 }
0x1580   :  { %v5265_v17 = vpop.eup %5264 }
0x1581   :  { %v5267_v18 = vpop.eup %5266  ;;  %1520 = vrot.lane.b32.xlu0 %v5265_v17, %s5782_s8 }
0x1582   :  { %1526 = vrot.lane.b32.xlu1 %v5267_v18, %s5782_s8 }
0x1585   :  { %455 = vrot.lane.b32.xlu0 %v6126_v13, %s5782_s8  ;;  %v5112_v13 = vld [vmem:[%s7507_s30 + $0x34] ss:$8 sps:$4 sm:$0xff]  }
0x1586   :  { %612 = vrot.lane.b32.xlu1 %v6166_v26, %s5782_s8  ;;  %v5110_v26 = vld [vmem:[%s7507_s30 + $0x30] ss:$8 sps:$4 sm:$0xff]   ;;  %1664 = vmatprep.subr.bf16.mxu1 %v5112_v13 }
0x1587   :  { %1665 = vmatpush1.bf16.msra.mxu1 %v5110_v26 }
0x1589   :  { %770 = vrot.lane.b32.xlu0 %v6205_v28, %s5782_s8  ;;  %v5115_v28 = vld [vmem:[%s7507_s30 + $0x24] ss:$8 sps:$4 sm:$0xff]  }
0x158a   :  { %925 = vrot.lane.b32.xlu1 %v6243_v63, %s5782_s8  ;;  %v5113_v63 = vld [vmem:[%s7507_s30 + $0x20] ss:$8 sps:$4 sm:$0xff]   ;;  %1666 = vmatprep.subr.bf16.mxu1 %v5115_v28  ;;  %s7512_s30 = sld [smem:[#allocation34_spill]] }
0x158b   :  { %1667 = vmatpush1.bf16.msra.mxu1 %v5113_v63  ;;  %v1601_v28 = vld [vmem:[%s7509_s5] sm:$0x3] }
0x158c   :  { %1668 = vmatprep.subr.bf16.mxu1 %v5118_v19  ;;  %v1606_v63 = vrot.slane %v1601_v28, %v6104_v25  ;;  %v1610_v19 = vrot.slane %v1601_v28, %v6110_v27 }
0x158d   :  { %1078 = vrot.lane.b32.xlu0 %v6282_v29, %s5782_s8  ;;  %v6374_v29 = vld [vmem:[%s7508_s10 + $0x78] sm:$0xff] }
0x158e   :  { %1231 = vrot.lane.b32.xlu1 %v6316_v53, %s5782_s8  ;;  %v6379_v53 = vld [vmem:[%s7508_s10 + $0x70] sm:$0xff]  ;;  %1735 = vmatprep.subr.mxu0 %v6374_v29 }
0x158f   :  { %1736 = vmatpush1.msra.mxu0 %v6379_v53  ;;  %1669 = vmatpush1.bf16.msra.mxu1 %v5116_v35 }
0x1590   :  { %1737 = vmatprep.subr.mxu0 %v6388_v20  ;;  %1670 = vmatprep.subr.bf16.mxu1 %v5121_v36 }
0x1591   :  { %1385 = vrot.lane.b32.xlu0 %v1378_v43, %s5782_s8  ;;  %1738 = vmatpush1.msra.mxu0 %v6394_v21 }
0x1592   :  { %1739 = vmatprep.subr.mxu0 %v6399_v22 }
0x1593   :  { %1740 = vmatpush1.msra.mxu0 %v6405_v34  ;;  %1671 = vmatpush1.bf16.msra.mxu1 %v5119_v38 }
0x1594   :  { %1879 = vmatprep.subr.mxu1 %v6374_v29  ;;  %1741 = vmatprep.subr.mxu0 %v6427_v44 }
0x1595   :  { %1742 = vmatpush1.msra.mxu0 %v6435_v45 }
0x1596   :  { %1743 = vmatprep.subr.mxu0 %v6440_v46 }
0x1597   :  { %1744 = vmatpush1.msra.mxu0 %v6445_v47 }
0x15f3   :  { %v1521_v37 = vpop.permute.xlu0 %1520 }
0x15f4   :  { %v1523_v39 = vmul.f32 %v5261_v61, %v1521_v37  ;;  %v1527_v40 = vpop.permute.xlu1 %1526 }
0x15f5   :  { %v1529_v41 = vmul.f32 %v5263_v30, %v1527_v40  ;;  %v6517_v30 = vsub.s32 %v1560_v60, %v6101_v24 }
0x15f6   :  { %1531 = vrot.lane.b32.xlu1 %v1523_v39, %s5783_s0 }
0x15f7   :  { %1536 = vrot.lane.b32.xlu0 %v1529_v41, %s5782_s8  ;;  %v456_v42 = vpop.permute.xlu0 %455 }
0x15f8   :  { %460 = vst.msk [vmem:[#allocation3 + $0x8] sm:$0xc0] %vm459_vm6, %v456_v42  ;;  %v613_v43 = vpop.permute.xlu1 %612 }
0x15f9   :  { %617 = vst.msk [vmem:[#allocation3 + $0x8] sm:$0x30] %vm616_vm7, %v613_v43 }
0x15fa   :  { %1383 = vst.msk [vmem:[#allocation3 + $0x8] sm:$0x30] %vm767_vm4, %v6334_v4  ;;  %v6451_v4 = vld [vmem:[%s7508_s10 + $0x28] sm:$0xff] }
0x15fb   :  { %v771_v48 = vpop.permute.xlu0 %770  ;;  %1745 = vmatprep.subr.mxu0 %v6451_v4 }
0x15fc   :  { %775 = vst.msk [vmem:[#allocation3 + $0x8] sm:$0xc] %vm774_vm8, %v771_v48  ;;  %v926_v49 = vpop.permute.xlu1 %925  ;;  %1746 = vmatpush1.msra.mxu0 %v6458_v50 }
0x15fd   :  { %1229 = vst.msk [vmem:[#allocation3 + $0x8] sm:$0xc] %vm609_vm3, %v6320_v55  ;;  %1747 = vmatprep.subr.mxu0 %v6467_v51 }
0x15fe   :  { %930 = vst.msk [vmem:[#allocation3 + $0x8] sm:$0x3] %vm929_vm9, %v926_v49  ;;  %1748 = vmatpush1.msra.mxu0 %v6475_v52 }
0x15ff   :  { %1076 = vst.msk [vmem:[#allocation3 + $0x8] sm:$0x3] %vm452_vm1, %v6286_v31  ;;  %v1079_v55 = vpop.permute.xlu0 %1078  ;;  %v6488_v31 = vld [vmem:[%s7508_s10] sm:$0xff]  ;;  %1749 = vmatprep.subr.mxu0 %v6481_v54 }
0x1600   :  { %1081 = vst.msk [vmem:[#allocation3] sm:$0xc0] %vm459_vm6, %v1079_v55  ;;  %v1232_v56 = vpop.permute.xlu1 %1231  ;;  %1750 = vmatpush1.msra.mxu0 %v6488_v31 }
0x1601   :  { %1234 = vst.msk [vmem:[#allocation3] sm:$0x30] %vm616_vm7, %v1232_v56  ;;  %1784 = vmatmul.mubr.f32.vlgmr.msra.gmra.mxu0 %v5781_v1  ;;  %2033 = vmatprep.subr.mxu0 %v6374_v29  ;;  %v1546_v33 = vld [vmem:[#allocation3 + $0xc] sm:$0x3] }
0x1602   :  { %2034 = vmatpush1.msra.mxu0 %v6379_v53  ;;  %2081 = vmatprep.mubr.f32.mxu0 %v5781_v1 }
0x1603   :  { %v1386_v57 = vpop.permute.xlu0 %1385  ;;  %2035 = vmatprep.subr.mxu0 %v6388_v20 }
0x1604   :  { %1388 = vst.msk [vmem:[#allocation3] sm:$0xc] %vm774_vm8, %v1386_v57  ;;  %2036 = vmatpush1.msra.mxu0 %v6394_v21  ;;  %v1545_v62 = vld [vmem:[#allocation3 + $0xa] sm:$0x3] }
0x1605   :  { %2037 = vmatprep.subr.mxu0 %v6399_v22 }
0x1606   :  { %2038 = vmatpush1.msra.mxu0 %v6405_v34  ;;  %v1544_v6 = vld [vmem:[#allocation3 + $0x8] sm:$0x3] }
0x1607   :  { %2039 = vmatprep.subr.mxu0 %v6427_v44  ;;  %v1543_v2 = vld [vmem:[#allocation3 + $0x6] sm:$0x3]  ;;  %v1573_v32 = vcombine.low %v1544_v6, %v1545_v62 }
0x1608   :  { %2040 = vmatpush1.msra.mxu0 %v6435_v45  ;;  %v1542_v61 = vld [vmem:[#allocation3 + $0x4] sm:$0x3] }
0x1609   :  { %2041 = vmatprep.subr.mxu0 %v6440_v46  ;;  %v1557_v7 = vcombine.low %v1542_v61, %v1543_v2  ;;  %v1581_v14 = vrot.slane %v1573_v32, %v6517_v30 }
0x160a   :  { %2042 = vmatpush1.msra.mxu0 %v6445_v47 }
0x160b   :  { %2043 = vmatprep.subr.mxu0 %v6451_v4  ;;  %v1541_v10 = vld [vmem:[#allocation3 + $0x2] sm:$0x3]  ;;  %v1571_v17 = vrot.slane %v1557_v7, %v6517_v30 }
0x160c   :  { %2044 = vmatpush1.msra.mxu0 %v6458_v50 }
0x160d   :  { %2045 = vmatprep.subr.mxu0 %v6467_v51 }
0x160e   :  { %2046 = vmatpush1.msra.mxu0 %v6475_v52 }
0x160f   :  { %2047 = vmatprep.subr.mxu0 %v6481_v54 }
0x1610   :  { %2048 = vmatpush1.msra.mxu0 %v6488_v31 }
0x1611   :  { %2338 = vmatprep.subr.mxu0 %v6374_v29 }
0x1668   :  { %v1532_v8 = vpop.permute.xlu1 %1531 }
0x1669   :  { %v1537_v59 = vpop.permute.xlu0 %1536  ;;  %1534 = vst.msk [vmem:[#allocation3 + $0x8] sm:$0xc0] %vm922_vm5, %v1532_v8 }
0x166a   :  { %1539 = vst.msk [vmem:[#allocation3] sm:$0x3] %vm929_vm9, %v1537_v59 }
0x1670   :  { %v1547_v5 = vld [vmem:[#allocation3 + $0xe] sm:$0x3] }
0x1671   :  { %v1540_v9 = vld [vmem:[#allocation3] sm:$0x3]  ;;  %v1574_v11 = vcombine.low %v1546_v33, %v1547_v5 }
0x1672   :  { %v1556_v12 = vcombine.low %v1540_v9, %v1541_v10 }
0x1673   :  { %v1588_v15 = vrot.slane %v1574_v11, %v6517_v30 }
0x1674   :  { %v1564_v16 = vrot.slane %v1556_v12, %v6517_v30 }
0x1675   :  { %v1589_v18 = vcombine.low %v1581_v14, %v1588_v15 }
0x1676   :  { %v1572_v13 = vcombine.low %v1564_v16, %v1571_v17 }
0x1678   :  { %v1592_v26 = vpack.c.bf16 %v1589_v18, %v1572_v13 }
0x167a   :  { %4949 = vmatmul.mubr.msk.bf16.vlgmr.msra.gmra.mxu1 %vm318_vm2, %v1592_v26 }
0x167b   :  { %1880 = vmatpush1.msra.mxu1 %v6379_v53  ;;  %1927 = vmatprep.mubr.f32.mxu1 %v5781_v1 }
0x167c   :  { %1881 = vmatprep.subr.mxu1 %v6388_v20 }
0x167d   :  { %1882 = vmatpush1.msra.mxu1 %v6394_v21 }
0x167e   :  { %1883 = vmatprep.subr.mxu1 %v6399_v22 }
0x167f   :  { %1884 = vmatpush1.msra.mxu1 %v6405_v34 }
0x1680   :  { %1885 = vmatprep.subr.mxu1 %v6427_v44 }
0x1681   :  { %1886 = vmatpush1.msra.mxu1 %v6435_v45 }
0x1682   :  { %1887 = vmatprep.subr.mxu1 %v6440_v46 }
0x1683   :  { %1888 = vmatpush1.msra.mxu1 %v6445_v47 }
0x1684   :  { %1889 = vmatprep.subr.mxu1 %v6451_v4 }
0x1685   :  { %1890 = vmatpush1.msra.mxu1 %v6458_v50 }
0x1686   :  { %1891 = vmatprep.subr.mxu1 %v6467_v51 }
0x1687   :  { %1892 = vmatpush1.msra.mxu1 %v6475_v52 }
0x1688   :  { %1893 = vmatprep.subr.mxu1 %v6481_v54 }
0x1689   :  { %1894 = vmatpush1.msra.mxu1 %v6488_v31 }
0x168a   :  { %2187 = vmatprep.subr.mxu1 %v6374_v29 }
0x16c1   :  { %v1785_v43 = vpop.f32.mrf.mxu0 }
0x16c3   :  { %v1787_v55 = vpop.f32.mrf.mxu0 }
0x16c4   :  { %v1794_v56 = vrot.slane %v1787_v55, 2 }
0x173a   :  { %v1690_v35 = vpop.f32.mrf.mxu1 }
0x173b   :  { %v1691_v36 = vadd.f32 %v1690_v35, %v1606_v63 }
0x173c   :  { %v1692_v37 = vpop.f32.mrf.mxu1 }
0x173d   :  { %1699 = vst [vmem:[#allocation2 + $0x10] sm:$0xff] %v1691_v36  ;;  %v1693_v38 = vadd.f32 %v1692_v37, %v1610_v19 }
0x173e   :  { %v1694_v39 = vpop.f32.mrf.mxu1 }
0x173f   :  { %1700 = vst [vmem:[#allocation2] sm:$0xff] %v1693_v38  ;;  %v1695_v40 = vadd.f32 %v1694_v39, %v1606_v63 }
0x1740   :  { %v1696_v41 = vpop.f32.mrf.mxu1 }
0x1741   :  { %1701 = vst [vmem:[#allocation2 + $0x18] sm:$0xff] %v1695_v40  ;;  %v1697_v42 = vadd.f32 %v1696_v41, %v1610_v19 }
0x1743   :  { %1702 = vst [vmem:[#allocation2 + $0x8] sm:$0xff] %v1697_v42 }
0x1744   :  { %v1790_v48 = vld [vmem:[#allocation2 + $0x10] sm:$0x3]  ;;  %v1934_v41 = vld [vmem:[#allocation2 + $0x10] sm:$0xc] }
0x1745   :  { %v1792_v49 = vadd.f32 %v1790_v48, %v1785_v43 }
0x1747   :  { %5268 = vtanh.f32 %v1792_v49  ;;  %v4950_v59 = vmul.f32 -1.442695, %v1792_v49 }
0x174a   :  { %v1791_v57 = vld [vmem:[#allocation2 + $0x8] sm:$0xc0]  ;;  %v1935_v49 = vld [vmem:[#allocation2 + $0x8] sm:$0x30] }
0x174b   :  { %v1796_v58 = vadd.f32 %v1794_v56, %v1791_v57 }
0x174d   :  { %5270 = vtanh.f32 %v1796_v58  ;;  %v4951_v60 = vmul.f32 -1.442695, %v1796_v58 }
0x174e   :  { %5272 = vpow2.f32 %v4950_v59 }
0x174f   :  { %5274 = vpow2.f32 %v4951_v60 }
0x1754   :  { %v5269_v3 = vpop.eup %5268 }
0x1755   :  { %1813 = vrot.lane.b32.xlu0 %v5269_v3, %s5782_s8 }
0x175a   :  { %v5271_v8 = vpop.eup %5270 }
0x175b   :  { %1824 = vrot.lane.b32.xlu1 %v5271_v8, %s5782_s8  ;;  %v5273_v6 = vpop.eup %5272 }
0x175c   :  { %v1800_v62 = vadd.f32 1.0, %v5273_v6  ;;  %v5275_v61 = vpop.eup %5274 }
0x175d   :  { %v1807_v2 = vadd.f32 1.0, %v5275_v61 }
0x175e   :  { %5276 = vrcp.f32 %v1800_v62 }
0x175f   :  { %5278 = vrcp.f32 %v1807_v2 }
0x176b   :  { %v5277_v32 = vpop.eup %5276 }
0x176c   :  { %v5279_v7 = vpop.eup %5278  ;;  %v1811_v11 = vmul.f32 0.0, %v5277_v32 }
0x176d   :  { %v1822_v15 = vmul.f32 0.0, %v5279_v7 }
0x17c7   :  { %v1814_v33 = vpop.permute.xlu0 %1813 }
0x17c8   :  { %v1816_v5 = vmul.f32 %v5277_v32, %v1814_v33 }
0x17ca   :  { %1818 = vrot.lane.b32.xlu0 %v1816_v5, %s5783_s0 }
0x17cd   :  { %v1825_v9 = vpop.permute.xlu1 %1824 }
0x17ce   :  { %v1827_v10 = vmul.f32 %v5279_v7, %v1825_v9 }
0x17d0   :  { %1829 = vrot.lane.b32.xlu1 %v1827_v10, %s5783_s0 }
0x183c   :  { %v1819_v12 = vpop.permute.xlu0 %1818 }
0x183d   :  { %v6550_v14 = vadd.f32 %v1819_v12, %v1811_v11 }
0x183f   :  { %5280 = vtanh.f32 %v6550_v14 }
0x1842   :  { %v1830_v16 = vpop.permute.xlu1 %1829 }
0x1843   :  { %v6553_v17 = vadd.f32 %v1830_v16, %v1822_v15 }
0x1845   :  { %5282 = vtanh.f32 %v6553_v17  ;;  %v1973_v10 = vrot.slane %v6553_v17, 2 }
0x184c   :  { %v5281_v18 = vpop.eup %5280 }
0x184d   :  { %1835 = vrot.lane.b32.xlu0 %v5281_v18, %s5782_s8 }
0x1852   :  { %v5283_v13 = vpop.eup %5282 }
0x1853   :  { %1841 = vrot.lane.b32.xlu1 %v5283_v13, %s5782_s8 }
0x18bf   :  { %v1836_v26 = vpop.permute.xlu0 %1835 }
0x18c0   :  { %v1838_v28 = vmul.f32 %v5277_v32, %v1836_v26 }
0x18c2   :  { %1846 = vrot.lane.b32.xlu1 %v1838_v28, %s5783_s0 }
0x18c5   :  { %v1842_v63 = vpop.permute.xlu1 %1841 }
0x18c6   :  { %v6559_v19 = vmul.f32 %v5279_v7, %v1842_v63  ;;  %v1959_v7 = vrot.slane %v6550_v14, 6 }
0x18c8   :  { %v1855_v35 = vrot.slane %v6559_v19, 6 }
0x18ca   :  { %1856 = vrot.lane.b32.xlu0 %v1855_v35, %s5782_s8 }
0x1934   :  { %v1847_v36 = vpop.permute.xlu1 %1846 }
0x1935   :  { %1849 = vst.msk [vmem:[#allocation3] sm:$0x3] %vm452_vm1, %v1847_v36 }
0x193c   :  { %v1857_v37 = vpop.permute.xlu0 %1856 }
0x193d   :  { %v1859_v38 = vsel %vm251_vm0, %v1847_v36, %v1857_v37 }
0x193e   :  { %4952 = vmatmul.mubr.msk.f32.vlgmr.msra.gmra.mxu1 %vm318_vm2, %v1859_v38 }
0x193f   :  { %2188 = vmatpush1.msra.mxu1 %v6379_v53  ;;  %2235 = vmatprep.mubr.f32.mxu1 %v5781_v1 }
0x1940   :  { %2189 = vmatprep.subr.mxu1 %v6388_v20 }
0x1941   :  { %2190 = vmatpush1.msra.mxu1 %v6394_v21 }
0x1942   :  { %2191 = vmatprep.subr.mxu1 %v6399_v22 }
0x1943   :  { %2192 = vmatpush1.msra.mxu1 %v6405_v34 }
0x1944   :  { %2193 = vmatprep.subr.mxu1 %v6427_v44 }
0x1945   :  { %2194 = vmatpush1.msra.mxu1 %v6435_v45 }
0x1946   :  { %2195 = vmatprep.subr.mxu1 %v6440_v46 }
0x1947   :  { %2196 = vmatpush1.msra.mxu1 %v6445_v47 }
0x1948   :  { %2197 = vmatprep.subr.mxu1 %v6451_v4 }
0x1949   :  { %2198 = vmatpush1.msra.mxu1 %v6458_v50 }
0x194a   :  { %2199 = vmatprep.subr.mxu1 %v6467_v51 }
0x194b   :  { %2200 = vmatpush1.msra.mxu1 %v6475_v52 }
0x194c   :  { %2201 = vmatprep.subr.mxu1 %v6481_v54 }
0x194d   :  { %2202 = vmatpush1.msra.mxu1 %v6488_v31 }
0x194e   :  { %2488 = vmatprep.subr.mxu1 %v6374_v29 }
0x19fe   :  { %v1929_v39 = vpop.f32.mrf.mxu1 }
0x19ff   :  { %v1937_v40 = vrot.slane %v1929_v39, 6 }
0x1a00   :  { %v1931_v42 = vpop.f32.mrf.mxu1 }
0x1a01   :  { %v1939_v43 = vadd.f32 %v1937_v40, %v1934_v41  ;;  %v1941_v48 = vrot.slane %v1931_v42, 4  ;;  %v2088_v42 = vld [vmem:[#allocation2 + $0x10] sm:$0x30] }
0x1a03   :  { %5284 = vtanh.f32 %v1939_v43  ;;  %v1943_v55 = vadd.f32 %v1941_v48, %v1935_v49  ;;  %v4953_v58 = vmul.f32 -1.442695, %v1939_v43 }
0x1a05   :  { %5286 = vtanh.f32 %v1943_v55  ;;  %v4954_v3 = vmul.f32 -1.442695, %v1943_v55  ;;  %v2089_v55 = vld [vmem:[#allocation2 + $0x8] sm:$0xc] }
0x1a06   :  { %5288 = vpow2.f32 %v4953_v58 }
0x1a07   :  { %5290 = vpow2.f32 %v4954_v3 }
0x1a10   :  { %v5285_v56 = vpop.eup %5284 }
0x1a11   :  { %1963 = vrot.lane.b32.xlu0 %v5285_v56, %s5782_s8 }
0x1a12   :  { %v5287_v57 = vpop.eup %5286 }
0x1a13   :  { %1977 = vrot.lane.b32.xlu1 %v5287_v57, %s5782_s8  ;;  %v5289_v8 = vpop.eup %5288 }
0x1a14   :  { %v5291_v59 = vpop.eup %5290  ;;  %v1947_v60 = vadd.f32 1.0, %v5289_v8 }
0x1a15   :  { %v1954_v6 = vadd.f32 1.0, %v5291_v59 }
0x1a16   :  { %5292 = vrcp.f32 %v1947_v60 }
0x1a17   :  { %5294 = vrcp.f32 %v1954_v6 }
0x1a23   :  { %v5293_v62 = vpop.eup %5292 }
0x1a24   :  { %v5295_v32 = vpop.eup %5294  ;;  %v1961_v9 = vmul.f32 %v5293_v62, %v1959_v7 }
0x1a25   :  { %v1975_v15 = vmul.f32 %v5295_v32, %v1973_v10 }
0x1a83   :  { %v1964_v61 = vpop.permute.xlu0 %1963 }
0x1a84   :  { %v1966_v2 = vmul.f32 %v5293_v62, %v1964_v61 }
0x1a85   :  { %v1978_v33 = vpop.permute.xlu1 %1977 }
0x1a86   :  { %1968 = vrot.lane.b32.xlu0 %v1966_v2, %s5783_s0  ;;  %v1980_v5 = vmul.f32 %v5295_v32, %v1978_v33 }
0x1a88   :  { %1982 = vrot.lane.b32.xlu1 %v1980_v5, %s5783_s0 }
0x1af8   :  { %v1969_v11 = vpop.permute.xlu0 %1968 }
0x1af9   :  { %v6589_v12 = vadd.f32 %v1969_v11, %v1961_v9 }
0x1afa   :  { %v1983_v16 = vpop.permute.xlu1 %1982 }
0x1afb   :  { %5296 = vtanh.f32 %v6589_v12  ;;  %v6592_v18 = vadd.f32 %v1983_v16, %v1975_v15  ;;  %v2113_v9 = vrot.slane %v6589_v12, 6 }
0x1afd   :  { %5298 = vtanh.f32 %v6592_v18  ;;  %v2127_v11 = vrot.slane %v6592_v18, 2 }
0x1b08   :  { %v5297_v13 = vpop.eup %5296 }
0x1b09   :  { %1988 = vrot.lane.b32.xlu0 %v5297_v13, %s5782_s8 }
0x1b0a   :  { %v5299_v26 = vpop.eup %5298 }
0x1b0b   :  { %1994 = vrot.lane.b32.xlu1 %v5299_v26, %s5782_s8 }
0x1b7b   :  { %v1989_v14 = vpop.permute.xlu0 %1988 }
0x1b7c   :  { %v1991_v28 = vmul.f32 %v5293_v62, %v1989_v14 }
0x1b7d   :  { %v1995_v17 = vpop.permute.xlu1 %1994 }
0x1b7e   :  { %1999 = vrot.lane.b32.xlu1 %v1991_v28, %s5783_s0  ;;  %v6598_v63 = vmul.f32 %v5295_v32, %v1995_v17 }
0x1b80   :  { %v2008_v35 = vrot.slane %v6598_v63, 2 }
0x1b82   :  { %2009 = vrot.lane.b32.xlu0 %v2008_v35, %s5782_s8 }
0x1bf0   :  { %v2000_v36 = vpop.permute.xlu1 %1999 }
0x1bf1   :  { %2002 = vst.msk [vmem:[#allocation3] sm:$0xc] %vm609_vm3, %v2000_v36 }
0x1bf4   :  { %v2010_v37 = vpop.permute.xlu0 %2009 }
0x1bf5   :  { %v2012_v38 = vsel %vm251_vm0, %v2000_v36, %v2010_v37 }
0x1bf6   :  { %v2014_v39 = vrot.slane %v2012_v38, 2 }
0x1bf8   :  { %4955 = vmatmul.mubr.msk.f32.vlgmr.msra.gmra.mxu0 %vm318_vm2, %v2014_v39 }
0x1bf9   :  { %2339 = vmatpush1.msra.mxu0 %v6379_v53  ;;  %2386 = vmatprep.mubr.f32.mxu0 %v5781_v1 }
0x1bfa   :  { %2340 = vmatprep.subr.mxu0 %v6388_v20 }
0x1bfb   :  { %2341 = vmatpush1.msra.mxu0 %v6394_v21 }
0x1bfc   :  { %2342 = vmatprep.subr.mxu0 %v6399_v22 }
0x1bfd   :  { %2343 = vmatpush1.msra.mxu0 %v6405_v34 }
0x1bfe   :  { %2344 = vmatprep.subr.mxu0 %v6427_v44 }
0x1bff   :  { %2345 = vmatpush1.msra.mxu0 %v6435_v45 }
0x1c00   :  { %2346 = vmatprep.subr.mxu0 %v6440_v46 }
0x1c01   :  { %2347 = vmatpush1.msra.mxu0 %v6445_v47 }
0x1c02   :  { %2348 = vmatprep.subr.mxu0 %v6451_v4 }
0x1c03   :  { %2349 = vmatpush1.msra.mxu0 %v6458_v50 }
0x1c04   :  { %2350 = vmatprep.subr.mxu0 %v6467_v51 }
0x1c05   :  { %2351 = vmatpush1.msra.mxu0 %v6475_v52 }
0x1c06   :  { %2352 = vmatprep.subr.mxu0 %v6481_v54 }
0x1c07   :  { %2353 = vmatpush1.msra.mxu0 %v6488_v31 }
0x1c08   :  { %2642 = vmatprep.subr.mxu0 %v6374_v29 }
0x1cb8   :  { %v2083_v40 = vpop.f32.mrf.mxu0 }
0x1cb9   :  { %v2091_v41 = vrot.slane %v2083_v40, 4 }
0x1cba   :  { %v2085_v43 = vpop.f32.mrf.mxu0 }
0x1cbb   :  { %v2093_v48 = vadd.f32 %v2091_v41, %v2088_v42  ;;  %v2095_v49 = vrot.slane %v2085_v43, 6 }
0x1cbd   :  { %5300 = vtanh.f32 %v2093_v48  ;;  %v2097_v56 = vadd.f32 %v2095_v49, %v2089_v55  ;;  %v4956_v3 = vmul.f32 -1.442695, %v2093_v48  ;;  %v2242_v48 = vld [vmem:[#allocation2 + $0x10] sm:$0xc0]  ;;  %v2243_v55 = vld [vmem:[#allocation2 + $0x8] sm:$0x3] }
0x1cbf   :  { %5302 = vtanh.f32 %v2097_v56  ;;  %v4957_v8 = vmul.f32 -1.442695, %v2097_v56 }
0x1cc0   :  { %5304 = vpow2.f32 %v4956_v3 }
0x1cc1   :  { %5306 = vpow2.f32 %v4957_v8 }
0x1cca   :  { %v5301_v57 = vpop.eup %5300 }
0x1ccb   :  { %2117 = vrot.lane.b32.xlu0 %v5301_v57, %s5782_s8 }
0x1ccc   :  { %v5303_v58 = vpop.eup %5302 }
0x1ccd   :  { %2131 = vrot.lane.b32.xlu1 %v5303_v58, %s5782_s8  ;;  %v5305_v59 = vpop.eup %5304 }
0x1cce   :  { %v5307_v60 = vpop.eup %5306  ;;  %v2101_v6 = vadd.f32 1.0, %v5305_v59 }
0x1ccf   :  { %v2108_v62 = vadd.f32 1.0, %v5307_v60 }
0x1cd0   :  { %5308 = vrcp.f32 %v2101_v6 }
0x1cd1   :  { %5310 = vrcp.f32 %v2108_v62 }
0x1cdd   :  { %v5309_v61 = vpop.eup %5308 }
0x1cde   :  { %v5311_v33 = vpop.eup %5310  ;;  %v2115_v10 = vmul.f32 %v5309_v61, %v2113_v9 }
0x1cdf   :  { %v2129_v13 = vmul.f32 %v5311_v33, %v2127_v11 }
0x1d3d   :  { %v2118_v2 = vpop.permute.xlu0 %2117 }
0x1d3e   :  { %v2120_v32 = vmul.f32 %v5309_v61, %v2118_v2 }
0x1d3f   :  { %v2132_v5 = vpop.permute.xlu1 %2131 }
0x1d40   :  { %2122 = vrot.lane.b32.xlu0 %v2120_v32, %s5783_s0  ;;  %v2134_v7 = vmul.f32 %v5311_v33, %v2132_v5 }
0x1d42   :  { %2136 = vrot.lane.b32.xlu1 %v2134_v7, %s5783_s0 }
0x1db2   :  { %v2123_v15 = vpop.permute.xlu0 %2122 }
0x1db3   :  { %v6628_v16 = vadd.f32 %v2123_v15, %v2115_v10 }
0x1db4   :  { %v2137_v26 = vpop.permute.xlu1 %2136 }
0x1db5   :  { %5312 = vtanh.f32 %v6628_v16  ;;  %v6631_v14 = vadd.f32 %v2137_v26, %v2129_v13  ;;  %v2264_v9 = vrot.slane %v6628_v16, 6 }
0x1db7   :  { %5314 = vtanh.f32 %v6631_v14  ;;  %v2278_v10 = vrot.slane %v6631_v14, 2 }
0x1dc2   :  { %v5313_v28 = vpop.eup %5312 }
0x1dc3   :  { %2142 = vrot.lane.b32.xlu0 %v5313_v28, %s5782_s8 }
0x1dc4   :  { %v5315_v17 = vpop.eup %5314 }
0x1dc5   :  { %2148 = vrot.lane.b32.xlu1 %v5315_v17, %s5782_s8 }
0x1e35   :  { %v2143_v12 = vpop.permute.xlu0 %2142 }
0x1e36   :  { %v2145_v35 = vmul.f32 %v5309_v61, %v2143_v12 }
0x1e37   :  { %v2149_v18 = vpop.permute.xlu1 %2148 }
0x1e38   :  { %2153 = vrot.lane.b32.xlu1 %v2145_v35, %s5783_s0  ;;  %v6637_v36 = vmul.f32 %v5311_v33, %v2149_v18 }
0x1e3a   :  { %v2162_v37 = vrot.slane %v6637_v36, 6 }
0x1e3c   :  { %2163 = vrot.lane.b32.xlu0 %v2162_v37, %s5782_s8 }
0x1eaa   :  { %v2154_v38 = vpop.permute.xlu1 %2153 }
0x1eab   :  { %2156 = vst.msk [vmem:[#allocation3] sm:$0x30] %vm767_vm4, %v2154_v38 }
0x1eae   :  { %v2164_v39 = vpop.permute.xlu0 %2163 }
0x1eaf   :  { %v2166_v40 = vsel %vm251_vm0, %v2154_v38, %v2164_v39 }
0x1eb0   :  { %v2168_v41 = vrot.slane %v2166_v40, 4 }
0x1eb2   :  { %4958 = vmatmul.mubr.msk.f32.vlgmr.msra.gmra.mxu1 %vm318_vm2, %v2168_v41 }
0x1eb3   :  { %2489 = vmatpush1.msra.mxu1 %v6379_v53  ;;  %2536 = vmatprep.mubr.f32.mxu1 %v5781_v1 }
0x1eb4   :  { %2490 = vmatprep.subr.mxu1 %v6388_v20 }
0x1eb5   :  { %2491 = vmatpush1.msra.mxu1 %v6394_v21 }
0x1eb6   :  { %2492 = vmatprep.subr.mxu1 %v6399_v22 }
0x1eb7   :  { %2493 = vmatpush1.msra.mxu1 %v6405_v34 }
0x1eb8   :  { %2494 = vmatprep.subr.mxu1 %v6427_v44 }
0x1eb9   :  { %2495 = vmatpush1.msra.mxu1 %v6435_v45 }
0x1eba   :  { %2496 = vmatprep.subr.mxu1 %v6440_v46 }
0x1ebb   :  { %2497 = vmatpush1.msra.mxu1 %v6445_v47 }
0x1ebc   :  { %2498 = vmatprep.subr.mxu1 %v6451_v4 }
0x1ebd   :  { %2499 = vmatpush1.msra.mxu1 %v6458_v50 }
0x1ebe   :  { %2500 = vmatprep.subr.mxu1 %v6467_v51 }
0x1ebf   :  { %2501 = vmatpush1.msra.mxu1 %v6475_v52 }
0x1ec0   :  { %2502 = vmatprep.subr.mxu1 %v6481_v54 }
0x1ec1   :  { %2503 = vmatpush1.msra.mxu1 %v6488_v31 }
0x1ec2   :  { %2796 = vmatprep.subr.mxu1 %v6374_v29 }
0x1f72   :  { %v2237_v42 = vpop.f32.mrf.mxu1 }
0x1f73   :  { %v2245_v43 = vrot.slane %v2237_v42, 2 }
0x1f74   :  { %v2239_v49 = vpop.f32.mrf.mxu1 }
0x1f75   :  { %v2247_v56 = vadd.f32 %v2245_v43, %v2242_v48  ;;  %v2248_v57 = vadd.f32 %v2243_v55, %v2239_v49  ;;  %v2393_v48 = vld [vmem:[#allocation2 + $0x18] sm:$0x3] }
0x1f77   :  { %5316 = vtanh.f32 %v2247_v56  ;;  %v4959_v8 = vmul.f32 -1.442695, %v2247_v56  ;;  %v4960_v59 = vmul.f32 -1.442695, %v2248_v57 }
0x1f78   :  { %5318 = vtanh.f32 %v2248_v57  ;;  %v2394_v57 = vld [vmem:[#allocation2] sm:$0xc0] }
0x1f79   :  { %5320 = vpow2.f32 %v4959_v8 }
0x1f7a   :  { %5322 = vpow2.f32 %v4960_v59 }
0x1f84   :  { %v5317_v58 = vpop.eup %5316 }
0x1f85   :  { %v5319_v3 = vpop.eup %5318  ;;  %2268 = vrot.lane.b32.xlu0 %v5317_v58, %s5782_s8 }
0x1f86   :  { %2282 = vrot.lane.b32.xlu1 %v5319_v3, %s5782_s8  ;;  %v5321_v29 = vpop.eup %5320 }
0x1f87   :  { %v5323_v60 = vpop.eup %5322  ;;  %v2252_v6 = vadd.f32 1.0, %v5321_v29 }
0x1f88   :  { %v2259_v62 = vadd.f32 1.0, %v5323_v60 }
0x1f89   :  { %5324 = vrcp.f32 %v2252_v6 }
0x1f8a   :  { %5326 = vrcp.f32 %v2259_v62 }
0x1f96   :  { %v5325_v61 = vpop.eup %5324 }
0x1f97   :  { %v5327_v32 = vpop.eup %5326  ;;  %v2266_v11 = vmul.f32 %v5325_v61, %v2264_v9 }
0x1f98   :  { %v2280_v13 = vmul.f32 %v5327_v32, %v2278_v10 }
0x1ff7   :  { %v2269_v2 = vpop.permute.xlu0 %2268 }
0x1ff8   :  { %v2271_v33 = vmul.f32 %v5325_v61, %v2269_v2  ;;  %v2283_v5 = vpop.permute.xlu1 %2282 }
0x1ff9   :  { %v2285_v7 = vmul.f32 %v5327_v32, %v2283_v5 }
0x1ffa   :  { %2273 = vrot.lane.b32.xlu0 %v2271_v33, %s5783_s0 }
0x1ffb   :  { %2287 = vrot.lane.b32.xlu1 %v2285_v7, %s5783_s0 }
0x206c   :  { %v2274_v15 = vpop.permute.xlu0 %2273 }
0x206d   :  { %v6667_v26 = vadd.f32 %v2274_v15, %v2266_v11  ;;  %v2288_v28 = vpop.permute.xlu1 %2287 }
0x206e   :  { %v6669_v17 = vadd.f32 %v2288_v28, %v2280_v13 }
0x206f   :  { %5328 = vtanh.f32 %v6667_v26  ;;  %v2415_v10 = vrot.slane %v6667_v26, 6 }
0x2070   :  { %5330 = vtanh.f32 %v6669_v17  ;;  %v2429_v13 = vrot.slane %v6669_v17, 2 }
0x207c   :  { %v5329_v12 = vpop.eup %5328 }
0x207d   :  { %v5331_v35 = vpop.eup %5330  ;;  %2293 = vrot.lane.b32.xlu0 %v5329_v12, %s5782_s8 }
0x207e   :  { %2299 = vrot.lane.b32.xlu1 %v5331_v35, %s5782_s8 }
0x20ef   :  { %v2294_v16 = vpop.permute.xlu0 %2293 }
0x20f0   :  { %v2296_v14 = vmul.f32 %v5325_v61, %v2294_v16  ;;  %v2300_v18 = vpop.permute.xlu1 %2299 }
0x20f1   :  { %v6675_v37 = vmul.f32 %v5327_v32, %v2300_v18 }
0x20f2   :  { %2304 = vrot.lane.b32.xlu1 %v2296_v14, %s5783_s0 }
0x20f3   :  { %v2313_v38 = vrot.slane %v6675_v37, 2 }
0x20f5   :  { %2314 = vrot.lane.b32.xlu0 %v2313_v38, %s5782_s8 }
0x2164   :  { %v2305_v39 = vpop.permute.xlu1 %2304 }
0x2165   :  { %2307 = vst.msk [vmem:[#allocation3] sm:$0xc0] %vm922_vm5, %v2305_v39 }
0x2167   :  { %v2315_v40 = vpop.permute.xlu0 %2314 }
0x2168   :  { %v2317_v41 = vsel %vm251_vm0, %v2305_v39, %v2315_v40 }
0x2169   :  { %v2319_v42 = vrot.slane %v2317_v41, 6 }
0x216b   :  { %4961 = vmatmul.mubr.msk.f32.vlgmr.msra.gmra.mxu0 %vm318_vm2, %v2319_v42 }
0x216c   :  { %2643 = vmatpush1.msra.mxu0 %v6379_v53  ;;  %2690 = vmatprep.mubr.f32.mxu0 %v5781_v1 }
0x216d   :  { %2644 = vmatprep.subr.mxu0 %v6388_v20 }
0x216e   :  { %2645 = vmatpush1.msra.mxu0 %v6394_v21 }
0x216f   :  { %2646 = vmatprep.subr.mxu0 %v6399_v22 }
0x2170   :  { %2647 = vmatpush1.msra.mxu0 %v6405_v34 }
0x2171   :  { %2648 = vmatprep.subr.mxu0 %v6427_v44 }
0x2172   :  { %2649 = vmatpush1.msra.mxu0 %v6435_v45 }
0x2173   :  { %2650 = vmatprep.subr.mxu0 %v6440_v46 }
0x2174   :  { %2651 = vmatpush1.msra.mxu0 %v6445_v47 }
0x2175   :  { %2652 = vmatprep.subr.mxu0 %v6451_v4 }
0x2176   :  { %2653 = vmatpush1.msra.mxu0 %v6458_v50 }
0x2177   :  { %2654 = vmatprep.subr.mxu0 %v6467_v51 }
0x2178   :  { %2655 = vmatpush1.msra.mxu0 %v6475_v52 }
0x2179   :  { %2656 = vmatprep.subr.mxu0 %v6481_v54 }
0x217a   :  { %2657 = vmatpush1.msra.mxu0 %v6488_v31 }
0x222b   :  { %v2388_v43 = vpop.f32.mrf.mxu0 }
0x222c   :  { %v2395_v49 = vadd.f32 %v2393_v48, %v2388_v43 }
0x222d   :  { %v2390_v55 = vpop.f32.mrf.mxu0 }
0x222e   :  { %5332 = vtanh.f32 %v2395_v49  ;;  %v2397_v56 = vrot.slane %v2390_v55, 2  ;;  %v4962_v59 = vmul.f32 -1.442695, %v2395_v49 }
0x2230   :  { %v2399_v58 = vadd.f32 %v2397_v56, %v2394_v57 }
0x2232   :  { %5334 = vtanh.f32 %v2399_v58  ;;  %v4963_v29 = vmul.f32 -1.442695, %v2399_v58 }
0x2233   :  { %5336 = vpow2.f32 %v4962_v59 }
0x2234   :  { %5338 = vpow2.f32 %v4963_v29 }
0x223b   :  { %v5333_v3 = vpop.eup %5332 }
0x223c   :  { %2419 = vrot.lane.b32.xlu0 %v5333_v3, %s5782_s8 }
0x223f   :  { %v5335_v8 = vpop.eup %5334 }
0x2240   :  { %2433 = vrot.lane.b32.xlu1 %v5335_v8, %s5782_s8  ;;  %v5337_v60 = vpop.eup %5336 }
0x2241   :  { %v2403_v6 = vadd.f32 1.0, %v5337_v60  ;;  %v5339_v62 = vpop.eup %5338 }
0x2242   :  { %v2410_v61 = vadd.f32 1.0, %v5339_v62 }
0x2243   :  { %5340 = vrcp.f32 %v2403_v6 }
0x2244   :  { %5342 = vrcp.f32 %v2410_v61 }
0x2250   :  { %v5341_v2 = vpop.eup %5340 }
0x2251   :  { %v5343_v5 = vpop.eup %5342  ;;  %v2417_v11 = vmul.f32 %v5341_v2, %v2415_v10 }
0x2252   :  { %v2431_v12 = vmul.f32 %v5343_v5, %v2429_v13 }
0x22ae   :  { %v2420_v32 = vpop.permute.xlu0 %2419 }
0x22af   :  { %v2422_v33 = vmul.f32 %v5341_v2, %v2420_v32 }
0x22b1   :  { %2424 = vrot.lane.b32.xlu0 %v2422_v33, %s5783_s0 }
0x22b2   :  { %v2434_v7 = vpop.permute.xlu1 %2433 }
0x22b3   :  { %v2436_v9 = vmul.f32 %v5343_v5, %v2434_v7 }
0x22b5   :  { %2438 = vrot.lane.b32.xlu1 %v2436_v9, %s5783_s0 }
0x2323   :  { %v2425_v15 = vpop.permute.xlu0 %2424 }
0x2324   :  { %v6705_v28 = vadd.f32 %v2425_v15, %v2417_v11  ;;  %v6759_v15 = vld [vmem:[%s7473_s12 + $0x78] sm:$0xff] }
0x2326   :  { %5344 = vtanh.f32 %v6705_v28  ;;  %v2568_v8 = vrot.slane %v6705_v28, 6 }
0x2327   :  { %v2439_v35 = vpop.permute.xlu1 %2438 }
0x2328   :  { %v6708_v16 = vadd.f32 %v2439_v35, %v2431_v12 }
0x232a   :  { %5346 = vtanh.f32 %v6708_v16  ;;  %v2582_v29 = vrot.slane %v6708_v16, 2  ;;  %v5122_v16 = vld [vmem:[#allocation11 + $0x10] ss:$8 sps:$4 sm:$0xff]  }
0x2333   :  { %v5345_v14 = vpop.eup %5344 }
0x2334   :  { %2444 = vrot.lane.b32.xlu0 %v5345_v14, %s5782_s8 }
0x2337   :  { %v5347_v18 = vpop.eup %5346 }
0x2338   :  { %2450 = vrot.lane.b32.xlu1 %v5347_v18, %s5782_s8  ;;  %v5127_v18 = vld [vmem:[#allocation11 + $0x4] ss:$8 sps:$4 sm:$0xff]  }
0x23a6   :  { %v2445_v26 = vpop.permute.xlu0 %2444 }
0x23a7   :  { %v2447_v38 = vmul.f32 %v5341_v2, %v2445_v26  ;;  %v5125_v26 = vld [vmem:[#allocation11] ss:$8 sps:$4 sm:$0xff]  }
0x23a9   :  { %2455 = vrot.lane.b32.xlu1 %v2447_v38, %s5783_s0  ;;  %v3140_v38 = vld [vmem:[%s7510_s1] sm:$0xf] }
0x23aa   :  { %v2451_v17 = vpop.permute.xlu1 %2450 }
0x23ab   :  { %v6714_v39 = vmul.f32 %v5343_v5, %v2451_v17  ;;  %v5124_v5 = vld [vmem:[#allocation11 + $0x14] ss:$8 sps:$4 sm:$0xff]   ;;  %v6777_v17 = vld [vmem:[%s7473_s12 + $0x70] sm:$0xff] }
0x23ac   :  { %3192 = vmatprep.subr.bf16.mxu0 %v5124_v5 }
0x23ad   :  { %v2464_v40 = vrot.slane %v6714_v39, 6 }
0x23af   :  { %2465 = vrot.lane.b32.xlu0 %v2464_v40, %s5782_s8  ;;  %v6782_v40 = vld [vmem:[%s7473_s12 + $0x68] sm:$0xff] }
0x241b   :  { %v6718_v41 = vpop.permute.xlu1 %2455 }
0x2421   :  { %v2466_v42 = vpop.permute.xlu0 %2465 }
0x2422   :  { %v2468_v43 = vsel %vm251_vm0, %v6718_v41, %v2466_v42  ;;  %v6788_v42 = vld [vmem:[%s7473_s12 + $0x60] sm:$0xff] }
0x2423   :  { %4964 = vmatmul.mubr.msk.f32.vlgmr.msra.gmra.mxu1 %vm318_vm2, %v2468_v43  ;;  %v6794_v43 = vld [vmem:[%s7473_s12 + $0x58] sm:$0xff] }
0x2424   :  { %2797 = vmatpush1.msra.mxu1 %v6379_v53  ;;  %2844 = vmatprep.mubr.f32.mxu1 %v5781_v1 }
0x2425   :  { %2798 = vmatprep.subr.mxu1 %v6388_v20 }
0x2426   :  { %2799 = vmatpush1.msra.mxu1 %v6394_v21  ;;  %v2543_v21 = vld [vmem:[#allocation2 + $0x18] sm:$0xc] }
0x2427   :  { %2800 = vmatprep.subr.mxu1 %v6399_v22 }
0x2428   :  { %2801 = vmatpush1.msra.mxu1 %v6405_v34 }
0x2429   :  { %2802 = vmatprep.subr.mxu1 %v6427_v44 }
0x242a   :  { %2803 = vmatpush1.msra.mxu1 %v6435_v45  ;;  %v2544_v45 = vld [vmem:[#allocation2] sm:$0x30] }
0x242b   :  { %2804 = vmatprep.subr.mxu1 %v6440_v46 }
0x242c   :  { %2805 = vmatpush1.msra.mxu1 %v6445_v47 }
0x242d   :  { %2806 = vmatprep.subr.mxu1 %v6451_v4 }
0x242e   :  { %2807 = vmatpush1.msra.mxu1 %v6458_v50 }
0x242f   :  { %2808 = vmatprep.subr.mxu1 %v6467_v51 }
0x2430   :  { %2809 = vmatpush1.msra.mxu1 %v6475_v52 }
0x2431   :  { %2810 = vmatprep.subr.mxu1 %v6481_v54 }
0x2432   :  { %2811 = vmatpush1.msra.mxu1 %v6488_v31 }
0x2433   :  { %3400 = vmatprep.subr.mxu1 %v6759_v15 }
0x24e3   :  { %v2538_v53 = vpop.f32.mrf.mxu1 }
0x24e4   :  { %v2546_v20 = vrot.slane %v2538_v53, 6  ;;  %v6801_v53 = vld [vmem:[%s7473_s12 + $0x50] sm:$0xff] }
0x24e5   :  { %v2540_v22 = vpop.f32.mrf.mxu1 }
0x24e6   :  { %v2548_v34 = vadd.f32 %v2546_v20, %v2543_v21  ;;  %v2550_v44 = vrot.slane %v2540_v22, 4  ;;  %v6807_v20 = vld [vmem:[%s7473_s12 + $0x48] sm:$0xff]  ;;  %v6813_v21 = vld [vmem:[%s7473_s12 + $0x40] sm:$0xff]  ;;  %v6819_v22 = vld [vmem:[%s7473_s12 + $0x38] sm:$0xff] }
0x24e8   :  { %5348 = vtanh.f32 %v2548_v34  ;;  %v2552_v46 = vadd.f32 %v2550_v44, %v2544_v45  ;;  %v4965_v50 = vmul.f32 -1.442695, %v2548_v34  ;;  %v6825_v34 = vld [vmem:[%s7473_s12 + $0x30] sm:$0xff]  ;;  %v6831_v44 = vld [vmem:[%s7473_s12 + $0x28] sm:$0xff]  ;;  %v6837_v45 = vld [vmem:[%s7473_s12 + $0x20] sm:$0xff] }
0x24ea   :  { %5350 = vtanh.f32 %v2552_v46  ;;  %v4966_v51 = vmul.f32 -1.442695, %v2552_v46  ;;  %v6843_v46 = vld [vmem:[%s7473_s12 + $0x18] sm:$0xff] }
0x24eb   :  { %5352 = vpow2.f32 %v4965_v50  ;;  %v6861_v50 = vld [vmem:[%s7473_s12] sm:$0xff] }
0x24ec   :  { %5354 = vpow2.f32 %v4966_v51 }
0x24f5   :  { %v5349_v47 = vpop.eup %5348 }
0x24f6   :  { %2572 = vrot.lane.b32.xlu0 %v5349_v47, %s5782_s8  ;;  %v6849_v47 = vld [vmem:[%s7473_s12 + $0x10] sm:$0xff] }
0x24f7   :  { %v5351_v4 = vpop.eup %5350 }
0x24f8   :  { %2586 = vrot.lane.b32.xlu1 %v5351_v4, %s5782_s8  ;;  %v5353_v52 = vpop.eup %5352  ;;  %v6855_v4 = vld [vmem:[%s7473_s12 + $0x8] sm:$0xff] }
0x24f9   :  { %v5355_v54 = vpop.eup %5354  ;;  %v2556_v31 = vadd.f32 1.0, %v5353_v52 }
0x24fa   :  { %v2563_v48 = vadd.f32 1.0, %v5355_v54  ;;  %v2697_v54 = vld [vmem:[#allocation2 + $0x18] sm:$0x30] }
0x24fb   :  { %5356 = vrcp.f32 %v2556_v31 }
0x24fc   :  { %5358 = vrcp.f32 %v2563_v48  ;;  %v3145_v48 = vld [vmem:[#allocation13] sm:$0x3] }
0x2508   :  { %v5357_v49 = vpop.eup %5356 }
0x2509   :  { %v5359_v57 = vpop.eup %5358  ;;  %v2570_v59 = vmul.f32 %v5357_v49, %v2568_v8 }
0x250a   :  { %v2584_v62 = vmul.f32 %v5359_v57, %v2582_v29 }
0x2568   :  { %v2573_v55 = vpop.permute.xlu0 %2572 }
0x2569   :  { %v2575_v56 = vmul.f32 %v5357_v49, %v2573_v55 }
0x256a   :  { %v2587_v58 = vpop.permute.xlu1 %2586 }
0x256b   :  { %2577 = vrot.lane.b32.xlu0 %v2575_v56, %s5783_s0  ;;  %v2589_v3 = vmul.f32 %v5359_v57, %v2587_v58  ;;  %v2698_v56 = vld [vmem:[#allocation2] sm:$0xc]  ;;  %v3150_v58 = vrot.slane %v3145_v48, %v6104_v25 }
0x256d   :  { %2591 = vrot.lane.b32.xlu1 %v2589_v3, %s5783_s0  ;;  %v3154_v3 = vrot.slane %v3145_v48, %v6110_v27 }
0x25dd   :  { %v2578_v60 = vpop.permute.xlu0 %2577 }
0x25de   :  { %v6745_v6 = vadd.f32 %v2578_v60, %v2570_v59 }
0x25df   :  { %v2592_v61 = vpop.permute.xlu1 %2591 }
0x25e0   :  { %5360 = vtanh.f32 %v6745_v6  ;;  %v6748_v2 = vadd.f32 %v2592_v61, %v2584_v62 }
0x25e2   :  { %5362 = vtanh.f32 %v6748_v2 }
0x25ed   :  { %v5361_v32 = vpop.eup %5360 }
0x25ee   :  { %2597 = vrot.lane.b32.xlu0 %v5361_v32, %s5782_s8 }
0x25ef   :  { %v5363_v33 = vpop.eup %5362 }
0x25f0   :  { %2603 = vrot.lane.b32.xlu1 %v5363_v33, %s5782_s8 }
0x2660   :  { %v2598_v7 = vpop.permute.xlu0 %2597 }
0x2661   :  { %v2600_v9 = vmul.f32 %v5357_v49, %v2598_v7 }
0x2662   :  { %v2604_v10 = vpop.permute.xlu1 %2603 }
0x2663   :  { %2608 = vrot.lane.b32.xlu1 %v2600_v9, %s5783_s0  ;;  %v6754_v11 = vmul.f32 %v5359_v57, %v2604_v10 }
0x2665   :  { %v2617_v13 = vrot.slane %v6754_v11, 2 }
0x2667   :  { %2618 = vrot.lane.b32.xlu0 %v2617_v13, %s5782_s8 }
0x26d5   :  { %v6764_v28 = vpop.permute.xlu1 %2608 }
0x26d9   :  { %v2619_v12 = vpop.permute.xlu0 %2618 }
0x26da   :  { %v2621_v35 = vsel %vm251_vm0, %v6764_v28, %v2619_v12 }
0x26db   :  { %v2623_v14 = vrot.slane %v2621_v35, 2 }
0x26dd   :  { %4967 = vmatmul.mubr.msk.f32.vlgmr.msra.gmra.mxu0 %vm318_vm2, %v2623_v14 }
0x26de   :  { %3193 = vmatpush1.bf16.msra.mxu0 %v5122_v16  ;;  %3212 = vmatprep.mubr.bf16.mxu0 %v5780_v0 }
0x26df   :  { %3194 = vmatprep.subr.bf16.mxu0 %v5127_v18 }
0x26e2   :  { %3195 = vmatpush1.bf16.msra.mxu0 %v5125_v26 }
0x26e3   :  { %3255 = vmatprep.subr.mxu0 %v6759_v15 }
0x26e5   :  { %4978 = vmatmul.mubr.msk.bf16.vlgmr.msra.gmra.mxu0 %vm251_vm0, %v3140_v38 }
0x26e6   :  { %3256 = vmatpush1.msra.mxu0 %v6777_v17  ;;  %3303 = vmatprep.mubr.f32.mxu0 %v5781_v1 }
0x26e7   :  { %3257 = vmatprep.subr.mxu0 %v6782_v40 }
0x26e8   :  { %3258 = vmatpush1.msra.mxu0 %v6788_v42 }
0x26e9   :  { %3259 = vmatprep.subr.mxu0 %v6794_v43 }
0x26ea   :  { %3260 = vmatpush1.msra.mxu0 %v6801_v53 }
0x26eb   :  { %3261 = vmatprep.subr.mxu0 %v6807_v20 }
0x26ec   :  { %3262 = vmatpush1.msra.mxu0 %v6813_v21 }
0x26ed   :  { %3263 = vmatprep.subr.mxu0 %v6819_v22 }
0x26ee   :  { %3264 = vmatpush1.msra.mxu0 %v6825_v34 }
0x26ef   :  { %3265 = vmatprep.subr.mxu0 %v6831_v44 }
0x26f0   :  { %3266 = vmatpush1.msra.mxu0 %v6837_v45 }
0x26f1   :  { %3267 = vmatprep.subr.mxu0 %v6843_v46 }
0x26f2   :  { %3268 = vmatpush1.msra.mxu0 %v6849_v47 }
0x26f3   :  { %3269 = vmatprep.subr.mxu0 %v6855_v4 }
0x26f4   :  { %3270 = vmatpush1.msra.mxu0 %v6861_v50 }
0x26f5   :  { %3304 = vmatmul.mubr.f32.vlgmr.msra.gmra.mxu0 %v5781_v1  ;;  %3556 = vmatprep.subr.mxu0 %v6759_v15 }
0x26f6   :  { %3557 = vmatpush1.msra.mxu0 %v6777_v17  ;;  %3604 = vmatprep.mubr.f32.mxu0 %v5781_v1 }
0x26f7   :  { %3558 = vmatprep.subr.mxu0 %v6782_v40 }
0x26f8   :  { %3559 = vmatpush1.msra.mxu0 %v6788_v42 }
0x26f9   :  { %3560 = vmatprep.subr.mxu0 %v6794_v43 }
0x26fa   :  { %3561 = vmatpush1.msra.mxu0 %v6801_v53 }
0x26fb   :  { %3562 = vmatprep.subr.mxu0 %v6807_v20 }
0x26fc   :  { %3563 = vmatpush1.msra.mxu0 %v6813_v21 }
0x26fd   :  { %3564 = vmatprep.subr.mxu0 %v6819_v22 }
0x26fe   :  { %3565 = vmatpush1.msra.mxu0 %v6825_v34 }
0x26ff   :  { %3566 = vmatprep.subr.mxu0 %v6831_v44 }
0x2700   :  { %3567 = vmatpush1.msra.mxu0 %v6837_v45 }
0x2701   :  { %3568 = vmatprep.subr.mxu0 %v6843_v46 }
0x2702   :  { %3569 = vmatpush1.msra.mxu0 %v6849_v47 }
0x2703   :  { %3570 = vmatprep.subr.mxu0 %v6855_v4 }
0x2704   :  { %3571 = vmatpush1.msra.mxu0 %v6861_v50 }
0x279d   :  { %v2692_v51 = vpop.f32.mrf.mxu0 }
0x279e   :  { %v2700_v52 = vrot.slane %v2692_v51, 4 }
0x279f   :  { %v2694_v31 = vpop.f32.mrf.mxu0 }
0x27a0   :  { %v2702_v49 = vadd.f32 %v2700_v52, %v2697_v54  ;;  %v2704_v55 = vrot.slane %v2694_v31, 6 }
0x27a2   :  { %5364 = vtanh.f32 %v2702_v49  ;;  %v2706_v57 = vadd.f32 %v2704_v55, %v2698_v56  ;;  %v4968_v18 = vmul.f32 -1.442695, %v2702_v49 }
0x27a4   :  { %5366 = vtanh.f32 %v2706_v57  ;;  %v4969_v26 = vmul.f32 -1.442695, %v2706_v57 }
0x27a5   :  { %v3214_v8 = vpop.f32.mrf.mxu0 }
0x27a6   :  { %v3215_v59 = vadd.f32 %v3214_v8, %v3150_v58 }
0x27a7   :  { %v3216_v29 = vpop.f32.mrf.mxu0 }
0x27a8   :  { %3221 = vst [vmem:[#allocation4] sm:$0xff] %v3215_v59  ;;  %v3217_v60 = vadd.f32 %v3216_v29, %v3154_v3 }
0x27a9   :  { %v3218_v62 = vpop.f32.mrf.mxu0 }
0x27aa   :  { %3222 = vst [vmem:[#allocation4 + $0x8] sm:$0xff] %v3217_v60 }
0x27ab   :  { %v3219_v61 = vpop.f32.mrf.mxu0 }
0x27af   :  { %v5365_v32 = vpop.eup %5364  ;;  %v3310_v7 = vld [vmem:[#allocation4] sm:$0x3] }
0x27b0   :  { %2726 = vrot.lane.b32.xlu0 %v5365_v32, %s5782_s8 }
0x27b1   :  { %v5367_v33 = vpop.eup %5366  ;;  %v3311_v12 = vld [vmem:[#allocation4 + $0x8] sm:$0xc0] }
0x27b2   :  { %2740 = vrot.lane.b32.xlu1 %v5367_v33, %s5782_s8 }
0x27b5   :  { %v3305_v5 = vpop.f32.mrf.mxu0 }
0x27b6   :  { %v3312_v9 = vadd.f32 %v3310_v7, %v3305_v5 }
0x27b7   :  { %v3307_v10 = vpop.f32.mrf.mxu0 }
0x27b8   :  { %5368 = vtanh.f32 %v3312_v9  ;;  %v3314_v13 = vrot.slane %v3307_v10, 2  ;;  %v4979_v54 = vmul.f32 -1.442695, %v3312_v9  ;;  %v2722_v9 = vrot.slane %v6745_v6, 6 }
0x27ba   :  { %v3316_v35 = vadd.f32 %v3314_v13, %v3311_v12  ;;  %v2736_v13 = vrot.slane %v6748_v2, 2 }
0x27bc   :  { %5370 = vtanh.f32 %v3316_v35  ;;  %v4980_v48 = vmul.f32 -1.442695, %v3316_v35 }
0x27bd   :  { %5372 = vpow2.f32 %v4968_v18 }
0x27be   :  { %5374 = vpow2.f32 %v4969_v26 }
0x27c5   :  { %v5369_v16 = vpop.eup %5368 }
0x27c6   :  { %3333 = vrot.lane.b32.xlu0 %v5369_v16, %s5782_s8 }
0x27c9   :  { %v5371_v14 = vpop.eup %5370 }
0x27ca   :  { %3344 = vrot.lane.b32.xlu1 %v5371_v14, %s5782_s8  ;;  %v5373_v38 = vpop.eup %5372 }
0x27cb   :  { %v5375_v51 = vpop.eup %5374  ;;  %v2710_v52 = vadd.f32 1.0, %v5373_v38 }
0x27cc   :  { %v2717_v31 = vadd.f32 1.0, %v5375_v51 }
0x27cd   :  { %5376 = vrcp.f32 %v2710_v52 }
0x27ce   :  { %5378 = vpow2.f32 %v4979_v54 }
0x27cf   :  { %5380 = vrcp.f32 %v2717_v31 }
0x27d0   :  { %5382 = vpow2.f32 %v4980_v48 }
0x27da   :  { %v5377_v55 = vpop.eup %5376 }
0x27db   :  { %v5379_v3 = vpop.eup %5378  ;;  %v2724_v10 = vmul.f32 %v5377_v55, %v2722_v9 }
0x27dc   :  { %v5381_v8 = vpop.eup %5380  ;;  %v3320_v57 = vadd.f32 1.0, %v5379_v3 }
0x27dd   :  { %v5383_v29 = vpop.eup %5382  ;;  %v2738_v16 = vmul.f32 %v5381_v8, %v2736_v13 }
0x27de   :  { %5384 = vrcp.f32 %v3320_v57  ;;  %v3327_v60 = vadd.f32 1.0, %v5383_v29 }
0x27e0   :  { %5386 = vrcp.f32 %v3327_v60 }
0x27eb   :  { %v5385_v62 = vpop.eup %5384 }
0x27ec   :  { %v3331_v6 = vmul.f32 0.0, %v5385_v62 }
0x27ed   :  { %v5387_v33 = vpop.eup %5386 }
0x27ee   :  { %v3342_v52 = vmul.f32 0.0, %v5387_v33 }
0x2822   :  { %v2727_v56 = vpop.permute.xlu0 %2726 }
0x2823   :  { %v2729_v58 = vmul.f32 %v5377_v55, %v2727_v56 }
0x2824   :  { %v2741_v59 = vpop.permute.xlu1 %2740 }
0x2825   :  { %2731 = vrot.lane.b32.xlu0 %v2729_v58, %s5783_s0  ;;  %v2743_v49 = vmul.f32 %v5381_v8, %v2741_v59 }
0x2827   :  { %2745 = vrot.lane.b32.xlu1 %v2743_v49, %s5783_s0 }
0x2838   :  { %v3334_v61 = vpop.permute.xlu0 %3333 }
0x2839   :  { %v3336_v32 = vmul.f32 %v5385_v62, %v3334_v61 }
0x283b   :  { %3338 = vrot.lane.b32.xlu0 %v3336_v32, %s5783_s0 }
0x283c   :  { %v3345_v5 = vpop.permute.xlu1 %3344 }
0x283d   :  { %v3347_v7 = vmul.f32 %v5387_v33, %v3345_v5 }
0x283f   :  { %3349 = vrot.lane.b32.xlu1 %v3347_v7, %s5783_s0 }
0x2897   :  { %v2732_v12 = vpop.permute.xlu0 %2731 }
0x2898   :  { %v6896_v35 = vadd.f32 %v2732_v12, %v2724_v10 }
0x2899   :  { %v2746_v14 = vpop.permute.xlu1 %2745 }
0x289a   :  { %5388 = vtanh.f32 %v6896_v35  ;;  %v6899_v18 = vadd.f32 %v2746_v14, %v2738_v16 }
0x289c   :  { %5390 = vtanh.f32 %v6899_v18 }
0x28a7   :  { %v5389_v26 = vpop.eup %5388 }
0x28a8   :  { %2751 = vrot.lane.b32.xlu0 %v5389_v26, %s5782_s8 }
0x28a9   :  { %v5391_v38 = vpop.eup %5390 }
0x28aa   :  { %2757 = vrot.lane.b32.xlu1 %v5391_v38, %s5782_s8 }
0x28ad   :  { %v3339_v51 = vpop.permute.xlu0 %3338 }
0x28ae   :  { %v6904_v2 = vadd.f32 %v3339_v51, %v3331_v6 }
0x28b0   :  { %5392 = vtanh.f32 %v6904_v2 }
0x28b1   :  { %v3350_v54 = vpop.permute.xlu1 %3349 }
0x28b2   :  { %v6907_v31 = vadd.f32 %v3350_v54, %v3342_v52  ;;  %v3480_v52 = vrot.slane %v6904_v2, 6 }
0x28b4   :  { %5394 = vtanh.f32 %v6907_v31 }
0x28bd   :  { %v5393_v48 = vpop.eup %5392 }
0x28be   :  { %3355 = vrot.lane.b32.xlu0 %v5393_v48, %s5782_s8  ;;  %v3494_v48 = vrot.slane %v6907_v31, 2 }
0x28c1   :  { %v5395_v56 = vpop.eup %5394 }
0x28c2   :  { %3361 = vrot.lane.b32.xlu1 %v5395_v56, %s5782_s8 }
0x291a   :  { %v2752_v58 = vpop.permute.xlu0 %2751 }
0x291b   :  { %v2754_v3 = vmul.f32 %v5377_v55, %v2752_v58 }
0x291c   :  { %v2758_v59 = vpop.permute.xlu1 %2757 }
0x291d   :  { %2762 = vrot.lane.b32.xlu1 %v2754_v3, %s5783_s0  ;;  %v6913_v49 = vmul.f32 %v5381_v8, %v2758_v59 }
0x291f   :  { %v2771_v57 = vrot.slane %v6913_v49, 6 }
0x2921   :  { %2772 = vrot.lane.b32.xlu0 %v2771_v57, %s5782_s8 }
0x2930   :  { %v3356_v29 = vpop.permute.xlu0 %3355 }
0x2931   :  { %v3358_v60 = vmul.f32 %v5385_v62, %v3356_v29 }
0x2933   :  { %3366 = vrot.lane.b32.xlu1 %v3358_v60, %s5783_s0 }
0x2934   :  { %v3362_v61 = vpop.permute.xlu1 %3361 }
0x2935   :  { %v6918_v32 = vmul.f32 %v5387_v33, %v3362_v61 }
0x2937   :  { %v3376_v5 = vrot.slane %v6918_v32, 6 }
0x2939   :  { %3377 = vrot.lane.b32.xlu0 %v3376_v5, %s5782_s8 }
0x298f   :  { %v6922_v55 = vpop.permute.xlu1 %2762 }
0x2993   :  { %v2773_v7 = vpop.permute.xlu0 %2772 }
0x2994   :  { %v2775_v8 = vsel %vm251_vm0, %v6922_v55, %v2773_v7 }
0x2995   :  { %v2777_v9 = vrot.slane %v2775_v8, 4 }
0x2997   :  { %4970 = vmatmul.mubr.msk.f32.vlgmr.msra.gmra.mxu1 %vm318_vm2, %v2777_v9 }
0x2998   :  { %3401 = vmatpush1.msra.mxu1 %v6777_v17  ;;  %3448 = vmatprep.mubr.f32.mxu1 %v5781_v1 }
0x2999   :  { %3402 = vmatprep.subr.mxu1 %v6782_v40 }
0x299a   :  { %3403 = vmatpush1.msra.mxu1 %v6788_v42 }
0x299b   :  { %3404 = vmatprep.subr.mxu1 %v6794_v43 }
0x299c   :  { %3405 = vmatpush1.msra.mxu1 %v6801_v53 }
0x299d   :  { %3406 = vmatprep.subr.mxu1 %v6807_v20 }
0x299e   :  { %3407 = vmatpush1.msra.mxu1 %v6813_v21 }
0x299f   :  { %3408 = vmatprep.subr.mxu1 %v6819_v22 }
0x29a0   :  { %3409 = vmatpush1.msra.mxu1 %v6825_v34 }
0x29a1   :  { %3410 = vmatprep.subr.mxu1 %v6831_v44 }
0x29a2   :  { %3411 = vmatpush1.msra.mxu1 %v6837_v45 }
0x29a3   :  { %3412 = vmatprep.subr.mxu1 %v6843_v46 }
0x29a4   :  { %3413 = vmatpush1.msra.mxu1 %v6849_v47 }
0x29a5   :  { %v3367_v62 = vpop.permute.xlu1 %3366  ;;  %3414 = vmatprep.subr.mxu1 %v6855_v4 }
0x29a6   :  { %3369 = vst.msk [vmem:[#allocation5] sm:$0x3] %vm452_vm1, %v3367_v62  ;;  %3415 = vmatpush1.msra.mxu1 %v6861_v50 }
0x29a7   :  { %3710 = vmatprep.subr.mxu1 %v6759_v15 }
0x29ab   :  { %v3378_v33 = vpop.permute.xlu0 %3377 }
0x29ac   :  { %v3380_v10 = vsel %vm251_vm0, %v3367_v62, %v3378_v33 }
0x29ad   :  { %4981 = vmatmul.mubr.msk.f32.vlgmr.msra.gmra.mxu1 %vm318_vm2, %v3380_v10 }
0x29ae   :  { %3711 = vmatpush1.msra.mxu1 %v6777_v17  ;;  %3758 = vmatprep.mubr.f32.mxu1 %v5781_v1 }
0x29af   :  { %3712 = vmatprep.subr.mxu1 %v6782_v40 }
0x29b0   :  { %3713 = vmatpush1.msra.mxu1 %v6788_v42 }
0x29b1   :  { %3714 = vmatprep.subr.mxu1 %v6794_v43  ;;  %v3455_v43 = vld [vmem:[#allocation4] sm:$0xc] }
0x29b2   :  { %3715 = vmatpush1.msra.mxu1 %v6801_v53 }
0x29b3   :  { %3716 = vmatprep.subr.mxu1 %v6807_v20 }
0x29b4   :  { %3717 = vmatpush1.msra.mxu1 %v6813_v21 }
0x29b5   :  { %3718 = vmatprep.subr.mxu1 %v6819_v22  ;;  %v3456_v22 = vld [vmem:[#allocation4 + $0x8] sm:$0x30] }
0x29b6   :  { %3719 = vmatpush1.msra.mxu1 %v6825_v34 }
0x29b7   :  { %3720 = vmatprep.subr.mxu1 %v6831_v44 }
0x29b8   :  { %3721 = vmatpush1.msra.mxu1 %v6837_v45 }
0x29b9   :  { %3722 = vmatprep.subr.mxu1 %v6843_v46 }
0x29ba   :  { %3723 = vmatpush1.msra.mxu1 %v6849_v47 }
0x29bb   :  { %3724 = vmatprep.subr.mxu1 %v6855_v4 }
0x29bc   :  { %3725 = vmatpush1.msra.mxu1 %v6861_v50 }
0x2a57   :  { %v6963_v15 = vpop.f32.mrf.mxu1 }
0x2a59   :  { %v6965_v17 = vpop.f32.mrf.mxu1 }
0x2a6d   :  { %v3450_v40 = vpop.f32.mrf.mxu1 }
0x2a6e   :  { %v3458_v42 = vrot.slane %v3450_v40, 6 }
0x2a6f   :  { %v3452_v53 = vpop.f32.mrf.mxu1 }
0x2a70   :  { %v3460_v20 = vadd.f32 %v3458_v42, %v3455_v43  ;;  %v3462_v21 = vrot.slane %v3452_v53, 4  ;;  %v3611_v42 = vld [vmem:[#allocation4] sm:$0x30] }
0x2a72   :  { %5396 = vtanh.f32 %v3460_v20  ;;  %v3464_v34 = vadd.f32 %v3462_v21, %v3456_v22  ;;  %v4982_v46 = vmul.f32 -1.442695, %v3460_v20  ;;  %v3612_v21 = vld [vmem:[#allocation4 + $0x8] sm:$0xc] }
0x2a74   :  { %5398 = vtanh.f32 %v3464_v34  ;;  %v4983_v47 = vmul.f32 -1.442695, %v3464_v34 }
0x2a75   :  { %5400 = vpow2.f32 %v4982_v46 }
0x2a76   :  { %5402 = vpow2.f32 %v4983_v47 }
0x2a7f   :  { %v5397_v44 = vpop.eup %5396 }
0x2a80   :  { %3484 = vrot.lane.b32.xlu0 %v5397_v44, %s5782_s8 }
0x2a81   :  { %v5399_v45 = vpop.eup %5398 }
0x2a82   :  { %3498 = vrot.lane.b32.xlu1 %v5399_v45, %s5782_s8  ;;  %v5401_v4 = vpop.eup %5400 }
0x2a83   :  { %v5403_v50 = vpop.eup %5402  ;;  %v3468_v13 = vadd.f32 1.0, %v5401_v4 }
0x2a84   :  { %v3475_v12 = vadd.f32 1.0, %v5403_v50 }
0x2a85   :  { %5404 = vrcp.f32 %v3468_v13 }
0x2a86   :  { %5406 = vrcp.f32 %v3475_v12 }
0x2a92   :  { %v5405_v16 = vpop.eup %5404 }
0x2a93   :  { %v5407_v38 = vpop.eup %5406  ;;  %v3482_v54 = vmul.f32 %v5405_v16, %v3480_v52 }
0x2a94   :  { %v3496_v3 = vmul.f32 %v5407_v38, %v3494_v48 }
0x2af2   :  { %v3485_v14 = vpop.permute.xlu0 %3484 }
0x2af3   :  { %v3487_v26 = vmul.f32 %v5405_v16, %v3485_v14 }
0x2af4   :  { %v3499_v6 = vpop.permute.xlu1 %3498 }
0x2af5   :  { %3489 = vrot.lane.b32.xlu0 %v3487_v26, %s5783_s0  ;;  %v3501_v51 = vmul.f32 %v5407_v38, %v3499_v6 }
0x2af7   :  { %3503 = vrot.lane.b32.xlu1 %v3501_v51, %s5783_s0 }
0x2b67   :  { %v3490_v56 = vpop.permute.xlu0 %3489 }
0x2b68   :  { %v3492_v58 = vadd.f32 %v3490_v56, %v3482_v54 }
0x2b69   :  { %v3504_v59 = vpop.permute.xlu1 %3503 }
0x2b6a   :  { %5408 = vtanh.f32 %v3492_v58  ;;  %v3506_v57 = vadd.f32 %v3504_v59, %v3496_v3  ;;  %v3636_v6 = vrot.slane %v3492_v58, 6 }
0x2b6c   :  { %5410 = vtanh.f32 %v3506_v57  ;;  %v3650_v52 = vrot.slane %v3506_v57, 2 }
0x2b77   :  { %v5409_v29 = vpop.eup %5408 }
0x2b78   :  { %3509 = vrot.lane.b32.xlu0 %v5409_v29, %s5782_s8 }
0x2b79   :  { %v5411_v60 = vpop.eup %5410 }
0x2b7a   :  { %3515 = vrot.lane.b32.xlu1 %v5411_v60, %s5782_s8 }
0x2bea   :  { %v3510_v61 = vpop.permute.xlu0 %3509 }
0x2beb   :  { %v3512_v5 = vmul.f32 %v5405_v16, %v3510_v61 }
0x2bec   :  { %v3516_v7 = vpop.permute.xlu1 %3515 }
0x2bed   :  { %3520 = vrot.lane.b32.xlu1 %v3512_v5, %s5783_s0  ;;  %v6976_v2 = vmul.f32 %v5407_v38, %v3516_v7 }
0x2bef   :  { %v3531_v31 = vrot.slane %v6976_v2, 2 }
0x2bf1   :  { %3532 = vrot.lane.b32.xlu0 %v3531_v31, %s5782_s8 }
0x2c5f   :  { %v3521_v8 = vpop.permute.xlu1 %3520 }
0x2c60   :  { %3524 = vst.msk [vmem:[#allocation5] sm:$0xc] %vm609_vm3, %v3521_v8 }
0x2c63   :  { %v3533_v9 = vpop.permute.xlu0 %3532 }
0x2c64   :  { %v3535_v62 = vsel %vm251_vm0, %v3521_v8, %v3533_v9 }
0x2c65   :  { %v3537_v33 = vrot.slane %v3535_v62, 2 }
0x2c67   :  { %4984 = vmatmul.mubr.msk.f32.vlgmr.msra.gmra.mxu0 %vm318_vm2, %v3537_v33 }
0x2c68   :  { %3958 = vmatprep.mubr.bf16.mxu0 %v5780_v0 }
0x2d27   :  { %v3606_v10 = vpop.f32.mrf.mxu0 }
0x2d28   :  { %v3614_v40 = vrot.slane %v3606_v10, 4 }
0x2d29   :  { %v3608_v43 = vpop.f32.mrf.mxu0 }
0x2d2a   :  { %v3616_v53 = vadd.f32 %v3614_v40, %v3611_v42  ;;  %v3618_v20 = vrot.slane %v3608_v43, 6  ;;  %v3765_v40 = vld [vmem:[#allocation4] sm:$0xc0]  ;;  %v3766_v43 = vld [vmem:[#allocation4 + $0x8] sm:$0x3] }
0x2d2c   :  { %5412 = vtanh.f32 %v3616_v53  ;;  %v3620_v22 = vadd.f32 %v3618_v20, %v3612_v21  ;;  %v4985_v45 = vmul.f32 -1.442695, %v3616_v53 }
0x2d2e   :  { %5414 = vtanh.f32 %v3620_v22  ;;  %v4986_v46 = vmul.f32 -1.442695, %v3620_v22 }
0x2d2f   :  { %5416 = vpow2.f32 %v4985_v45 }
0x2d30   :  { %5418 = vpow2.f32 %v4986_v46 }
0x2d39   :  { %v5413_v34 = vpop.eup %5412 }
0x2d3a   :  { %3640 = vrot.lane.b32.xlu0 %v5413_v34, %s5782_s8 }
0x2d3b   :  { %v5415_v44 = vpop.eup %5414 }
0x2d3c   :  { %3654 = vrot.lane.b32.xlu1 %v5415_v44, %s5782_s8  ;;  %v5417_v0 = vpop.eup %5416 }
0x2d3d   :  { %v5419_v47 = vpop.eup %5418  ;;  %v3624_v4 = vadd.f32 1.0, %v5417_v0 }
0x2d3e   :  { %v3631_v50 = vadd.f32 1.0, %v5419_v47 }
0x2d3f   :  { %5420 = vrcp.f32 %v3624_v4 }
0x2d40   :  { %5422 = vrcp.f32 %v3631_v50 }
0x2d4c   :  { %v5421_v13 = vpop.eup %5420 }
0x2d4d   :  { %v5423_v14 = vpop.eup %5422  ;;  %v3638_v51 = vmul.f32 %v5421_v13, %v3636_v6 }
0x2d4e   :  { %v3652_v56 = vmul.f32 %v5423_v14, %v3650_v52 }
0x2dac   :  { %v3641_v12 = vpop.permute.xlu0 %3640 }
0x2dad   :  { %v3643_v16 = vmul.f32 %v5421_v13, %v3641_v12 }
0x2dae   :  { %v3655_v26 = vpop.permute.xlu1 %3654 }
0x2daf   :  { %3645 = vrot.lane.b32.xlu0 %v3643_v16, %s5783_s0  ;;  %v3657_v38 = vmul.f32 %v5423_v14, %v3655_v26 }
0x2db1   :  { %3659 = vrot.lane.b32.xlu1 %v3657_v38, %s5783_s0 }
0x2e21   :  { %v3646_v54 = vpop.permute.xlu0 %3645 }
0x2e22   :  { %v3648_v48 = vadd.f32 %v3646_v54, %v3638_v51 }
0x2e23   :  { %v3660_v3 = vpop.permute.xlu1 %3659 }
0x2e24   :  { %5424 = vtanh.f32 %v3648_v48  ;;  %v3662_v59 = vadd.f32 %v3660_v3, %v3652_v56  ;;  %v3787_v26 = vrot.slane %v3648_v48, 6  ;;  %v5130_v48 = vld [vmem:[#allocation14 + $0x34] ss:$8 sps:$4 sm:$0xff]  }
0x2e25   :  { %3934 = vmatprep.subr.bf16.mxu0 %v5130_v48 }
0x2e26   :  { %5426 = vtanh.f32 %v3662_v59  ;;  %v3801_v38 = vrot.slane %v3662_v59, 2  ;;  %v5128_v59 = vld [vmem:[#allocation14 + $0x30] ss:$8 sps:$4 sm:$0xff]  }
0x2e27   :  { %3935 = vmatpush1.bf16.msra.mxu0 %v5128_v59 }
0x2e31   :  { %v5425_v29 = vpop.eup %5424 }
0x2e32   :  { %3665 = vrot.lane.b32.xlu0 %v5425_v29, %s5782_s8 }
0x2e33   :  { %v5427_v60 = vpop.eup %5426 }
0x2e34   :  { %3671 = vrot.lane.b32.xlu1 %v5427_v60, %s5782_s8 }
0x2ea4   :  { %v3666_v61 = vpop.permute.xlu0 %3665 }
0x2ea5   :  { %v3668_v5 = vmul.f32 %v5421_v13, %v3666_v61  ;;  %v5133_v61 = vld [vmem:[#allocation14 + $0x24] ss:$8 sps:$4 sm:$0xff]  }
0x2ea6   :  { %v3672_v7 = vpop.permute.xlu1 %3671  ;;  %3936 = vmatprep.subr.bf16.mxu0 %v5133_v61 }
0x2ea7   :  { %3676 = vrot.lane.b32.xlu1 %v3668_v5, %s5783_s0  ;;  %v3674_v58 = vmul.f32 %v5423_v14, %v3672_v7  ;;  %v7009_v5 = vld [vmem:[#allocation17 + $0x78] sm:$0xff] }
0x2ea8   :  { %v5131_v7 = vld [vmem:[#allocation14 + $0x20] ss:$8 sps:$4 sm:$0xff]   ;;  %4001 = vmatprep.subr.mxu1 %v7009_v5 }
0x2ea9   :  { %v3685_v57 = vrot.slane %v3674_v58, 6  ;;  %3937 = vmatpush1.bf16.msra.mxu0 %v5131_v7 }
0x2eab   :  { %3686 = vrot.lane.b32.xlu0 %v3685_v57, %s5782_s8  ;;  %v7012_v57 = vld [vmem:[#allocation17 + $0x70] sm:$0xff] }
0x2f19   :  { %v6992_v31 = vpop.permute.xlu1 %3676 }
0x2f1d   :  { %v3687_v8 = vpop.permute.xlu0 %3686 }
0x2f1e   :  { %v3689_v9 = vsel %vm251_vm0, %v6992_v31, %v3687_v8  ;;  %v5136_v8 = vld [vmem:[#allocation14 + $0x14] ss:$8 sps:$4 sm:$0xff]  }
0x2f1f   :  { %v3691_v62 = vrot.slane %v3689_v9, 4  ;;  %v7022_v9 = vld [vmem:[#allocation17 + $0x50] sm:$0xff]  ;;  %3938 = vmatprep.subr.bf16.mxu0 %v5136_v8 }
0x2f21   :  { %4987 = vmatmul.mubr.msk.f32.vlgmr.msra.gmra.mxu1 %vm318_vm2, %v3691_v62  ;;  %v7025_v62 = vld [vmem:[#allocation17 + $0x48] sm:$0xff] }
0x2f22   :  { %4049 = vmatprep.mubr.f32.mxu1 %v5781_v1  ;;  %4002 = vmatpush1.msra.mxu1 %v7012_v57 }
0x2fe1   :  { %v3760_v33 = vpop.f32.mrf.mxu1 }
0x2fe2   :  { %v3768_v10 = vrot.slane %v3760_v33, 2  ;;  %v5134_v33 = vld [vmem:[#allocation14 + $0x10] ss:$8 sps:$4 sm:$0xff]  }
0x2fe3   :  { %v3762_v42 = vpop.f32.mrf.mxu1  ;;  %3939 = vmatpush1.bf16.msra.mxu0 %v5134_v33 }
0x2fe4   :  { %v3770_v53 = vadd.f32 %v3768_v10, %v3765_v40  ;;  %v3771_v20 = vadd.f32 %v3766_v43, %v3762_v42  ;;  %v7028_v10 = vld [vmem:[#allocation17 + $0x40] sm:$0xff]  ;;  %v7031_v42 = vld [vmem:[#allocation17 + $0x38] sm:$0xff]  ;;  %v7034_v43 = vld [vmem:[#allocation17 + $0x30] sm:$0xff] }
0x2fe5   :  { %v5139_v40 = vld [vmem:[#allocation14 + $0x4] ss:$8 sps:$4 sm:$0xff]  }
0x2fe6   :  { %5428 = vtanh.f32 %v3770_v53  ;;  %v4988_v34 = vmul.f32 -1.442695, %v3770_v53  ;;  %v4989_v44 = vmul.f32 -1.442695, %v3771_v20  ;;  %3940 = vmatprep.subr.bf16.mxu0 %v5139_v40 }
0x2fe7   :  { %5430 = vtanh.f32 %v3771_v20  ;;  %v5137_v20 = vld [vmem:[#allocation14] ss:$8 sps:$4 sm:$0xff]  }
0x2fe8   :  { %5432 = vpow2.f32 %v4988_v34  ;;  %3941 = vmatpush1.bf16.msra.mxu0 %v5137_v20 }
0x2fe9   :  { %5434 = vpow2.f32 %v4989_v44  ;;  %4145 = vmatprep.subr.mxu0 %v7009_v5 }
0x2ff3   :  { %v5429_v21 = vpop.eup %5428 }
0x2ff4   :  { %v5431_v22 = vpop.eup %5430  ;;  %3791 = vrot.lane.b32.xlu1 %v5429_v21, %s5782_s8 }
0x2ff5   :  { %3805 = vrot.lane.b32.xlu0 %v5431_v22, %s5782_s8  ;;  %v5433_v45 = vpop.eup %5432 }
0x2ff6   :  { %v5435_v46 = vpop.eup %5434  ;;  %v3775_v0 = vadd.f32 1.0, %v5433_v45 }
0x2ff7   :  { %v3782_v47 = vadd.f32 1.0, %v5435_v46  ;;  %v7044_v46 = vld [vmem:[#allocation17 + $0x28] sm:$0xff] }
0x2ff8   :  { %5436 = vrcp.f32 %v3775_v0  ;;  %v7049_v0 = vld [vmem:[#allocation17 + $0x20] sm:$0xff] }
0x2ff9   :  { %5438 = vrcp.f32 %v3782_v47  ;;  %v7051_v47 = vld [vmem:[#allocation17 + $0x18] sm:$0xff] }
0x3005   :  { %v5437_v4 = vpop.eup %5436 }
0x3006   :  { %v5439_v13 = vpop.eup %5438  ;;  %v3789_v6 = vmul.f32 %v5437_v4, %v3787_v26 }
0x3007   :  { %v3803_v52 = vmul.f32 %v5439_v13, %v3801_v38 }
0x3066   :  { %v3792_v50 = vpop.permute.xlu1 %3791 }
0x3067   :  { %v3794_v12 = vmul.f32 %v5437_v4, %v3792_v50  ;;  %v3806_v16 = vpop.permute.xlu0 %3805 }
0x3068   :  { %v3808_v14 = vmul.f32 %v5439_v13, %v3806_v16 }
0x3069   :  { %3796 = vrot.lane.b32.xlu1 %v3794_v12, %s5783_s0  ;;  %v7060_v12 = vld [vmem:[#allocation17] sm:$0xff] }
0x306a   :  { %3810 = vrot.lane.b32.xlu0 %v3808_v14, %s5783_s0 }
0x30db   :  { %v3797_v51 = vpop.permute.xlu1 %3796 }
0x30dc   :  { %v3799_v54 = vadd.f32 %v3797_v51, %v3789_v6  ;;  %v3811_v56 = vpop.permute.xlu0 %3810 }
0x30dd   :  { %v3813_v3 = vadd.f32 %v3811_v56, %v3803_v52 }
0x30de   :  { %5440 = vtanh.f32 %v3799_v54 }
0x30df   :  { %5442 = vtanh.f32 %v3813_v3 }
0x30eb   :  { %v5441_v29 = vpop.eup %5440 }
0x30ec   :  { %v5443_v60 = vpop.eup %5442  ;;  %3816 = vrot.lane.b32.xlu1 %v5441_v29, %s5782_s8 }
0x30ed   :  { %3822 = vrot.lane.b32.xlu0 %v5443_v60, %s5782_s8 }
0x30f0   :  { %3371 = vrot.lane.b32.xlu1 %v6918_v32, %s5782_s8  ;;  %v7015_v32 = vld [vmem:[#allocation17 + $0x68] sm:$0xff] }
0x30f1   :  { %3526 = vrot.lane.b32.xlu0 %v6976_v2, %s5782_s8  ;;  %v7017_v2 = vld [vmem:[#allocation17 + $0x60] sm:$0xff]  ;;  %4003 = vmatprep.subr.mxu1 %v7015_v32 }
0x30f2   :  { %4004 = vmatpush1.msra.mxu1 %v7017_v2 }
0x30f4   :  { %3681 = vrot.lane.b32.xlu1 %v3674_v58, %s5782_s8  ;;  %v7019_v58 = vld [vmem:[#allocation17 + $0x58] sm:$0xff] }
0x30f5   :  { %4005 = vmatprep.subr.mxu1 %v7019_v58 }
0x30f6   :  { %4006 = vmatpush1.msra.mxu1 %v7022_v9 }
0x30f7   :  { %4007 = vmatprep.subr.mxu1 %v7025_v62 }
0x30f8   :  { %4008 = vmatpush1.msra.mxu1 %v7028_v10 }
0x30f9   :  { %4009 = vmatprep.subr.mxu1 %v7031_v42 }
0x30fa   :  { %4010 = vmatpush1.msra.mxu1 %v7034_v43 }
0x30fb   :  { %4011 = vmatprep.subr.mxu1 %v7044_v46 }
0x30fc   :  { %4012 = vmatpush1.msra.mxu1 %v7049_v0 }
0x30fd   :  { %4013 = vmatprep.subr.mxu1 %v7051_v47 }
0x315e   :  { %v3817_v53 = vpop.permute.xlu1 %3816 }
0x315f   :  { %v3819_v21 = vmul.f32 %v5437_v4, %v3817_v53  ;;  %v3823_v22 = vpop.permute.xlu0 %3822  ;;  %v7053_v4 = vld [vmem:[#allocation17 + $0x10] sm:$0xff] }
0x3160   :  { %v3825_v34 = vmul.f32 %v5439_v13, %v3823_v22  ;;  %v7056_v13 = vld [vmem:[#allocation17 + $0x8] sm:$0xff]  ;;  %4014 = vmatpush1.msra.mxu1 %v7053_v4 }
0x3161   :  { %3827 = vrot.lane.b32.xlu0 %v3819_v21, %s5783_s0  ;;  %4015 = vmatprep.subr.mxu1 %v7056_v13 }
0x3162   :  { %3832 = vrot.lane.b32.xlu1 %v3825_v34, %s5782_s8  ;;  %v3372_v44 = vpop.permute.xlu1 %3371  ;;  %4016 = vmatpush1.msra.mxu1 %v7060_v12 }
0x3163   :  { %3375 = vst.msk [vmem:[#allocation5] sm:$0xc0] %vm459_vm6, %v3372_v44  ;;  %v3527_v45 = vpop.permute.xlu0 %3526  ;;  %4050 = vmatmul.mubr.f32.vlgmr.msra.gmra.mxu1 %v5781_v1  ;;  %4299 = vmatprep.subr.mxu1 %v7009_v5 }
0x3164   :  { %3530 = vst.msk [vmem:[#allocation5] sm:$0x30] %vm616_vm7, %v3527_v45  ;;  %4300 = vmatpush1.msra.mxu1 %v7012_v57  ;;  %4347 = vmatprep.mubr.f32.mxu1 %v5781_v1 }
0x3165   :  { %3679 = vst.msk [vmem:[#allocation5] sm:$0x30] %vm767_vm4, %v6992_v31  ;;  %4301 = vmatprep.subr.mxu1 %v7015_v32 }
0x3166   :  { %v3682_v50 = vpop.permute.xlu1 %3681  ;;  %4302 = vmatpush1.msra.mxu1 %v7017_v2 }
0x3167   :  { %3684 = vst.msk [vmem:[#allocation5] sm:$0xc] %vm774_vm8, %v3682_v50  ;;  %4303 = vmatprep.subr.mxu1 %v7019_v58 }
0x3168   :  { %4304 = vmatpush1.msra.mxu1 %v7022_v9 }
0x3169   :  { %4305 = vmatprep.subr.mxu1 %v7025_v62 }
0x316a   :  { %4306 = vmatpush1.msra.mxu1 %v7028_v10 }
0x316b   :  { %4307 = vmatprep.subr.mxu1 %v7031_v42 }
0x316c   :  { %4308 = vmatpush1.msra.mxu1 %v7034_v43  ;;  %v3838_v14 = vld [vmem:[#allocation5 + $0x4] sm:$0x3] }
0x316d   :  { %4309 = vmatprep.subr.mxu1 %v7044_v46 }
0x316e   :  { %4310 = vmatpush1.msra.mxu1 %v7049_v0  ;;  %v3837_v6 = vld [vmem:[#allocation5 + $0x2] sm:$0x3] }
0x316f   :  { %4311 = vmatprep.subr.mxu1 %v7051_v47 }
0x3170   :  { %4312 = vmatpush1.msra.mxu1 %v7053_v4 }
0x3171   :  { %4313 = vmatprep.subr.mxu1 %v7056_v13 }
0x3172   :  { %4314 = vmatpush1.msra.mxu1 %v7060_v12 }
0x3173   :  { %5036 = vmatprep.subr.mxu1 %v5781_v1 }
0x31d3   :  { %v3828_v31 = vpop.permute.xlu0 %3827 }
0x31d4   :  { %v3833_v16 = vpop.permute.xlu1 %3832  ;;  %3830 = vst.msk [vmem:[#allocation5] sm:$0xc0] %vm922_vm5, %v3828_v31 }
0x31d5   :  { %3835 = vst.msk [vmem:[#allocation5] sm:$0x3] %vm929_vm9, %v3833_v16 }
0x31db   :  { %v3839_v26 = vld [vmem:[#allocation5 + $0x6] sm:$0x3] }
0x31dc   :  { %v3836_v38 = vld [vmem:[#allocation5] sm:$0x3]  ;;  %v3845_v51 = vcombine.low %v3838_v14, %v3839_v26 }
0x31dd   :  { %v3844_v52 = vcombine.low %v3836_v38, %v3837_v6 }
0x31de   :  { %v3859_v54 = vrot.slane %v3845_v51, %v6517_v30 }
0x31df   :  { %v3852_v56 = vrot.slane %v3844_v52, %v6517_v30  ;;  %v3871_v30 = vld [vmem:[#allocation16] sm:$0x3] }
0x31e0   :  { %v3876_v60 = vrot.slane %v3871_v30, %v6104_v25  ;;  %v3880_v48 = vrot.slane %v3871_v30, %v6110_v27 }
0x31e1   :  { %v3860_v3 = vcombine.low %v3852_v56, %v3859_v54 }
0x31e3   :  { %v3862_v29 = vpack.c.bf16 %v3860_v3, %v3860_v3 }
0x31e5   :  { %4998 = vmatmul.mubr.msk.bf16.vlgmr.msra.gmra.mxu0 %vm318_vm2, %v3862_v29 }
0x31e6   :  { %4146 = vmatpush1.msra.mxu0 %v7012_v57  ;;  %4193 = vmatprep.mubr.f32.mxu0 %v5781_v1 }
0x31e7   :  { %4147 = vmatprep.subr.mxu0 %v7015_v32 }
0x31e8   :  { %4148 = vmatpush1.msra.mxu0 %v7017_v2 }
0x31e9   :  { %4149 = vmatprep.subr.mxu0 %v7019_v58 }
0x31ea   :  { %4150 = vmatpush1.msra.mxu0 %v7022_v9 }
0x31eb   :  { %4151 = vmatprep.subr.mxu0 %v7025_v62 }
0x31ec   :  { %4152 = vmatpush1.msra.mxu0 %v7028_v10 }
0x31ed   :  { %4153 = vmatprep.subr.mxu0 %v7031_v42 }
0x31ee   :  { %4154 = vmatpush1.msra.mxu0 %v7034_v43 }
0x31ef   :  { %4155 = vmatprep.subr.mxu0 %v7044_v46 }
0x31f0   :  { %4156 = vmatpush1.msra.mxu0 %v7049_v0 }
0x31f1   :  { %4157 = vmatprep.subr.mxu0 %v7051_v47 }
0x31f2   :  { %4158 = vmatpush1.msra.mxu0 %v7053_v4 }
0x31f3   :  { %4159 = vmatprep.subr.mxu0 %v7056_v13 }
0x31f4   :  { %4160 = vmatpush1.msra.mxu0 %v7060_v12 }
0x31f5   :  { %4453 = vmatprep.subr.mxu0 %v7009_v5 }
0x3223   :  { %v4051_v40 = vpop.f32.mrf.mxu1 }
0x3225   :  { %v4053_v20 = vpop.f32.mrf.mxu1 }
0x3226   :  { %v4060_v34 = vrot.slane %v4053_v20, 2 }
0x32a5   :  { %v3960_v59 = vpop.f32.mrf.mxu0 }
0x32a6   :  { %v3961_v61 = vadd.f32 %v3960_v59, %v3876_v60 }
0x32a7   :  { %v3962_v7 = vpop.f32.mrf.mxu0 }
0x32a8   :  { %3967 = vst [vmem:[#allocation4] sm:$0xff] %v3961_v61  ;;  %v3963_v8 = vadd.f32 %v3962_v7, %v3880_v48 }
0x32a9   :  { %v3964_v33 = vpop.f32.mrf.mxu0 }
0x32aa   :  { %3968 = vst [vmem:[#allocation4 + $0x8] sm:$0xff] %v3963_v8 }
0x32ab   :  { %v3965_v53 = vpop.f32.mrf.mxu0 }
0x32af   :  { %v4056_v21 = vld [vmem:[#allocation4] sm:$0x3] }
0x32b0   :  { %v4058_v22 = vadd.f32 %v4056_v21, %v4051_v40 }
0x32b1   :  { %v4057_v44 = vld [vmem:[#allocation4 + $0x8] sm:$0xc0] }
0x32b2   :  { %5444 = vtanh.f32 %v4058_v22  ;;  %v4062_v5 = vadd.f32 %v4060_v34, %v4057_v44  ;;  %v4999_v31 = vmul.f32 -1.442695, %v4058_v22 }
0x32b4   :  { %5446 = vtanh.f32 %v4062_v5  ;;  %v5000_v16 = vmul.f32 -1.442695, %v4062_v5 }
0x32b5   :  { %5448 = vpow2.f32 %v4999_v31 }
0x32b6   :  { %5450 = vpow2.f32 %v5000_v16 }
0x32bf   :  { %v5445_v45 = vpop.eup %5444 }
0x32c0   :  { %4079 = vrot.lane.b32.xlu1 %v5445_v45, %s5782_s8 }
0x32c1   :  { %v5447_v50 = vpop.eup %5446 }
0x32c2   :  { %4090 = vrot.lane.b32.xlu0 %v5447_v50, %s5782_s8  ;;  %v5449_v14 = vpop.eup %5448 }
0x32c3   :  { %v5451_v26 = vpop.eup %5450  ;;  %v4066_v38 = vadd.f32 1.0, %v5449_v14 }
0x32c4   :  { %v4073_v6 = vadd.f32 1.0, %v5451_v26 }
0x32c5   :  { %5452 = vrcp.f32 %v4066_v38 }
0x32c6   :  { %5454 = vrcp.f32 %v4073_v6 }
0x32d2   :  { %v5453_v51 = vpop.eup %5452 }
0x32d3   :  { %v5455_v56 = vpop.eup %5454  ;;  %v4077_v30 = vmul.f32 0.0, %v5453_v51 }
0x32d4   :  { %v4088_v59 = vmul.f32 0.0, %v5455_v56 }
0x3332   :  { %v4080_v52 = vpop.permute.xlu1 %4079 }
0x3333   :  { %v4082_v54 = vmul.f32 %v5453_v51, %v4080_v52 }
0x3334   :  { %v4091_v3 = vpop.permute.xlu0 %4090 }
0x3335   :  { %4084 = vrot.lane.b32.xlu1 %v4082_v54, %s5783_s0  ;;  %v4093_v29 = vmul.f32 %v5455_v56, %v4091_v3 }
0x3337   :  { %4095 = vrot.lane.b32.xlu0 %v4093_v29, %s5783_s0 }
0x33a7   :  { %v4085_v60 = vpop.permute.xlu1 %4084 }
0x33a8   :  { %v7112_v48 = vadd.f32 %v4085_v60, %v4077_v30 }
0x33a9   :  { %v4096_v61 = vpop.permute.xlu0 %4095 }
0x33aa   :  { %5456 = vtanh.f32 %v7112_v48  ;;  %v7115_v7 = vadd.f32 %v4096_v61, %v4088_v59  ;;  %v4225_v6 = vrot.slane %v7112_v48, 6 }
0x33ac   :  { %5458 = vtanh.f32 %v7115_v7  ;;  %v4239_v52 = vrot.slane %v7115_v7, 2 }
0x33b7   :  { %v5457_v8 = vpop.eup %5456 }
0x33b8   :  { %4101 = vrot.lane.b32.xlu1 %v5457_v8, %s5782_s8 }
0x33b9   :  { %v5459_v33 = vpop.eup %5458 }
0x33ba   :  { %4107 = vrot.lane.b32.xlu0 %v5459_v33, %s5782_s8 }
0x342a   :  { %v4102_v40 = vpop.permute.xlu1 %4101 }
0x342b   :  { %v4104_v53 = vmul.f32 %v5453_v51, %v4102_v40 }
0x342c   :  { %v4108_v20 = vpop.permute.xlu0 %4107 }
0x342d   :  { %4112 = vrot.lane.b32.xlu0 %v4104_v53, %s5783_s0  ;;  %v7121_v21 = vmul.f32 %v5455_v56, %v4108_v20 }
0x342f   :  { %v4121_v22 = vrot.slane %v7121_v21, 6 }
0x3431   :  { %4122 = vrot.lane.b32.xlu1 %v4121_v22, %s5782_s8 }
0x349f   :  { %v4113_v34 = vpop.permute.xlu0 %4112 }
0x34a0   :  { %4115 = vst.msk [vmem:[#allocation5] sm:$0x3] %vm452_vm1, %v4113_v34 }
0x34a3   :  { %v4123_v44 = vpop.permute.xlu1 %4122 }
0x34a4   :  { %v4125_v5 = vsel %vm251_vm0, %v4113_v34, %v4123_v44 }
0x34a5   :  { %5001 = vmatmul.mubr.msk.f32.vlgmr.msra.gmra.mxu0 %vm318_vm2, %v4125_v5  ;;  %v4354_v5 = vld [vmem:[#allocation4] sm:$0x30] }
0x34a6   :  { %4454 = vmatpush1.msra.mxu0 %v7012_v57  ;;  %4501 = vmatprep.mubr.f32.mxu0 %v5781_v1 }
0x34a7   :  { %4455 = vmatprep.subr.mxu0 %v7015_v32 }
0x34a8   :  { %4456 = vmatpush1.msra.mxu0 %v7017_v2  ;;  %v4200_v2 = vld [vmem:[#allocation4] sm:$0xc] }
0x34a9   :  { %4457 = vmatprep.subr.mxu0 %v7019_v58 }
0x34aa   :  { %4458 = vmatpush1.msra.mxu0 %v7022_v9 }
0x34ab   :  { %4459 = vmatprep.subr.mxu0 %v7025_v62 }
0x34ac   :  { %4460 = vmatpush1.msra.mxu0 %v7028_v10  ;;  %v4201_v10 = vld [vmem:[#allocation4 + $0x8] sm:$0x30] }
0x34ad   :  { %4461 = vmatprep.subr.mxu0 %v7031_v42 }
0x34ae   :  { %4462 = vmatpush1.msra.mxu0 %v7034_v43 }
0x34af   :  { %4463 = vmatprep.subr.mxu0 %v7044_v46 }
0x34b0   :  { %4464 = vmatpush1.msra.mxu0 %v7049_v0 }
0x34b1   :  { %4465 = vmatprep.subr.mxu0 %v7051_v47 }
0x34b2   :  { %4466 = vmatpush1.msra.mxu0 %v7053_v4 }
0x34b3   :  { %4467 = vmatprep.subr.mxu0 %v7056_v13 }
0x34b4   :  { %4468 = vmatpush1.msra.mxu0 %v7060_v12 }
0x34b5   :  { %5071 = vmatprep.subr.mxu0 %v5781_v1 }
0x3565   :  { %v4195_v57 = vpop.f32.mrf.mxu0 }
0x3566   :  { %v4203_v32 = vrot.slane %v4195_v57, 6 }
0x3567   :  { %v4197_v58 = vpop.f32.mrf.mxu0 }
0x3568   :  { %v4205_v9 = vadd.f32 %v4203_v32, %v4200_v2  ;;  %v4207_v62 = vrot.slane %v4197_v58, 4  ;;  %v4355_v58 = vld [vmem:[#allocation4 + $0x8] sm:$0xc] }
0x356a   :  { %5460 = vtanh.f32 %v4205_v9  ;;  %v4209_v42 = vadd.f32 %v4207_v62, %v4201_v10  ;;  %v5002_v0 = vmul.f32 -1.442695, %v4205_v9 }
0x356c   :  { %5462 = vtanh.f32 %v4209_v42  ;;  %v5003_v47 = vmul.f32 -1.442695, %v4209_v42 }
0x356d   :  { %5464 = vpow2.f32 %v5002_v0 }
0x356e   :  { %5466 = vpow2.f32 %v5003_v47 }
0x3577   :  { %v5461_v43 = vpop.eup %5460 }
0x3578   :  { %4229 = vrot.lane.b32.xlu1 %v5461_v43, %s5782_s8 }
0x3579   :  { %v5463_v46 = vpop.eup %5462 }
0x357a   :  { %4243 = vrot.lane.b32.xlu0 %v5463_v46, %s5782_s8  ;;  %v5465_v4 = vpop.eup %5464 }
0x357b   :  { %v5467_v13 = vpop.eup %5466  ;;  %v4213_v12 = vadd.f32 1.0, %v5465_v4 }
0x357c   :  { %v4220_v45 = vadd.f32 1.0, %v5467_v13 }
0x357d   :  { %5468 = vrcp.f32 %v4213_v12 }
0x357e   :  { %5470 = vrcp.f32 %v4220_v45 }
0x358a   :  { %v5469_v50 = vpop.eup %5468 }
0x358b   :  { %v5471_v14 = vpop.eup %5470  ;;  %v4227_v51 = vmul.f32 %v5469_v50, %v4225_v6 }
0x358c   :  { %v4241_v3 = vmul.f32 %v5471_v14, %v4239_v52 }
0x35ea   :  { %v4230_v31 = vpop.permute.xlu1 %4229 }
0x35eb   :  { %v4232_v16 = vmul.f32 %v5469_v50, %v4230_v31 }
0x35ec   :  { %v4244_v26 = vpop.permute.xlu0 %4243 }
0x35ed   :  { %4234 = vrot.lane.b32.xlu1 %v4232_v16, %s5783_s0  ;;  %v4246_v38 = vmul.f32 %v5471_v14, %v4244_v26 }
0x35ef   :  { %4248 = vrot.lane.b32.xlu0 %v4246_v38, %s5783_s0 }
0x365f   :  { %v4235_v54 = vpop.permute.xlu1 %4234 }
0x3660   :  { %v4237_v56 = vadd.f32 %v4235_v54, %v4227_v51 }
0x3661   :  { %v4249_v29 = vpop.permute.xlu0 %4248 }
0x3662   :  { %5472 = vtanh.f32 %v4237_v56  ;;  %v4251_v30 = vadd.f32 %v4249_v29, %v4241_v3 }
0x3664   :  { %5474 = vtanh.f32 %v4251_v30  ;;  %v4393_v38 = vrot.slane %v4251_v30, 2 }
0x366f   :  { %v5473_v60 = vpop.eup %5472 }
0x3670   :  { %4254 = vrot.lane.b32.xlu1 %v5473_v60, %s5782_s8 }
0x3671   :  { %v5475_v59 = vpop.eup %5474 }
0x3672   :  { %4260 = vrot.lane.b32.xlu0 %v5475_v59, %s5782_s8 }
0x36e2   :  { %v4255_v61 = vpop.permute.xlu1 %4254 }
0x36e3   :  { %v4257_v8 = vmul.f32 %v5469_v50, %v4255_v61 }
0x36e4   :  { %v4261_v33 = vpop.permute.xlu0 %4260 }
0x36e5   :  { %4265 = vrot.lane.b32.xlu0 %v4257_v8, %s5783_s0  ;;  %v7154_v48 = vmul.f32 %v5471_v14, %v4261_v33  ;;  %v4379_v14 = vrot.slane %v4237_v56, 6 }
0x36e7   :  { %v4274_v7 = vrot.slane %v7154_v48, 2 }
0x36e9   :  { %4275 = vrot.lane.b32.xlu1 %v4274_v7, %s5782_s8 }
0x3757   :  { %v4266_v40 = vpop.permute.xlu0 %4265 }
0x3758   :  { %4268 = vst.msk [vmem:[#allocation5] sm:$0xc] %vm609_vm3, %v4266_v40 }
0x375b   :  { %v4276_v53 = vpop.permute.xlu1 %4275 }
0x375c   :  { %v4278_v20 = vsel %vm251_vm0, %v4266_v40, %v4276_v53 }
0x375d   :  { %v4280_v22 = vrot.slane %v4278_v20, 2 }
0x375f   :  { %5004 = vmatmul.mubr.msk.f32.vlgmr.msra.gmra.mxu1 %vm318_vm2, %v4280_v22  ;;  %v2854_v22 = vrot.slane %v6963_v15, 2 }
0x381f   :  { %v4349_v34 = vpop.f32.mrf.mxu1 }
0x3820   :  { %v4357_v44 = vrot.slane %v4349_v34, 4 }
0x3821   :  { %v4351_v57 = vpop.f32.mrf.mxu1 }
0x3822   :  { %v4359_v32 = vadd.f32 %v4357_v44, %v4354_v5  ;;  %v4361_v2 = vrot.slane %v4351_v57, 6  ;;  %v4508_v44 = vld [vmem:[#allocation4] sm:$0xc0]  ;;  %v4509_v57 = vld [vmem:[#allocation4 + $0x8] sm:$0x3] }
0x3824   :  { %5476 = vtanh.f32 %v4359_v32  ;;  %v4363_v9 = vadd.f32 %v4361_v2, %v4355_v58  ;;  %v5005_v42 = vmul.f32 -1.442695, %v4359_v32  ;;  %v2851_v58 = vld [vmem:[#allocation2 + $0x18] sm:$0xc0] }
0x3826   :  { %5478 = vtanh.f32 %v4363_v9  ;;  %v5006_v43 = vmul.f32 -1.442695, %v4363_v9  ;;  %v2856_v9 = vadd.f32 %v2854_v22, %v2851_v58 }
0x3827   :  { %5480 = vpow2.f32 %v5005_v42 }
0x3828   :  { %5482 = vpow2.f32 %v5006_v43 }
0x3831   :  { %v5477_v62 = vpop.eup %5476 }
0x3832   :  { %4383 = vrot.lane.b32.xlu1 %v5477_v62, %s5782_s8  ;;  %v2852_v62 = vld [vmem:[#allocation2] sm:$0x3] }
0x3833   :  { %v5479_v10 = vpop.eup %5478 }
0x3834   :  { %4397 = vrot.lane.b32.xlu0 %v5479_v10, %s5782_s8  ;;  %v5481_v46 = vpop.eup %5480  ;;  %v2857_v10 = vadd.f32 %v2852_v62, %v6965_v17 }
0x3835   :  { %v5483_v0 = vpop.eup %5482  ;;  %v4367_v47 = vadd.f32 1.0, %v5481_v46 }
0x3836   :  { %v4374_v4 = vadd.f32 1.0, %v5483_v0  ;;  %v4972_v17 = vmul.f32 -1.442695, %v2857_v10 }
0x3837   :  { %5484 = vrcp.f32 %v4367_v47 }
0x3838   :  { %5486 = vrcp.f32 %v4374_v4  ;;  %v4971_v4 = vmul.f32 -1.442695, %v2856_v9 }
0x3844   :  { %v5485_v13 = vpop.eup %5484 }
0x3845   :  { %v5487_v50 = vpop.eup %5486  ;;  %v4381_v26 = vmul.f32 %v5485_v13, %v4379_v14 }
0x3846   :  { %v4395_v52 = vmul.f32 %v5487_v50, %v4393_v38 }
0x38a4   :  { %v4384_v12 = vpop.permute.xlu1 %4383 }
0x38a5   :  { %v4386_v45 = vmul.f32 %v5485_v13, %v4384_v12 }
0x38a6   :  { %v4398_v31 = vpop.permute.xlu0 %4397 }
0x38a7   :  { %4388 = vrot.lane.b32.xlu1 %v4386_v45, %s5783_s0  ;;  %v4400_v16 = vmul.f32 %v5487_v50, %v4398_v31 }
0x38a9   :  { %4402 = vrot.lane.b32.xlu0 %v4400_v16, %s5783_s0 }
0x3919   :  { %v4389_v6 = vpop.permute.xlu1 %4388 }
0x391a   :  { %v7165_v51 = vadd.f32 %v4389_v6, %v4381_v26 }
0x391b   :  { %v4403_v54 = vpop.permute.xlu0 %4402 }
0x391c   :  { %5488 = vtanh.f32 %v7165_v51  ;;  %v7168_v3 = vadd.f32 %v4403_v54, %v4395_v52 }
0x391e   :  { %5490 = vtanh.f32 %v7168_v3 }
0x3929   :  { %v5489_v29 = vpop.eup %5488 }
0x392a   :  { %4408 = vrot.lane.b32.xlu1 %v5489_v29, %s5782_s8 }
0x392b   :  { %v5491_v60 = vpop.eup %5490 }
0x392c   :  { %4414 = vrot.lane.b32.xlu0 %v5491_v60, %s5782_s8 }
0x399c   :  { %v4409_v56 = vpop.permute.xlu1 %4408 }
0x399d   :  { %v4411_v59 = vmul.f32 %v5485_v13, %v4409_v56 }
0x399e   :  { %v4415_v30 = vpop.permute.xlu0 %4414 }
0x399f   :  { %4419 = vrot.lane.b32.xlu0 %v4411_v59, %s5783_s0  ;;  %v7174_v61 = vmul.f32 %v5487_v50, %v4415_v30 }
0x39a1   :  { %v4428_v8 = vrot.slane %v7174_v61, 6 }
0x39a3   :  { %4429 = vrot.lane.b32.xlu1 %v4428_v8, %s5782_s8 }
0x3a11   :  { %v7178_v33 = vpop.permute.xlu0 %4419 }
0x3a15   :  { %v4430_v7 = vpop.permute.xlu1 %4429 }
0x3a16   :  { %v4432_v40 = vsel %vm251_vm0, %v7178_v33, %v4430_v7 }
0x3a17   :  { %v4434_v53 = vrot.slane %v4432_v40, 4 }
0x3a19   :  { %5007 = vmatmul.mubr.msk.f32.vlgmr.msra.gmra.mxu0 %vm318_vm2, %v4434_v53  ;;  %v4530_v53 = vrot.slane %v7165_v51, 6 }
0x3ad9   :  { %v4503_v20 = vpop.f32.mrf.mxu0 }
0x3ada   :  { %v4511_v34 = vrot.slane %v4503_v20, 2  ;;  %v4544_v20 = vrot.slane %v7168_v3, 2 }
0x3adb   :  { %v4505_v5 = vpop.f32.mrf.mxu0 }
0x3adc   :  { %v4513_v32 = vadd.f32 %v4511_v34, %v4508_v44  ;;  %v4514_v2 = vadd.f32 %v4509_v57, %v4505_v5  ;;  %v2873_v5 = vrot.slane %v6896_v35, 6 }
0x3ade   :  { %5492 = vtanh.f32 %v4513_v32  ;;  %v5008_v0 = vmul.f32 -1.442695, %v4513_v32  ;;  %v5009_v47 = vmul.f32 -1.442695, %v4514_v2 }
0x3adf   :  { %5494 = vtanh.f32 %v4514_v2  ;;  %v2887_v2 = vrot.slane %v6899_v18, 2 }
0x3ae0   :  { %5496 = vtanh.f32 %v2856_v9 }
0x3ae1   :  { %5498 = vtanh.f32 %v2857_v10 }
0x3ae2   :  { %5500 = vpow2.f32 %v5008_v0 }
0x3ae3   :  { %5502 = vpow2.f32 %v5009_v47 }
0x3ae4   :  { %5504 = vpow2.f32 %v4971_v4 }
0x3ae5   :  { %5506 = vpow2.f32 %v4972_v17 }
0x3aeb   :  { %v5493_v42 = vpop.eup %5492 }
0x3aec   :  { %v5495_v43 = vpop.eup %5494  ;;  %4534 = vrot.lane.b32.xlu1 %v5493_v42, %s5782_s8 }
0x3aed   :  { %4548 = vrot.lane.b32.xlu0 %v5495_v43, %s5782_s8  ;;  %v5497_v15 = vpop.eup %5496 }
0x3aee   :  { %v5499_v46 = vpop.eup %5498 }
0x3aef   :  { %v5501_v13 = vpop.eup %5500 }
0x3af0   :  { %2877 = vrot.lane.b32.xlu1 %v5497_v15, %s5782_s8  ;;  %v5503_v12 = vpop.eup %5502  ;;  %v4518_v45 = vadd.f32 1.0, %v5501_v13 }
0x3af1   :  { %2891 = vrot.lane.b32.xlu0 %v5499_v46, %s5782_s8  ;;  %v5505_v50 = vpop.eup %5504  ;;  %v4525_v31 = vadd.f32 1.0, %v5503_v12 }
0x3af2   :  { %v5507_v16 = vpop.eup %5506  ;;  %v2861_v14 = vadd.f32 1.0, %v5505_v50  ;;  %5508 = vrcp.f32 %v4518_v45  ;;  %v5010_v45 = vld [vmem:[#allocation20] ss:$0 sm:$0xff] }
0x3af3   :  { %v2868_v26 = vadd.f32 1.0, %v5507_v16  ;;  %5510 = vrcp.f32 %v4525_v31 }
0x3af4   :  { %5512 = vrcp.f32 %v2861_v14 }
0x3af5   :  { %5514 = vrcp.f32 %v2868_v26 }
0x3aff   :  { %v5509_v38 = vpop.eup %5508 }
0x3b00   :  { %v5511_v52 = vpop.eup %5510  ;;  %v4532_v22 = vmul.f32 %v5509_v38, %v4530_v53 }
0x3b01   :  { %v5513_v56 = vpop.eup %5512  ;;  %v4546_v44 = vmul.f32 %v5511_v52, %v4544_v20 }
0x3b02   :  { %v5515_v30 = vpop.eup %5514  ;;  %v2875_v9 = vmul.f32 %v5513_v56, %v2873_v5 }
0x3b03   :  { %v2889_v10 = vmul.f32 %v5515_v30, %v2887_v2 }
0x3b5e   :  { %v4535_v6 = vpop.permute.xlu1 %4534 }
0x3b5f   :  { %v4537_v54 = vmul.f32 %v5509_v38, %v4535_v6  ;;  %v4549_v29 = vpop.permute.xlu0 %4548 }
0x3b60   :  { %v4551_v60 = vmul.f32 %v5511_v52, %v4549_v29 }
0x3b61   :  { %4539 = vrot.lane.b32.xlu1 %v4537_v54, %s5783_s0 }
0x3b62   :  { %4553 = vrot.lane.b32.xlu0 %v4551_v60, %s5783_s0  ;;  %v2878_v59 = vpop.permute.xlu1 %2877  ;;  %v4973_v60 = vld [vmem:[#allocation19] ss:$0 sm:$0xff] }
0x3b63   :  { %v2880_v8 = vmul.f32 %v5513_v56, %v2878_v59  ;;  %v2892_v7 = vpop.permute.xlu0 %2891 }
0x3b64   :  { %v2894_v40 = vmul.f32 %v5515_v30, %v2892_v7 }
0x3b65   :  { %2882 = vrot.lane.b32.xlu1 %v2880_v8, %s5783_s0 }
0x3b66   :  { %2896 = vrot.lane.b32.xlu0 %v2894_v40, %s5783_s0 }
0x3bd3   :  { %v4540_v34 = vpop.permute.xlu1 %4539 }
0x3bd4   :  { %v4542_v57 = vadd.f32 %v4540_v34, %v4532_v22  ;;  %v4554_v32 = vpop.permute.xlu0 %4553 }
0x3bd5   :  { %v4556_v58 = vadd.f32 %v4554_v32, %v4546_v44 }
0x3bd6   :  { %5516 = vtanh.f32 %v4542_v57 }
0x3bd7   :  { %5518 = vtanh.f32 %v4556_v58  ;;  %v2883_v62 = vpop.permute.xlu1 %2882 }
0x3bd8   :  { %v2885_v42 = vadd.f32 %v2883_v62, %v2875_v9  ;;  %v2897_v43 = vpop.permute.xlu0 %2896 }
0x3bd9   :  { %v2899_v51 = vadd.f32 %v2897_v43, %v2889_v10 }
0x3bda   :  { %5520 = vtanh.f32 %v2885_v42 }
0x3bdb   :  { %5522 = vtanh.f32 %v2899_v51 }
0x3be3   :  { %v5517_v3 = vpop.eup %5516 }
0x3be4   :  { %v5519_v15 = vpop.eup %5518  ;;  %4559 = vrot.lane.b32.xlu1 %v5517_v3, %s5782_s8 }
0x3be5   :  { %4565 = vrot.lane.b32.xlu0 %v5519_v15, %s5782_s8 }
0x3be7   :  { %v5521_v35 = vpop.eup %5520 }
0x3be8   :  { %v5523_v46 = vpop.eup %5522  ;;  %2902 = vrot.lane.b32.xlu1 %v5521_v35, %s5782_s8 }
0x3be9   :  { %2908 = vrot.lane.b32.xlu0 %v5523_v46, %s5782_s8 }
0x3bec   :  { %4424 = vrot.lane.b32.xlu1 %v7174_v61, %s5782_s8 }
0x3bed   :  { %4270 = vrot.lane.b32.xlu0 %v7154_v48, %s5782_s8 }
0x3bf0   :  { %4117 = vrot.lane.b32.xlu1 %v7121_v21, %s5782_s8 }
0x3bf4   :  { %2767 = vrot.lane.b32.xlu1 %v6913_v49, %s5782_s8 }
0x3bf8   :  { %2613 = vrot.lane.b32.xlu1 %v6754_v11, %s5782_s8 }
0x3bfc   :  { %2460 = vrot.lane.b32.xlu1 %v6714_v39, %s5782_s8 }
0x3c00   :  { %2004 = vrot.lane.b32.xlu1 %v6598_v63, %s5782_s8 }
0x3c56   :  { %v4560_v18 = vpop.permute.xlu1 %4559 }
0x3c57   :  { %v4566_v61 = vpop.permute.xlu0 %4565  ;;  %v4562_v4 = vmul.f32 %v5509_v38, %v4560_v18 }
0x3c58   :  { %v4568_v0 = vmul.f32 %v5511_v52, %v4566_v61  ;;  %v2991_v61 = vand.u32 127, %v216_v23  ;;  %v4612_v23 = vld [vmem:[%s7511_s29] sm:$0xf] }
0x3c59   :  { %vm4613_vm14 = vcmp.eq.f32.partialorder %v4612_v23, 0.0 }
0x3c5a   :  { %4575 = vrot.lane.b32.xlu0 %v4568_v0, %s5782_s8  ;;  %v2903_v48 = vpop.permute.xlu1 %2902  ;;  %v4607_v0 = vstv %s7480_s19 }
0x3c5b   :  { %v2905_v47 = vmul.f32 %v5513_v56, %v2903_v48  ;;  %v2909_v21 = vpop.permute.xlu0 %2908 }
0x3c5c   :  { %v2911_v49 = vmul.f32 %v5515_v30, %v2909_v21  ;;  %v7300_v21 = vsub.s32 %v2991_v61, %v6101_v24 }
0x3c5d   :  { %2913 = vrot.lane.b32.xlu1 %v2905_v47, %s5783_s0 }
0x3c5e   :  { %4570 = vrot.lane.b32.xlu0 %v4562_v4, %s5783_s0  ;;  %v4425_v11 = vpop.permute.xlu1 %4424 }
0x3c5f   :  { %4427 = vst.msk [vmem:[#allocation5] sm:$0xc] %vm774_vm8, %v4425_v11  ;;  %v4271_v39 = vpop.permute.xlu0 %4270 }
0x3c60   :  { %4273 = vst.msk [vmem:[#allocation5] sm:$0x30] %vm616_vm7, %v4271_v39 }
0x3c61   :  { %4422 = vst.msk [vmem:[#allocation5] sm:$0x30] %vm767_vm4, %v7178_v33 }
0x3c62   :  { %2918 = vrot.lane.b32.xlu0 %v2911_v49, %s5782_s8  ;;  %v4118_v63 = vpop.permute.xlu1 %4117 }
0x3c63   :  { %4120 = vst.msk [vmem:[#allocation5] sm:$0xc0] %vm459_vm6, %v4118_v63 }
0x3c66   :  { %2309 = vrot.lane.b32.xlu0 %v6675_v37, %s5782_s8  ;;  %v2768_v17 = vpop.permute.xlu1 %2767  ;;  %v7236_v37 = vld [vmem:[#allocation5 + $0x2] sm:$0x3] }
0x3c67   :  { %2770 = vst.msk [vmem:[#allocation3] sm:$0xc] %vm774_vm8, %v2768_v17 }
0x3c68   :  { %v7240_v31 = vld [vmem:[#allocation5 + $0x4] sm:$0x3] }
0x3c6a   :  { %2158 = vrot.lane.b32.xlu0 %v6637_v36, %s5782_s8  ;;  %v2614_v13 = vpop.permute.xlu1 %2613  ;;  %v4591_v36 = vmul.f32 %v5010_v45, %v7236_v37 }
0x3c6b   :  { %2616 = vst.msk [vmem:[#allocation3] sm:$0x30] %vm616_vm7, %v2614_v13 }
0x3c6c   :  { %v4597_v50 = vsel %vm2945_vm10, %v4591_v36, 0.0  ;;  %v2971_v36 = vstv %s7478_s17 }
0x3c6e   :  { %1851 = vrot.lane.b32.xlu0 %v6559_v19, %s5782_s8  ;;  %v2461_v33 = vpop.permute.xlu1 %2460  ;;  %v4592_v19 = vmul.f32 %v5010_v45, %v7240_v31  ;;  %v7253_v56 = vld [vmem:[#allocation3 + $0x2] sm:$0x3] }
0x3c6f   :  { %2463 = vst.msk [vmem:[#allocation3] sm:$0xc0] %vm459_vm6, %v2461_v33  ;;  %v2938_v8 = vmul.f32 %v4973_v60, %v7253_v56 }
0x3c70   :  { %v4600_v16 = vsel %vm2945_vm10, %v4592_v19, 0.0 }
0x3c71   :  { %v2949_v34 = vsel %vm2945_vm10, %v2938_v8, 0.0 }
0x3c72   :  { %v2005_v12 = vpop.permute.xlu1 %2004  ;;  %v7263_v53 = vld [vmem:[#allocation3 + $0x4] sm:$0x3] }
0x3c73   :  { %2007 = vst.msk [vmem:[#allocation3 + $0x8] sm:$0x30] %vm616_vm7, %v2005_v12  ;;  %v2939_v44 = vmul.f32 %v4973_v60, %v7263_v53  ;;  %vm3040_vm7 = vcmask 15360  }
0x3c74   :  { %2765 = vst.msk [vmem:[#allocation3 + $0x8] sm:$0x30] %vm767_vm4, %v6922_v55  ;;  %vm3034_vm4 = vcmask 1046534  }
0x3c76   :  { %v7265_v20 = vld [vmem:[#allocation3 + $0x6] sm:$0x3] }
0x3c77   :  { %v2940_v5 = vmul.f32 %v4973_v60, %v7265_v20 }
0x3c79   :  { %v2955_v58 = vsel %vm2945_vm10, %v2940_v5, 0.0 }
0x3c7b   :  { %v7282_v62 = vld [vmem:[#allocation3 + $0xc] sm:$0x3] }
0x3c7c   :  { %v2943_v51 = vmul.f32 %v4973_v60, %v7282_v62 }
0x3c7e   :  { %v2964_v46 = vsel %vm2945_vm10, %v2943_v51, 0.0 }
0x3c81   :  { %4598 = vadd.xlane.f32.xlu1 %v4597_v50 }
0x3c8d   :  { %4601 = vadd.xlane.f32.xlu0 %v4600_v16 }
0x3ccc   :  { %v4576_v14 = vpop.permute.xlu0 %4575 }
0x3ccd   :  { %4578 = vst.msk [vmem:[#allocation5] sm:$0x3] %vm929_vm9, %v4576_v14 }
0x3ccf   :  { %v2914_v32 = vpop.permute.xlu1 %2913 }
0x3cd0   :  { %v4571_v55 = vpop.permute.xlu0 %4570 }
0x3cd1   :  { %4573 = vst.msk [vmem:[#allocation5] sm:$0xc0] %vm922_vm5, %v4571_v55 }
0x3cd4   :  { %v2919_v26 = vpop.permute.xlu0 %2918  ;;  %v7246_v38 = vld [vmem:[#allocation5] sm:$0x3] }
0x3cd5   :  { %2921 = vst.msk [vmem:[#allocation3] sm:$0x3] %vm929_vm9, %v2919_v26  ;;  %v4590_v6 = vmul.f32 %v5010_v45, %v7246_v38 }
0x3cd7   :  { %v4594_v52 = vsel %vm2945_vm10, %v4590_v6, 0.0 }
0x3cd8   :  { %4595 = vadd.xlane.f32.xlu0 %v4594_v52  ;;  %v2310_v54 = vpop.permute.xlu0 %2309  ;;  %v7251_v29 = vld [vmem:[#allocation5 + $0x6] sm:$0x3] }
0x3cd9   :  { %2312 = vst.msk [vmem:[#allocation3 + $0x8] sm:$0x3] %vm929_vm9, %v2310_v54  ;;  %v4593_v59 = vmul.f32 %v5010_v45, %v7251_v29 }
0x3cda   :  { %2458 = vst.msk [vmem:[#allocation3 + $0x8] sm:$0x3] %vm452_vm1, %v6718_v41  ;;  %vm3030_vm1 = vcmask 1044484  }
0x3cdb   :  { %v4603_v30 = vsel %vm2945_vm10, %v4593_v59, 0.0 }
0x3cdc   :  { %4604 = vadd.xlane.f32.xlu0 %v4603_v30  ;;  %v2159_v7 = vpop.permute.xlu0 %2158  ;;  %v7261_v40 = vld [vmem:[#allocation3] sm:$0x3] }
0x3cdd   :  { %2161 = vst.msk [vmem:[#allocation3 + $0x8] sm:$0xc] %vm774_vm8, %v2159_v7  ;;  %v2937_v22 = vmul.f32 %v4973_v60, %v7261_v40  ;;  %vm5785_vm8 = vmmov 0  }
0x3cde   :  { %2611 = vst.msk [vmem:[#allocation3 + $0x8] sm:$0xc] %vm609_vm3, %v6764_v28  ;;  %v2952_v28 = vsel %vm2945_vm10, %v2939_v44, 0.0  ;;  %vm3032_vm3 = vcmask 1045509   ;;  %5068 = vmatprep.mubr.msk.f32.mxu1 %vm5785_vm8, %v5781_v1  ;;  %5079 = vmatprep.mubr.msk.f32.mxu0 %vm5785_vm8, %v5781_v1 }
0x3cdf   :  { %v2946_v41 = vsel %vm2945_vm10, %v2937_v22, 0.0 }
0x3ce0   :  { %v1852_v57 = vpop.permute.xlu0 %1851  ;;  %2947 = vadd.xlane.f32.xlu1 %v2946_v41  ;;  %2950 = vadd.xlane.f32.xlu0 %v2949_v34 }
0x3ce1   :  { %1854 = vst.msk [vmem:[#allocation3 + $0x8] sm:$0xc0] %vm459_vm6, %v1852_v57  ;;  %v7276_v2 = vld [vmem:[#allocation3 + $0x8] sm:$0x3] }
0x3ce2   :  { %2916 = vst.msk [vmem:[#allocation3 + $0x8] sm:$0xc0] %vm922_vm5, %v2914_v32  ;;  %v2941_v9 = vmul.f32 %v4973_v60, %v7276_v2  ;;  %vm3036_vm5 = vcmask 1047559  }
0x3ce4   :  { %2953 = vadd.xlane.f32.xlu1 %v2952_v28  ;;  %2956 = vadd.xlane.f32.xlu0 %v2955_v58  ;;  %v2958_v43 = vsel %vm2945_vm10, %v2941_v9, 0.0 }
0x3ce5   :  { %v7284_v10 = vld [vmem:[#allocation3 + $0xa] sm:$0x3] }
0x3ce6   :  { %v2942_v42 = vmul.f32 %v4973_v60, %v7284_v10 }
0x3ce8   :  { %2959 = vadd.xlane.f32.xlu1 %v2958_v43  ;;  %v2961_v3 = vsel %vm2945_vm10, %v2942_v42, 0.0 }
0x3ce9   :  { %2962 = vadd.xlane.f32.xlu0 %v2961_v3  ;;  %v7290_v15 = vld [vmem:[#allocation3 + $0xe] sm:$0x3] }
0x3cea   :  { %v2944_v35 = vmul.f32 %v4973_v60, %v7290_v15 }
0x3cec   :  { %2965 = vadd.xlane.f32.xlu1 %v2964_v46  ;;  %v2967_v18 = vsel %vm2945_vm10, %v2944_v35, 0.0 }
0x3ced   :  { %2968 = vadd.xlane.f32.xlu0 %v2967_v18 }
0x3d0a   :  { %v4599_v48 = vpop.xlane.xlu1 %4598 }
0x3d0b   :  { %v4609_v4 = vadd.f32 %v4607_v0, %v4599_v48 }
0x3d0d   :  { %v4625_v63 = vrot.slane %v4609_v4, %v7300_v21 }
0x3d16   :  { %v4602_v47 = vpop.xlane.xlu0 %4601 }
0x3d17   :  { %v4610_v49 = vadd.f32 %v4607_v0, %v4602_v47  ;;  %v2980_v47 = vld [vmem:[%s7512_s30] sm:$0xff] }
0x3d18   :  { %vm2981_vm6 = vcmp.eq.f32.partialorder %v2980_v47, 0.0 }
0x3d19   :  { %v4629_v45 = vrot.slane %v4610_v49, %v7300_v21 }
0x3d61   :  { %v4596_v11 = vpop.xlane.xlu0 %4595 }
0x3d62   :  { %v4608_v39 = vadd.f32 %v4607_v0, %v4596_v11 }
0x3d64   :  { %v4621_v17 = vrot.slane %v4608_v39, %v7300_v21 }
0x3d65   :  { %v4605_v13 = vpop.xlane.xlu0 %4604 }
0x3d66   :  { %v4634_v33 = vsel %vm3024_vm11, %v4625_v63, %v4621_v17  ;;  %v4611_v12 = vadd.f32 %v4607_v0, %v4605_v13 }
0x3d67   :  { %v4635_v19 = vsel %vm3026_vm12, %v4629_v45, %v4634_v33 }
0x3d68   :  { %v4633_v50 = vrot.slane %v4611_v12, %v7300_v21 }
0x3d69   :  { %v2948_v16 = vpop.xlane.xlu1 %2947  ;;  %v2951_v14 = vpop.xlane.xlu0 %2950 }
0x3d6a   :  { %v4636_v55 = vsel %vm3028_vm13, %v4633_v50, %v4635_v19  ;;  %v2972_v26 = vadd.f32 %v2971_v36, %v2948_v16  ;;  %v2973_v6 = vadd.f32 %v2971_v36, %v2951_v14 }
0x3d6b   :  { %v4638_v52 = vsel %vm4613_vm14, -1e+09, %v4636_v55 }
0x3d6c   :  { %v4640_v54 = vsel %vm4639_vm15, %v4638_v52, -inf  ;;  %v2995_v59 = vrot.slane %v2972_v26, %v7300_v21  ;;  %v2999_v30 = vrot.slane %v2973_v6, %v7300_v21 }
0x3d6d   :  { %v4641_v60 = vrot.slane %v4640_v54, 4  ;;  %v2954_v8 = vpop.xlane.xlu1 %2953  ;;  %v2957_v7 = vpop.xlane.xlu0 %2956 }
0x3d6e   :  { %v2974_v22 = vadd.f32 %v2971_v36, %v2954_v8  ;;  %v2975_v41 = vadd.f32 %v2971_v36, %v2957_v7  ;;  %v3025_v57 = vsel %vm3024_vm11, %v2999_v30, %v2995_v59 }
0x3d6f   :  { %v4642_v34 = vmax.f32 %v4640_v54, %v4641_v60 }
0x3d70   :  { %v3003_v44 = vrot.slane %v2974_v22, %v7300_v21  ;;  %v3007_v32 = vrot.slane %v2975_v41, %v7300_v21 }
0x3d71   :  { %v4643_v5 = vrot.slane %v4642_v34, 2  ;;  %v2960_v28 = vpop.xlane.xlu1 %2959 }
0x3d72   :  { %v3027_v58 = vsel %vm3026_vm12, %v3003_v44, %v3025_v57  ;;  %v2976_v9 = vadd.f32 %v2971_v36, %v2960_v28  ;;  %v2963_v42 = vpop.xlane.xlu0 %2962 }
0x3d73   :  { %v4644_v43 = vmax.f32 %v4642_v34, %v4643_v5  ;;  %v2977_v51 = vadd.f32 %v2971_v36, %v2963_v42  ;;  %v3029_v46 = vsel %vm3028_vm13, %v3007_v32, %v3027_v58 }
0x3d74   :  { %v3011_v3 = vrot.slane %v2976_v9, %v7300_v21 }
0x3d75   :  { %v4645_v35 = vrot.slane %v4644_v43, 1  ;;  %v3015_v18 = vrot.slane %v2977_v51, %v7300_v21  ;;  %v2966_v61 = vpop.xlane.xlu1 %2965 }
0x3d76   :  { %v3031_v0 = vsel %vm3030_vm1, %v3011_v3, %v3029_v46  ;;  %v2978_v48 = vadd.f32 %v2971_v36, %v2966_v61  ;;  %v2969_v4 = vpop.xlane.xlu0 %2968  ;;  %v3077_v3 = vsub.s32 2, %v6101_v24  ;;  %v3084_v46 = vsub.s32 3, %v6101_v24 }
0x3d77   :  { %v4646_v11 = vmax.f32 %v4644_v43, %v4645_v35  ;;  %v2979_v39 = vadd.f32 %v2971_v36, %v2969_v4  ;;  %v3033_v17 = vsel %vm3032_vm3, %v3015_v18, %v3031_v0 }
0x3d78   :  { %v3019_v49 = vrot.slane %v2978_v48, %v7300_v21 }
0x3d79   :  { %v4647_v63 = vsub.f32 %v4638_v52, %v4646_v11  ;;  %v3023_v23 = vrot.slane %v2979_v39, %v7300_v21  ;;  %v3098_v39 = vsub.s32 5, %v6101_v24 }
0x3d7a   :  { %v3035_v13 = vsel %vm3034_vm4, %v3019_v49, %v3033_v17  ;;  %v3091_v49 = vsub.s32 4, %v6101_v24 }
0x3d7b   :  { %v4648_v33 = vmul.f32 1.442695, %v4647_v63  ;;  %v3037_v12 = vsel %vm3036_vm5, %v3023_v23, %v3035_v13  ;;  %v4719_v63 = vld [vmem:[%s7481_s20 + $0x78] sm:$0xff]  ;;  %v3112_v23 = vsub.s32 7, %v6101_v24  ;;  %v3105_v13 = vsub.s32 6, %v6101_v24 }
0x3d7c   :  { %v3039_v45 = vsel %vm2981_vm6, -1e+09, %v3037_v12  ;;  %5037 = vmatpush3.msra.mxu1 %v4719_v63  ;;  %v4715_v24 = vld [vmem:[%s7481_s20 + $0x58] sm:$0xff] }
0x3d7d   :  { %5524 = vpow2.f32 %v4648_v33  ;;  %v3041_v50 = vsel %vm3040_vm7, %v3039_v45, -inf  ;;  %5038 = vmatprep.subr.mxu1 %v5781_v1  ;;  %v4717_v33 = vld [vmem:[%s7481_s20 + $0x68] sm:$0xff] }
0x3d7e   :  { %v3042_v19 = vrot.slane %v3041_v50, 4 }
0x3d80   :  { %v3043_v16 = vmax.f32 %v3041_v50, %v3042_v19  ;;  %v4716_v50 = vld [vmem:[%s7481_s20 + $0x60] sm:$0xff]  ;;  %v4714_v19 = vld [vmem:[%s7481_s20 + $0x50] sm:$0xff] }
0x3d82   :  { %v3044_v14 = vrot.slane %v3043_v16, 2 }
0x3d84   :  { %v3045_v36 = vmax.f32 %v3043_v16, %v3044_v14  ;;  %v4713_v16 = vld [vmem:[%s7481_s20 + $0x48] sm:$0xff]  ;;  %v4712_v14 = vld [vmem:[%s7481_s20 + $0x40] sm:$0xff] }
0x3d86   :  { %v3046_v55 = vrot.slane %v3045_v36, 1 }
0x3d88   :  { %v3047_v26 = vmax.f32 %v3045_v36, %v3046_v55  ;;  %v4711_v36 = vld [vmem:[%s7481_s20 + $0x38] sm:$0xff]  ;;  %v4710_v55 = vld [vmem:[%s7481_s20 + $0x30] sm:$0xff] }
0x3d8a   :  { %v5525_v6 = vpop.eup %5524  ;;  %v3048_v52 = vsub.f32 %v3039_v45, %v3047_v26  ;;  %v4709_v26 = vld [vmem:[%s7481_s20 + $0x28] sm:$0xff] }
0x3d8b   :  { %v4650_v54 = vsel %vm4639_vm15, %v5525_v6, 0.0 }
0x3d8c   :  { %v4651_v60 = vrot.slane %v4650_v54, 4  ;;  %v3049_v21 = vmul.f32 1.442695, %v3048_v52  ;;  %v4707_v52 = vld [vmem:[%s7481_s20 + $0x18] sm:$0xff] }
0x3d8e   :  { %v4652_v59 = vadd.f32 %v4651_v60, %v4650_v54  ;;  %5526 = vpow2.f32 %v3049_v21  ;;  %v4706_v54 = vld [vmem:[%s7481_s20 + $0x10] sm:$0xff]  ;;  %v4705_v60 = vld [vmem:[%s7481_s20 + $0x8] sm:$0xff] }
0x3d90   :  { %v4653_v30 = vrot.slane %v4652_v59, 2 }
0x3d92   :  { %v4654_v8 = vadd.f32 %v4653_v30, %v4652_v59 }
0x3d94   :  { %v4655_v7 = vrot.slane %v4654_v8, 1 }
0x3d96   :  { %v4656_v22 = vadd.f32 %v4655_v7, %v4654_v8  ;;  %v4704_v7 = vld [vmem:[%s7481_s20] sm:$0xff] }
0x3d98   :  { %5528 = vrcp.f32 %v4656_v22  ;;  %v4801_v22 = vld [vmem:[%s7483_s22 + $0x18] sm:$0xff] }
0x3d99   :  { %5072 = vmatpush3.msra.mxu0 %v4801_v22 }
0x3d9a   :  { %5073 = vmatprep.subr.mxu0 %v5781_v1 }
0x3d9b   :  { %v5527_v41 = vpop.eup %5526 }
0x3d9c   :  { %v3051_v34 = vsel %vm3040_vm7, %v5527_v41, 0.0 }
0x3d9d   :  { %v3052_v44 = vrot.slane %v3051_v34, 4 }
0x3d9f   :  { %v3053_v5 = vadd.f32 %v3052_v44, %v3051_v34 }
0x3da1   :  { %v3054_v57 = vrot.slane %v3053_v5, 2 }
0x3da3   :  { %v3055_v32 = vadd.f32 %v3054_v57, %v3053_v5 }
0x3da5   :  { %v5529_v28 = vpop.eup %5528  ;;  %v3056_v58 = vrot.slane %v3055_v32, 1 }
0x3da6   :  { %v4658_v9 = vmul.f32 %v5529_v28, %v5525_v6  ;;  %v4708_v6 = vld [vmem:[%s7481_s20 + $0x20] sm:$0xff] }
0x3da7   :  { %v3057_v42 = vadd.f32 %v3056_v58, %v3055_v32 }
0x3da8   :  { %4659 = vst.msk [vmem:[%s7487_s26] sm:$0xf] %vm4639_vm15, %v4658_v9  ;;  %v4663_v43 = vrot.slane %v4658_v9, %v6104_v25  ;;  %v4670_v51 = vrot.slane %v4658_v9, %v6110_v27  ;;  %v4677_v35 = vrot.slane %v4658_v9, %v3077_v3  ;;  %v4684_v18 = vrot.slane %v4658_v9, %v3084_v46 }
0x3da9   :  { %5530 = vrcp.f32 %v3057_v42 }
0x3daa   :  { %4665 = vbcast.lane.b32.xlu1 %v4663_v43, 256  ;;  %4672 = vbcast.lane.b32.xlu0 %v4670_v51, 256 }
0x3dae   :  { %4679 = vbcast.lane.b32.xlu1 %v4677_v35, 256 }
0x3db2   :  { %4686 = vbcast.lane.b32.xlu1 %v4684_v18, 256 }
0x3db6   :  { %v5531_v61 = vpop.eup %5530 }
0x3db7   :  { %v3059_v0 = vmul.f32 %v5531_v61, %v5527_v41 }
0x3db9   :  { %3060 = vst.msk [vmem:[%s7486_s25] sm:$0xff] %vm3040_vm7, %v3059_v0  ;;  %v3071_v48 = vrot.slane %v3059_v0, %v6110_v27  ;;  %v3064_v47 = vrot.slane %v3059_v0, %v6104_v25  ;;  %v3085_v4 = vrot.slane %v3059_v0, %v3084_v46  ;;  %v3078_v11 = vrot.slane %v3059_v0, %v3077_v3  ;;  %v4718_v27 = vld [vmem:[%s7481_s20 + $0x70] sm:$0xff] }
0x3dba   :  { %v3099_v25 = vrot.slane %v3059_v0, %v3098_v39  ;;  %v3092_v17 = vrot.slane %v3059_v0, %v3091_v49  ;;  %5039 = vmatpush3.msra.mxu1 %v4718_v27  ;;  %v3113_v12 = vrot.slane %v3059_v0, %v3112_v23  ;;  %v3106_v45 = vrot.slane %v3059_v0, %v3105_v13 }
0x3dbb   :  { %3073 = vbcast.lane.b32.xlu1 %v3071_v48, 256  ;;  %3066 = vbcast.lane.b32.xlu0 %v3064_v47, 256 }
0x3dbc   :  { %5040 = vmatprep.subr.mxu1 %v5781_v1 }
0x3dbd   :  { %5041 = vmatpush3.msra.mxu1 %v4717_v33 }
0x3dbe   :  { %5042 = vmatprep.subr.mxu1 %v5781_v1 }
0x3dbf   :  { %3087 = vbcast.lane.b32.xlu1 %v3085_v4, 256  ;;  %3080 = vbcast.lane.b32.xlu0 %v3078_v11, 256 }
0x3dc0   :  { %5043 = vmatpush3.msra.mxu1 %v4716_v50 }
0x3dc1   :  { %5044 = vmatprep.subr.mxu1 %v5781_v1 }
0x3dc2   :  { %5045 = vmatpush3.msra.mxu1 %v4715_v24 }
0x3dc3   :  { %3101 = vbcast.lane.b32.xlu1 %v3099_v25, 256  ;;  %3094 = vbcast.lane.b32.xlu0 %v3092_v17, 256 }
0x3dc4   :  { %5046 = vmatprep.subr.mxu1 %v5781_v1 }
0x3dc5   :  { %5047 = vmatpush3.msra.mxu1 %v4714_v19  ;;  %v5011_v19 = vld [vmem:[#allocation22] ss:$0 sm:$0xff] }
0x3dc6   :  { %5048 = vmatprep.subr.mxu1 %v5781_v1 }
0x3dc7   :  { %3115 = vbcast.lane.b32.xlu1 %v3113_v12, 256  ;;  %3108 = vbcast.lane.b32.xlu0 %v3106_v45, 256 }
0x3dc8   :  { %5049 = vmatpush3.msra.mxu1 %v4713_v16 }
0x3dc9   :  { %5050 = vmatprep.subr.mxu1 %v5781_v1 }
0x3dca   :  { %5051 = vmatpush3.msra.mxu1 %v4712_v14 }
0x3dcb   :  { %5052 = vmatprep.subr.mxu1 %v5781_v1 }
0x3dcc   :  { %5053 = vmatpush3.msra.mxu1 %v4711_v36 }
0x3dcd   :  { %5054 = vmatprep.subr.mxu1 %v5781_v1 }
0x3dce   :  { %5055 = vmatpush3.msra.mxu1 %v4710_v55 }
0x3dcf   :  { %5056 = vmatprep.subr.mxu1 %v5781_v1 }
0x3dd0   :  { %5057 = vmatpush3.msra.mxu1 %v4709_v26  ;;  %v5012_v26 = vld [vmem:[#allocation23] ss:$0 sm:$0xff] }
0x3dd1   :  { %5058 = vmatprep.subr.mxu1 %v5781_v1 }
0x3dd2   :  { %5059 = vmatpush3.msra.mxu1 %v4708_v6 }
0x3dd3   :  { %5060 = vmatprep.subr.mxu1 %v5781_v1 }
0x3dd4   :  { %5061 = vmatpush3.msra.mxu1 %v4707_v52 }
0x3dd5   :  { %5062 = vmatprep.subr.mxu1 %v5781_v1 }
0x3dd6   :  { %5063 = vmatpush3.msra.mxu1 %v4706_v54 }
0x3dd7   :  { %5064 = vmatprep.subr.mxu1 %v5781_v1 }
0x3dd8   :  { %5065 = vmatpush3.msra.mxu1 %v4705_v60 }
0x3dd9   :  { %5066 = vmatprep.subr.mxu1 %v5781_v1 }
0x3dda   :  { %5067 = vmatpush3.msra.mxu1 %v4704_v7 }
0x3e1c   :  { %v4666_v21 = vpop.permute.xlu1 %4665  ;;  %v4673_v59 = vpop.permute.xlu0 %4672 }
0x3e1d   :  { %v4688_v30 = vmul.f32 %v4666_v21, %v7246_v38  ;;  %v4689_v8 = vmul.f32 %v4673_v59, %v7236_v37 }
0x3e1f   :  { %v4692_v37 = vsel %vm2945_vm10, %v4688_v30, 0.0  ;;  %v4693_v38 = vsel %vm2945_vm10, %v4689_v8, 0.0 }
0x3e20   :  { %v4680_v41 = vpop.permute.xlu1 %4679  ;;  %v4694_v5 = vadd.f32 %v4693_v38, %v4692_v37 }
0x3e21   :  { %v4690_v34 = vmul.f32 %v4680_v41, %v7240_v31 }
0x3e23   :  { %v4695_v44 = vsel %vm2945_vm10, %v4690_v34, 0.0 }
0x3e24   :  { %v4687_v57 = vpop.permute.xlu1 %4686  ;;  %v4696_v28 = vadd.f32 %v4695_v44, %v4694_v5 }
0x3e25   :  { %v4691_v32 = vmul.f32 %v4687_v57, %v7251_v29 }
0x3e27   :  { %v4697_v58 = vsel %vm2945_vm10, %v4691_v32, 0.0 }
0x3e28   :  { %v4698_v9 = vadd.f32 %v4697_v58, %v4696_v28 }
0x3e2a   :  { %4700 = vrot.lane.b32.xlu0 %v4698_v9, %s5782_s8 }
0x3e2d   :  { %v3067_v42 = vpop.permute.xlu0 %3066  ;;  %v3074_v43 = vpop.permute.xlu1 %3073 }
0x3e2e   :  { %v3118_v3 = vmul.f32 %v3074_v43, %v7253_v56  ;;  %v3117_v35 = vmul.f32 %v3067_v42, %v7261_v40 }
0x3e30   :  { %v3126_v46 = vsel %vm2945_vm10, %v3118_v3, 0.0  ;;  %v3125_v18 = vsel %vm2945_vm10, %v3117_v35, 0.0 }
0x3e31   :  { %v3081_v51 = vpop.permute.xlu0 %3080  ;;  %v3088_v29 = vpop.permute.xlu1 %3087  ;;  %v3127_v0 = vadd.f32 %v3126_v46, %v3125_v18 }
0x3e32   :  { %v3119_v31 = vmul.f32 %v3081_v51, %v7263_v53  ;;  %v3120_v47 = vmul.f32 %v3088_v29, %v7265_v20 }
0x3e34   :  { %v3128_v61 = vsel %vm2945_vm10, %v3119_v31, 0.0  ;;  %v3130_v56 = vsel %vm2945_vm10, %v3120_v47, 0.0 }
0x3e35   :  { %v3095_v48 = vpop.permute.xlu0 %3094  ;;  %v3129_v4 = vadd.f32 %v3128_v61, %v3127_v0  ;;  %v3102_v39 = vpop.permute.xlu1 %3101 }
0x3e36   :  { %v3121_v11 = vmul.f32 %v3095_v48, %v7276_v2  ;;  %v3122_v63 = vmul.f32 %v3102_v39, %v7284_v10  ;;  %v4799_v10 = vld [vmem:[%s7483_s22 + $0x8] sm:$0xff] }
0x3e37   :  { %v3131_v40 = vadd.f32 %v3130_v56, %v3129_v4 }
0x3e38   :  { %v3132_v53 = vsel %vm2945_vm10, %v3121_v11, 0.0  ;;  %v3134_v17 = vsel %vm2945_vm10, %v3122_v63, 0.0 }
0x3e39   :  { %v3109_v49 = vpop.permute.xlu0 %3108  ;;  %v3133_v27 = vadd.f32 %v3132_v53, %v3131_v40  ;;  %v3116_v23 = vpop.permute.xlu1 %3115 }
0x3e3a   :  { %v3123_v25 = vmul.f32 %v3109_v49, %v7282_v62  ;;  %v3124_v2 = vmul.f32 %v3116_v23, %v7290_v15  ;;  %v4800_v62 = vld [vmem:[%s7483_s22 + $0x10] sm:$0xff]  ;;  %v4798_v15 = vld [vmem:[%s7483_s22] sm:$0xff]  ;;  %s5732_s22 = scalar_lea.vmem %s4891_s21, 32 }
0x3e3b   :  { %v3135_v13 = vadd.f32 %v3134_v17, %v3133_v27  ;;  %5074 = vmatpush3.msra.mxu0 %v4800_v62  ;;  %p5733_p8 = scmp.ne.s32.totalorder %s4891_s21, %s5732_s22  ;;  %p5738_p10 = scmp.lt.s32.totalorder %s5732_s22, %s5732_s22 }
0x3e3c   :  { %v3136_v20 = vsel %vm2945_vm10, %v3123_v25, 0.0  ;;  %v3138_v12 = vsel %vm2945_vm10, %v3124_v2, 0.0  ;;  %5075 = vmatprep.subr.mxu0 %v5781_v1 }
0x3e3d   :  { %v3137_v33 = vadd.f32 %v3136_v20, %v3135_v13  ;;  %5076 = vmatpush3.msra.mxu0 %v4799_v10  ;;  %p5739_p11 = por %p5738_p10, %p5737_p9 }
0x3e3e   :  { %5077 = vmatprep.subr.mxu0 %v5781_v1 }
0x3e3f   :  { %v3139_v45 = vadd.f32 %v3138_v12, %v3137_v33  ;;  %5078 = vmatpush3.msra.mxu0 %v4798_v15  ;;  %p5740_p12 = pnand %p5739_p11, %p5733_p8 }
0x3e9c   :  { %v4701_v50 = vpop.permute.xlu0 %4700 }
0x3e9d   :  { %v4703_v24 = vsel %vm318_vm2, %v3139_v45, %v4701_v50  ;;  %vm4882_vm2 = vcmask 17408  }
0x3e9e   :  { %5069 = vmatmul.mubr.f32.vlgmr.msra.gmra.mxu1 %v4703_v24 }
0x3f5e   :  { %v4793_v16 = vpop.f32.mrf.mxu1 }
0x3f5f   :  { %v4794_v14 = vadd.f32 %v5011_v19, %v4793_v16 }
0x3f60   :  { %v5070_v36 = vpop.f32.mrf.mxu1 }
0x3f61   :  { %v4797_v55 = vmax.f32 %v4794_v14, 0.0 }
0x3f63   :  { %5080 = vmatmul.mubr.msk.f32.vlgmr.msra.gmra.mxu0 %vm251_vm0, %v4797_v55 }
0x4023   :  { %v4878_v6 = vpop.f32.mrf.mxu0 }
0x4024   :  { %v4879_v52 = vadd.f32 %v5012_v26, %v4878_v6 }
0x4025   :  { %v5081_v54 = vpop.f32.mrf.mxu0 }
0x4026   :  { %4883 = vst.msk [vmem:[#allocation25] sm:$0x3] %vm4882_vm2, %v4879_v52 }
0x4027   :  { %5743 = shalt.err (!%p5740_p12)
}
0x4028   :  { %4893 = dma.vmem_to_hbm [thread:$0]  %s4891_s21, 32, %s7485_s24, [#allocation10]  }
0x4029   :  { %5764 = dma.done.wait [#allocation10], 32  }
0x402a   :  { %5765 = vsyncadd [#allocation10], 4294967264 }
0x402b   :  { %4905 = vsyncpa [#allocation9], 1 }
0x402c   :  { %4906 = vsyncpa [#allocation12], 1 }
0x402d   :  { %4907 = vsyncpa [#allocation15], 1 }
0x402e   :  { %4908 = vsyncpa [#allocation18], 1 }
0x402f   :  { %4909 = vsyncpa [#allocation21], 1 }
0x4030   :  { %4910 = vsyncpa [#allocation24], 1 }
0x4031   :  { %4911 = vsyncpa [#allocation10], 1 }

</bundles_post_ra>
